<compile_context>
chip_gen: v5e
topology: v5e:2x2
jax: 0.10.0
libtpu: 0.0.40
codegen_flags: <defaults>
</compile_context>

<pallas_src>
import jax
import jax.numpy as jnp
from jax.experimental import pallas as pl
from jax.experimental.pallas import tpu as pltpu

K = 3
N_POINTS = 1024          # nn.MaxPool1d(1024) in the reference => 1024 points/cloud
C1, C2, C3 = 64, 128, 1024
H1, H2 = 512, 256
CHUNK_ROWS = 256         # layer-3 output rows per chunk (bounds live f32 epilogue)
BN_EPS = 1e-5


# ------------------------------- kernels ----------------------------------- #

def point_mlp_kernel(x_ref, w1_ref, w2_ref, w3_ref, t1_ref, t2_ref, pooled_ref):
    """Per-batch point MLP (conv1..conv3, BN folded) + global max-pool."""
    x = x_ref[...]                                        # (K, N)   f32
    w1 = w1_ref[...]                                      # (64, K)  f32

    # Layer 1: K=3 contraction as broadcast VPU FMAs (too small for the MXU).
    h = t1_ref[...] + w1[:, 0:1] * x[0:1, :]
    for i in range(1, x.shape[0]):
        h = h + w1[:, i:i + 1] * x[i:i + 1, :]
    h = jnp.maximum(h, 0.0)                               # (64, N)  f32

    # Layer 2: bf16 MXU inputs, f32 accumulation.
    h = jnp.dot(w2_ref[...], h.astype(jnp.bfloat16),
                preferred_element_type=jnp.float32)       # (128, N) f32
    h2 = jnp.maximum(h + t2_ref[...], 0.0).astype(jnp.bfloat16)

    # Layer 3 + global max-pool, chunked over the 1024 output rows so the
    # f32 epilogue live set stays bounded (v5e spill relief).
    n_lane_chunks = x.shape[1] // 128
    for c in range(C3 // CHUNK_ROWS):
        rs = c * CHUNK_ROWS
        s = jnp.dot(w3_ref[pl.ds(rs, CHUNK_ROWS), :], h2,
                    preferred_element_type=jnp.float32)   # (256, N) f32
        # Two-stage max: VPU elementwise fold over 128-lane chunks, then a
        # single 128-wide XLU cross-lane reduce per chunk.
        m = s[:, 0:128]
        for lc in range(1, n_lane_chunks):
            m = jnp.maximum(m, s[:, lc * 128:(lc + 1) * 128])
        # conv3's bias + ReLU are applied after the pool (in the head kernel):
        # max_n relu(s + t3) == relu(max_n s + t3).
        pooled_ref[pl.ds(rs, CHUNK_ROWS), :] = jnp.max(m, axis=1, keepdims=True)


def head_kernel(p_ref, t3_ref, w4_ref, t4_ref, w5_ref, t5_ref, w6_ref, b6_ref,
                out_ref):
    """FC head batched over B: (B,1024)->(B,512)->(B,256)->(B,K*K)."""
    # conv3's bias + ReLU (deferred from the point-MLP kernel).
    p = jnp.maximum(p_ref[...] + t3_ref[...], 0.0)        # (B, 1024) f32
    h = jnp.dot(p.astype(jnp.bfloat16), w4_ref[...],
                preferred_element_type=jnp.float32)       # (B, 512)
    h = jnp.maximum(h + t4_ref[...], 0.0)
    h = jnp.dot(h.astype(jnp.bfloat16), w5_ref[...],
                preferred_element_type=jnp.float32)       # (B, 256)
    h = jnp.maximum(h + t5_ref[...], 0.0)
    h = jnp.dot(h.astype(jnp.bfloat16), w6_ref[...],
                preferred_element_type=jnp.float32)       # (B, K*K)
    out_ref[...] = h + b6_ref[...]                        # "+ identity" folded in b6


# ------------------------------- wrapper ------------------------------------ #

def tnet_forward(x, params):
    B, k, N = x.shape
    assert k == K, "kernel is specialized to k == 3 point clouds"
    assert N % 128 == 0 and C3 % CHUNK_ROWS == 0

    # Kernel A: point MLP + max-pool, one grid step per batch element.
    pooled = pl.pallas_call(
        point_mlp_kernel,
        out_shape=jax.ShapeDtypeStruct((B, C3, 1), jnp.float32),
        grid=(B,),
        in_specs=[
            pl.BlockSpec((None, K, N), lambda b: (b, 0, 0)),   # x   (K, N) f32
            pl.BlockSpec((C1, K), lambda b: (0, 0)),           # w1  f32 (VPU)
            pl.BlockSpec((C2, C1), lambda b: (0, 0)),          # w2  bf16
            pl.BlockSpec((C3, C2), lambda b: (0, 0)),          # w3  bf16
            pl.BlockSpec((C1, 1), lambda b: (0, 0)),           # t1
            pl.BlockSpec((C2, 1), lambda b: (0, 0)),           # t2
        ],
        out_specs=pl.BlockSpec((None, C3, 1), lambda b: (b, 0, 0)),
        compiler_params=pltpu.CompilerParams(
            dimension_semantics=("parallel",)),
    )(x, params["w1"], params["w2"], params["w3"], params["t1"], params["t2"])

    # Lane-dense (B, 1024) view of the pooled features (metadata-only reshape).
    pooled2d = pooled.reshape(B, C3)

    # Kernel B: the tiny FC head, run once for the whole batch.
    out = pl.pallas_call(
        head_kernel,
        out_shape=jax.ShapeDtypeStruct((B, K * K), jnp.float32),
    )(pooled2d, params["t3r"], params["w4t"], params["t4r"],
      params["w5t"], params["t5r"], params["w6t"], params["b6r"])

    return out.reshape(B, K, K)


# ------------------------- deterministic params ----------------------------- #

def _uniform(kk, shape, bound):
    return jax.random.uniform(kk, shape, jnp.float32, -bound, bound)


def init_raw_params(key):
    it = iter(jax.random.split(key, 20))

    def linear(c_in, c_out):                       # PyTorch (out, in) layout
        b = 1.0 / (c_in ** 0.5)
        w = _uniform(next(it), (c_out, c_in), b)
        bias = _uniform(next(it), (c_out,), b)
        return w, bias

    def bn(c):
        kk = jax.random.split(next(it), 4)
        gamma = jax.random.uniform(kk[0], (c,), jnp.float32, 0.5, 1.5)
        beta = jax.random.uniform(kk[1], (c,), jnp.float32, -0.1, 0.1)
        mean = jax.random.uniform(kk[2], (c,), jnp.float32, -0.1, 0.1)
        var = jax.random.uniform(kk[3], (c,), jnp.float32, 0.5, 1.5)
        return gamma, beta, mean, var

    raw = {}
    raw['conv1'] = linear(K, C1);    raw['bn1'] = bn(C1)
    raw['conv2'] = linear(C1, C2);   raw['bn2'] = bn(C2)
    raw['conv3'] = linear(C2, C3);   raw['bn3'] = bn(C3)
    raw['fc1'] = linear(C3, H1);     raw['bn4'] = bn(H1)
    raw['fc2'] = linear(H1, H2);     raw['bn5'] = bn(H2)
    raw['fc3'] = linear(H2, K * K)
    return raw


def fold_params(raw):
    """Fold eval-mode BN into each layer.  bf16 MXU weights (pre-transposed
    for the batched FC head), f32 biases; layer 1 stays f32 (VPU path).
    conv3's bias is kept as a row and applied after the max-pool (exact)."""
    def fold(lin, bn_stats):
        w, b = lin
        gamma, beta, mean, var = bn_stats
        s = gamma / jnp.sqrt(var + BN_EPS)
        return w * s[:, None], s * (b - mean) + beta

    w1, t1 = fold(raw['conv1'], raw['bn1'])
    w2, t2 = fold(raw['conv2'], raw['bn2'])
    w3, t3 = fold(raw['conv3'], raw['bn3'])
    w4, t4 = fold(raw['fc1'], raw['bn4'])
    w5, t5 = fold(raw['fc2'], raw['bn5'])
    w6, b6 = raw['fc3']
    return {
        # point-MLP kernel (channels-first): (C_out, C_in) weights, column biases
        "w1": w1.astype(jnp.float32), "t1": t1[:, None].astype(jnp.float32),
        "w2": w2.astype(jnp.bfloat16), "t2": t2[:, None].astype(jnp.float32),
        "w3": w3.astype(jnp.bfloat16),
        # FC-head kernel (batch-major): (C_in, C_out) transposed weights, row biases
        "t3r": t3[None, :].astype(jnp.float32),
        "w4t": w4.T.astype(jnp.bfloat16), "t4r": t4[None, :].astype(jnp.float32),
        "w5t": w5.T.astype(jnp.bfloat16), "t5r": t5[None, :].astype(jnp.float32),
        "w6t": w6.T.astype(jnp.bfloat16),
        # fc3 bias with the T-Net "+ identity" folded in (row-major flatten)
        "b6r": (b6 + jnp.eye(K, dtype=jnp.float32).reshape(-1))[None, :]
               .astype(jnp.float32),
    }


# ------------------------------ references ---------------------------------- #

_HI = jax.lax.Precision.HIGHEST


def tnet_reference_f32(x_nchw, raw):
    """Pure-f32 reference with the exact PyTorch (eval-mode BN) semantics."""
    x = x_nchw.astype(jnp.float32)                              # (B, K, N)

    def conv_bn_relu(h, lin, bn_stats):
        w, b = lin
        gamma, beta, mean, var = bn_stats
        h = jnp.einsum('oc,bcn->bon', w, h, precision=_HI) + b[None, :, None]
        h = (gamma[None, :, None] * (h - mean[None, :, None])
             / jnp.sqrt(var + BN_EPS)[None, :, None] + beta[None, :, None])
        return jnp.maximum(h, 0.0)

    def fc_bn_relu(h, lin, bn_stats):
        w, b = lin
        gamma, beta, mean, var = bn_stats
        h = jnp.einsum('oc,bc->bo', w, h, precision=_HI) + b[None]
        h = gamma * (h - mean) / jnp.sqrt(var + BN_EPS) + beta
        return jnp.maximum(h, 0.0)

    h = conv_bn_relu(x, raw['conv1'], raw['bn1'])
    h = conv_bn_relu(h, raw['conv2'], raw['bn2'])
    h = conv_bn_relu(h, raw['conv3'], raw['bn3'])
    p = jnp.max(h, axis=-1)                                     # (B, 1024)
    h = fc_bn_relu(p, raw['fc1'], raw['bn4'])
    h = fc_bn_relu(h, raw['fc2'], raw['bn5'])
    w6, b6 = raw['fc3']
    out = jnp.einsum('oc,bc->bo', w6, h, precision=_HI) + b6[None]
    B = x.shape[0]
    return out.reshape(B, K, K) + jnp.eye(K, dtype=jnp.float32)[None]


def tnet_reference_matched(x_nchw, fp):
    """Reference mirroring the kernel's folded params + bf16 rounding discipline."""
    f32 = jnp.float32

    def b2f(a):
        return a.astype(jnp.bfloat16).astype(f32)

    x = x_nchw.astype(f32)                                      # (B, K, N)
    # layer 1 (f32 VPU path)
    h = jnp.einsum('oc,bcn->bon', fp['w1'], x, precision=_HI) + fp['t1'][None]
    h = jnp.maximum(h, 0.0)
    # layer 2 (bf16 MXU, f32 acc)
    h = jnp.einsum('oc,bcn->bon', fp['w2'].astype(f32), b2f(h),
                   precision=_HI) + fp['t2'][None]
    h = jnp.maximum(h, 0.0)
    # layer 3 pre-activation + max-pool; bias/ReLU after the pool (exact rewrite)
    s = jnp.einsum('oc,bcn->bon', fp['w3'].astype(f32), b2f(h), precision=_HI)
    p = jnp.max(s, axis=-1)                                     # (B, 1024)
    p = jnp.maximum(p + fp['t3r'], 0.0)
    # FC head (batch-major, transposed weights)
    h = jnp.einsum('bc,co->bo', b2f(p), fp['w4t'].astype(f32),
                   precision=_HI) + fp['t4r']
    h = jnp.maximum(h, 0.0)
    h = jnp.einsum('bc,co->bo', b2f(h), fp['w5t'].astype(f32),
                   precision=_HI) + fp['t5r']
    h = jnp.maximum(h, 0.0)
    out = jnp.einsum('bc,co->bo', b2f(h), fp['w6t'].astype(f32),
                     precision=_HI) + fp['b6r']
    return out.reshape(-1, K, K)


# --------------------------------- main -------------------------------------- #

if __name__ == "__main__":
    key = jax.random.PRNGKey(0)
    pkey, xkey = jax.random.split(key)
    raw = init_raw_params(pkey)
    params = fold_params(raw)

    B = 2   # even batch keeps both v7x TensorCores busy on the "parallel" axis
    x = jax.random.normal(xkey, (B, K, N_POINTS), dtype=jnp.float32)  # NCW layout

    out = jax.block_until_ready(jax.jit(tnet_forward)(x, params))
    ref_matched = jax.block_until_ready(tnet_reference_matched(x, params))
    ref_f32 = jax.block_until_ready(tnet_reference_f32(x, raw))

    assert out.shape == (B, K, K)
    # Tight check vs. a reference using the same bf16 rounding discipline.
    assert jnp.allclose(out, ref_matched, rtol=2e-3, atol=2e-3), \
        "kernel mismatch vs bf16-matched reference"
    # Loose check vs. the pure-f32 PyTorch-semantics reference (bf16 MXU drift budget).
    assert jnp.allclose(out, ref_f32, rtol=2e-2, atol=2e-2), \
        "kernel drift vs f32 reference exceeds bf16 budget"
    print("KERNEL_OK")
</pallas_src>

<mosaic_0001>
module attributes {stable_mosaic.version = 11 : i64} {
  func.func @point_mlp_kernel(%arg0: i32, %arg1: memref<1x3x1024xf32, #tpu.memory_space<vmem>>, %arg2: memref<64x3xf32, #tpu.memory_space<vmem>>, %arg3: memref<128x64xbf16, #tpu.memory_space<vmem>>, %arg4: memref<1024x128xbf16, #tpu.memory_space<vmem>>, %arg5: memref<64x1xf32, #tpu.memory_space<vmem>>, %arg6: memref<128x1xf32, #tpu.memory_space<vmem>>, %arg7: memref<1x1024x1xf32, #tpu.memory_space<vmem>>) attributes {dimension_semantics = [#tpu.dimension_semantics<parallel>], iteration_bounds = array<i64: 2>, scalar_prefetch = 0 : i64, scratch_operands = 0 : i64, tpu.core_type = #tpu.core_type<tc>, window_params = [{transform_indices = @transform_0, window_bounds = array<i64: 1, 3, 1024>}, {pipeline_mode = #tpu.pipeline_mode<synchronous>, transform_indices = @transform_1, window_bounds = array<i64: 64, 3>}, {pipeline_mode = #tpu.pipeline_mode<synchronous>, transform_indices = @transform_2, window_bounds = array<i64: 128, 64>}, {pipeline_mode = #tpu.pipeline_mode<synchronous>, transform_indices = @transform_3, window_bounds = array<i64: 1024, 128>}, {pipeline_mode = #tpu.pipeline_mode<synchronous>, transform_indices = @transform_4, window_bounds = array<i64: 64, 1>}, {pipeline_mode = #tpu.pipeline_mode<synchronous>, transform_indices = @transform_5, window_bounds = array<i64: 128, 1>}, {transform_indices = @transform_6, window_bounds = array<i64: 1, 1024, 1>}]} {
    %c0 = arith.constant 0 : index
    %c0_0 = arith.constant 0 : index
    %c0_1 = arith.constant 0 : index
    %0 = vector.load %arg1[%c0, %c0_0, %c0_1] : memref<1x3x1024xf32, #tpu.memory_space<vmem>>, vector<1x3x1024xf32>
    %1 = vector.shape_cast %0 : vector<1x3x1024xf32> to vector<3x1024xf32>
    %c0_2 = arith.constant 0 : index
    %c0_3 = arith.constant 0 : index
    %2 = vector.load %arg2[%c0_2, %c0_3] : memref<64x3xf32, #tpu.memory_space<vmem>>, vector<64x3xf32>
    %c0_4 = arith.constant 0 : index
    %c0_5 = arith.constant 0 : index
    %3 = vector.load %arg5[%c0_4, %c0_5] : memref<64x1xf32, #tpu.memory_space<vmem>>, vector<64x1xf32>
    %4 = vector.extract_strided_slice %2 {offsets = [0, 0], sizes = [64, 1], strides = [1, 1]} : vector<64x3xf32> to vector<64x1xf32>
    %5 = vector.extract_strided_slice %1 {offsets = [0, 0], sizes = [1, 1024], strides = [1, 1]} : vector<3x1024xf32> to vector<1x1024xf32>
    %6 = vector.broadcast %4 : vector<64x1xf32> to vector<64x1024xf32>
    %7 = vector.broadcast %5 : vector<1x1024xf32> to vector<64x1024xf32>
    %8 = arith.mulf %6, %7 : vector<64x1024xf32>
    %9 = vector.broadcast %3 : vector<64x1xf32> to vector<64x1024xf32>
    %10 = arith.addf %9, %8 : vector<64x1024xf32>
    %11 = vector.extract_strided_slice %2 {offsets = [0, 1], sizes = [64, 1], strides = [1, 1]} : vector<64x3xf32> to vector<64x1xf32>
    %12 = vector.extract_strided_slice %1 {offsets = [1, 0], sizes = [1, 1024], strides = [1, 1]} : vector<3x1024xf32> to vector<1x1024xf32>
    %13 = vector.broadcast %11 : vector<64x1xf32> to vector<64x1024xf32>
    %14 = vector.broadcast %12 : vector<1x1024xf32> to vector<64x1024xf32>
    %15 = arith.mulf %13, %14 : vector<64x1024xf32>
    %16 = arith.addf %10, %15 : vector<64x1024xf32>
    %17 = vector.extract_strided_slice %2 {offsets = [0, 2], sizes = [64, 1], strides = [1, 1]} : vector<64x3xf32> to vector<64x1xf32>
    %18 = vector.extract_strided_slice %1 {offsets = [2, 0], sizes = [1, 1024], strides = [1, 1]} : vector<3x1024xf32> to vector<1x1024xf32>
    %19 = vector.broadcast %17 : vector<64x1xf32> to vector<64x1024xf32>
    %20 = vector.broadcast %18 : vector<1x1024xf32> to vector<64x1024xf32>
    %21 = arith.mulf %19, %20 : vector<64x1024xf32>
    %22 = arith.addf %16, %21 : vector<64x1024xf32>
    %cst = arith.constant 0.000000e+00 : f32
    %23 = vector.broadcast %cst : f32 to vector<64x1024xf32>
    %24 = arith.maximumf %22, %23 : vector<64x1024xf32>
    %c0_6 = arith.constant 0 : index
    %c0_7 = arith.constant 0 : index
    %25 = vector.load %arg3[%c0_6, %c0_7] : memref<128x64xbf16, #tpu.memory_space<vmem>>, vector<128x64xbf16>
    %26 = arith.truncf %24 : vector<64x1024xf32> to vector<64x1024xbf16>
    %cst_8 = arith.constant dense<0.000000e+00> : vector<128x1024xf32>
    %27 = tpu.matmul %25, %26, %cst_8 {dimension_numbers = #tpu.dot_dimension_numbers<[1], [0], [0], [1], [0, 0, 1, 1], [], []>} : vector<128x64xbf16>, vector<64x1024xbf16>, vector<128x1024xf32> -> vector<128x1024xf32>
    %c0_9 = arith.constant 0 : index
    %c0_10 = arith.constant 0 : index
    %28 = vector.load %arg6[%c0_9, %c0_10] : memref<128x1xf32, #tpu.memory_space<vmem>>, vector<128x1xf32>
    %29 = vector.broadcast %28 : vector<128x1xf32> to vector<128x1024xf32>
    %30 = arith.addf %27, %29 : vector<128x1024xf32>
    %cst_11 = arith.constant 0.000000e+00 : f32
    %31 = vector.broadcast %cst_11 : f32 to vector<128x1024xf32>
    %32 = arith.maximumf %30, %31 : vector<128x1024xf32>
    %33 = arith.truncf %32 : vector<128x1024xf32> to vector<128x1024xbf16>
    %c0_12 = arith.constant 0 : index
    %c0_13 = arith.constant 0 : index
    %34 = vector.load %arg4[%c0_12, %c0_13] : memref<1024x128xbf16, #tpu.memory_space<vmem>>, vector<256x128xbf16>
    %cst_14 = arith.constant dense<0.000000e+00> : vector<256x1024xf32>
    %35 = tpu.matmul %34, %33, %cst_14 {dimension_numbers = #tpu.dot_dimension_numbers<[1], [0], [0], [1], [0, 0, 1, 1], [], []>} : vector<256x128xbf16>, vector<128x1024xbf16>, vector<256x1024xf32> -> vector<256x1024xf32>
    %36 = vector.extract_strided_slice %35 {offsets = [0, 0], sizes = [256, 128], strides = [1, 1]} : vector<256x1024xf32> to vector<256x128xf32>
    %37 = vector.extract_strided_slice %35 {offsets = [0, 128], sizes = [256, 128], strides = [1, 1]} : vector<256x1024xf32> to vector<256x128xf32>
    %38 = arith.maximumf %36, %37 : vector<256x128xf32>
    %39 = vector.extract_strided_slice %35 {offsets = [0, 256], sizes = [256, 128], strides = [1, 1]} : vector<256x1024xf32> to vector<256x128xf32>
    %40 = arith.maximumf %38, %39 : vector<256x128xf32>
    %41 = vector.extract_strided_slice %35 {offsets = [0, 384], sizes = [256, 128], strides = [1, 1]} : vector<256x1024xf32> to vector<256x128xf32>
    %42 = arith.maximumf %40, %41 : vector<256x128xf32>
    %43 = vector.extract_strided_slice %35 {offsets = [0, 512], sizes = [256, 128], strides = [1, 1]} : vector<256x1024xf32> to vector<256x128xf32>
    %44 = arith.maximumf %42, %43 : vector<256x128xf32>
    %45 = vector.extract_strided_slice %35 {offsets = [0, 640], sizes = [256, 128], strides = [1, 1]} : vector<256x1024xf32> to vector<256x128xf32>
    %46 = arith.maximumf %44, %45 : vector<256x128xf32>
    %47 = vector.extract_strided_slice %35 {offsets = [0, 768], sizes = [256, 128], strides = [1, 1]} : vector<256x1024xf32> to vector<256x128xf32>
    %48 = arith.maximumf %46, %47 : vector<256x128xf32>
    %49 = vector.extract_strided_slice %35 {offsets = [0, 896], sizes = [256, 128], strides = [1, 1]} : vector<256x1024xf32> to vector<256x128xf32>
    %50 = arith.maximumf %48, %49 : vector<256x128xf32>
    %cst_15 = arith.constant dense<0xFF800000> : vector<256xf32>
    %51 = vector.multi_reduction <maximumf>, %50, %cst_15 [1] : vector<256x128xf32> to vector<256xf32>
    %52 = vector.shape_cast %51 : vector<256xf32> to vector<256x1xf32>
    %c0_16 = arith.constant 0 : index
    %c0_17 = arith.constant 0 : index
    %c0_18 = arith.constant 0 : index
    %53 = vector.load %arg7[%c0_16, %c0_17, %c0_18] : memref<1x1024x1xf32, #tpu.memory_space<vmem>>, vector<1x256x1xf32>
    %54 = vector.shape_cast %53 : vector<1x256x1xf32> to vector<256x1xf32>
    %55 = vector.shape_cast %52 : vector<256x1xf32> to vector<1x256x1xf32>
    tpu.vector_store %arg7[%c0_16, %c0_17, %c0_18], %55 {strides = array<i32>} : memref<1x1024x1xf32, #tpu.memory_space<vmem>>, vector<1x256x1xf32>,
    %c256 = arith.constant 256 : index
    %c0_19 = arith.constant 0 : index
    %56 = vector.load %arg4[%c256, %c0_19] : memref<1024x128xbf16, #tpu.memory_space<vmem>>, vector<256x128xbf16>
    %cst_20 = arith.constant dense<0.000000e+00> : vector<256x1024xf32>
    %57 = tpu.matmul %56, %33, %cst_20 {dimension_numbers = #tpu.dot_dimension_numbers<[1], [0], [0], [1], [0, 0, 1, 1], [], []>} : vector<256x128xbf16>, vector<128x1024xbf16>, vector<256x1024xf32> -> vector<256x1024xf32>
    %58 = vector.extract_strided_slice %57 {offsets = [0, 0], sizes = [256, 128], strides = [1, 1]} : vector<256x1024xf32> to vector<256x128xf32>
    %59 = vector.extract_strided_slice %57 {offsets = [0, 128], sizes = [256, 128], strides = [1, 1]} : vector<256x1024xf32> to vector<256x128xf32>
    %60 = arith.maximumf %58, %59 : vector<256x128xf32>
    %61 = vector.extract_strided_slice %57 {offsets = [0, 256], sizes = [256, 128], strides = [1, 1]} : vector<256x1024xf32> to vector<256x128xf32>
    %62 = arith.maximumf %60, %61 : vector<256x128xf32>
    %63 = vector.extract_strided_slice %57 {offsets = [0, 384], sizes = [256, 128], strides = [1, 1]} : vector<256x1024xf32> to vector<256x128xf32>
    %64 = arith.maximumf %62, %63 : vector<256x128xf32>
    %65 = vector.extract_strided_slice %57 {offsets = [0, 512], sizes = [256, 128], strides = [1, 1]} : vector<256x1024xf32> to vector<256x128xf32>
    %66 = arith.maximumf %64, %65 : vector<256x128xf32>
    %67 = vector.extract_strided_slice %57 {offsets = [0, 640], sizes = [256, 128], strides = [1, 1]} : vector<256x1024xf32> to vector<256x128xf32>
    %68 = arith.maximumf %66, %67 : vector<256x128xf32>
    %69 = vector.extract_strided_slice %57 {offsets = [0, 768], sizes = [256, 128], strides = [1, 1]} : vector<256x1024xf32> to vector<256x128xf32>
    %70 = arith.maximumf %68, %69 : vector<256x128xf32>
    %71 = vector.extract_strided_slice %57 {offsets = [0, 896], sizes = [256, 128], strides = [1, 1]} : vector<256x1024xf32> to vector<256x128xf32>
    %72 = arith.maximumf %70, %71 : vector<256x128xf32>
    %cst_21 = arith.constant dense<0xFF800000> : vector<256xf32>
    %73 = vector.multi_reduction <maximumf>, %72, %cst_21 [1] : vector<256x128xf32> to vector<256xf32>
    %74 = vector.shape_cast %73 : vector<256xf32> to vector<256x1xf32>
    %c0_22 = arith.constant 0 : index
    %c256_23 = arith.constant 256 : index
    %c0_24 = arith.constant 0 : index
    %75 = vector.load %arg7[%c0_22, %c256_23, %c0_24] : memref<1x1024x1xf32, #tpu.memory_space<vmem>>, vector<1x256x1xf32>
    %76 = vector.shape_cast %75 : vector<1x256x1xf32> to vector<256x1xf32>
    %77 = vector.shape_cast %74 : vector<256x1xf32> to vector<1x256x1xf32>
    tpu.vector_store %arg7[%c0_22, %c256_23, %c0_24], %77 {strides = array<i32>} : memref<1x1024x1xf32, #tpu.memory_space<vmem>>, vector<1x256x1xf32>,
    %c512 = arith.constant 512 : index
    %c0_25 = arith.constant 0 : index
    %78 = vector.load %arg4[%c512, %c0_25] : memref<1024x128xbf16, #tpu.memory_space<vmem>>, vector<256x128xbf16>
    %cst_26 = arith.constant dense<0.000000e+00> : vector<256x1024xf32>
    %79 = tpu.matmul %78, %33, %cst_26 {dimension_numbers = #tpu.dot_dimension_numbers<[1], [0], [0], [1], [0, 0, 1, 1], [], []>} : vector<256x128xbf16>, vector<128x1024xbf16>, vector<256x1024xf32> -> vector<256x1024xf32>
    %80 = vector.extract_strided_slice %79 {offsets = [0, 0], sizes = [256, 128], strides = [1, 1]} : vector<256x1024xf32> to vector<256x128xf32>
    %81 = vector.extract_strided_slice %79 {offsets = [0, 128], sizes = [256, 128], strides = [1, 1]} : vector<256x1024xf32> to vector<256x128xf32>
    %82 = arith.maximumf %80, %81 : vector<256x128xf32>
    %83 = vector.extract_strided_slice %79 {offsets = [0, 256], sizes = [256, 128], strides = [1, 1]} : vector<256x1024xf32> to vector<256x128xf32>
    %84 = arith.maximumf %82, %83 : vector<256x128xf32>
    %85 = vector.extract_strided_slice %79 {offsets = [0, 384], sizes = [256, 128], strides = [1, 1]} : vector<256x1024xf32> to vector<256x128xf32>
    %86 = arith.maximumf %84, %85 : vector<256x128xf32>
    %87 = vector.extract_strided_slice %79 {offsets = [0, 512], sizes = [256, 128], strides = [1, 1]} : vector<256x1024xf32> to vector<256x128xf32>
    %88 = arith.maximumf %86, %87 : vector<256x128xf32>
    %89 = vector.extract_strided_slice %79 {offsets = [0, 640], sizes = [256, 128], strides = [1, 1]} : vector<256x1024xf32> to vector<256x128xf32>
    %90 = arith.maximumf %88, %89 : vector<256x128xf32>
    %91 = vector.extract_strided_slice %79 {offsets = [0, 768], sizes = [256, 128], strides = [1, 1]} : vector<256x1024xf32> to vector<256x128xf32>
    %92 = arith.maximumf %90, %91 : vector<256x128xf32>
    %93 = vector.extract_strided_slice %79 {offsets = [0, 896], sizes = [256, 128], strides = [1, 1]} : vector<256x1024xf32> to vector<256x128xf32>
    %94 = arith.maximumf %92, %93 : vector<256x128xf32>
    %cst_27 = arith.constant dense<0xFF800000> : vector<256xf32>
    %95 = vector.multi_reduction <maximumf>, %94, %cst_27 [1] : vector<256x128xf32> to vector<256xf32>
    %96 = vector.shape_cast %95 : vector<256xf32> to vector<256x1xf32>
    %c0_28 = arith.constant 0 : index
    %c512_29 = arith.constant 512 : index
    %c0_30 = arith.constant 0 : index
    %97 = vector.load %arg7[%c0_28, %c512_29, %c0_30] : memref<1x1024x1xf32, #tpu.memory_space<vmem>>, vector<1x256x1xf32>
    %98 = vector.shape_cast %97 : vector<1x256x1xf32> to vector<256x1xf32>
    %99 = vector.shape_cast %96 : vector<256x1xf32> to vector<1x256x1xf32>
    tpu.vector_store %arg7[%c0_28, %c512_29, %c0_30], %99 {strides = array<i32>} : memref<1x1024x1xf32, #tpu.memory_space<vmem>>, vector<1x256x1xf32>,
    %c768 = arith.constant 768 : index
    %c0_31 = arith.constant 0 : index
    %100 = vector.load %arg4[%c768, %c0_31] : memref<1024x128xbf16, #tpu.memory_space<vmem>>, vector<256x128xbf16>
    %cst_32 = arith.constant dense<0.000000e+00> : vector<256x1024xf32>
    %101 = tpu.matmul %100, %33, %cst_32 {dimension_numbers = #tpu.dot_dimension_numbers<[1], [0], [0], [1], [0, 0, 1, 1], [], []>} : vector<256x128xbf16>, vector<128x1024xbf16>, vector<256x1024xf32> -> vector<256x1024xf32>
    %102 = vector.extract_strided_slice %101 {offsets = [0, 0], sizes = [256, 128], strides = [1, 1]} : vector<256x1024xf32> to vector<256x128xf32>
    %103 = vector.extract_strided_slice %101 {offsets = [0, 128], sizes = [256, 128], strides = [1, 1]} : vector<256x1024xf32> to vector<256x128xf32>
    %104 = arith.maximumf %102, %103 : vector<256x128xf32>
    %105 = vector.extract_strided_slice %101 {offsets = [0, 256], sizes = [256, 128], strides = [1, 1]} : vector<256x1024xf32> to vector<256x128xf32>
    %106 = arith.maximumf %104, %105 : vector<256x128xf32>
    %107 = vector.extract_strided_slice %101 {offsets = [0, 384], sizes = [256, 128], strides = [1, 1]} : vector<256x1024xf32> to vector<256x128xf32>
    %108 = arith.maximumf %106, %107 : vector<256x128xf32>
    %109 = vector.extract_strided_slice %101 {offsets = [0, 512], sizes = [256, 128], strides = [1, 1]} : vector<256x1024xf32> to vector<256x128xf32>
    %110 = arith.maximumf %108, %109 : vector<256x128xf32>
    %111 = vector.extract_strided_slice %101 {offsets = [0, 640], sizes = [256, 128], strides = [1, 1]} : vector<256x1024xf32> to vector<256x128xf32>
    %112 = arith.maximumf %110, %111 : vector<256x128xf32>
    %113 = vector.extract_strided_slice %101 {offsets = [0, 768], sizes = [256, 128], strides = [1, 1]} : vector<256x1024xf32> to vector<256x128xf32>
    %114 = arith.maximumf %112, %113 : vector<256x128xf32>
    %115 = vector.extract_strided_slice %101 {offsets = [0, 896], sizes = [256, 128], strides = [1, 1]} : vector<256x1024xf32> to vector<256x128xf32>
    %116 = arith.maximumf %114, %115 : vector<256x128xf32>
    %cst_33 = arith.constant dense<0xFF800000> : vector<256xf32>
    %117 = vector.multi_reduction <maximumf>, %116, %cst_33 [1] : vector<256x128xf32> to vector<256xf32>
    %118 = vector.shape_cast %117 : vector<256xf32> to vector<256x1xf32>
    %c0_34 = arith.constant 0 : index
    %c768_35 = arith.constant 768 : index
    %c0_36 = arith.constant 0 : index
    %119 = vector.load %arg7[%c0_34, %c768_35, %c0_36] : memref<1x1024x1xf32, #tpu.memory_space<vmem>>, vector<1x256x1xf32>
    %120 = vector.shape_cast %119 : vector<1x256x1xf32> to vector<256x1xf32>
    %121 = vector.shape_cast %118 : vector<256x1xf32> to vector<1x256x1xf32>
    tpu.vector_store %arg7[%c0_34, %c768_35, %c0_36], %121 {strides = array<i32>} : memref<1x1024x1xf32, #tpu.memory_space<vmem>>, vector<1x256x1xf32>,
    return
  }
  func.func @transform_0(%arg0: i32) -> (i32, i32, i32) {
    %c0_i32 = arith.constant 0 : i32
    %c0_i32_0 = arith.constant 0 : i32
    %c0_i32_1 = arith.constant 0 : i32
    return %arg0, %c0_i32, %c0_i32_0 : i32, i32, i32
  }
  func.func @transform_1(%arg0: i32) -> (i32, i32) {
    %c0_i32 = arith.constant 0 : i32
    %c0_i32_0 = arith.constant 0 : i32
    %c0_i32_1 = arith.constant 0 : i32
    return %c0_i32, %c0_i32_0 : i32, i32
  }
  func.func @transform_2(%arg0: i32) -> (i32, i32) {
    %c0_i32 = arith.constant 0 : i32
    %c0_i32_0 = arith.constant 0 : i32
    %c0_i32_1 = arith.constant 0 : i32
    return %c0_i32, %c0_i32_0 : i32, i32
  }
  func.func @transform_3(%arg0: i32) -> (i32, i32) {
    %c0_i32 = arith.constant 0 : i32
    %c0_i32_0 = arith.constant 0 : i32
    %c0_i32_1 = arith.constant 0 : i32
    return %c0_i32, %c0_i32_0 : i32, i32
  }
  func.func @transform_4(%arg0: i32) -> (i32, i32) {
    %c0_i32 = arith.constant 0 : i32
    %c0_i32_0 = arith.constant 0 : i32
    %c0_i32_1 = arith.constant 0 : i32
    return %c0_i32, %c0_i32_0 : i32, i32
  }
  func.func @transform_5(%arg0: i32) -> (i32, i32) {
    %c0_i32 = arith.constant 0 : i32
    %c0_i32_0 = arith.constant 0 : i32
    %c0_i32_1 = arith.constant 0 : i32
    return %c0_i32, %c0_i32_0 : i32, i32
  }
  func.func @transform_6(%arg0: i32) -> (i32, i32, i32) {
    %c0_i32 = arith.constant 0 : i32
    %c0_i32_0 = arith.constant 0 : i32
    %c0_i32_1 = arith.constant 0 : i32
    return %arg0, %c0_i32, %c0_i32_0 : i32, i32, i32
  }
}

module attributes {stable_mosaic.version = 11 : i64} {
  func.func @head_kernel(%arg0: memref<2x1024xf32, #tpu.memory_space<vmem>>, %arg1: memref<1x1024xf32, #tpu.memory_space<vmem>>, %arg2: memref<1024x512xbf16, #tpu.memory_space<vmem>>, %arg3: memref<1x512xf32, #tpu.memory_space<vmem>>, %arg4: memref<512x256xbf16, #tpu.memory_space<vmem>>, %arg5: memref<1x256xf32, #tpu.memory_space<vmem>>, %arg6: memref<256x9xbf16, #tpu.memory_space<vmem>>, %arg7: memref<1x9xf32, #tpu.memory_space<vmem>>, %arg8: memref<2x9xf32, #tpu.memory_space<vmem>>) attributes {dimension_semantics = [], scalar_prefetch = 0 : i64, scratch_operands = 0 : i64, tpu.core_type = #tpu.core_type<tc>} {
    %c0 = arith.constant 0 : index
    %c0_0 = arith.constant 0 : index
    %0 = vector.load %arg0[%c0, %c0_0] : memref<2x1024xf32, #tpu.memory_space<vmem>>, vector<2x1024xf32>
    %c0_1 = arith.constant 0 : index
    %c0_2 = arith.constant 0 : index
    %1 = vector.load %arg1[%c0_1, %c0_2] : memref<1x1024xf32, #tpu.memory_space<vmem>>, vector<1x1024xf32>
    %2 = vector.broadcast %1 : vector<1x1024xf32> to vector<2x1024xf32>
    %3 = arith.addf %0, %2 : vector<2x1024xf32>
    %cst = arith.constant 0.000000e+00 : f32
    %4 = vector.broadcast %cst : f32 to vector<2x1024xf32>
    %5 = arith.maximumf %3, %4 : vector<2x1024xf32>
    %6 = arith.truncf %5 : vector<2x1024xf32> to vector<2x1024xbf16>
    %c0_3 = arith.constant 0 : index
    %c0_4 = arith.constant 0 : index
    %7 = vector.load %arg2[%c0_3, %c0_4] : memref<1024x512xbf16, #tpu.memory_space<vmem>>, vector<1024x512xbf16>
    %cst_5 = arith.constant dense<0.000000e+00> : vector<2x512xf32>
    %8 = tpu.matmul %6, %7, %cst_5 {dimension_numbers = #tpu.dot_dimension_numbers<[1], [0], [0], [1], [0, 0, 1, 1], [], []>} : vector<2x1024xbf16>, vector<1024x512xbf16>, vector<2x512xf32> -> vector<2x512xf32>
    %c0_6 = arith.constant 0 : index
    %c0_7 = arith.constant 0 : index
    %9 = vector.load %arg3[%c0_6, %c0_7] : memref<1x512xf32, #tpu.memory_space<vmem>>, vector<1x512xf32>
    %10 = vector.broadcast %9 : vector<1x512xf32> to vector<2x512xf32>
    %11 = arith.addf %8, %10 : vector<2x512xf32>
    %cst_8 = arith.constant 0.000000e+00 : f32
    %12 = vector.broadcast %cst_8 : f32 to vector<2x512xf32>
    %13 = arith.maximumf %11, %12 : vector<2x512xf32>
    %14 = arith.truncf %13 : vector<2x512xf32> to vector<2x512xbf16>
    %c0_9 = arith.constant 0 : index
    %c0_10 = arith.constant 0 : index
    %15 = vector.load %arg4[%c0_9, %c0_10] : memref<512x256xbf16, #tpu.memory_space<vmem>>, vector<512x256xbf16>
    %cst_11 = arith.constant dense<0.000000e+00> : vector<2x256xf32>
    %16 = tpu.matmul %14, %15, %cst_11 {dimension_numbers = #tpu.dot_dimension_numbers<[1], [0], [0], [1], [0, 0, 1, 1], [], []>} : vector<2x512xbf16>, vector<512x256xbf16>, vector<2x256xf32> -> vector<2x256xf32>
    %c0_12 = arith.constant 0 : index
    %c0_13 = arith.constant 0 : index
    %17 = vector.load %arg5[%c0_12, %c0_13] : memref<1x256xf32, #tpu.memory_space<vmem>>, vector<1x256xf32>
    %18 = vector.broadcast %17 : vector<1x256xf32> to vector<2x256xf32>
    %19 = arith.addf %16, %18 : vector<2x256xf32>
    %cst_14 = arith.constant 0.000000e+00 : f32
    %20 = vector.broadcast %cst_14 : f32 to vector<2x256xf32>
    %21 = arith.maximumf %19, %20 : vector<2x256xf32>
    %22 = arith.truncf %21 : vector<2x256xf32> to vector<2x256xbf16>
    %c0_15 = arith.constant 0 : index
    %c0_16 = arith.constant 0 : index
    %23 = vector.load %arg6[%c0_15, %c0_16] : memref<256x9xbf16, #tpu.memory_space<vmem>>, vector<256x9xbf16>
    %cst_17 = arith.constant dense<0.000000e+00> : vector<2x9xf32>
    %24 = tpu.matmul %22, %23, %cst_17 {dimension_numbers = #tpu.dot_dimension_numbers<[1], [0], [0], [1], [0, 0, 1, 1], [], []>} : vector<2x256xbf16>, vector<256x9xbf16>, vector<2x9xf32> -> vector<2x9xf32>
    %c0_18 = arith.constant 0 : index
    %c0_19 = arith.constant 0 : index
    %25 = vector.load %arg7[%c0_18, %c0_19] : memref<1x9xf32, #tpu.memory_space<vmem>>, vector<1x9xf32>
    %26 = vector.broadcast %25 : vector<1x9xf32> to vector<2x9xf32>
    %27 = arith.addf %24, %26 : vector<2x9xf32>
    %c0_20 = arith.constant 0 : index
    %c0_21 = arith.constant 0 : index
    %28 = vector.load %arg8[%c0_20, %c0_21] : memref<2x9xf32, #tpu.memory_space<vmem>>, vector<2x9xf32>
    tpu.vector_store %arg8[%c0_20, %c0_21], %27 {strides = array<i32>} : memref<2x9xf32, #tpu.memory_space<vmem>>, vector<2x9xf32>,
    return
  }
}

</mosaic_0001>

<bundles_post_ra>
// kernel: tnet_forward.3
= control target key start
LH: loop header
LB: loop body
LE: loop exit
PB: predicated region body
PF: predicated region fallthrough
CT: control target
= control target key end

     0   :  { %13 = vsyncpa [#allocation3], 0  ;;  %s4451_s30 = smov [#allocation2]   ;;  %s4452_s10 = smov 128   ;;  %s6208_s0 = inlined_call_operand.vmem [shape: f32[2,1024], index: 0, kind: input, shape index: {}]   ;;  %s6209_s1 = inlined_call_operand.vmem [shape: f32[1,1024], index: 1, kind: input, shape index: {}]   ;;  %s6210_s2 = inlined_call_operand.vmem [shape: bf16[1024,512], index: 2, kind: input, shape index: {}]   ;;  %s6211_s3 = inlined_call_operand.vmem [shape: f32[1,512], index: 3, kind: input, shape index: {}]   ;;  %s6212_s4 = inlined_call_operand.hbm [shape: bf16[512,256], index: 4, kind: input, shape index: {}]   ;;  %s6213_s5 = inlined_call_operand.vmem [shape: f32[1,256], index: 5, kind: input, shape index: {}]   ;;  %s6214_s6 = inlined_call_operand.vmem [shape: bf16[256,9], index: 6, kind: input, shape index: {}]   ;;  %s6215_s7 = inlined_call_operand.vmem [shape: f32[1,9], index: 7, kind: input, shape index: {}]   ;;  %s6216_s8 = inlined_call_operand.vmem [shape: f32[2,9], index: 8, kind: output, shape index: {}]  }
   0x1   :  { %s26_s29 = sshll.u32 %s6212_s4, 4  ;;  %s28_s9 = sshll.u32 %s4451_s30, 4  ;;  %s27_s29 = int_to_ptr.hbm [resolvable:$true] %s26_s29  ;;  %s29_s9 = int_to_ptr.vmem [resolvable:$true] %s28_s9 }
   0x2   :  { %s4453_s11 = smov 8  }
   0x3   :  { %34 = dma.hbm_to_vmem [thread:$0]  %s27_s29, 8192, %s29_s9, [#allocation3], %s4452_s10, %s4452_s10, %s4453_s11  }
   0x4   :  { %4449 = dma.done.wait [#allocation3], 8192  }
   0x5   :  { %4450 = vsyncadd [#allocation3], 4294959104  ;;  %v2854_v0 = vld [vmem:[%s6210_s2 + $0xe0] sm:$0xf]  ;;  %v4114_v1 = vld [vmem:[%s6210_s2 + $0xec] sm:$0xf0] }
   0x6   :  { %v2982_v2 = vld [vmem:[%s6210_s2 + $0x1e0] sm:$0xf]  ;;  %v2855_v3 = vor.u32 %v4114_v1, %v2854_v0  ;;  %v4146_v4 = vld [vmem:[%s6210_s2 + $0x1ec] sm:$0xf0]  ;;  %vm63_vm0 = vcmask 1041408   ;;  %vm65_vm1 = vcmask 1045508  }
   0x7   :  { %v3110_v5 = vld [vmem:[%s6210_s2 + $0x2e0] sm:$0xf]  ;;  %v4178_v6 = vld [vmem:[%s6210_s2 + $0x2ec] sm:$0xf0]  ;;  %v2983_v7 = vor.u32 %v4146_v4, %v2982_v2  ;;  %vm67_vm2 = vcmask 1043456   ;;  %vm2733_vm3 = vcmask 66560  }
   0x8   :  { %v3111_v8 = vor.u32 %v4178_v6, %v3110_v5  ;;  %v3238_v9 = vld [vmem:[%s6210_s2 + $0x3e0] sm:$0xf]  ;;  %v4210_v10 = vld [vmem:[%s6210_s2 + $0x3ec] sm:$0xf0]  ;;  %1653 = vmatpush.bf16.msra.mxu0 %v2855_v3 }
   0x9   :  { %v2838_v11 = vld [vmem:[%s6210_s2 + $0xc0] sm:$0xf]  ;;  %v3239_v12 = vor.u32 %v4210_v10, %v3238_v9  ;;  %v4110_v13 = vld [vmem:[%s6210_s2 + $0xcc] sm:$0xf0]  ;;  %1666 = vmatpush.bf16.msra.mxu1 %v2983_v7 }
   0xa   :  { %v2966_v14 = vld [vmem:[%s6210_s2 + $0x1c0] sm:$0xf]  ;;  %v4142_v15 = vld [vmem:[%s6210_s2 + $0x1cc] sm:$0xf0]  ;;  %1679 = vmatpush.bf16.msra.mxu2 %v3111_v8  ;;  %v2839_v16 = vor.u32 %v4110_v13, %v2838_v11 }
   0xb   :  { %v2967_v17 = vor.u32 %v4142_v15, %v2966_v14  ;;  %v3094_v18 = vld [vmem:[%s6210_s2 + $0x2c0] sm:$0xf]  ;;  %v4174_v19 = vld [vmem:[%s6210_s2 + $0x2cc] sm:$0xf0]  ;;  %1692 = vmatpush.bf16.msra.mxu3 %v3239_v12 }
   0xc   :  { %v3222_v20 = vld [vmem:[%s6210_s2 + $0x3c0] sm:$0xf]  ;;  %v3095_v21 = vor.u32 %v4174_v19, %v3094_v18  ;;  %v4206_v22 = vld [vmem:[%s6210_s2 + $0x3cc] sm:$0xf0]  ;;  %1654 = vmatpush.bf16.msra.mxu0 %v2839_v16 }
   0xd   :  { %v2822_v23 = vld [vmem:[%s6210_s2 + $0xa0] sm:$0xf]  ;;  %v4106_v24 = vld [vmem:[%s6210_s2 + $0xac] sm:$0xf0]  ;;  %v3223_v25 = vor.u32 %v4206_v22, %v3222_v20  ;;  %1667 = vmatpush.bf16.msra.mxu1 %v2967_v17 }
   0xe   :  { %v2950_v26 = vld [vmem:[%s6210_s2 + $0x1a0] sm:$0xf]  ;;  %v4138_v27 = vld [vmem:[%s6210_s2 + $0x1ac] sm:$0xf0]  ;;  %v2823_v29 = vor.u32 %v4106_v24, %v2822_v23  ;;  %1680 = vmatpush.bf16.msra.mxu2 %v3095_v21 }
   0xf   :  { %v3078_v28 = vld [vmem:[%s6210_s2 + $0x2a0] sm:$0xf]  ;;  %v4170_v30 = vld [vmem:[%s6210_s2 + $0x2ac] sm:$0xf0]  ;;  %v2951_v33 = vor.u32 %v4138_v27, %v2950_v26  ;;  %1693 = vmatpush.bf16.msra.mxu3 %v3223_v25 }
  0x10   :  { %v3206_v31 = vld [vmem:[%s6210_s2 + $0x3a0] sm:$0xf]  ;;  %v4202_v32 = vld [vmem:[%s6210_s2 + $0x3ac] sm:$0xf0]  ;;  %v3079_v34 = vor.u32 %v4170_v30, %v3078_v28  ;;  %1655 = vmatpush.bf16.msra.mxu0 %v2823_v29 }
  0x11   :  { %v2806_v35 = vld [vmem:[%s6210_s2 + $0x80] sm:$0xf]  ;;  %v4102_v36 = vld [vmem:[%s6210_s2 + $0x8c] sm:$0xf0]  ;;  %v3207_v38 = vor.u32 %v4202_v32, %v3206_v31  ;;  %1668 = vmatpush.bf16.msra.mxu1 %v2951_v33 }
  0x12   :  { %v2934_v37 = vld [vmem:[%s6210_s2 + $0x180] sm:$0xf]  ;;  %v4134_v39 = vld [vmem:[%s6210_s2 + $0x18c] sm:$0xf0]  ;;  %v2807_v44 = vor.u32 %v4102_v36, %v2806_v35  ;;  %1681 = vmatpush.bf16.msra.mxu2 %v3079_v34 }
  0x13   :  { %v3062_v40 = vld [vmem:[%s6210_s2 + $0x280] sm:$0xf]  ;;  %v4166_v41 = vld [vmem:[%s6210_s2 + $0x28c] sm:$0xf0]  ;;  %v2935_v45 = vor.u32 %v4134_v39, %v2934_v37  ;;  %1694 = vmatpush.bf16.msra.mxu3 %v3207_v38 }
  0x14   :  { %v3190_v42 = vld [vmem:[%s6210_s2 + $0x380] sm:$0xf]  ;;  %v4198_v43 = vld [vmem:[%s6210_s2 + $0x38c] sm:$0xf0]  ;;  %v3063_v46 = vor.u32 %v4166_v41, %v3062_v40  ;;  %1656 = vmatpush.bf16.msra.mxu0 %v2807_v44 }
  0x15   :  { %v2790_v47 = vld [vmem:[%s6210_s2 + $0x60] sm:$0xf]  ;;  %v4098_v48 = vld [vmem:[%s6210_s2 + $0x6c] sm:$0xf0]  ;;  %v3191_v50 = vor.u32 %v4198_v43, %v3190_v42  ;;  %1669 = vmatpush.bf16.msra.mxu1 %v2935_v45 }
  0x16   :  { %v2918_v49 = vld [vmem:[%s6210_s2 + $0x160] sm:$0xf]  ;;  %v4130_v51 = vld [vmem:[%s6210_s2 + $0x16c] sm:$0xf0]  ;;  %v2791_v56 = vor.u32 %v4098_v48, %v2790_v47  ;;  %1682 = vmatpush.bf16.msra.mxu2 %v3063_v46 }
  0x17   :  { %v3046_v52 = vld [vmem:[%s6210_s2 + $0x260] sm:$0xf]  ;;  %v4162_v53 = vld [vmem:[%s6210_s2 + $0x26c] sm:$0xf0]  ;;  %v2919_v57 = vor.u32 %v4130_v51, %v2918_v49  ;;  %1695 = vmatpush.bf16.msra.mxu3 %v3191_v50 }
  0x18   :  { %v3174_v54 = vld [vmem:[%s6210_s2 + $0x360] sm:$0xf]  ;;  %v4194_v55 = vld [vmem:[%s6210_s2 + $0x36c] sm:$0xf0]  ;;  %v3047_v58 = vor.u32 %v4162_v53, %v3046_v52  ;;  %1657 = vmatpush.bf16.msra.mxu0 %v2791_v56 }
  0x19   :  { %v2774_v59 = vld [vmem:[%s6210_s2 + $0x40] sm:$0xf]  ;;  %v4094_v60 = vld [vmem:[%s6210_s2 + $0x4c] sm:$0xf0]  ;;  %v3175_v62 = vor.u32 %v4194_v55, %v3174_v54  ;;  %1670 = vmatpush.bf16.msra.mxu1 %v2919_v57 }
  0x1a   :  { %v2902_v61 = vld [vmem:[%s6210_s2 + $0x140] sm:$0xf]  ;;  %v4126_v63 = vld [vmem:[%s6210_s2 + $0x14c] sm:$0xf0]  ;;  %v2775_v4 = vor.u32 %v4094_v60, %v2774_v59  ;;  %1683 = vmatpush.bf16.msra.mxu2 %v3047_v58 }
  0x1b   :  { %v3030_v0 = vld [vmem:[%s6210_s2 + $0x240] sm:$0xf]  ;;  %v4158_v1 = vld [vmem:[%s6210_s2 + $0x24c] sm:$0xf0]  ;;  %v2903_v5 = vor.u32 %v4126_v63, %v2902_v61  ;;  %1696 = vmatpush.bf16.msra.mxu3 %v3175_v62 }
  0x1c   :  { %v3158_v2 = vld [vmem:[%s6210_s2 + $0x340] sm:$0xf]  ;;  %v4190_v3 = vld [vmem:[%s6210_s2 + $0x34c] sm:$0xf0]  ;;  %v3031_v6 = vor.u32 %v4158_v1, %v3030_v0  ;;  %1658 = vmatpush.bf16.msra.mxu0 %v2775_v4 }
  0x1d   :  { %v2758_v7 = vld [vmem:[%s6210_s2 + $0x20] sm:$0xf]  ;;  %v4090_v8 = vld [vmem:[%s6210_s2 + $0x2c] sm:$0xf0]  ;;  %v3159_v10 = vor.u32 %v4190_v3, %v3158_v2  ;;  %1671 = vmatpush.bf16.msra.mxu1 %v2903_v5 }
  0x1e   :  { %v2886_v9 = vld [vmem:[%s6210_s2 + $0x120] sm:$0xf]  ;;  %v4122_v11 = vld [vmem:[%s6210_s2 + $0x12c] sm:$0xf0]  ;;  %v2759_v16 = vor.u32 %v4090_v8, %v2758_v7  ;;  %1684 = vmatpush.bf16.msra.mxu2 %v3031_v6 }
  0x1f   :  { %v3014_v12 = vld [vmem:[%s6210_s2 + $0x220] sm:$0xf]  ;;  %v4154_v13 = vld [vmem:[%s6210_s2 + $0x22c] sm:$0xf0]  ;;  %v2887_v19 = vor.u32 %v4122_v11, %v2886_v9  ;;  %1697 = vmatpush.bf16.msra.mxu3 %v3159_v10 }
  0x20   :  { %v3142_v14 = vld [vmem:[%s6210_s2 + $0x320] sm:$0xf]  ;;  %v4186_v15 = vld [vmem:[%s6210_s2 + $0x32c] sm:$0xf0]  ;;  %v3015_v20 = vor.u32 %v4154_v13, %v3014_v12  ;;  %1659 = vmatpush.bf16.msra.mxu0 %v2759_v16 }
  0x21   :  { %v2742_v17 = vld [vmem:[%s6210_s2] sm:$0xf]  ;;  %v4086_v18 = vld [vmem:[%s6210_s2 + $0xc] sm:$0xf0]  ;;  %v3143_v24 = vor.u32 %v4186_v15, %v3142_v14  ;;  %1672 = vmatpush.bf16.msra.mxu1 %v2887_v19 }
  0x22   :  { %v2870_v21 = vld [vmem:[%s6210_s2 + $0x100] sm:$0xf]  ;;  %v4118_v22 = vld [vmem:[%s6210_s2 + $0x10c] sm:$0xf0]  ;;  %v2743_v31 = vor.u32 %v4086_v18, %v2742_v17  ;;  %1685 = vmatpush.bf16.msra.mxu2 %v3015_v20 }
  0x23   :  { %v2998_v23 = vld [vmem:[%s6210_s2 + $0x200] sm:$0xf]  ;;  %v4150_v25 = vld [vmem:[%s6210_s2 + $0x20c] sm:$0xf0]  ;;  %v2871_v35 = vor.u32 %v4118_v22, %v2870_v21  ;;  %1698 = vmatpush.bf16.msra.mxu3 %v3143_v24 }
  0x24   :  { %v3126_v26 = vld [vmem:[%s6210_s2 + $0x300] sm:$0xf]  ;;  %v4182_v27 = vld [vmem:[%s6210_s2 + $0x30c] sm:$0xf0]  ;;  %v2999_v36 = vor.u32 %v4150_v25, %v2998_v23  ;;  %1660 = vmatpush.bf16.msra.mxu0 %v2743_v31 }
  0x25   :  { %v3366_v28 = vld [vmem:[%s6210_s2 + $0x4e0] sm:$0xf]  ;;  %v4242_v29 = vld [vmem:[%s6210_s2 + $0x4ec] sm:$0xf0]  ;;  %v3127_v39 = vor.u32 %v4182_v27, %v3126_v26  ;;  %1673 = vmatpush.bf16.msra.mxu1 %v2871_v35 }
  0x26   :  { %v3494_v30 = vld [vmem:[%s6210_s2 + $0x5e0] sm:$0xf]  ;;  %v4274_v32 = vld [vmem:[%s6210_s2 + $0x5ec] sm:$0xf0]  ;;  %v3367_v40 = vor.u32 %v4242_v29, %v3366_v28  ;;  %1686 = vmatpush.bf16.msra.mxu2 %v2999_v36 }
  0x27   :  { %v3622_v33 = vld [vmem:[%s6210_s2 + $0x6e0] sm:$0xf]  ;;  %v4306_v34 = vld [vmem:[%s6210_s2 + $0x6ec] sm:$0xf0]  ;;  %v3495_v41 = vor.u32 %v4274_v32, %v3494_v30  ;;  %1699 = vmatpush.bf16.msra.mxu3 %v3127_v39 }
  0x28   :  { %v3750_v37 = vld [vmem:[%s6210_s2 + $0x7e0] sm:$0xf]  ;;  %v4338_v38 = vld [vmem:[%s6210_s2 + $0x7ec] sm:$0xf0]  ;;  %v3623_v42 = vor.u32 %v4306_v34, %v3622_v33  ;;  %1705 = vmatpush.bf16.msrb.mxu0 %v3367_v40 }
  0x29   :  { %v3350_v43 = vld [vmem:[%s6210_s2 + $0x4c0] sm:$0xf]  ;;  %v4238_v44 = vld [vmem:[%s6210_s2 + $0x4cc] sm:$0xf0]  ;;  %v3751_v46 = vor.u32 %v4338_v38, %v3750_v37  ;;  %1718 = vmatpush.bf16.msrb.mxu1 %v3495_v41 }
  0x2a   :  { %v3478_v45 = vld [vmem:[%s6210_s2 + $0x5c0] sm:$0xf]  ;;  %v4270_v47 = vld [vmem:[%s6210_s2 + $0x5cc] sm:$0xf0]  ;;  %v3351_v52 = vor.u32 %v4238_v44, %v3350_v43  ;;  %1731 = vmatpush.bf16.msrb.mxu2 %v3623_v42 }
  0x2b   :  { %v3606_v48 = vld [vmem:[%s6210_s2 + $0x6c0] sm:$0xf]  ;;  %v4302_v49 = vld [vmem:[%s6210_s2 + $0x6cc] sm:$0xf0]  ;;  %v3479_v54 = vor.u32 %v4270_v47, %v3478_v45  ;;  %1744 = vmatpush.bf16.msrb.mxu3 %v3751_v46 }
  0x2c   :  { %v3734_v50 = vld [vmem:[%s6210_s2 + $0x7c0] sm:$0xf]  ;;  %v4334_v51 = vld [vmem:[%s6210_s2 + $0x7cc] sm:$0xf0]  ;;  %v3607_v55 = vor.u32 %v4302_v49, %v3606_v48  ;;  %1706 = vmatpush.bf16.msrb.mxu0 %v3351_v52 }
  0x2d   :  { %v3334_v53 = vld [vmem:[%s6210_s2 + $0x4a0] sm:$0xf]  ;;  %v4234_v56 = vld [vmem:[%s6210_s2 + $0x4ac] sm:$0xf0]  ;;  %v3735_v59 = vor.u32 %v4334_v51, %v3734_v50  ;;  %1719 = vmatpush.bf16.msrb.mxu1 %v3479_v54 }
  0x2e   :  { %v3462_v57 = vld [vmem:[%s6210_s2 + $0x5a0] sm:$0xf]  ;;  %v4266_v58 = vld [vmem:[%s6210_s2 + $0x5ac] sm:$0xf0]  ;;  %v3335_v2 = vor.u32 %v4234_v56, %v3334_v53  ;;  %1732 = vmatpush.bf16.msrb.mxu2 %v3607_v55 }
  0x2f   :  { %v3590_v60 = vld [vmem:[%s6210_s2 + $0x6a0] sm:$0xf]  ;;  %v4298_v61 = vld [vmem:[%s6210_s2 + $0x6ac] sm:$0xf0]  ;;  %v3463_v3 = vor.u32 %v4266_v58, %v3462_v57  ;;  %1745 = vmatpush.bf16.msrb.mxu3 %v3735_v59 }
  0x30   :  { %v3718_v62 = vld [vmem:[%s6210_s2 + $0x7a0] sm:$0xf]  ;;  %v4330_v63 = vld [vmem:[%s6210_s2 + $0x7ac] sm:$0xf0]  ;;  %v3591_v7 = vor.u32 %v4298_v61, %v3590_v60  ;;  %1707 = vmatpush.bf16.msrb.mxu0 %v3335_v2 }
  0x31   :  { %v3318_v0 = vld [vmem:[%s6210_s2 + $0x480] sm:$0xf]  ;;  %v4230_v1 = vld [vmem:[%s6210_s2 + $0x48c] sm:$0xf0]  ;;  %v3719_v12 = vor.u32 %v4330_v63, %v3718_v62  ;;  %1720 = vmatpush.bf16.msrb.mxu1 %v3463_v3 }
  0x32   :  { %v3446_v4 = vld [vmem:[%s6210_s2 + $0x580] sm:$0xf]  ;;  %v4262_v5 = vld [vmem:[%s6210_s2 + $0x58c] sm:$0xf0]  ;;  %v3319_v19 = vor.u32 %v4230_v1, %v3318_v0  ;;  %1733 = vmatpush.bf16.msrb.mxu2 %v3591_v7  ;;  %v46_v7 = vld [vmem:[%s6208_s0 + $0x8] sm:$0xff] }
  0x33   :  { %v4781_v6 = vld [vmem:[%s6209_s1] sm:$0xff]  ;;  %v4294_v13 = vld [vmem:[%s6210_s2 + $0x68c] sm:$0xf0]  ;;  %v3447_v22 = vor.u32 %v4262_v5, %v3446_v4  ;;  %1746 = vmatpush.bf16.msrb.mxu3 %v3719_v12 }
  0x34   :  { %v3574_v8 = vld [vmem:[%s6210_s2 + $0x680] sm:$0xf]  ;;  %v49_v9 = vperm.slane %v4781_v6, 0  ;;  %v50_v10 = vperm.slane %v4781_v6, 1  ;;  %v51_v11 = vperm.slane %v4781_v6, 2  ;;  %v52_v15 = vperm.slane %v4781_v6, 3  ;;  %1708 = vmatpush.bf16.msrb.mxu0 %v3319_v19 }
  0x35   :  { %v3702_v14 = vld [vmem:[%s6210_s2 + $0x780] sm:$0xf]  ;;  %v4326_v16 = vld [vmem:[%s6210_s2 + $0x78c] sm:$0xf0]  ;;  %v3575_v23 = vor.u32 %v4294_v13, %v3574_v8  ;;  %1721 = vmatpush.bf16.msrb.mxu1 %v3447_v22  ;;  %v54_v52 = vperm.slane %v4781_v6, 5  ;;  %v53_v60 = vperm.slane %v4781_v6, 4 }
  0x36   :  { %v57_v17 = vrot.slane %v50_v10, 6  ;;  %v58_v18 = vrot.slane %v51_v11, 4  ;;  %v3302_v20 = vld [vmem:[%s6210_s2 + $0x460] sm:$0xf]  ;;  %v59_v21 = vrot.slane %v52_v15, 2  ;;  %v3703_v28 = vor.u32 %v4326_v16, %v3702_v14 }
  0x37   :  { %v4226_v24 = vld [vmem:[%s6210_s2 + $0x46c] sm:$0xf0]  ;;  %v3430_v25 = vld [vmem:[%s6210_s2 + $0x560] sm:$0xf]  ;;  %1734 = vmatpush.bf16.msrb.mxu2 %v3575_v23  ;;  %v55_v2 = vperm.slane %v4781_v6, 6  ;;  %v56_v3 = vperm.slane %v4781_v6, 7 }
  0x38   :  { %v45_v26 = vld [vmem:[%s6208_s0] sm:$0xff]  ;;  %v64_v27 = vsel %vm63_vm0, %v49_v9, %v57_v17  ;;  %v4258_v29 = vld [vmem:[%s6210_s2 + $0x56c] sm:$0xf0]  ;;  %v66_v32 = vsel %vm65_vm1, %v58_v18, %v59_v21  ;;  %v3303_v36 = vor.u32 %v4226_v24, %v3302_v20  ;;  %1747 = vmatpush.bf16.msrb.mxu3 %v3703_v28  ;;  %v60_v8 = vrot.slane %v54_v52, 6  ;;  %v2856_v16 = vld [vmem:[%s6210_s2 + $0xf0] sm:$0xf0] }
  0x39   :  { %v3558_v30 = vld [vmem:[%s6210_s2 + $0x660] sm:$0xf]  ;;  %v4290_v31 = vld [vmem:[%s6210_s2 + $0x66c] sm:$0xf0]  ;;  %v68_v35 = vsel %vm67_vm2, %v64_v27, %v66_v32  ;;  %v3431_v41 = vor.u32 %v4258_v29, %v3430_v25  ;;  %v61_v11 = vrot.slane %v55_v2, 4  ;;  %v62_v12 = vrot.slane %v56_v3, 2 }
  0x3a   :  { %v3686_v33 = vld [vmem:[%s6210_s2 + $0x760] sm:$0xf]  ;;  %v4322_v34 = vld [vmem:[%s6210_s2 + $0x76c] sm:$0xf0]  ;;  %v74_v40 = vadd.f32 %v68_v35, %v45_v26  ;;  %v3559_v42 = vor.u32 %v4290_v31, %v3558_v30  ;;  %1709 = vmatpush.bf16.msrb.mxu0 %v3303_v36  ;;  %v4112_v15 = vld [vmem:[%s6210_s2 + $0xe4] sm:$0xf]  ;;  %v69_v18 = vsel %vm63_vm0, %v53_v60, %v60_v8 }
  0x3b   :  { %v3286_v37 = vld [vmem:[%s6210_s2 + $0x440] sm:$0xf]  ;;  %v4222_v38 = vld [vmem:[%s6210_s2 + $0x44c] sm:$0xf0]  ;;  %v3687_v46 = vor.u32 %v4322_v34, %v3686_v33  ;;  %1722 = vmatpush.bf16.msrb.mxu1 %v3431_v41  ;;  %v4144_v17 = vld [vmem:[%s6210_s2 + $0x1e4] sm:$0xf]  ;;  %v70_v22 = vsel %vm65_vm1, %v61_v11, %v62_v12 }
  0x3c   :  { %v3414_v39 = vld [vmem:[%s6210_s2 + $0x540] sm:$0xf]  ;;  %v4254_v43 = vld [vmem:[%s6210_s2 + $0x54c] sm:$0xf0]  ;;  %v76_v49 = vmax.f32 %v74_v40, 0.0  ;;  %v3287_v53 = vor.u32 %v4222_v38, %v3286_v37  ;;  %1735 = vmatpush.bf16.msrb.mxu2 %v3559_v42  ;;  %v71_v27 = vsel %vm67_vm2, %v69_v18, %v70_v22  ;;  %v2859_v40 = vor.u32 %v4112_v15, %v2856_v16 }
  0x3d   :  { %v3542_v44 = vld [vmem:[%s6210_s2 + $0x640] sm:$0xf]  ;;  %v4286_v45 = vld [vmem:[%s6210_s2 + $0x64c] sm:$0xf0]  ;;  %v3415_v56 = vor.u32 %v4254_v43, %v3414_v39  ;;  %1748 = vmatpush.bf16.msrb.mxu3 %v3687_v46  ;;  %v2984_v19 = vld [vmem:[%s6210_s2 + $0x1f0] sm:$0xf0]  ;;  %v75_v33 = vadd.f32 %v71_v27, %v46_v7 }
  0x3e   :  { %v3670_v47 = vld [vmem:[%s6210_s2 + $0x740] sm:$0xf]  ;;  %v4318_v48 = vld [vmem:[%s6210_s2 + $0x74c] sm:$0xf0]  ;;  %80 = vst [vmem:[#allocation1] ss:$4 sm:$0xff] %v76_v49  ;;  %v3543_v57 = vor.u32 %v4286_v45, %v3542_v44  ;;  %1710 = vmatpush.bf16.msrb.mxu0 %v3287_v53  ;;  %v2987_v41 = vor.u32 %v4144_v17, %v2984_v19 }
  0x3f   :  { %v3270_v50 = vld [vmem:[%s6210_s2 + $0x420] sm:$0xf]  ;;  %v4218_v51 = vld [vmem:[%s6210_s2 + $0x42c] sm:$0xf0]  ;;  %v3671_v61 = vor.u32 %v4318_v48, %v3670_v47  ;;  %1723 = vmatpush.bf16.msrb.mxu1 %v3415_v56  ;;  %v4176_v20 = vld [vmem:[%s6210_s2 + $0x2e4] sm:$0xf] }
  0x40   :  { %v3398_v54 = vld [vmem:[%s6210_s2 + $0x520] sm:$0xf]  ;;  %v4250_v55 = vld [vmem:[%s6210_s2 + $0x52c] sm:$0xf0]  ;;  %v3271_v9 = vor.u32 %v4218_v51, %v3270_v50  ;;  %1736 = vmatpush.bf16.msrb.mxu2 %v3543_v57  ;;  %v3112_v21 = vld [vmem:[%s6210_s2 + $0x2f0] sm:$0xf0] }
  0x41   :  { %v3526_v58 = vld [vmem:[%s6210_s2 + $0x620] sm:$0xf]  ;;  %v4282_v59 = vld [vmem:[%s6210_s2 + $0x62c] sm:$0xf0]  ;;  %v3399_v13 = vor.u32 %v4250_v55, %v3398_v54  ;;  %1749 = vmatpush.bf16.msrb.mxu3 %v3671_v61  ;;  %v4208_v39 = vld [vmem:[%s6210_s2 + $0x3e4] sm:$0xf]  ;;  %v3115_v45 = vor.u32 %v4176_v20, %v3112_v21 }
  0x42   :  { %v3654_v62 = vld [vmem:[%s6210_s2 + $0x720] sm:$0xf]  ;;  %v4314_v63 = vld [vmem:[%s6210_s2 + $0x72c] sm:$0xf0]  ;;  %v3527_v14 = vor.u32 %v4282_v59, %v3526_v58  ;;  %1711 = vmatpush.bf16.msrb.mxu0 %v3271_v9  ;;  %v3240_v42 = vld [vmem:[%s6210_s2 + $0x3f0] sm:$0xf0] }
  0x43   :  { %v3254_v0 = vld [vmem:[%s6210_s2 + $0x400] sm:$0xf]  ;;  %v4214_v1 = vld [vmem:[%s6210_s2 + $0x40c] sm:$0xf0]  ;;  %v3655_v25 = vor.u32 %v4314_v63, %v3654_v62  ;;  %1724 = vmatpush.bf16.msrb.mxu1 %v3399_v13  ;;  %v4108_v43 = vld [vmem:[%s6210_s2 + $0xc4] sm:$0xf]  ;;  %v3243_v52 = vor.u32 %v4208_v39, %v3240_v42 }
  0x44   :  { %v3382_v4 = vld [vmem:[%s6210_s2 + $0x500] sm:$0xf]  ;;  %v4246_v5 = vld [vmem:[%s6210_s2 + $0x50c] sm:$0xf0]  ;;  %v3255_v26 = vor.u32 %v4214_v1, %v3254_v0  ;;  %1737 = vmatpush.bf16.msrb.mxu2 %v3527_v14  ;;  %v77_v44 = vmax.f32 %v75_v33, 0.0 }
  0x45   :  { %v3510_v10 = vld [vmem:[%s6210_s2 + $0x600] sm:$0xf]  ;;  %v4278_v6 = vld [vmem:[%s6210_s2 + $0x60c] sm:$0xf0]  ;;  %v3383_v32 = vor.u32 %v4246_v5, %v3382_v4  ;;  %v2840_v46 = vld [vmem:[%s6210_s2 + $0xd0] sm:$0xf0]  ;;  %1750 = vmatpush.bf16.msrb.mxu3 %v3655_v25 }
  0x46   :  { %v85_v23 = vld.sshfl [vmem:[#allocation1 + $0x10] sm:$0xff pattern:$0x73625140]  ;;  %v83_v24 = vld.sshfl [vmem:[#allocation1] sm:$0xff pattern:$0x73625140]  ;;  %v3511_v36 = vor.u32 %v4278_v6, %v3510_v10  ;;  %1712 = vmatpush.bf16.msrb.mxu0 %v3255_v26  ;;  %v2843_v53 = vor.u32 %v4108_v43, %v2840_v46 }
  0x47   :  { %v4923_v28 = vpack.c.bf16 %v85_v23, %v85_v23  ;;  %v4925_v29 = vpack.c.bf16 %v83_v24, %v83_v24  ;;  %v86_v30 = vld.sshfl [vmem:[#allocation1 + $0x18] sm:$0xff pattern:$0x73625140]  ;;  %v84_v31 = vld.sshfl [vmem:[#allocation1 + $0x8] sm:$0xff pattern:$0x73625140]  ;;  %1725 = vmatpush.bf16.msrb.mxu1 %v3383_v32 }
  0x48   :  { %v4927_v34 = vpack.c.bf16 %v86_v30, %v86_v30  ;;  %v4929_v35 = vpack.c.bf16 %v84_v31, %v84_v31  ;;  %v3638_v37 = vld [vmem:[%s6210_s2 + $0x700] sm:$0xf]  ;;  %v4310_v38 = vld [vmem:[%s6210_s2 + $0x70c] sm:$0xf0]  ;;  %v4140_v47 = vld [vmem:[%s6210_s2 + $0x1c4] sm:$0xf]  ;;  %1738 = vmatpush.bf16.msrb.mxu2 %v3511_v36 }
  0x49   :  { %1687 = vmatmul.bf16.vlgmr.msra.gmra.mxu2 %v4923_v28  ;;  %1661 = vmatmul.bf16.vlgmr.msra.gmra.mxu0 %v4925_v29  ;;  %v2968_v48 = vld [vmem:[%s6210_s2 + $0x1d0] sm:$0xf0]  ;;  %v3639_v49 = vor.u32 %v4310_v38, %v3638_v37  ;;  %v4172_v50 = vld [vmem:[%s6210_s2 + $0x2c4] sm:$0xf]  ;;  %82 = vst [vmem:[#allocation1 + $0x20] ss:$4 sm:$0xff] %v77_v44 }
  0x4a   :  { %1700 = vmatmul.bf16.vlgmr.msra.gmra.mxu3 %v4927_v34  ;;  %1674 = vmatmul.bf16.vlgmr.msra.gmra.mxu1 %v4929_v35  ;;  %v3096_v51 = vld [vmem:[%s6210_s2 + $0x2d0] sm:$0xf0]  ;;  %v2971_v54 = vor.u32 %v4140_v47, %v2968_v48  ;;  %v4204_v55 = vld [vmem:[%s6210_s2 + $0x3c4] sm:$0xf] }
  0x4b   :  { %1757 = vmatpush.bf16.msra.mxu0 %v2859_v40  ;;  %1770 = vmatpush.bf16.msra.mxu1 %v2987_v41  ;;  %v3224_v56 = vld [vmem:[%s6210_s2 + $0x3d0] sm:$0xf0]  ;;  %v4104_v57 = vld [vmem:[%s6210_s2 + $0xa4] sm:$0xf]  ;;  %v3099_v58 = vor.u32 %v4172_v50, %v3096_v51 }
  0x4c   :  { %1783 = vmatpush.bf16.msra.mxu2 %v3115_v45  ;;  %v2824_v59 = vld [vmem:[%s6210_s2 + $0xb0] sm:$0xf0]  ;;  %v4136_v60 = vld [vmem:[%s6210_s2 + $0x1a4] sm:$0xf]  ;;  %1751 = vmatpush.bf16.msrb.mxu3 %v3639_v49  ;;  %v3227_v0 = vor.u32 %v4204_v55, %v3224_v56 }
  0x4d   :  { %v2952_v61 = vld [vmem:[%s6210_s2 + $0x1b0] sm:$0xf0]  ;;  %v4168_v62 = vld [vmem:[%s6210_s2 + $0x2a4] sm:$0xf]  ;;  %v2827_v1 = vor.u32 %v4104_v57, %v2824_v59 }
  0x4e   :  { %v3080_v63 = vld [vmem:[%s6210_s2 + $0x2b0] sm:$0xf0]  ;;  %v2955_v2 = vor.u32 %v4136_v60, %v2952_v61  ;;  %v4200_v3 = vld [vmem:[%s6210_s2 + $0x3a4] sm:$0xf] }
  0x4f   :  { %1758 = vmatpush.bf16.msra.mxu0 %v2843_v53  ;;  %1771 = vmatpush.bf16.msra.mxu1 %v2971_v54  ;;  %v3208_v4 = vld [vmem:[%s6210_s2 + $0x3b0] sm:$0xf0]  ;;  %v3083_v7 = vor.u32 %v4168_v62, %v3080_v63  ;;  %v4100_v9 = vld [vmem:[%s6210_s2 + $0x84] sm:$0xf] }
  0x50   :  { %1796 = vmatpush.bf16.msra.mxu3 %v3243_v52  ;;  %1784 = vmatpush.bf16.msra.mxu2 %v3099_v58  ;;  %v89_v5 = vld.sshfl [vmem:[#allocation1 + $0x30] sm:$0xff pattern:$0x73625140]  ;;  %v87_v8 = vld.sshfl [vmem:[#allocation1 + $0x20] sm:$0xff pattern:$0x73625140]  ;;  %v3211_v12 = vor.u32 %v4200_v3, %v3208_v4 }
  0x51   :  { %v2808_v10 = vld [vmem:[%s6210_s2 + $0x90] sm:$0xf0]  ;;  %v90_v6 = vld.sshfl [vmem:[#allocation1 + $0x38] sm:$0xff pattern:$0x73625140]  ;;  %v5010_v16 = vpack.c.bf16 %v89_v5, %v89_v5  ;;  %v5012_v17 = vpack.c.bf16 %v87_v8, %v87_v8 }
  0x52   :  { %v88_v11 = vld.sshfl [vmem:[#allocation1 + $0x28] sm:$0xff pattern:$0x73625140]  ;;  %v4132_v13 = vld [vmem:[%s6210_s2 + $0x184] sm:$0xf]  ;;  %v5023_v21 = vpack.c.bf16 %v90_v6, %v90_v6  ;;  %v2811_v23 = vor.u32 %v4100_v9, %v2808_v10 }
  0x53   :  { %v2936_v14 = vld [vmem:[%s6210_s2 + $0x190] sm:$0xf0]  ;;  %v4164_v15 = vld [vmem:[%s6210_s2 + $0x284] sm:$0xf]  ;;  %1759 = vmatpush.bf16.msra.mxu0 %v2827_v1  ;;  %1772 = vmatpush.bf16.msra.mxu1 %v2955_v2  ;;  %v5025_v22 = vpack.c.bf16 %v88_v11, %v88_v11 }
  0x54   :  { %1797 = vmatpush.bf16.msra.mxu3 %v3227_v0  ;;  %v3064_v18 = vld [vmem:[%s6210_s2 + $0x290] sm:$0xf0]  ;;  %v4196_v19 = vld [vmem:[%s6210_s2 + $0x384] sm:$0xf]  ;;  %1785 = vmatpush.bf16.msra.mxu2 %v3083_v7  ;;  %v2939_v24 = vor.u32 %v4132_v13, %v2936_v14 }
  0x55   :  { %v3192_v20 = vld [vmem:[%s6210_s2 + $0x390] sm:$0xf0]  ;;  %v4096_v25 = vld [vmem:[%s6210_s2 + $0x64] sm:$0xf]  ;;  %v3067_v27 = vor.u32 %v4164_v15, %v3064_v18 }
  0x56   :  { %v2792_v26 = vld [vmem:[%s6210_s2 + $0x70] sm:$0xf0]  ;;  %v3195_v30 = vor.u32 %v4196_v19, %v3192_v20  ;;  %v4128_v31 = vld [vmem:[%s6210_s2 + $0x164] sm:$0xf] }
  0x57   :  { %v2920_v32 = vld [vmem:[%s6210_s2 + $0x170] sm:$0xf0]  ;;  %v4160_v33 = vld [vmem:[%s6210_s2 + $0x264] sm:$0xf]  ;;  %1760 = vmatpush.bf16.msra.mxu0 %v2811_v23  ;;  %1773 = vmatpush.bf16.msra.mxu1 %v2939_v24  ;;  %v2795_v39 = vor.u32 %v4096_v25, %v2792_v26 }
  0x58   :  { %1798 = vmatpush.bf16.msra.mxu3 %v3211_v12  ;;  %v3048_v36 = vld [vmem:[%s6210_s2 + $0x270] sm:$0xf0]  ;;  %v4192_v37 = vld [vmem:[%s6210_s2 + $0x364] sm:$0xf]  ;;  %v2923_v40 = vor.u32 %v4128_v31, %v2920_v32  ;;  %1786 = vmatpush.bf16.msra.mxu2 %v3067_v27 }
  0x59   :  { %1739 = vmatmul.bf16.vlgmr.msrb.gmra.mxu2 %v5010_v16  ;;  %1713 = vmatmul.bf16.vlgmr.msrb.gmra.mxu0 %v5012_v17  ;;  %v3176_v38 = vld [vmem:[%s6210_s2 + $0x370] sm:$0xf0]  ;;  %v4092_v41 = vld [vmem:[%s6210_s2 + $0x44] sm:$0xf]  ;;  %v3051_v43 = vor.u32 %v4160_v33, %v3048_v36 }
  0x5a   :  { %1752 = vmatmul.bf16.vlgmr.msrb.gmra.mxu3 %v5023_v21  ;;  %1726 = vmatmul.bf16.vlgmr.msrb.gmra.mxu1 %v5025_v22  ;;  %v2776_v42 = vld [vmem:[%s6210_s2 + $0x50] sm:$0xf0]  ;;  %v3179_v44 = vor.u32 %v4192_v37, %v3176_v38  ;;  %v4124_v45 = vld [vmem:[%s6210_s2 + $0x144] sm:$0xf] }
  0x5b   :  { %v2904_v46 = vld [vmem:[%s6210_s2 + $0x150] sm:$0xf0]  ;;  %v4156_v47 = vld [vmem:[%s6210_s2 + $0x244] sm:$0xf]  ;;  %1761 = vmatpush.bf16.msra.mxu0 %v2795_v39  ;;  %1774 = vmatpush.bf16.msra.mxu1 %v2923_v40  ;;  %v2779_v51 = vor.u32 %v4092_v41, %v2776_v42 }
  0x5c   :  { %1799 = vmatpush.bf16.msra.mxu3 %v3195_v30  ;;  %v3032_v48 = vld [vmem:[%s6210_s2 + $0x250] sm:$0xf0]  ;;  %v4188_v49 = vld [vmem:[%s6210_s2 + $0x344] sm:$0xf]  ;;  %v2907_v52 = vor.u32 %v4124_v45, %v2904_v46  ;;  %1787 = vmatpush.bf16.msra.mxu2 %v3051_v43 }
  0x5d   :  { %v3160_v50 = vld [vmem:[%s6210_s2 + $0x350] sm:$0xf0]  ;;  %v4088_v53 = vld [vmem:[%s6210_s2 + $0x24] sm:$0xf]  ;;  %v3035_v55 = vor.u32 %v4156_v47, %v3032_v48 }
  0x5e   :  { %v2760_v54 = vld [vmem:[%s6210_s2 + $0x30] sm:$0xf0]  ;;  %v3163_v56 = vor.u32 %v4188_v49, %v3160_v50  ;;  %v4120_v57 = vld [vmem:[%s6210_s2 + $0x124] sm:$0xf] }
  0x5f   :  { %v2888_v58 = vld [vmem:[%s6210_s2 + $0x130] sm:$0xf0]  ;;  %v4152_v59 = vld [vmem:[%s6210_s2 + $0x224] sm:$0xf]  ;;  %1762 = vmatpush.bf16.msra.mxu0 %v2779_v51  ;;  %1775 = vmatpush.bf16.msra.mxu1 %v2907_v52  ;;  %v2763_v0 = vor.u32 %v4088_v53, %v2760_v54 }
  0x60   :  { %1800 = vmatpush.bf16.msra.mxu3 %v3179_v44  ;;  %v3016_v60 = vld [vmem:[%s6210_s2 + $0x230] sm:$0xf0]  ;;  %v4184_v61 = vld [vmem:[%s6210_s2 + $0x324] sm:$0xf]  ;;  %v2891_v1 = vor.u32 %v4120_v57, %v2888_v58  ;;  %1788 = vmatpush.bf16.msra.mxu2 %v3035_v55 }
  0x61   :  { %v3144_v62 = vld [vmem:[%s6210_s2 + $0x330] sm:$0xf0]  ;;  %v4084_v63 = vld [vmem:[%s6210_s2 + $0x4] sm:$0xf]  ;;  %v3019_v5 = vor.u32 %v4152_v59, %v3016_v60 }
  0x62   :  { %v2744_v2 = vld [vmem:[%s6210_s2 + $0x10] sm:$0xf0]  ;;  %v4116_v3 = vld [vmem:[%s6210_s2 + $0x104] sm:$0xf]  ;;  %v3147_v7 = vor.u32 %v4184_v61, %v3144_v62 }
  0x63   :  { %v2872_v4 = vld [vmem:[%s6210_s2 + $0x110] sm:$0xf0]  ;;  %v4148_v8 = vld [vmem:[%s6210_s2 + $0x204] sm:$0xf]  ;;  %1763 = vmatpush.bf16.msra.mxu0 %v2763_v0  ;;  %1776 = vmatpush.bf16.msra.mxu1 %v2891_v1  ;;  %v2747_v18 = vor.u32 %v4084_v63, %v2744_v2 }
  0x64   :  { %1801 = vmatpush.bf16.msra.mxu3 %v3163_v56  ;;  %v3000_v9 = vld [vmem:[%s6210_s2 + $0x210] sm:$0xf0]  ;;  %v4180_v10 = vld [vmem:[%s6210_s2 + $0x304] sm:$0xf]  ;;  %v2875_v19 = vor.u32 %v4116_v3, %v2872_v4  ;;  %1789 = vmatpush.bf16.msra.mxu2 %v3019_v5 }
  0x65   :  { %v3128_v6 = vld [vmem:[%s6210_s2 + $0x310] sm:$0xf0]  ;;  %v4240_v11 = vld [vmem:[%s6210_s2 + $0x4e4] sm:$0xf]  ;;  %v3003_v25 = vor.u32 %v4148_v8, %v3000_v9 }
  0x66   :  { %v3368_v12 = vld [vmem:[%s6210_s2 + $0x4f0] sm:$0xf0]  ;;  %v4272_v13 = vld [vmem:[%s6210_s2 + $0x5e4] sm:$0xf]  ;;  %v3131_v26 = vor.u32 %v4180_v10, %v3128_v6 }
  0x67   :  { %v3496_v14 = vld [vmem:[%s6210_s2 + $0x5f0] sm:$0xf0]  ;;  %v4304_v15 = vld [vmem:[%s6210_s2 + $0x6e4] sm:$0xf]  ;;  %v3371_v27 = vor.u32 %v4240_v11, %v3368_v12  ;;  %1764 = vmatpush.bf16.msra.mxu0 %v2747_v18  ;;  %1777 = vmatpush.bf16.msra.mxu1 %v2875_v19 }
  0x68   :  { %v3624_v20 = vld [vmem:[%s6210_s2 + $0x6f0] sm:$0xf0]  ;;  %v4336_v23 = vld [vmem:[%s6210_s2 + $0x7e4] sm:$0xf]  ;;  %1802 = vmatpush.bf16.msra.mxu3 %v3147_v7  ;;  %v3499_v30 = vor.u32 %v4272_v13, %v3496_v14  ;;  %1790 = vmatpush.bf16.msra.mxu2 %v3003_v25 }
  0x69   :  { %v3752_v24 = vld [vmem:[%s6210_s2 + $0x7f0] sm:$0xf0]  ;;  %v4236_v31 = vld [vmem:[%s6210_s2 + $0x4c4] sm:$0xf]  ;;  %v3627_v33 = vor.u32 %v4304_v15, %v3624_v20 }
  0x6a   :  { %v3352_v32 = vld [vmem:[%s6210_s2 + $0x4d0] sm:$0xf0]  ;;  %v3755_v36 = vor.u32 %v4336_v23, %v3752_v24  ;;  %v4268_v37 = vld [vmem:[%s6210_s2 + $0x5c4] sm:$0xf]  ;;  %1765 = vmatmul.bf16.vlgmr.msra.gmra.mxu0 %v4925_v29  ;;  %1778 = vmatmul.bf16.vlgmr.msra.gmra.mxu1 %v4929_v35 }
  0x6b   :  { %v3480_v38 = vld [vmem:[%s6210_s2 + $0x5d0] sm:$0xf0]  ;;  %v4300_v39 = vld [vmem:[%s6210_s2 + $0x6c4] sm:$0xf]  ;;  %1809 = vmatpush.bf16.msrb.mxu0 %v3371_v27  ;;  %1822 = vmatpush.bf16.msrb.mxu1 %v3499_v30  ;;  %v3355_v43 = vor.u32 %v4236_v31, %v3352_v32 }
  0x6c   :  { %v3608_v40 = vld [vmem:[%s6210_s2 + $0x6d0] sm:$0xf0]  ;;  %v4332_v41 = vld [vmem:[%s6210_s2 + $0x7c4] sm:$0xf]  ;;  %1803 = vmatpush.bf16.msra.mxu3 %v3131_v26  ;;  %v3483_v44 = vor.u32 %v4268_v37, %v3480_v38  ;;  %1835 = vmatpush.bf16.msrb.mxu2 %v3627_v33 }
  0x6d   :  { %v3736_v42 = vld [vmem:[%s6210_s2 + $0x7d0] sm:$0xf0]  ;;  %v4232_v45 = vld [vmem:[%s6210_s2 + $0x4a4] sm:$0xf]  ;;  %v3611_v47 = vor.u32 %v4300_v39, %v3608_v40  ;;  %1791 = vmatmul.bf16.vlgmr.msra.gmra.mxu2 %v4923_v28 }
  0x6e   :  { %v3336_v46 = vld [vmem:[%s6210_s2 + $0x4b0] sm:$0xf0]  ;;  %v3739_v48 = vor.u32 %v4332_v41, %v3736_v42  ;;  %v4264_v49 = vld [vmem:[%s6210_s2 + $0x5a4] sm:$0xf] }
  0x6f   :  { %v3464_v50 = vld [vmem:[%s6210_s2 + $0x5b0] sm:$0xf0]  ;;  %v4296_v51 = vld [vmem:[%s6210_s2 + $0x6a4] sm:$0xf]  ;;  %1804 = vmatmul.bf16.vlgmr.msra.gmra.mxu3 %v4927_v34  ;;  %1810 = vmatpush.bf16.msrb.mxu0 %v3355_v43  ;;  %v3339_v55 = vor.u32 %v4232_v45, %v3336_v46 }
  0x70   :  { %1848 = vmatpush.bf16.msrb.mxu3 %v3755_v36  ;;  %v3592_v52 = vld [vmem:[%s6210_s2 + $0x6b0] sm:$0xf0]  ;;  %v4328_v53 = vld [vmem:[%s6210_s2 + $0x7a4] sm:$0xf]  ;;  %1823 = vmatpush.bf16.msrb.mxu1 %v3483_v44  ;;  %v3467_v56 = vor.u32 %v4264_v49, %v3464_v50 }
  0x71   :  { %v3720_v54 = vld [vmem:[%s6210_s2 + $0x7b0] sm:$0xf0]  ;;  %v4228_v57 = vld [vmem:[%s6210_s2 + $0x484] sm:$0xf]  ;;  %1836 = vmatpush.bf16.msrb.mxu2 %v3611_v47  ;;  %v3595_v59 = vor.u32 %v4296_v51, %v3592_v52 }
  0x72   :  { %v3320_v58 = vld [vmem:[%s6210_s2 + $0x490] sm:$0xf0]  ;;  %v3723_v60 = vor.u32 %v4328_v53, %v3720_v54  ;;  %v4260_v61 = vld [vmem:[%s6210_s2 + $0x584] sm:$0xf] }
  0x73   :  { %v3448_v62 = vld [vmem:[%s6210_s2 + $0x590] sm:$0xf0]  ;;  %v4292_v63 = vld [vmem:[%s6210_s2 + $0x684] sm:$0xf]  ;;  %1811 = vmatpush.bf16.msrb.mxu0 %v3339_v55  ;;  %v3323_v3 = vor.u32 %v4228_v57, %v3320_v58 }
  0x74   :  { %1849 = vmatpush.bf16.msrb.mxu3 %v3739_v48  ;;  %v3576_v0 = vld [vmem:[%s6210_s2 + $0x690] sm:$0xf0]  ;;  %v4324_v1 = vld [vmem:[%s6210_s2 + $0x784] sm:$0xf]  ;;  %1824 = vmatpush.bf16.msrb.mxu1 %v3467_v56  ;;  %v3451_v4 = vor.u32 %v4260_v61, %v3448_v62  ;;  %v2990_v61 = vld [vmem:[%s6210_s2 + $0x1e8] sm:$0xf] }
  0x75   :  { %v3704_v2 = vld [vmem:[%s6210_s2 + $0x790] sm:$0xf0]  ;;  %v4224_v5 = vld [vmem:[%s6210_s2 + $0x464] sm:$0xf]  ;;  %1837 = vmatpush.bf16.msrb.mxu2 %v3595_v59  ;;  %v3579_v8 = vor.u32 %v4292_v63, %v3576_v0  ;;  %v2862_v59 = vld [vmem:[%s6210_s2 + $0xe8] sm:$0xf] }
  0x76   :  { %v3304_v7 = vld [vmem:[%s6210_s2 + $0x470] sm:$0xf0]  ;;  %v3707_v9 = vor.u32 %v4324_v1, %v3704_v2  ;;  %v4256_v10 = vld [vmem:[%s6210_s2 + $0x564] sm:$0xf]  ;;  %v4147_v62 = vld [vmem:[%s6210_s2 + $0x1f4] sm:$0xf0] }
  0x77   :  { %v3432_v6 = vld [vmem:[%s6210_s2 + $0x570] sm:$0xf0]  ;;  %v4288_v11 = vld [vmem:[%s6210_s2 + $0x664] sm:$0xf]  ;;  %1812 = vmatpush.bf16.msrb.mxu0 %v3323_v3  ;;  %v3307_v15 = vor.u32 %v4224_v5, %v3304_v7  ;;  %v3118_v63 = vld [vmem:[%s6210_s2 + $0x2e8] sm:$0xf] }
  0x78   :  { %1850 = vmatpush.bf16.msrb.mxu3 %v3723_v60  ;;  %v3560_v12 = vld [vmem:[%s6210_s2 + $0x670] sm:$0xf0]  ;;  %v4320_v13 = vld [vmem:[%s6210_s2 + $0x764] sm:$0xf]  ;;  %1825 = vmatpush.bf16.msrb.mxu1 %v3451_v4  ;;  %v3435_v18 = vor.u32 %v4256_v10, %v3432_v6  ;;  %v4115_v60 = vld [vmem:[%s6210_s2 + $0xf4] sm:$0xf0] }
  0x79   :  { %v3688_v14 = vld [vmem:[%s6210_s2 + $0x770] sm:$0xf0]  ;;  %v4220_v19 = vld [vmem:[%s6210_s2 + $0x444] sm:$0xf]  ;;  %1838 = vmatpush.bf16.msrb.mxu2 %v3579_v8  ;;  %v3563_v23 = vor.u32 %v4288_v11, %v3560_v12  ;;  %v4179_v2 = vld [vmem:[%s6210_s2 + $0x2f4] sm:$0xf0]  ;;  %v2863_v8 = vor.u32 %v4115_v60, %v2862_v59 }
  0x7a   :  { %v3288_v20 = vld [vmem:[%s6210_s2 + $0x450] sm:$0xf0]  ;;  %v3691_v24 = vor.u32 %v4320_v13, %v3688_v14  ;;  %v4252_v25 = vld [vmem:[%s6210_s2 + $0x544] sm:$0xf]  ;;  %v3246_v3 = vld [vmem:[%s6210_s2 + $0x3e8] sm:$0xf]  ;;  %v3119_v11 = vor.u32 %v4179_v2, %v3118_v63 }
  0x7b   :  { %v3416_v26 = vld [vmem:[%s6210_s2 + $0x550] sm:$0xf0]  ;;  %v4284_v27 = vld [vmem:[%s6210_s2 + $0x644] sm:$0xf]  ;;  %1813 = vmatpush.bf16.msrb.mxu0 %v3307_v15  ;;  %v3291_v33 = vor.u32 %v4220_v19, %v3288_v20  ;;  %v4211_v4 = vld [vmem:[%s6210_s2 + $0x3f4] sm:$0xf0] }
  0x7c   :  { %1851 = vmatpush.bf16.msrb.mxu3 %v3707_v9  ;;  %v3544_v30 = vld [vmem:[%s6210_s2 + $0x650] sm:$0xf0]  ;;  %v4316_v31 = vld [vmem:[%s6210_s2 + $0x744] sm:$0xf]  ;;  %1826 = vmatpush.bf16.msrb.mxu1 %v3435_v18  ;;  %v3419_v36 = vor.u32 %v4252_v25, %v3416_v26  ;;  %v2991_v9 = vor.u32 %v4147_v62, %v2990_v61  ;;  %v2846_v10 = vld [vmem:[%s6210_s2 + $0xc8] sm:$0xf]  ;;  %v3247_v12 = vor.u32 %v4211_v4, %v3246_v3 }
  0x7d   :  { %v3672_v32 = vld [vmem:[%s6210_s2 + $0x750] sm:$0xf0]  ;;  %v4216_v37 = vld [vmem:[%s6210_s2 + $0x424] sm:$0xf]  ;;  %1839 = vmatpush.bf16.msrb.mxu2 %v3563_v23  ;;  %v3547_v39 = vor.u32 %v4284_v27, %v3544_v30  ;;  %v4111_v6 = vld [vmem:[%s6210_s2 + $0xd4] sm:$0xf0] }
  0x7e   :  { %v3272_v38 = vld [vmem:[%s6210_s2 + $0x430] sm:$0xf0]  ;;  %v3675_v40 = vor.u32 %v4316_v31, %v3672_v32  ;;  %v4248_v41 = vld [vmem:[%s6210_s2 + $0x524] sm:$0xf]  ;;  %v2974_v13 = vld [vmem:[%s6210_s2 + $0x1c8] sm:$0xf]  ;;  %v2847_v23 = vor.u32 %v4111_v6, %v2846_v10 }
  0x7f   :  { %v3400_v42 = vld [vmem:[%s6210_s2 + $0x530] sm:$0xf0]  ;;  %v4280_v43 = vld [vmem:[%s6210_s2 + $0x624] sm:$0xf]  ;;  %1814 = vmatpush.bf16.msrb.mxu0 %v3291_v33  ;;  %v3275_v48 = vor.u32 %v4216_v37, %v3272_v38  ;;  %v4143_v14 = vld [vmem:[%s6210_s2 + $0x1d4] sm:$0xf0] }
  0x80   :  { %1852 = vmatpush.bf16.msrb.mxu3 %v3691_v24  ;;  %v3528_v44 = vld [vmem:[%s6210_s2 + $0x630] sm:$0xf0]  ;;  %v4312_v45 = vld [vmem:[%s6210_s2 + $0x724] sm:$0xf]  ;;  %1827 = vmatpush.bf16.msrb.mxu1 %v3419_v36  ;;  %v3403_v49 = vor.u32 %v4248_v41, %v3400_v42  ;;  %v3102_v15 = vld [vmem:[%s6210_s2 + $0x2c8] sm:$0xf]  ;;  %v2975_v24 = vor.u32 %v4143_v14, %v2974_v13 }
  0x81   :  { %v3656_v46 = vld [vmem:[%s6210_s2 + $0x730] sm:$0xf0]  ;;  %v4212_v47 = vld [vmem:[%s6210_s2 + $0x404] sm:$0xf]  ;;  %1840 = vmatpush.bf16.msrb.mxu2 %v3547_v39  ;;  %v3531_v53 = vor.u32 %v4280_v43, %v3528_v44  ;;  %v4175_v18 = vld [vmem:[%s6210_s2 + $0x2d4] sm:$0xf0] }
  0x82   :  { %v3256_v50 = vld [vmem:[%s6210_s2 + $0x410] sm:$0xf0]  ;;  %v4244_v51 = vld [vmem:[%s6210_s2 + $0x504] sm:$0xf]  ;;  %v3659_v54 = vor.u32 %v4312_v45, %v3656_v46  ;;  %v3230_v19 = vld [vmem:[%s6210_s2 + $0x3c8] sm:$0xf]  ;;  %v3103_v27 = vor.u32 %v4175_v18, %v3102_v15 }
  0x83   :  { %v3384_v52 = vld [vmem:[%s6210_s2 + $0x510] sm:$0xf0]  ;;  %v4276_v55 = vld [vmem:[%s6210_s2 + $0x604] sm:$0xf]  ;;  %1815 = vmatpush.bf16.msrb.mxu0 %v3275_v48  ;;  %v3259_v0 = vor.u32 %v4212_v47, %v3256_v50  ;;  %v4207_v20 = vld [vmem:[%s6210_s2 + $0x3d4] sm:$0xf0] }
  0x84   :  { %1853 = vmatpush.bf16.msrb.mxu3 %v3675_v40  ;;  %v3512_v56 = vld [vmem:[%s6210_s2 + $0x610] sm:$0xf0]  ;;  %v4308_v57 = vld [vmem:[%s6210_s2 + $0x704] sm:$0xf]  ;;  %1828 = vmatpush.bf16.msrb.mxu1 %v3403_v49  ;;  %v3387_v1 = vor.u32 %v4244_v51, %v3384_v52  ;;  %v2830_v25 = vld [vmem:[%s6210_s2 + $0xa8] sm:$0xf]  ;;  %v3231_v30 = vor.u32 %v4207_v20, %v3230_v19 }
  0x85   :  { %v3640_v58 = vld [vmem:[%s6210_s2 + $0x710] sm:$0xf0]  ;;  %1841 = vmatpush.bf16.msrb.mxu2 %v3531_v53  ;;  %v3515_v5 = vor.u32 %v4276_v55, %v3512_v56  ;;  %v4107_v26 = vld [vmem:[%s6210_s2 + $0xb4] sm:$0xf0]  ;;  %v2958_v31 = vld [vmem:[%s6210_s2 + $0x1a8] sm:$0xf] }
  0x86   :  { %v3643_v7 = vor.u32 %v4308_v57, %v3640_v58  ;;  %v4139_v32 = vld [vmem:[%s6210_s2 + $0x1b4] sm:$0xf0]  ;;  %v3086_v33 = vld [vmem:[%s6210_s2 + $0x2a8] sm:$0xf]  ;;  %v2831_v39 = vor.u32 %v4107_v26, %v2830_v25 }
  0x87   :  { %1816 = vmatpush.bf16.msrb.mxu0 %v3259_v0  ;;  %v4171_v36 = vld [vmem:[%s6210_s2 + $0x2b4] sm:$0xf0]  ;;  %v3214_v37 = vld [vmem:[%s6210_s2 + $0x3a8] sm:$0xf]  ;;  %v2959_v40 = vor.u32 %v4139_v32, %v2958_v31 }
  0x88   :  { %1854 = vmatpush.bf16.msrb.mxu3 %v3659_v54  ;;  %1829 = vmatpush.bf16.msrb.mxu1 %v3387_v1  ;;  %v4203_v38 = vld [vmem:[%s6210_s2 + $0x3b4] sm:$0xf0]  ;;  %v2814_v41 = vld [vmem:[%s6210_s2 + $0x88] sm:$0xf]  ;;  %v3087_v43 = vor.u32 %v4171_v36, %v3086_v33 }
  0x89   :  { %1842 = vmatpush.bf16.msrb.mxu2 %v3515_v5  ;;  %v4103_v42 = vld [vmem:[%s6210_s2 + $0x94] sm:$0xf0]  ;;  %v3215_v44 = vor.u32 %v4203_v38, %v3214_v37  ;;  %v2942_v45 = vld [vmem:[%s6210_s2 + $0x188] sm:$0xf] }
  0x8a   :  { %1817 = vmatmul.bf16.vlgmr.msrb.gmra.mxu0 %v5012_v17  ;;  %v4135_v46 = vld [vmem:[%s6210_s2 + $0x194] sm:$0xf0]  ;;  %v3070_v47 = vld [vmem:[%s6210_s2 + $0x288] sm:$0xf]  ;;  %v2815_v51 = vor.u32 %v4103_v42, %v2814_v41 }
  0x8b   :  { %1861 = vmatpush.bf16.msra.mxu0 %v2863_v8  ;;  %1830 = vmatmul.bf16.vlgmr.msrb.gmra.mxu1 %v5025_v22  ;;  %v4167_v48 = vld [vmem:[%s6210_s2 + $0x294] sm:$0xf0]  ;;  %v3198_v49 = vld [vmem:[%s6210_s2 + $0x388] sm:$0xf]  ;;  %v2943_v52 = vor.u32 %v4135_v46, %v2942_v45 }
  0x8c   :  { %1855 = vmatpush.bf16.msrb.mxu3 %v3643_v7  ;;  %1874 = vmatpush.bf16.msra.mxu1 %v2991_v9  ;;  %v4199_v50 = vld [vmem:[%s6210_s2 + $0x394] sm:$0xf0]  ;;  %v2798_v53 = vld [vmem:[%s6210_s2 + $0x68] sm:$0xf]  ;;  %v3071_v55 = vor.u32 %v4167_v48, %v3070_v47 }
  0x8d   :  { %1887 = vmatpush.bf16.msra.mxu2 %v3119_v11  ;;  %v4099_v54 = vld [vmem:[%s6210_s2 + $0x74] sm:$0xf0]  ;;  %v3199_v56 = vor.u32 %v4199_v50, %v3198_v49  ;;  %v2926_v57 = vld [vmem:[%s6210_s2 + $0x168] sm:$0xf] }
  0x8e   :  { %1843 = vmatmul.bf16.vlgmr.msrb.gmra.mxu2 %v5010_v16  ;;  %v4131_v58 = vld [vmem:[%s6210_s2 + $0x174] sm:$0xf0]  ;;  %v3054_v59 = vld [vmem:[%s6210_s2 + $0x268] sm:$0xf]  ;;  %v2799_v63 = vor.u32 %v4099_v54, %v2798_v53 }
  0x8f   :  { %1856 = vmatmul.bf16.vlgmr.msrb.gmra.mxu3 %v5023_v21  ;;  %1862 = vmatpush.bf16.msra.mxu0 %v2847_v23  ;;  %v4163_v60 = vld [vmem:[%s6210_s2 + $0x274] sm:$0xf0]  ;;  %v3182_v61 = vld [vmem:[%s6210_s2 + $0x368] sm:$0xf]  ;;  %v2927_v0 = vor.u32 %v4131_v58, %v2926_v57 }
  0x90   :  { %1900 = vmatpush.bf16.msra.mxu3 %v3247_v12  ;;  %1875 = vmatpush.bf16.msra.mxu1 %v2975_v24  ;;  %v4195_v62 = vld [vmem:[%s6210_s2 + $0x374] sm:$0xf0]  ;;  %v2782_v1 = vld [vmem:[%s6210_s2 + $0x48] sm:$0xf]  ;;  %v3055_v3 = vor.u32 %v4163_v60, %v3054_v59 }
  0x91   :  { %1888 = vmatpush.bf16.msra.mxu2 %v3103_v27  ;;  %v4095_v2 = vld [vmem:[%s6210_s2 + $0x54] sm:$0xf0]  ;;  %v3183_v4 = vor.u32 %v4195_v62, %v3182_v61  ;;  %v2910_v5 = vld [vmem:[%s6210_s2 + $0x148] sm:$0xf] }
  0x92   :  { %v4127_v7 = vld [vmem:[%s6210_s2 + $0x154] sm:$0xf0]  ;;  %v3038_v8 = vld [vmem:[%s6210_s2 + $0x248] sm:$0xf]  ;;  %v2783_v11 = vor.u32 %v4095_v2, %v2782_v1 }
  0x93   :  { %1863 = vmatpush.bf16.msra.mxu0 %v2831_v39  ;;  %v4159_v9 = vld [vmem:[%s6210_s2 + $0x254] sm:$0xf0]  ;;  %v3166_v10 = vld [vmem:[%s6210_s2 + $0x348] sm:$0xf]  ;;  %v2911_v12 = vor.u32 %v4127_v7, %v2910_v5 }
  0x94   :  { %1901 = vmatpush.bf16.msra.mxu3 %v3231_v30  ;;  %1876 = vmatpush.bf16.msra.mxu1 %v2959_v40  ;;  %v4191_v6 = vld [vmem:[%s6210_s2 + $0x354] sm:$0xf0]  ;;  %v2766_v13 = vld [vmem:[%s6210_s2 + $0x28] sm:$0xf]  ;;  %v3039_v15 = vor.u32 %v4159_v9, %v3038_v8 }
  0x95   :  { %1889 = vmatpush.bf16.msra.mxu2 %v3087_v43  ;;  %v4091_v14 = vld [vmem:[%s6210_s2 + $0x34] sm:$0xf0]  ;;  %v3167_v18 = vor.u32 %v4191_v6, %v3166_v10  ;;  %v2894_v19 = vld [vmem:[%s6210_s2 + $0x128] sm:$0xf] }
  0x96   :  { %v4123_v20 = vld [vmem:[%s6210_s2 + $0x134] sm:$0xf0]  ;;  %v3022_v23 = vld [vmem:[%s6210_s2 + $0x228] sm:$0xf]  ;;  %v2767_v30 = vor.u32 %v4091_v14, %v2766_v13 }
  0x97   :  { %1864 = vmatpush.bf16.msra.mxu0 %v2815_v51  ;;  %v4155_v24 = vld [vmem:[%s6210_s2 + $0x234] sm:$0xf0]  ;;  %v3150_v25 = vld [vmem:[%s6210_s2 + $0x328] sm:$0xf]  ;;  %v2895_v31 = vor.u32 %v4123_v20, %v2894_v19 }
  0x98   :  { %1902 = vmatpush.bf16.msra.mxu3 %v3215_v44  ;;  %1877 = vmatpush.bf16.msra.mxu1 %v2943_v52  ;;  %v4187_v26 = vld [vmem:[%s6210_s2 + $0x334] sm:$0xf0]  ;;  %v2750_v27 = vld [vmem:[%s6210_s2 + $0x8] sm:$0xf]  ;;  %v3023_v37 = vor.u32 %v4155_v24, %v3022_v23 }
  0x99   :  { %1890 = vmatpush.bf16.msra.mxu2 %v3071_v55  ;;  %v4087_v32 = vld [vmem:[%s6210_s2 + $0x14] sm:$0xf0]  ;;  %v2878_v33 = vld [vmem:[%s6210_s2 + $0x108] sm:$0xf]  ;;  %v3151_v38 = vor.u32 %v4187_v26, %v3150_v25 }
  0x9a   :  { %v4119_v36 = vld [vmem:[%s6210_s2 + $0x114] sm:$0xf0]  ;;  %v3006_v39 = vld [vmem:[%s6210_s2 + $0x208] sm:$0xf]  ;;  %v2751_v48 = vor.u32 %v4087_v32, %v2750_v27 }
  0x9b   :  { %1865 = vmatpush.bf16.msra.mxu0 %v2799_v63  ;;  %v4151_v40 = vld [vmem:[%s6210_s2 + $0x214] sm:$0xf0]  ;;  %v3134_v41 = vld [vmem:[%s6210_s2 + $0x308] sm:$0xf]  ;;  %v2879_v49 = vor.u32 %v4119_v36, %v2878_v33 }
  0x9c   :  { %1903 = vmatpush.bf16.msra.mxu3 %v3199_v56  ;;  %1878 = vmatpush.bf16.msra.mxu1 %v2927_v0  ;;  %v4183_v42 = vld [vmem:[%s6210_s2 + $0x314] sm:$0xf0]  ;;  %v3374_v43 = vld [vmem:[%s6210_s2 + $0x4e8] sm:$0xf]  ;;  %v3007_v53 = vor.u32 %v4151_v40, %v3006_v39 }
  0x9d   :  { %1891 = vmatpush.bf16.msra.mxu2 %v3055_v3  ;;  %v4243_v44 = vld [vmem:[%s6210_s2 + $0x4f4] sm:$0xf0]  ;;  %v3502_v45 = vld [vmem:[%s6210_s2 + $0x5e8] sm:$0xf]  ;;  %v3135_v54 = vor.u32 %v4183_v42, %v3134_v41 }
  0x9e   :  { %v4275_v46 = vld [vmem:[%s6210_s2 + $0x5f4] sm:$0xf0]  ;;  %v3630_v47 = vld [vmem:[%s6210_s2 + $0x6e8] sm:$0xf]  ;;  %v3375_v55 = vor.u32 %v4243_v44, %v3374_v43 }
  0x9f   :  { %1866 = vmatpush.bf16.msra.mxu0 %v2783_v11  ;;  %v4307_v50 = vld [vmem:[%s6210_s2 + $0x6f4] sm:$0xf0]  ;;  %v3758_v51 = vld [vmem:[%s6210_s2 + $0x7e8] sm:$0xf]  ;;  %v3503_v56 = vor.u32 %v4275_v46, %v3502_v45 }
  0xa0   :  { %1904 = vmatpush.bf16.msra.mxu3 %v3183_v4  ;;  %1879 = vmatpush.bf16.msra.mxu1 %v2911_v12  ;;  %v4339_v52 = vld [vmem:[%s6210_s2 + $0x7f4] sm:$0xf0]  ;;  %v3358_v57 = vld [vmem:[%s6210_s2 + $0x4c8] sm:$0xf]  ;;  %v3631_v59 = vor.u32 %v4307_v50, %v3630_v47 }
  0xa1   :  { %1892 = vmatpush.bf16.msra.mxu2 %v3039_v15  ;;  %v4239_v58 = vld [vmem:[%s6210_s2 + $0x4d4] sm:$0xf0]  ;;  %v3759_v60 = vor.u32 %v4339_v52, %v3758_v51  ;;  %v3486_v61 = vld [vmem:[%s6210_s2 + $0x5c8] sm:$0xf] }
  0xa2   :  { %v4271_v62 = vld [vmem:[%s6210_s2 + $0x5d4] sm:$0xf0]  ;;  %v3614_v63 = vld [vmem:[%s6210_s2 + $0x6c8] sm:$0xf]  ;;  %v3359_v3 = vor.u32 %v4239_v58, %v3358_v57 }
  0xa3   :  { %1867 = vmatpush.bf16.msra.mxu0 %v2767_v30  ;;  %v4303_v0 = vld [vmem:[%s6210_s2 + $0x6d4] sm:$0xf0]  ;;  %v3742_v1 = vld [vmem:[%s6210_s2 + $0x7c8] sm:$0xf]  ;;  %v3487_v4 = vor.u32 %v4271_v62, %v3486_v61 }
  0xa4   :  { %1905 = vmatpush.bf16.msra.mxu3 %v3167_v18  ;;  %1880 = vmatpush.bf16.msra.mxu1 %v2895_v31  ;;  %v4335_v2 = vld [vmem:[%s6210_s2 + $0x7d4] sm:$0xf0]  ;;  %v3342_v5 = vld [vmem:[%s6210_s2 + $0x4a8] sm:$0xf]  ;;  %v3615_v8 = vor.u32 %v4303_v0, %v3614_v63 }
  0xa5   :  { %1893 = vmatpush.bf16.msra.mxu2 %v3023_v37  ;;  %v4235_v7 = vld [vmem:[%s6210_s2 + $0x4b4] sm:$0xf0]  ;;  %v3743_v9 = vor.u32 %v4335_v2, %v3742_v1  ;;  %v3470_v10 = vld [vmem:[%s6210_s2 + $0x5a8] sm:$0xf] }
  0xa6   :  { %v4267_v6 = vld [vmem:[%s6210_s2 + $0x5b4] sm:$0xf0]  ;;  %v3598_v11 = vld [vmem:[%s6210_s2 + $0x6a8] sm:$0xf]  ;;  %v3343_v15 = vor.u32 %v4235_v7, %v3342_v5 }
  0xa7   :  { %1868 = vmatpush.bf16.msra.mxu0 %v2751_v48  ;;  %v4299_v12 = vld [vmem:[%s6210_s2 + $0x6b4] sm:$0xf0]  ;;  %v3726_v13 = vld [vmem:[%s6210_s2 + $0x7a8] sm:$0xf]  ;;  %v3471_v18 = vor.u32 %v4267_v6, %v3470_v10 }
  0xa8   :  { %1906 = vmatpush.bf16.msra.mxu3 %v3151_v38  ;;  %1881 = vmatpush.bf16.msra.mxu1 %v2879_v49  ;;  %v4331_v14 = vld [vmem:[%s6210_s2 + $0x7b4] sm:$0xf0]  ;;  %v3326_v19 = vld [vmem:[%s6210_s2 + $0x488] sm:$0xf]  ;;  %v3599_v23 = vor.u32 %v4299_v12, %v3598_v11 }
  0xa9   :  { %1894 = vmatpush.bf16.msra.mxu2 %v3007_v53  ;;  %v4231_v20 = vld [vmem:[%s6210_s2 + $0x494] sm:$0xf0]  ;;  %v3727_v24 = vor.u32 %v4331_v14, %v3726_v13  ;;  %v3454_v25 = vld [vmem:[%s6210_s2 + $0x588] sm:$0xf] }
  0xaa   :  { %1869 = vmatmul.bf16.vlgmr.msra.gmra.mxu0 %v4925_v29  ;;  %v4263_v26 = vld [vmem:[%s6210_s2 + $0x594] sm:$0xf0]  ;;  %v3582_v27 = vld [vmem:[%s6210_s2 + $0x688] sm:$0xf]  ;;  %v3327_v33 = vor.u32 %v4231_v20, %v3326_v19 }
  0xab   :  { %1913 = vmatpush.bf16.msrb.mxu0 %v3375_v55  ;;  %1882 = vmatmul.bf16.vlgmr.msra.gmra.mxu1 %v4929_v35  ;;  %v4295_v30 = vld [vmem:[%s6210_s2 + $0x694] sm:$0xf0]  ;;  %v3710_v31 = vld [vmem:[%s6210_s2 + $0x788] sm:$0xf]  ;;  %v3455_v36 = vor.u32 %v4263_v26, %v3454_v25  ;;  %v4145_v25 = vld [vmem:[%s6210_s2 + $0x1ec] sm:$0xf] }
  0xac   :  { %1907 = vmatpush.bf16.msra.mxu3 %v3135_v54  ;;  %1926 = vmatpush.bf16.msrb.mxu1 %v3503_v56  ;;  %v4327_v32 = vld [vmem:[%s6210_s2 + $0x794] sm:$0xf0]  ;;  %v3310_v37 = vld [vmem:[%s6210_s2 + $0x468] sm:$0xf]  ;;  %v3583_v39 = vor.u32 %v4295_v30, %v3582_v27  ;;  %v2992_v26 = vld [vmem:[%s6210_s2 + $0x1f8] sm:$0xf0] }
  0xad   :  { %1939 = vmatpush.bf16.msrb.mxu2 %v3631_v59  ;;  %v4227_v38 = vld [vmem:[%s6210_s2 + $0x474] sm:$0xf0]  ;;  %v3711_v40 = vor.u32 %v4327_v32, %v3710_v31  ;;  %v3438_v41 = vld [vmem:[%s6210_s2 + $0x568] sm:$0xf]  ;;  %v4177_v27 = vld [vmem:[%s6210_s2 + $0x2ec] sm:$0xf] }
  0xae   :  { %1895 = vmatmul.bf16.vlgmr.msra.gmra.mxu2 %v4923_v28  ;;  %v4259_v42 = vld [vmem:[%s6210_s2 + $0x574] sm:$0xf0]  ;;  %v3566_v43 = vld [vmem:[%s6210_s2 + $0x668] sm:$0xf]  ;;  %v3311_v47 = vor.u32 %v4227_v38, %v3310_v37  ;;  %v5733_v30 = vld [vmem:[%s6211_s3] sm:$0xf] }
  0xaf   :  { %1908 = vmatmul.bf16.vlgmr.msra.gmra.mxu3 %v4927_v34  ;;  %1914 = vmatpush.bf16.msrb.mxu0 %v3359_v3  ;;  %v4291_v44 = vld [vmem:[%s6210_s2 + $0x674] sm:$0xf0]  ;;  %v3694_v45 = vld [vmem:[%s6210_s2 + $0x768] sm:$0xf]  ;;  %v3439_v48 = vor.u32 %v4259_v42, %v3438_v41  ;;  %v3248_v37 = vld [vmem:[%s6210_s2 + $0x3f8] sm:$0xf0]  ;;  %v2995_v41 = vor.u32 %v4145_v25, %v2992_v26 }
  0xb0   :  { %1952 = vmatpush.bf16.msrb.mxu3 %v3759_v60  ;;  %1927 = vmatpush.bf16.msrb.mxu1 %v3487_v4  ;;  %v4323_v46 = vld [vmem:[%s6210_s2 + $0x774] sm:$0xf0]  ;;  %v3294_v49 = vld [vmem:[%s6210_s2 + $0x448] sm:$0xf]  ;;  %v3567_v51 = vor.u32 %v4291_v44, %v3566_v43  ;;  %v365_v42 = vperm.slane %v5733_v30, 0 }
  0xb1   :  { %1940 = vmatpush.bf16.msrb.mxu2 %v3615_v8  ;;  %v4223_v50 = vld [vmem:[%s6210_s2 + $0x454] sm:$0xf0]  ;;  %v3695_v52 = vor.u32 %v4323_v46, %v3694_v45  ;;  %v3422_v53 = vld [vmem:[%s6210_s2 + $0x548] sm:$0xf]  ;;  %v4109_v43 = vld [vmem:[%s6210_s2 + $0xcc] sm:$0xf] }
  0xb2   :  { %v4255_v54 = vld [vmem:[%s6210_s2 + $0x554] sm:$0xf0]  ;;  %v3550_v55 = vld [vmem:[%s6210_s2 + $0x648] sm:$0xf]  ;;  %v3295_v59 = vor.u32 %v4223_v50, %v3294_v49  ;;  %v2848_v44 = vld [vmem:[%s6210_s2 + $0xd8] sm:$0xf0] }
  0xb3   :  { %1915 = vmatpush.bf16.msrb.mxu0 %v3343_v15  ;;  %v4287_v56 = vld [vmem:[%s6210_s2 + $0x654] sm:$0xf0]  ;;  %v3678_v57 = vld [vmem:[%s6210_s2 + $0x748] sm:$0xf]  ;;  %v3423_v60 = vor.u32 %v4255_v54, %v3422_v53  ;;  %v4173_v49 = vld [vmem:[%s6210_s2 + $0x2cc] sm:$0xf] }
  0xb4   :  { %1953 = vmatpush.bf16.msrb.mxu3 %v3743_v9  ;;  %1928 = vmatpush.bf16.msrb.mxu1 %v3471_v18  ;;  %v4319_v58 = vld [vmem:[%s6210_s2 + $0x754] sm:$0xf0]  ;;  %v3278_v61 = vld [vmem:[%s6210_s2 + $0x428] sm:$0xf]  ;;  %v3551_v63 = vor.u32 %v4287_v56, %v3550_v55  ;;  %v3104_v50 = vld [vmem:[%s6210_s2 + $0x2d8] sm:$0xf0]  ;;  %v2851_v55 = vor.u32 %v4109_v43, %v2848_v44 }
  0xb5   :  { %1941 = vmatpush.bf16.msrb.mxu2 %v3599_v23  ;;  %v4219_v62 = vld [vmem:[%s6210_s2 + $0x434] sm:$0xf0]  ;;  %v3679_v0 = vor.u32 %v4319_v58, %v3678_v57  ;;  %v3406_v1 = vld [vmem:[%s6210_s2 + $0x528] sm:$0xf]  ;;  %v4113_v23 = vld [vmem:[%s6210_s2 + $0xec] sm:$0xf] }
  0xb6   :  { %v4251_v2 = vld [vmem:[%s6210_s2 + $0x534] sm:$0xf0]  ;;  %v3534_v3 = vld [vmem:[%s6210_s2 + $0x628] sm:$0xf]  ;;  %v3279_v10 = vor.u32 %v4219_v62, %v3278_v61  ;;  %v4105_v58 = vld [vmem:[%s6210_s2 + $0xac] sm:$0xf] }
  0xb7   :  { %1916 = vmatpush.bf16.msrb.mxu0 %v3327_v33  ;;  %v4283_v4 = vld [vmem:[%s6210_s2 + $0x634] sm:$0xf0]  ;;  %v3662_v5 = vld [vmem:[%s6210_s2 + $0x728] sm:$0xf]  ;;  %v3407_v6 = vor.u32 %v4251_v2, %v3406_v1  ;;  %v3120_v33 = vld [vmem:[%s6210_s2 + $0x2f8] sm:$0xf0] }
  0xb8   :  { %1954 = vmatpush.bf16.msrb.mxu3 %v3727_v24  ;;  %1929 = vmatpush.bf16.msrb.mxu1 %v3455_v36  ;;  %v4315_v7 = vld [vmem:[%s6210_s2 + $0x734] sm:$0xf0]  ;;  %v3262_v8 = vld [vmem:[%s6210_s2 + $0x408] sm:$0xf]  ;;  %v3535_v14 = vor.u32 %v4283_v4, %v3534_v3  ;;  %v2864_v24 = vld [vmem:[%s6210_s2 + $0xf8] sm:$0xf0]  ;;  %v3123_v45 = vor.u32 %v4177_v27, %v3120_v33 }
  0xb9   :  { %1942 = vmatpush.bf16.msrb.mxu2 %v3583_v39  ;;  %v4215_v9 = vld [vmem:[%s6210_s2 + $0x414] sm:$0xf0]  ;;  %v3390_v11 = vld [vmem:[%s6210_s2 + $0x508] sm:$0xf]  ;;  %v3663_v15 = vor.u32 %v4315_v7, %v3662_v5  ;;  %v4209_v36 = vld [vmem:[%s6210_s2 + $0x3ec] sm:$0xf] }
  0xba   :  { %v4247_v12 = vld [vmem:[%s6210_s2 + $0x514] sm:$0xf0]  ;;  %v3518_v13 = vld [vmem:[%s6210_s2 + $0x608] sm:$0xf]  ;;  %v3263_v31 = vor.u32 %v4215_v9, %v3262_v8  ;;  %v3251_v46 = vor.u32 %v4209_v36, %v3248_v37  ;;  %v4137_v62 = vld [vmem:[%s6210_s2 + $0x1ac] sm:$0xf] }
  0xbb   :  { %1917 = vmatpush.bf16.msrb.mxu0 %v3311_v47  ;;  %v4279_v18 = vld [vmem:[%s6210_s2 + $0x614] sm:$0xf0]  ;;  %v3646_v19 = vld [vmem:[%s6210_s2 + $0x708] sm:$0xf]  ;;  %v3391_v32 = vor.u32 %v4247_v12, %v3390_v11  ;;  %v4141_v47 = vld [vmem:[%s6210_s2 + $0x1cc] sm:$0xf] }
  0xbc   :  { %1955 = vmatpush.bf16.msrb.mxu3 %v3711_v40  ;;  %1930 = vmatpush.bf16.msrb.mxu1 %v3439_v48  ;;  %v4311_v20 = vld [vmem:[%s6210_s2 + $0x714] sm:$0xf0]  ;;  %v3519_v38 = vor.u32 %v4279_v18, %v3518_v13  ;;  %v2867_v40 = vor.u32 %v4113_v23, %v2864_v24  ;;  %v2976_v48 = vld [vmem:[%s6210_s2 + $0x1d8] sm:$0xf0]  ;;  %v4201_v3 = vld [vmem:[%s6210_s2 + $0x3ac] sm:$0xf] }
  0xbd   :  { %1943 = vmatpush.bf16.msrb.mxu2 %v3567_v51  ;;  %v3647_v39 = vor.u32 %v4311_v20, %v3646_v19  ;;  %v4205_v51 = vld [vmem:[%s6210_s2 + $0x3cc] sm:$0xf]  ;;  %v2979_v56 = vor.u32 %v4141_v47, %v2976_v48  ;;  %v3088_v2 = vld [vmem:[%s6210_s2 + $0x2b8] sm:$0xf0] }
  0xbe   :  { %v3216_v4 = vld [vmem:[%s6210_s2 + $0x3b8] sm:$0xf0]  ;;  %v4101_v8 = vld [vmem:[%s6210_s2 + $0x8c] sm:$0xf] }
  0xbf   :  { %1918 = vmatpush.bf16.msrb.mxu0 %v3295_v59  ;;  %v2832_v59 = vld [vmem:[%s6210_s2 + $0xb8] sm:$0xf0]  ;;  %v3219_v11 = vor.u32 %v4201_v3, %v3216_v4  ;;  %v4133_v12 = vld [vmem:[%s6210_s2 + $0x18c] sm:$0xf] }
  0xc0   :  { %1956 = vmatpush.bf16.msrb.mxu3 %v3695_v52  ;;  %1931 = vmatpush.bf16.msrb.mxu1 %v3423_v60  ;;  %v3232_v52 = vld [vmem:[%s6210_s2 + $0x3d8] sm:$0xf0]  ;;  %v3107_v60 = vor.u32 %v4173_v49, %v3104_v50  ;;  %v2835_v5 = vor.u32 %v4105_v58, %v2832_v59  ;;  %v4197_v20 = vld [vmem:[%s6210_s2 + $0x38c] sm:$0xf] }
  0xc1   :  { %1944 = vmatpush.bf16.msrb.mxu2 %v3551_v63  ;;  %v3235_v61 = vor.u32 %v4205_v51, %v3232_v52  ;;  %v2960_v63 = vld [vmem:[%s6210_s2 + $0x1b8] sm:$0xf0]  ;;  %v4125_v51 = vld [vmem:[%s6210_s2 + $0x14c] sm:$0xf] }
  0xc2   :  { %v2963_v7 = vor.u32 %v4137_v62, %v2960_v63  ;;  %v2816_v9 = vld [vmem:[%s6210_s2 + $0x98] sm:$0xf0]  ;;  %v4089_v63 = vld [vmem:[%s6210_s2 + $0x2c] sm:$0xf] }
  0xc3   :  { %1919 = vmatpush.bf16.msrb.mxu0 %v3279_v10  ;;  %v2944_v13 = vld [vmem:[%s6210_s2 + $0x198] sm:$0xf0]  ;;  %v2819_v26 = vor.u32 %v4101_v8, %v2816_v9  ;;  %v4121_v3 = vld [vmem:[%s6210_s2 + $0x12c] sm:$0xf] }
  0xc4   :  { %1957 = vmatpush.bf16.msrb.mxu3 %v3679_v0  ;;  %1932 = vmatpush.bf16.msrb.mxu1 %v3407_v6  ;;  %v4169_v0 = vld [vmem:[%s6210_s2 + $0x2ac] sm:$0xf]  ;;  %v3072_v19 = vld [vmem:[%s6210_s2 + $0x298] sm:$0xf0]  ;;  %v2947_v27 = vor.u32 %v4133_v12, %v2944_v13 }
  0xc5   :  { %1945 = vmatpush.bf16.msrb.mxu2 %v3535_v14  ;;  %v3091_v6 = vor.u32 %v4169_v0, %v3088_v2  ;;  %v4165_v14 = vld [vmem:[%s6210_s2 + $0x28c] sm:$0xf]  ;;  %v3200_v23 = vld [vmem:[%s6210_s2 + $0x398] sm:$0xf0] }
  0xc6   :  { %v1662_v53 = vpop.f32.mrf.mxu0  ;;  %v2800_v33 = vld [vmem:[%s6210_s2 + $0x78] sm:$0xf0]  ;;  %v3075_v36 = vor.u32 %v4165_v14, %v3072_v19  ;;  %v3203_v37 = vor.u32 %v4197_v20, %v3200_v23  ;;  %v4185_v9 = vld [vmem:[%s6210_s2 + $0x32c] sm:$0xf] }
  0xc7   :  { %1920 = vmatpush.bf16.msrb.mxu0 %v3263_v31  ;;  %v1663_v54 = vadd.f32 %v1662_v53, %v365_v42  ;;  %v1675_v57 = vpop.f32.mrf.mxu1  ;;  %v4193_v42 = vld [vmem:[%s6210_s2 + $0x36c] sm:$0xf]  ;;  %v3184_v43 = vld [vmem:[%s6210_s2 + $0x378] sm:$0xf0] }
  0xc8   :  { %1958 = vmatpush.bf16.msrb.mxu3 %v3663_v15  ;;  %1933 = vmatpush.bf16.msrb.mxu1 %v3391_v32  ;;  %v4097_v32 = vld [vmem:[%s6210_s2 + $0x6c] sm:$0xf]  ;;  %v2784_v47 = vld [vmem:[%s6210_s2 + $0x58] sm:$0xf0]  ;;  %v3187_v50 = vor.u32 %v4193_v42, %v3184_v43 }
  0xc9   :  { %1946 = vmatpush.bf16.msrb.mxu2 %v3519_v38  ;;  %v1676_v1 = vadd.f32 %v1675_v57, %v1663_v54  ;;  %v4129_v38 = vld [vmem:[%s6210_s2 + $0x16c] sm:$0xf]  ;;  %v2803_v44 = vor.u32 %v4097_v32, %v2800_v33  ;;  %v2912_v52 = vld [vmem:[%s6210_s2 + $0x158] sm:$0xf0] }
  0xca   :  { %1921 = vmatmul.bf16.vlgmr.msrb.gmra.mxu0 %v5012_v17  ;;  %v4157_v53 = vld [vmem:[%s6210_s2 + $0x24c] sm:$0xf]  ;;  %v3168_v57 = vld [vmem:[%s6210_s2 + $0x358] sm:$0xf0] }
  0xcb   :  { %1965 = vmatpush.bf16.msra.mxu0 %v2867_v40  ;;  %1934 = vmatmul.bf16.vlgmr.msrb.gmra.mxu1 %v5025_v22  ;;  %v4161_v40 = vld [vmem:[%s6210_s2 + $0x26c] sm:$0xf]  ;;  %v2768_v0 = vld [vmem:[%s6210_s2 + $0x38] sm:$0xf0] }
  0xcc   :  { %1959 = vmatpush.bf16.msrb.mxu3 %v3647_v39  ;;  %1978 = vmatpush.bf16.msra.mxu1 %v2995_v41  ;;  %v1688_v10 = vpop.f32.mrf.mxu2  ;;  %v2928_v39 = vld [vmem:[%s6210_s2 + $0x178] sm:$0xf0]  ;;  %v4117_v14 = vld [vmem:[%s6210_s2 + $0x10c] sm:$0xf] }
  0xcd   :  { %1991 = vmatpush.bf16.msra.mxu2 %v3123_v45  ;;  %v1689_v15 = vadd.f32 %v1688_v10, %v1676_v1  ;;  %v1701_v18 = vpop.f32.mrf.mxu3  ;;  %v3056_v41 = vld [vmem:[%s6210_s2 + $0x278] sm:$0xf0]  ;;  %v2931_v45 = vor.u32 %v4129_v38, %v2928_v39  ;;  %v4149_v23 = vld [vmem:[%s6210_s2 + $0x20c] sm:$0xf] }
  0xce   :  { %1947 = vmatmul.bf16.vlgmr.msrb.gmra.mxu2 %v5010_v16  ;;  %v1664_v24 = vpop.f32.mrf.mxu0  ;;  %v3059_v49 = vor.u32 %v4161_v40, %v3056_v41  ;;  %v2896_v4 = vld [vmem:[%s6210_s2 + $0x138] sm:$0xf0]  ;;  %v4273_v33 = vld [vmem:[%s6210_s2 + $0x5ec] sm:$0xf] }
  0xcf   :  { %1960 = vmatmul.bf16.vlgmr.msrb.gmra.mxu3 %v5023_v21  ;;  %1966 = vmatpush.bf16.msra.mxu0 %v2851_v55  ;;  %v1702_v25 = vadd.f32 %v1701_v18, %v1689_v15  ;;  %v1677_v31 = vpop.f32.mrf.mxu1  ;;  %v3040_v55 = vld [vmem:[%s6210_s2 + $0x258] sm:$0xf0]  ;;  %v2899_v12 = vor.u32 %v4121_v3, %v2896_v4  ;;  %v4337_v42 = vld [vmem:[%s6210_s2 + $0x7ec] sm:$0xf] }
  0xd0   :  { %2004 = vmatpush.bf16.msra.mxu3 %v3251_v46  ;;  %1979 = vmatpush.bf16.msra.mxu1 %v2979_v56  ;;  %v4093_v46 = vld [vmem:[%s6210_s2 + $0x4c] sm:$0xf]  ;;  %v3043_v1 = vor.u32 %v4157_v53, %v3040_v55  ;;  %v3024_v8 = vld [vmem:[%s6210_s2 + $0x238] sm:$0xf0] }
  0xd1   :  { %1992 = vmatpush.bf16.msra.mxu2 %v3107_v60  ;;  %v4189_v56 = vld [vmem:[%s6210_s2 + $0x34c] sm:$0xf]  ;;  %v2787_v60 = vor.u32 %v4093_v46, %v2784_v47  ;;  %v3152_v10 = vld [vmem:[%s6210_s2 + $0x338] sm:$0xf0] }
  0xd2   :  { %v3171_v2 = vor.u32 %v4189_v56, %v3168_v57  ;;  %v2752_v13 = vld [vmem:[%s6210_s2 + $0x18] sm:$0xf0]  ;;  %v3155_v20 = vor.u32 %v4185_v9, %v3152_v10  ;;  %v4241_v31 = vld [vmem:[%s6210_s2 + $0x4ec] sm:$0xf] }
  0xd3   :  { %1967 = vmatpush.bf16.msra.mxu0 %v2835_v5  ;;  %v4153_v5 = vld [vmem:[%s6210_s2 + $0x22c] sm:$0xf]  ;;  %v2880_v15 = vld [vmem:[%s6210_s2 + $0x118] sm:$0xf0] }
  0xd4   :  { %2005 = vmatpush.bf16.msra.mxu3 %v3235_v61  ;;  %1980 = vmatpush.bf16.msra.mxu1 %v2963_v7  ;;  %v1690_v48 = vpop.f32.mrf.mxu2  ;;  %v2915_v61 = vor.u32 %v4125_v51, %v2912_v52  ;;  %v3027_v19 = vor.u32 %v4153_v5, %v3024_v8  ;;  %v3008_v24 = vld [vmem:[%s6210_s2 + $0x218] sm:$0xf0]  ;;  %v2883_v40 = vor.u32 %v4117_v14, %v2880_v15  ;;  %v4269_v53 = vld [vmem:[%s6210_s2 + $0x5cc] sm:$0xf] }
  0xd5   :  { %1993 = vmatpush.bf16.msra.mxu2 %v3091_v6  ;;  %v1703_v54 = vpop.f32.mrf.mxu3  ;;  %v4085_v6 = vld [vmem:[%s6210_s2 + $0xc] sm:$0xf]  ;;  %v3376_v32 = vld [vmem:[%s6210_s2 + $0x4f8] sm:$0xf0] }
  0xd6   :  { %v1714_v58 = vpop.f32.mrf.mxu0  ;;  %v2755_v39 = vor.u32 %v4085_v6, %v2752_v13  ;;  %v3632_v41 = vld [vmem:[%s6210_s2 + $0x6f8] sm:$0xf0]  ;;  %v3379_v47 = vor.u32 %v4241_v31, %v3376_v32  ;;  %v4301_v55 = vld [vmem:[%s6210_s2 + $0x6cc] sm:$0xf] }
  0xd7   :  { %1968 = vmatpush.bf16.msra.mxu0 %v2819_v26  ;;  %v1715_v59 = vadd.f32 %v1714_v58, %v1702_v25  ;;  %v1727_v62 = vpop.f32.mrf.mxu1  ;;  %v4181_v25 = vld [vmem:[%s6210_s2 + $0x30c] sm:$0xf]  ;;  %v3760_v43 = vld [vmem:[%s6210_s2 + $0x7f8] sm:$0xf0] }
  0xd8   :  { %2006 = vmatpush.bf16.msra.mxu3 %v3219_v11  ;;  %1981 = vmatpush.bf16.msra.mxu1 %v2947_v27  ;;  %v2771_v11 = vor.u32 %v4089_v63, %v2768_v0  ;;  %v3136_v27 = vld [vmem:[%s6210_s2 + $0x318] sm:$0xf0]  ;;  %v3763_v52 = vor.u32 %v4337_v42, %v3760_v43  ;;  %v4333_v57 = vld [vmem:[%s6210_s2 + $0x7cc] sm:$0xf] }
  0xd9   :  { %1994 = vmatpush.bf16.msra.mxu2 %v3075_v36  ;;  %v5884_v7 = vadd.f32 %v1727_v62, %v1715_v59  ;;  %v3504_v36 = vld [vmem:[%s6210_s2 + $0x5f8] sm:$0xf0]  ;;  %v3139_v46 = vor.u32 %v4181_v25, %v3136_v27  ;;  %v4233_v62 = vld [vmem:[%s6210_s2 + $0x4ac] sm:$0xf] }
  0xda   :  { %v3507_v48 = vor.u32 %v4273_v33, %v3504_v36  ;;  %v3488_v54 = vld [vmem:[%s6210_s2 + $0x5d8] sm:$0xf0]  ;;  %v4265_v3 = vld [vmem:[%s6210_s2 + $0x5ac] sm:$0xf] }
  0xdb   :  { %1969 = vmatpush.bf16.msra.mxu0 %v2803_v44  ;;  %v3616_v56 = vld [vmem:[%s6210_s2 + $0x6d8] sm:$0xf0]  ;;  %v4297_v5 = vld [vmem:[%s6210_s2 + $0x6ac] sm:$0xf] }
  0xdc   :  { %2007 = vmatpush.bf16.msra.mxu3 %v3203_v37  ;;  %1982 = vmatpush.bf16.msra.mxu1 %v2931_v45  ;;  %v5907_v18 = vpop.f32.mrf.mxu2  ;;  %v4305_v37 = vld [vmem:[%s6210_s2 + $0x6ec] sm:$0xf]  ;;  %v3011_v45 = vor.u32 %v4149_v23, %v3008_v24  ;;  %v3744_v58 = vld [vmem:[%s6210_s2 + $0x7d8] sm:$0xf0] }
  0xdd   :  { %1995 = vmatpush.bf16.msra.mxu2 %v3059_v49  ;;  %v5918_v26 = vpop.f32.mrf.mxu3  ;;  %v4237_v49 = vld [vmem:[%s6210_s2 + $0x4cc] sm:$0xf]  ;;  %v3635_v51 = vor.u32 %v4305_v37, %v3632_v41  ;;  %v3344_v63 = vld [vmem:[%s6210_s2 + $0x4b8] sm:$0xf0] }
  0xde   :  { %v1716_v38 = vpop.f32.mrf.mxu0  ;;  %v3472_v4 = vld [vmem:[%s6210_s2 + $0x5b8] sm:$0xf0]  ;;  %v4329_v9 = vld [vmem:[%s6210_s2 + $0x7ac] sm:$0xf] }
  0xdf   :  { %1970 = vmatpush.bf16.msra.mxu0 %v2787_v60  ;;  %v1729_v44 = vpop.f32.mrf.mxu1  ;;  %v3600_v8 = vld [vmem:[%s6210_s2 + $0x6b8] sm:$0xf0]  ;;  %v3475_v6 = vor.u32 %v4265_v3, %v3472_v4  ;;  %v4293_v14 = vld [vmem:[%s6210_s2 + $0x68c] sm:$0xf] }
  0xe0   :  { %2008 = vmatpush.bf16.msra.mxu3 %v3187_v50  ;;  %1983 = vmatpush.bf16.msra.mxu1 %v2915_v61  ;;  %v3360_v50 = vld [vmem:[%s6210_s2 + $0x4d8] sm:$0xf0]  ;;  %v3491_v61 = vor.u32 %v4269_v53, %v3488_v54  ;;  %v3603_v13 = vor.u32 %v4297_v5, %v3600_v8  ;;  %v4225_v27 = vld [vmem:[%s6210_s2 + $0x46c] sm:$0xf] }
  0xe1   :  { %1996 = vmatpush.bf16.msra.mxu2 %v3043_v1  ;;  %v3363_v60 = vor.u32 %v4237_v49, %v3360_v50  ;;  %v3619_v1 = vor.u32 %v4301_v55, %v3616_v56  ;;  %v3728_v10 = vld [vmem:[%s6210_s2 + $0x7b8] sm:$0xf0]  ;;  %v4257_v37 = vld [vmem:[%s6210_s2 + $0x56c] sm:$0xf] }
  0xe2   :  { %v3584_v15 = vld [vmem:[%s6210_s2 + $0x698] sm:$0xf0]  ;;  %v4321_v41 = vld [vmem:[%s6210_s2 + $0x76c] sm:$0xf] }
  0xe3   :  { %1971 = vmatpush.bf16.msra.mxu0 %v2771_v11  ;;  %v4229_v11 = vld [vmem:[%s6210_s2 + $0x48c] sm:$0xf]  ;;  %v3312_v31 = vld [vmem:[%s6210_s2 + $0x478] sm:$0xf0]  ;;  %v3587_v33 = vor.u32 %v4293_v14, %v3584_v15 }
  0xe4   :  { %2009 = vmatpush.bf16.msra.mxu3 %v3171_v2  ;;  %1984 = vmatpush.bf16.msra.mxu1 %v2899_v12  ;;  %v1742_v59 = vpop.f32.mrf.mxu2  ;;  %v3747_v2 = vor.u32 %v4333_v57, %v3744_v58  ;;  %v3328_v12 = vld [vmem:[%s6210_s2 + $0x498] sm:$0xf0]  ;;  %v3315_v43 = vor.u32 %v4225_v27, %v3312_v31  ;;  %v4253_v49 = vld [vmem:[%s6210_s2 + $0x54c] sm:$0xf]  ;;  %v4355_v31 = vld [vmem:[#allocation2 + $0x74] sm:$0xf0] }
  0xe5   :  { %1997 = vmatpush.bf16.msra.mxu2 %v3027_v19  ;;  %v1755_v0 = vpop.f32.mrf.mxu3  ;;  %v4325_v19 = vld [vmem:[%s6210_s2 + $0x78c] sm:$0xf]  ;;  %v3331_v24 = vor.u32 %v4229_v11, %v3328_v12  ;;  %v3440_v38 = vld [vmem:[%s6210_s2 + $0x578] sm:$0xf0] }
  0xe6   :  { %v3696_v42 = vld [vmem:[%s6210_s2 + $0x778] sm:$0xf0]  ;;  %v3443_v44 = vor.u32 %v4257_v37, %v3440_v38  ;;  %v4317_v54 = vld [vmem:[%s6210_s2 + $0x74c] sm:$0xf] }
  0xe7   :  { %1972 = vmatpush.bf16.msra.mxu0 %v2755_v39  ;;  %v6023_v23 = vpop.f32.mrf.mxu0  ;;  %v6031_v32 = vpop.f32.mrf.mxu1  ;;  %v4289_v39 = vld [vmem:[%s6210_s2 + $0x66c] sm:$0xf]  ;;  %v3424_v50 = vld [vmem:[%s6210_s2 + $0x558] sm:$0xf0] }
  0xe8   :  { %2010 = vmatpush.bf16.msra.mxu3 %v3155_v20  ;;  %1985 = vmatpush.bf16.msra.mxu1 %v2883_v40  ;;  %v3712_v20 = vld [vmem:[%s6210_s2 + $0x798] sm:$0xf0]  ;;  %v3427_v59 = vor.u32 %v4253_v49, %v3424_v50  ;;  %v4281_v3 = vld [vmem:[%s6210_s2 + $0x62c] sm:$0xf]  ;;  %v3806_v50 = vld [vmem:[#allocation2 + $0x50] sm:$0xf] }
  0xe9   :  { %1998 = vmatpush.bf16.msra.mxu2 %v3011_v45  ;;  %v3715_v36 = vor.u32 %v4325_v19, %v3712_v20  ;;  %v3568_v40 = vld [vmem:[%s6210_s2 + $0x678] sm:$0xf0]  ;;  %v4221_v45 = vld [vmem:[%s6210_s2 + $0x44c] sm:$0xf] }
  0xea   :  { %1973 = vmatmul.bf16.vlgmr.msra.gmra.mxu0 %v4925_v29  ;;  %v3731_v29 = vor.u32 %v4329_v9, %v3728_v10  ;;  %v3552_v53 = vld [vmem:[%s6210_s2 + $0x658] sm:$0xf0]  ;;  %v4313_v5 = vld [vmem:[%s6210_s2 + $0x72c] sm:$0xf]  ;;  %v366_v9 = vperm.slane %v5733_v30, 1 }
  0xeb   :  { %2017 = vmatpush.bf16.msrb.mxu0 %v3379_v47  ;;  %1986 = vmatmul.bf16.vlgmr.msra.gmra.mxu1 %v4929_v35  ;;  %v3456_v35 = vld [vmem:[%s6210_s2 + $0x598] sm:$0xf0]  ;;  %v3571_v47 = vor.u32 %v4289_v39, %v3568_v40  ;;  %v4245_v12 = vld [vmem:[%s6210_s2 + $0x50c] sm:$0xf] }
  0xec   :  { %2011 = vmatpush.bf16.msra.mxu3 %v3139_v46  ;;  %2030 = vmatpush.bf16.msrb.mxu1 %v3507_v48  ;;  %v3296_v46 = vld [vmem:[%s6210_s2 + $0x458] sm:$0xf0]  ;;  %v3699_v48 = vor.u32 %v4321_v41, %v3696_v42  ;;  %v4309_v19 = vld [vmem:[%s6210_s2 + $0x70c] sm:$0xf] }
  0xed   :  { %2043 = vmatpush.bf16.msrb.mxu2 %v3635_v51  ;;  %v4285_v51 = vld [vmem:[%s6210_s2 + $0x64c] sm:$0xf]  ;;  %v3680_v55 = vld [vmem:[%s6210_s2 + $0x758] sm:$0xf0]  ;;  %v3299_v58 = vor.u32 %v4221_v45, %v3296_v46  ;;  %v4353_v45 = vld [vmem:[#allocation2 + $0x64] sm:$0xf0] }
  0xee   :  { %1999 = vmatmul.bf16.vlgmr.msra.gmra.mxu2 %v4923_v28  ;;  %v3347_v28 = vor.u32 %v4233_v62, %v3344_v63  ;;  %v4249_v62 = vld [vmem:[%s6210_s2 + $0x52c] sm:$0xf]  ;;  %v3555_v0 = vor.u32 %v4285_v51, %v3552_v53  ;;  %v3536_v4 = vld [vmem:[%s6210_s2 + $0x638] sm:$0xf0]  ;;  %v3878_v46 = vld [vmem:[#allocation2 + $0xe0] sm:$0xf] }
  0xef   :  { %2012 = vmatmul.bf16.vlgmr.msra.gmra.mxu3 %v4927_v34  ;;  %2018 = vmatpush.bf16.msrb.mxu0 %v3363_v60  ;;  %v4261_v34 = vld [vmem:[%s6210_s2 + $0x58c] sm:$0xf]  ;;  %v1768_v57 = vpop.f32.mrf.mxu0  ;;  %v1781_v63 = vpop.f32.mrf.mxu1  ;;  %v3664_v8 = vld [vmem:[%s6210_s2 + $0x738] sm:$0xf0]  ;;  %v3870_v51 = vld [vmem:[#allocation2 + $0xd0] sm:$0xf] }
  0xf0   :  { %2056 = vmatpush.bf16.msrb.mxu3 %v3763_v52  ;;  %2031 = vmatpush.bf16.msrb.mxu1 %v3491_v61  ;;  %v3459_v25 = vor.u32 %v4261_v34, %v3456_v35  ;;  %v6066_v52 = vpop.f32.mrf.mxu2  ;;  %v4217_v60 = vld [vmem:[%s6210_s2 + $0x42c] sm:$0xf]  ;;  %v3280_v61 = vld [vmem:[%s6210_s2 + $0x438] sm:$0xf0]  ;;  %v4367_v53 = vld [vmem:[#allocation2 + $0xd4] sm:$0xf0] }
  0xf1   :  { %2044 = vmatpush.bf16.msrb.mxu2 %v3619_v1  ;;  %v3683_v1 = vor.u32 %v4317_v54, %v3680_v55  ;;  %v3283_v10 = vor.u32 %v4217_v60, %v3280_v61  ;;  %v3264_v11 = vld [vmem:[%s6210_s2 + $0x418] sm:$0xf0]  ;;  %v4277_v35 = vld [vmem:[%s6210_s2 + $0x60c] sm:$0xf]  ;;  %v3871_v57 = vor.u32 %v4367_v53, %v3870_v51  ;;  %v4365_v60 = vld [vmem:[#allocation2 + $0xc4] sm:$0xf0] }
  0xf2   :  { %v6077_v56 = vpop.f32.mrf.mxu3  ;;  %v3392_v34 = vld [vmem:[%s6210_s2 + $0x518] sm:$0xf0]  ;;  %v4387_v61 = vld [vmem:[#allocation2 + $0x174] sm:$0xf0]  ;;  %v3888_v53 = vld [vmem:[#allocation2 + $0xf8] sm:$0xf0] }
  0xf3   :  { %2019 = vmatpush.bf16.msrb.mxu0 %v3347_v28  ;;  %v3520_v14 = vld [vmem:[%s6210_s2 + $0x618] sm:$0xf0]  ;;  %v3395_v38 = vor.u32 %v4245_v12, %v3392_v34  ;;  %v3846_v12 = vld [vmem:[#allocation2 + $0xa0] sm:$0xf]  ;;  %v3934_v34 = vld [vmem:[#allocation2 + $0x150] sm:$0xf] }
  0xf4   :  { %2057 = vmatpush.bf16.msrb.mxu3 %v3747_v2  ;;  %2032 = vmatpush.bf16.msrb.mxu1 %v3475_v6  ;;  %v3408_v2 = vld [vmem:[%s6210_s2 + $0x538] sm:$0xf0]  ;;  %v4213_v6 = vld [vmem:[%s6210_s2 + $0x40c] sm:$0xf]  ;;  %v3523_v39 = vor.u32 %v4277_v35, %v3520_v14  ;;  %v4383_v35 = vld [vmem:[#allocation2 + $0x154] sm:$0xf0] }
  0xf5   :  { %2045 = vmatpush.bf16.msrb.mxu2 %v3603_v13  ;;  %v3411_v28 = vor.u32 %v4249_v62, %v3408_v2  ;;  %v3539_v13 = vor.u32 %v4281_v3, %v3536_v4  ;;  %v3648_v20 = vld [vmem:[%s6210_s2 + $0x718] sm:$0xf0]  ;;  %v3267_v37 = vor.u32 %v4213_v6, %v3264_v11  ;;  %v3942_v4 = vld [vmem:[#allocation2 + $0x160] sm:$0xf]  ;;  %v4345_v11 = vld [vmem:[#allocation2 + $0x24] sm:$0xf0] }
  0xf6   :  { %v3651_v40 = vor.u32 %v4309_v19, %v3648_v20  ;;  %v3782_v6 = vld [vmem:[#allocation2 + $0x20] sm:$0xf]  ;;  %v4370_v51 = vld [vmem:[#allocation2 + $0xf4] sm:$0xf] }
  0xf7   :  { %2020 = vmatpush.bf16.msrb.mxu0 %v3331_v24  ;;  %v3822_v24 = vld [vmem:[#allocation2 + $0x70] sm:$0xf] }
  0xf8   :  { %2058 = vmatpush.bf16.msrb.mxu3 %v3731_v29  ;;  %2033 = vmatpush.bf16.msrb.mxu1 %v3459_v25  ;;  %v3667_v29 = vor.u32 %v4313_v5, %v3664_v8  ;;  %v1794_v15 = vpop.f32.mrf.mxu2  ;;  %v1767_v25 = vadd.f32 %v6023_v23, %v366_v9  ;;  %v3823_v41 = vor.u32 %v4355_v31, %v3822_v24  ;;  %v4369_v23 = vld [vmem:[#allocation2 + $0xe4] sm:$0xf0]  ;;  %v3774_v31 = vld [vmem:[#allocation2 + $0x10] sm:$0xf] }
  0xf9   :  { %2046 = vmatpush.bf16.msrb.mxu2 %v3587_v33  ;;  %v3886_v33 = vld [vmem:[#allocation2 + $0xf0] sm:$0xf]  ;;  %v4385_v5 = vld [vmem:[#allocation2 + $0x164] sm:$0xf0]  ;;  %v3935_v15 = vor.u32 %v4383_v35, %v3934_v34  ;;  %v1741_v24 = vadd.f32 %v5907_v18, %v5884_v7  ;;  %v4348_v35 = vld [vmem:[#allocation2 + $0x44] sm:$0xf] }
  0xfa   :  { %v1807_v27 = vpop.f32.mrf.mxu3  ;;  %v3943_v8 = vor.u32 %v4385_v5, %v3942_v4  ;;  %v4350_v5 = vld [vmem:[#allocation2 + $0x54] sm:$0xf] }
  0xfb   :  { %2021 = vmatpush.bf16.msrb.mxu0 %v3315_v43  ;;  %v1780_v43 = vadd.f32 %v6031_v32, %v1767_v25  ;;  %v4351_v32 = vld [vmem:[#allocation2 + $0x54] sm:$0xf0]  ;;  %v3783_v25 = vor.u32 %v4345_v11, %v3782_v6  ;;  %v3894_v6 = vld [vmem:[#allocation2 + $0x100] sm:$0xf]  ;;  %v4373_v11 = vld [vmem:[#allocation2 + $0x104] sm:$0xf0] }
  0xfc   :  { %2059 = vmatpush.bf16.msrb.mxu3 %v3715_v36  ;;  %2034 = vmatpush.bf16.msrb.mxu1 %v3443_v44  ;;  %v4371_v36 = vld [vmem:[#allocation2 + $0xf4] sm:$0xf0]  ;;  %v3814_v44 = vld [vmem:[#allocation2 + $0x60] sm:$0xf]  ;;  %v3807_v55 = vor.u32 %v4351_v32, %v3806_v50  ;;  %v3824_v32 = vld [vmem:[#allocation2 + $0x78] sm:$0xf0] }
  0xfd   :  { %2047 = vmatpush.bf16.msrb.mxu2 %v3571_v47  ;;  %v3887_v42 = vor.u32 %v4371_v36, %v3886_v33  ;;  %v3815_v47 = vor.u32 %v4353_v45, %v3814_v44  ;;  %v1793_v49 = vadd.f32 %v6066_v52, %v1780_v43  ;;  %v4349_v52 = vld [vmem:[#allocation2 + $0x44] sm:$0xf0]  ;;  %v4343_v33 = vld [vmem:[#allocation2 + $0x14] sm:$0xf0]  ;;  %v3838_v36 = vld [vmem:[#allocation2 + $0x90] sm:$0xf]  ;;  %v1754_v44 = vadd.f32 %v5918_v26, %v1741_v24 }
  0xfe   :  { %v3766_v43 = vld [vmem:[#allocation2] sm:$0xf]  ;;  %v3775_v7 = vor.u32 %v4343_v33, %v3774_v31  ;;  %v4341_v45 = vld [vmem:[#allocation2 + $0x4] sm:$0xf0]  ;;  %v4379_v50 = vld [vmem:[#allocation2 + $0x134] sm:$0xf0] }
  0xff   :  { %2022 = vmatpush.bf16.msrb.mxu0 %v3299_v58  ;;  %v1806_v54 = vadd.f32 %v6077_v56, %v1793_v49  ;;  %v3798_v58 = vld [vmem:[#allocation2 + $0x40] sm:$0xf]  ;;  %v4363_v56 = vld [vmem:[#allocation2 + $0xb4] sm:$0xf0]  ;;  %v3918_v49 = vld [vmem:[#allocation2 + $0x130] sm:$0xf]  ;;  %v3767_v26 = vor.u32 %v4341_v45, %v3766_v43 }
 0x100   :  { %2060 = vmatpush.bf16.msrb.mxu3 %v3699_v48  ;;  %2035 = vmatpush.bf16.msrb.mxu1 %v3427_v59  ;;  %v3879_v48 = vor.u32 %v4369_v23, %v3878_v46  ;;  %v3862_v59 = vld [vmem:[#allocation2 + $0xc0] sm:$0xf]  ;;  %v3799_v63 = vor.u32 %v4349_v52, %v3798_v58  ;;  %v4357_v23 = vld [vmem:[#allocation2 + $0x84] sm:$0xf0]  ;;  %v2069_v58 = vmax.f32 %v1754_v44, 0.0 }
 0x101   :  { %2048 = vmatpush.bf16.msrb.mxu2 %v3555_v0  ;;  %v3790_v0 = vld [vmem:[#allocation2 + $0x30] sm:$0xf]  ;;  %v3830_v46 = vld [vmem:[#allocation2 + $0x80] sm:$0xf]  ;;  %v4346_v31 = vld [vmem:[#allocation2 + $0x34] sm:$0xf] }
 0x102   :  { %v3831_v52 = vor.u32 %v4357_v23, %v3830_v46  ;;  %v3792_v33 = vld [vmem:[#allocation2 + $0x38] sm:$0xf0]  ;;  %v4360_v45 = vld [vmem:[#allocation2 + $0xa4] sm:$0xf]  ;;  %v3848_v46 = vld [vmem:[#allocation2 + $0xa8] sm:$0xf0] }
 0x103   :  { %2023 = vmatpush.bf16.msrb.mxu0 %v3283_v10  ;;  %v3795_v43 = vor.u32 %v4346_v31, %v3792_v33  ;;  %v4382_v23 = vld [vmem:[#allocation2 + $0x154] sm:$0xf]  ;;  %v4401_v31 = vld [vmem:[#allocation2 + $0x1e4] sm:$0xf0] }
 0x104   :  { %2061 = vmatpush.bf16.msrb.mxu3 %v3683_v1  ;;  %2036 = vmatpush.bf16.msrb.mxu1 %v3411_v28  ;;  %v3854_v1 = vld [vmem:[#allocation2 + $0xb0] sm:$0xf] }
 0x105   :  { %2049 = vmatpush.bf16.msrb.mxu2 %v3539_v13  ;;  %v3855_v28 = vor.u32 %v4363_v56, %v3854_v1  ;;  %v4361_v13 = vld [vmem:[#allocation2 + $0xa4] sm:$0xf0]  ;;  %v3902_v1 = vld [vmem:[#allocation2 + $0x110] sm:$0xf] }
 0x106   :  { %v3847_v27 = vor.u32 %v4361_v13, %v3846_v12  ;;  %v4386_v12 = vld [vmem:[#allocation2 + $0x174] sm:$0xf]  ;;  %v3952_v13 = vld [vmem:[#allocation2 + $0x178] sm:$0xf0] }
 0x107   :  { %2024 = vmatpush.bf16.msrb.mxu0 %v3267_v37  ;;  %v1818_v62 = vpop.f32.mrf.mxu0  ;;  %v3955_v24 = vor.u32 %v4386_v12, %v3952_v13 }
 0x108   :  { %2062 = vmatpush.bf16.msrb.mxu3 %v3667_v29  ;;  %2037 = vmatpush.bf16.msrb.mxu1 %v3395_v38  ;;  %v1819_v2 = vadd.f32 %v1818_v62, %v1806_v54  ;;  %v1831_v3 = vpop.f32.mrf.mxu1  ;;  %v4359_v38 = vld [vmem:[#allocation2 + $0x94] sm:$0xf0]  ;;  %v3816_v62 = vld [vmem:[#allocation2 + $0x68] sm:$0xf0] }
 0x109   :  { %2050 = vmatpush.bf16.msrb.mxu2 %v3523_v39  ;;  %v3926_v39 = vld [vmem:[#allocation2 + $0x140] sm:$0xf]  ;;  %v3839_v18 = vor.u32 %v4359_v38, %v3838_v36  ;;  %v4362_v36 = vld [vmem:[#allocation2 + $0xb4] sm:$0xf]  ;;  %v3856_v38 = vld [vmem:[#allocation2 + $0xb8] sm:$0xf0] }
 0x10a   :  { %2025 = vmatmul.bf16.vlgmr.msrb.gmra.mxu0 %v5012_v17  ;;  %v3950_v17 = vld [vmem:[#allocation2 + $0x170] sm:$0xf]  ;;  %v1832_v9 = vadd.f32 %v1831_v3, %v1819_v2  ;;  %v4375_v2 = vld [vmem:[#allocation2 + $0x114] sm:$0xf0]  ;;  %v6141_v3 = vpack.c.bf16 %v2069_v58, %v2069_v58  ;;  %v3859_v44 = vor.u32 %v4362_v36, %v3856_v38  ;;  %v3840_v58 = vld [vmem:[#allocation2 + $0x98] sm:$0xf0] }
 0x10b   :  { %2467 = vmatpush.bf16.msra.mxu0 %v3823_v41  ;;  %2038 = vmatmul.bf16.vlgmr.msrb.gmra.mxu1 %v5025_v22  ;;  %v3951_v22 = vor.u32 %v4387_v61, %v3950_v17  ;;  %v4352_v17 = vld [vmem:[#allocation2 + $0x64] sm:$0xf]  ;;  %v3910_v61 = vld [vmem:[#allocation2 + $0x120] sm:$0xf]  ;;  %v4399_v38 = vld [vmem:[#allocation2 + $0x1d4] sm:$0xf0] }
 0x10c   :  { %2063 = vmatpush.bf16.msrb.mxu3 %v3651_v40  ;;  %2480 = vmatpush.bf16.msra.mxu1 %v3887_v42  ;;  %v4381_v40 = vld [vmem:[#allocation2 + $0x144] sm:$0xf0]  ;;  %v3819_v56 = vor.u32 %v4352_v17, %v3816_v62  ;;  %v367_v17 = vperm.slane %v5733_v30, 2  ;;  %v4340_v62 = vld [vmem:[#allocation2 + $0x4] sm:$0xf] }
 0x10d   :  { %2051 = vmatmul.bf16.vlgmr.msrb.gmra.mxu2 %v5010_v16  ;;  %v3863_v16 = vor.u32 %v4365_v60, %v3862_v59  ;;  %v3927_v41 = vor.u32 %v4381_v40, %v3926_v39  ;;  %v3891_v60 = vor.u32 %v4370_v51, %v3888_v53  ;;  %v4384_v40 = vld [vmem:[#allocation2 + $0x164] sm:$0xf]  ;;  %v3851_v51 = vor.u32 %v4360_v45, %v3848_v46  ;;  %v4342_v53 = vld [vmem:[#allocation2 + $0x14] sm:$0xf]  ;;  %v3982_v45 = vld [vmem:[#allocation2 + $0x1b0] sm:$0xf] }
 0x10e   :  { %2493 = vmatpush.bf16.msra.mxu2 %v3951_v22  ;;  %v4377_v22 = vld [vmem:[#allocation2 + $0x124] sm:$0xf0]  ;;  %v4395_v46 = vld [vmem:[#allocation2 + $0x1b4] sm:$0xf0] }
 0x10f   :  { %2064 = vmatmul.bf16.vlgmr.msrb.gmra.mxu3 %v5023_v21  ;;  %2468 = vmatpush.bf16.msra.mxu0 %v3815_v47  ;;  %v4347_v21 = vld [vmem:[#allocation2 + $0x34] sm:$0xf0]  ;;  %v1820_v20 = vpop.f32.mrf.mxu0  ;;  %v4354_v47 = vld [vmem:[#allocation2 + $0x74] sm:$0xf] }
 0x110   :  { %2481 = vmatpush.bf16.msra.mxu1 %v3879_v48  ;;  %v3791_v10 = vor.u32 %v4347_v21, %v3790_v0  ;;  %v1833_v37 = vpop.f32.mrf.mxu1  ;;  %v3827_v59 = vor.u32 %v4354_v47, %v3824_v32  ;;  %v3911_v0 = vor.u32 %v4377_v22, %v3910_v61  ;;  %v3895_v20 = vor.u32 %v4373_v11, %v3894_v6  ;;  %v3936_v47 = vld [vmem:[#allocation2 + $0x158] sm:$0xf0]  ;;  %v4403_v11 = vld [vmem:[#allocation2 + $0x1f4] sm:$0xf0] }
 0x111   :  { %v1844_v29 = vpop.f32.mrf.mxu2 }
 0x112   :  { %2494 = vmatpush.bf16.msra.mxu2 %v3943_v8  ;;  %v1857_v14 = vpop.f32.mrf.mxu3  ;;  %v1845_v19 = vadd.f32 %v1844_v29, %v1832_v9  ;;  %v3808_v8 = vld [vmem:[#allocation2 + $0x58] sm:$0xf0]  ;;  %v4366_v9 = vld [vmem:[#allocation2 + $0xd4] sm:$0xf] }
 0x113   :  { %2469 = vmatpush.bf16.msra.mxu0 %v3807_v55  ;;  %v3919_v55 = vor.u32 %v4379_v50, %v3918_v49  ;;  %v3811_v29 = vor.u32 %v4350_v5, %v3808_v8  ;;  %v3939_v49 = vor.u32 %v4382_v23, %v3936_v47 }
 0x114   :  { %2482 = vmatpush.bf16.msra.mxu1 %v3871_v57  ;;  %v1858_v42 = vadd.f32 %v1857_v14, %v1845_v19  ;;  %v3800_v14 = vld [vmem:[#allocation2 + $0x48] sm:$0xf0] }
 0x115   :  { %v3864_v19 = vld [vmem:[#allocation2 + $0xc8] sm:$0xf0] }
 0x116   :  { %2495 = vmatpush.bf16.msra.mxu2 %v3935_v15  ;;  %v2070_v57 = vmax.f32 %v1858_v42, 0.0  ;;  %v4364_v15 = vld [vmem:[#allocation2 + $0xc4] sm:$0xf] }
 0x117   :  { %2470 = vmatpush.bf16.msra.mxu0 %v3799_v63  ;;  %v4368_v63 = vld [vmem:[#allocation2 + $0xe4] sm:$0xf] }
 0x118   :  { %2483 = vmatpush.bf16.msra.mxu1 %v3863_v16  ;;  %v3880_v16 = vld [vmem:[#allocation2 + $0xe8] sm:$0xf0]  ;;  %v6139_v21 = vpack.c.bf16 %v2070_v57, %v2070_v57 }
 0x119   :  { %v1846_v48 = vpop.f32.mrf.mxu2  ;;  %v3883_v4 = vor.u32 %v4368_v63, %v3880_v16  ;;  %v3768_v63 = vld [vmem:[#allocation2 + $0x8] sm:$0xf0]  ;;  %v4356_v16 = vld [vmem:[#allocation2 + $0x84] sm:$0xf] }
 0x11a   :  { %2496 = vmatpush.bf16.msra.mxu2 %v3927_v41  ;;  %v1859_v54 = vpop.f32.mrf.mxu3  ;;  %v3944_v41 = vld [vmem:[#allocation2 + $0x168] sm:$0xf0]  ;;  %v3771_v30 = vor.u32 %v4340_v62, %v3768_v63  ;;  %v4400_v63 = vld [vmem:[#allocation2 + $0x1e4] sm:$0xf] }
 0x11b   :  { %2471 = vmatpush.bf16.msra.mxu0 %v3791_v10  ;;  %v3872_v10 = vld [vmem:[#allocation2 + $0xd8] sm:$0xf0]  ;;  %v3947_v42 = vor.u32 %v4384_v40, %v3944_v41 }
 0x11c   :  { %2484 = vmatpush.bf16.msra.mxu1 %v3855_v28  ;;  %v3903_v28 = vor.u32 %v4375_v2, %v3902_v1  ;;  %v3875_v34 = vor.u32 %v4366_v9, %v3872_v10  ;;  %v3776_v54 = vld [vmem:[#allocation2 + $0x18] sm:$0xf0]  ;;  %v4378_v1 = vld [vmem:[#allocation2 + $0x134] sm:$0xf]  ;;  %v4376_v9 = vld [vmem:[#allocation2 + $0x124] sm:$0xf] }
 0x11d   :  { %v3779_v61 = vor.u32 %v4342_v53, %v3776_v54  ;;  %v3920_v2 = vld [vmem:[#allocation2 + $0x138] sm:$0xf0]  ;;  %v3912_v10 = vld [vmem:[#allocation2 + $0x128] sm:$0xf0] }
 0x11e   :  { %2497 = vmatpush.bf16.msra.mxu2 %v3919_v55  ;;  %v4358_v55 = vld [vmem:[#allocation2 + $0x94] sm:$0xf]  ;;  %v3915_v13 = vor.u32 %v4376_v9, %v3912_v10  ;;  %v4396_v10 = vld [vmem:[#allocation2 + $0x1c4] sm:$0xf] }
 0x11f   :  { %2472 = vmatpush.bf16.msra.mxu0 %v3783_v25  ;;  %v3803_v25 = vor.u32 %v4348_v35, %v3800_v14  ;;  %v3843_v22 = vor.u32 %v4358_v55, %v3840_v58  ;;  %v3904_v35 = vld [vmem:[#allocation2 + $0x118] sm:$0xf0]  ;;  %v3966_v58 = vld [vmem:[#allocation2 + $0x190] sm:$0xf] }
 0x120   :  { %2485 = vmatpush.bf16.msra.mxu1 %v3847_v27  ;;  %v3867_v27 = vor.u32 %v4364_v15, %v3864_v19  ;;  %v4372_v19 = vld [vmem:[#allocation2 + $0x104] sm:$0xf] }
 0x122   :  { %2498 = vmatpush.bf16.msra.mxu2 %v3911_v0  ;;  %v3832_v0 = vld [vmem:[#allocation2 + $0x88] sm:$0xf0] }
 0x123   :  { %2473 = vmatpush.bf16.msra.mxu0 %v3775_v7  ;;  %v4344_v7 = vld [vmem:[#allocation2 + $0x24] sm:$0xf]  ;;  %v3835_v6 = vor.u32 %v4356_v16, %v3832_v0  ;;  %v4008_v16 = vld [vmem:[#allocation2 + $0x1e8] sm:$0xf0] }
 0x124   :  { %2486 = vmatpush.bf16.msra.mxu1 %v3839_v18  ;;  %v3784_v18 = vld [vmem:[#allocation2 + $0x28] sm:$0xf0] }
 0x125   :  { %v3787_v32 = vor.u32 %v4344_v7, %v3784_v18 }
 0x126   :  { %2499 = vmatpush.bf16.msra.mxu2 %v3903_v28  ;;  %v4014_v28 = vld [vmem:[#allocation2 + $0x1f0] sm:$0xf] }
 0x127   :  { %2474 = vmatpush.bf16.msra.mxu0 %v3767_v26  ;;  %v1870_v37 = vpop.f32.mrf.mxu0  ;;  %v4015_v12 = vor.u32 %v4403_v11, %v4014_v28  ;;  %v3992_v28 = vld [vmem:[#allocation2 + $0x1c8] sm:$0xf0] }
 0x128   :  { %2487 = vmatpush.bf16.msra.mxu1 %v3831_v52  ;;  %v1883_v39 = vpop.f32.mrf.mxu1  ;;  %v4380_v52 = vld [vmem:[#allocation2 + $0x144] sm:$0xf]  ;;  %v1871_v5 = vadd.f32 %v1870_v37, %v367_v17  ;;  %v3998_v37 = vld [vmem:[#allocation2 + $0x1d0] sm:$0xf] }
 0x129   :  { %2506 = vmatpush.bf16.msra.mxu3 %v4015_v12  ;;  %v3999_v41 = vor.u32 %v4399_v38, %v3998_v37  ;;  %v4394_v12 = vld [vmem:[#allocation2 + $0x1b4] sm:$0xf]  ;;  %v3960_v37 = vld [vmem:[#allocation2 + $0x188] sm:$0xf0] }
 0x12a   :  { %2475 = vmatmul.bf16.vlgmr.msra.gmra.mxu0 %v6141_v3  ;;  %2500 = vmatpush.bf16.msra.mxu2 %v3895_v20  ;;  %v3896_v20 = vld [vmem:[#allocation2 + $0x108] sm:$0xf0] }
 0x12b   :  { %2519 = vmatpush.bf16.msrb.mxu0 %v3827_v59  ;;  %2488 = vmatmul.bf16.vlgmr.msra.gmra.mxu1 %v6139_v21  ;;  %v3928_v59 = vld [vmem:[#allocation2 + $0x148] sm:$0xf0] }
 0x12c   :  { %2532 = vmatpush.bf16.msrb.mxu1 %v3891_v60  ;;  %v3931_v60 = vor.u32 %v4380_v52, %v3928_v59  ;;  %v3958_v59 = vld [vmem:[#allocation2 + $0x180] sm:$0xf] }
 0x12e   :  { %2545 = vmatpush.bf16.msrb.mxu2 %v3955_v24  ;;  %v3899_v24 = vor.u32 %v4372_v19, %v3896_v20 }
 0x12f   :  { %2520 = vmatpush.bf16.msrb.mxu0 %v3819_v56  ;;  %v1872_v57 = vpop.f32.mrf.mxu0 }
 0x130   :  { %2533 = vmatpush.bf16.msrb.mxu1 %v3883_v4  ;;  %v1885_v26 = vpop.f32.mrf.mxu1  ;;  %v3923_v4 = vor.u32 %v4378_v1, %v3920_v2  ;;  %v4011_v1 = vor.u32 %v4400_v63, %v4008_v16  ;;  %v4411_v63 = vld [vmem:[%s6214_s6 + $0x38] sm:$0xff] }
 0x131   :  { %v1896_v48 = vpop.f32.mrf.mxu2  ;;  %v4391_v26 = vld [vmem:[#allocation2 + $0x194] sm:$0xf0]  ;;  %v4419_v16 = vld [vmem:[%s6214_s6 + $0x78] sm:$0xff] }
 0x132   :  { %2546 = vmatpush.bf16.msrb.mxu2 %v3947_v42  ;;  %v1909_v50 = vpop.f32.mrf.mxu3  ;;  %v3967_v52 = vor.u32 %v4391_v26, %v3966_v58 }
 0x133   :  { %2521 = vmatpush.bf16.msrb.mxu0 %v3811_v29  ;;  %v1884_v29 = vadd.f32 %v1883_v39, %v1871_v5 }
 0x134   :  { %2534 = vmatpush.bf16.msrb.mxu1 %v3875_v34  ;;  %v4374_v34 = vld [vmem:[#allocation2 + $0x114] sm:$0xf] }
 0x135   :  { %v3907_v14 = vor.u32 %v4374_v34, %v3904_v35  ;;  %v1897_v15 = vadd.f32 %v1896_v48, %v1884_v29  ;;  %v4424_v34 = vld [vmem:[%s6211_s3] sm:$0xf] }
 0x136   :  { %2547 = vmatpush.bf16.msrb.mxu2 %v3939_v49  ;;  %v3983_v49 = vor.u32 %v4395_v46, %v3982_v45  ;;  %v368_v35 = vperm.slane %v4424_v34, 3  ;;  %v4413_v34 = vld [vmem:[%s6214_s6 + $0x48] sm:$0xff] }
 0x137   :  { %2522 = vmatpush.bf16.msrb.mxu0 %v3803_v25  ;;  %v1910_v25 = vadd.f32 %v1909_v50, %v1897_v15  ;;  %v3976_v15 = vld [vmem:[#allocation2 + $0x1a8] sm:$0xf0] }
 0x138   :  { %2535 = vmatpush.bf16.msrb.mxu1 %v3867_v27  ;;  %v4006_v27 = vld [vmem:[#allocation2 + $0x1e0] sm:$0xf] }
 0x139   :  { %v1898_v56 = vpop.f32.mrf.mxu2  ;;  %v4007_v36 = vor.u32 %v4401_v31, %v4006_v27  ;;  %v3968_v27 = vld [vmem:[#allocation2 + $0x198] sm:$0xf0] }
 0x13a   :  { %2548 = vmatpush.bf16.msrb.mxu2 %v3931_v60  ;;  %v1911_v8 = vpop.f32.mrf.mxu3  ;;  %v4389_v60 = vld [vmem:[#allocation2 + $0x184] sm:$0xf0]  ;;  %v4398_v56 = vld [vmem:[#allocation2 + $0x1d4] sm:$0xf] }
 0x13b   :  { %2523 = vmatpush.bf16.msrb.mxu0 %v3795_v43  ;;  %2507 = vmatpush.bf16.msra.mxu3 %v4007_v36  ;;  %v4397_v43 = vld [vmem:[#allocation2 + $0x1c4] sm:$0xf0]  ;;  %v3959_v17 = vor.u32 %v4389_v60, %v3958_v59  ;;  %v4388_v36 = vld [vmem:[#allocation2 + $0x184] sm:$0xf] }
 0x13c   :  { %2536 = vmatpush.bf16.msrb.mxu1 %v3859_v44 }
 0x13e   :  { %2549 = vmatpush.bf16.msrb.mxu2 %v3923_v4  ;;  %v4000_v4 = vld [vmem:[#allocation2 + $0x1d8] sm:$0xf0] }
 0x13f   :  { %2524 = vmatpush.bf16.msrb.mxu0 %v3787_v32  ;;  %2508 = vmatpush.bf16.msra.mxu3 %v3999_v41  ;;  %v3974_v32 = vld [vmem:[#allocation2 + $0x1a0] sm:$0xf]  ;;  %v4003_v5 = vor.u32 %v4398_v56, %v4000_v4  ;;  %v4408_v4 = vld [vmem:[%s6214_s6 + $0x20] sm:$0xff] }
 0x140   :  { %2537 = vmatpush.bf16.msrb.mxu1 %v3851_v51  ;;  %v4393_v51 = vld [vmem:[#allocation2 + $0x1a4] sm:$0xf0] }
 0x141   :  { %v3975_v55 = vor.u32 %v4393_v51, %v3974_v32  ;;  %v2141_v32 = vld [vmem:[%s6213_s5] sm:$0x3] }
 0x142   :  { %2550 = vmatpush.bf16.msrb.mxu2 %v3915_v13  ;;  %v3984_v13 = vld [vmem:[#allocation2 + $0x1b8] sm:$0xf0]  ;;  %v2143_v51 = vperm.slane %v2141_v32, 0 }
 0x143   :  { %2525 = vmatpush.bf16.msrb.mxu0 %v3779_v61  ;;  %v4402_v61 = vld [vmem:[#allocation2 + $0x1f4] sm:$0xf]  ;;  %v3987_v29 = vor.u32 %v4394_v12, %v3984_v13  ;;  %v4416_v12 = vld [vmem:[%s6214_s6 + $0x60] sm:$0xff] }
 0x144   :  { %2538 = vmatpush.bf16.msrb.mxu1 %v3843_v22  ;;  %v4016_v22 = vld [vmem:[#allocation2 + $0x1f8] sm:$0xf0]  ;;  %v4415_v13 = vld [vmem:[%s6214_s6 + $0x58] sm:$0xff] }
 0x145   :  { %v4019_v62 = vor.u32 %v4402_v61, %v4016_v22 }
 0x146   :  { %2551 = vmatpush.bf16.msrb.mxu2 %v3907_v14  ;;  %v4392_v14 = vld [vmem:[#allocation2 + $0x1a4] sm:$0xf] }
 0x147   :  { %2526 = vmatpush.bf16.msrb.mxu0 %v3771_v30  ;;  %v1922_v33 = vpop.f32.mrf.mxu0  ;;  %v3979_v20 = vor.u32 %v4392_v14, %v3976_v15 }
 0x148   :  { %2539 = vmatpush.bf16.msrb.mxu1 %v3835_v6  ;;  %v1923_v39 = vadd.f32 %v1922_v33, %v1910_v25  ;;  %v1935_v40 = vpop.f32.mrf.mxu1  ;;  %v3995_v6 = vor.u32 %v4396_v10, %v3992_v28  ;;  %v4390_v25 = vld [vmem:[#allocation2 + $0x194] sm:$0xf] }
 0x149   :  { %v3971_v33 = vor.u32 %v4390_v25, %v3968_v27 }
 0x14a   :  { %2527 = vmatmul.bf16.vlgmr.msrb.gmra.mxu0 %v6141_v3  ;;  %2552 = vmatpush.bf16.msrb.mxu2 %v3899_v24  ;;  %v1936_v42 = vadd.f32 %v1935_v40, %v1923_v39  ;;  %v3990_v3 = vld [vmem:[#allocation2 + $0x1c0] sm:$0xf]  ;;  %v3963_v39 = vor.u32 %v4388_v36, %v3960_v37 }
 0x14b   :  { %2540 = vmatmul.bf16.vlgmr.msrb.gmra.mxu1 %v6139_v21  ;;  %v3991_v44 = vor.u32 %v4397_v43, %v3990_v3  ;;  %2707 = vmatpush.bf16.msra.mxu0 %v4411_v63 }
 0x14c   :  { %2720 = vmatpush.bf16.msra.mxu1 %v4419_v16 }
 0x14d   :  { %2509 = vmatpush.bf16.msra.mxu3 %v3991_v44 }
 0x14f   :  { %v1924_v23 = vpop.f32.mrf.mxu0 }
 0x150   :  { %v1937_v48 = vpop.f32.mrf.mxu1 }
 0x151   :  { %v1948_v21 = vpop.f32.mrf.mxu2  ;;  %2510 = vmatpush.bf16.msra.mxu3 %v3983_v49 }
 0x152   :  { %v1949_v7 = vadd.f32 %v1948_v21, %v1936_v42  ;;  %v1961_v18 = vpop.f32.mrf.mxu3 }
 0x154   :  { %v1962_v47 = vadd.f32 %v1961_v18, %v1949_v7 }
 0x155   :  { %2511 = vmatpush.bf16.msra.mxu3 %v3975_v55 }
 0x156   :  { %v2071_v50 = vmax.f32 %v1962_v47, 0.0 }
 0x158   :  { %v2075_v53 = vpack.c.bf16 %v2071_v50, %v2071_v50 }
 0x159   :  { %v1950_v54 = vpop.f32.mrf.mxu2  ;;  %2512 = vmatpush.bf16.msra.mxu3 %v3967_v52  ;;  %v2144_v52 = vperm.slane %v2141_v32, 1 }
 0x15a   :  { %2501 = vmatmul.bf16.vlgmr.msra.gmra.mxu2 %v2075_v53  ;;  %v1963_v57 = vpop.f32.mrf.mxu3 }
 0x15d   :  { %2513 = vmatpush.bf16.msra.mxu3 %v3959_v17 }
 0x161   :  { %2558 = vmatpush.bf16.msrb.mxu3 %v4019_v62 }
 0x165   :  { %2559 = vmatpush.bf16.msrb.mxu3 %v4011_v1  ;;  %v4418_v1 = vld [vmem:[%s6214_s6 + $0x70] sm:$0xff] }
 0x166   :  { %2721 = vmatpush.bf16.msra.mxu1 %v4418_v1 }
 0x167   :  { %v1974_v0 = vpop.f32.mrf.mxu0 }
 0x168   :  { %v1987_v2 = vpop.f32.mrf.mxu1  ;;  %v1975_v31 = vadd.f32 %v1974_v0, %v368_v35  ;;  %v4410_v0 = vld [vmem:[%s6214_s6 + $0x30] sm:$0xff]  ;;  %v4412_v35 = vld [vmem:[%s6214_s6 + $0x40] sm:$0xff] }
 0x169   :  { %2560 = vmatpush.bf16.msrb.mxu3 %v4003_v5  ;;  %2708 = vmatpush.bf16.msra.mxu0 %v4410_v0  ;;  %v4407_v5 = vld [vmem:[%s6214_s6 + $0x18] sm:$0xff] }
 0x16a   :  { %2553 = vmatmul.bf16.vlgmr.msrb.gmra.mxu2 %v2075_v53  ;;  %v1988_v38 = vadd.f32 %v1987_v2, %v1975_v31  ;;  %v4409_v2 = vld [vmem:[%s6214_s6 + $0x28] sm:$0xff] }
 0x16d   :  { %2561 = vmatpush.bf16.msrb.mxu3 %v3995_v6  ;;  %2709 = vmatpush.bf16.msra.mxu0 %v4409_v2  ;;  %v4417_v6 = vld [vmem:[%s6214_s6 + $0x68] sm:$0xff] }
 0x16e   :  { %2722 = vmatpush.bf16.msra.mxu1 %v4417_v6 }
 0x16f   :  { %v1976_v30 = vpop.f32.mrf.mxu0 }
 0x170   :  { %v1989_v11 = vpop.f32.mrf.mxu1  ;;  %v4405_v30 = vld [vmem:[%s6214_s6 + $0x8] sm:$0xff] }
 0x171   :  { %v2000_v8 = vpop.f32.mrf.mxu2  ;;  %2562 = vmatpush.bf16.msrb.mxu3 %v3987_v29  ;;  %2710 = vmatpush.bf16.msra.mxu0 %v4408_v4  ;;  %v4404_v11 = vld [vmem:[%s6214_s6] sm:$0xff]  ;;  %v4414_v29 = vld [vmem:[%s6214_s6 + $0x50] sm:$0xff] }
 0x172   :  { %v2013_v9 = vpop.f32.mrf.mxu3  ;;  %v2001_v40 = vadd.f32 %v2000_v8, %v1988_v38  ;;  %2723 = vmatpush.bf16.msra.mxu1 %v4416_v12 }
 0x174   :  { %v2014_v41 = vadd.f32 %v2013_v9, %v2001_v40  ;;  %v4406_v9 = vld [vmem:[%s6214_s6 + $0x10] sm:$0xff] }
 0x175   :  { %2563 = vmatpush.bf16.msrb.mxu3 %v3979_v20  ;;  %2711 = vmatpush.bf16.msra.mxu0 %v4407_v5 }
 0x176   :  { %2724 = vmatpush.bf16.msra.mxu1 %v4415_v13 }
 0x179   :  { %v2002_v19 = vpop.f32.mrf.mxu2  ;;  %2564 = vmatpush.bf16.msrb.mxu3 %v3971_v33  ;;  %2712 = vmatpush.bf16.msra.mxu0 %v4406_v9 }
 0x17a   :  { %v2015_v24 = vpop.f32.mrf.mxu3  ;;  %2725 = vmatpush.bf16.msra.mxu1 %v4414_v29 }
 0x17d   :  { %2565 = vmatpush.bf16.msrb.mxu3 %v3963_v39  ;;  %2713 = vmatpush.bf16.msra.mxu0 %v4405_v30 }
 0x17e   :  { %2726 = vmatpush.bf16.msra.mxu1 %v4413_v34 }
 0x181   :  { %2714 = vmatpush.bf16.msra.mxu0 %v4404_v11 }
 0x182   :  { %2727 = vmatpush.bf16.msra.mxu1 %v4412_v35 }
 0x187   :  { %v2026_v42 = vpop.f32.mrf.mxu0 }
 0x188   :  { %v2039_v3 = vpop.f32.mrf.mxu1  ;;  %v2027_v43 = vadd.f32 %v2026_v42, %v2014_v41  ;;  %v4423_v41 = vld [vmem:[%s6215_s7] ss:$0 sm:$0xff] }
 0x18a   :  { %v2040_v21 = vadd.f32 %v2039_v3, %v2027_v43 }
 0x18f   :  { %v2028_v45 = vpop.f32.mrf.mxu0 }
 0x190   :  { %v2052_v44 = vpop.f32.mrf.mxu2  ;;  %v2041_v46 = vpop.f32.mrf.mxu1 }
 0x191   :  { %v2053_v18 = vadd.f32 %v2052_v44, %v2040_v21 }
 0x192   :  { %v2065_v7 = vpop.f32.mrf.mxu3 }
 0x193   :  { %v2066_v23 = vadd.f32 %v2065_v7, %v2053_v18 }
 0x195   :  { %v2072_v47 = vmax.f32 %v2066_v23, 0.0 }
 0x197   :  { %v2076_v48 = vpack.c.bf16 %v2072_v47, %v2072_v47 }
 0x198   :  { %v2054_v49 = vpop.f32.mrf.mxu2 }
 0x199   :  { %2514 = vmatmul.bf16.vlgmr.msra.gmra.mxu3 %v2076_v48 }
 0x19a   :  { %v2067_v50 = vpop.f32.mrf.mxu3 }
 0x1a7   :  { %v2476_v53 = vpop.f32.mrf.mxu0 }
 0x1a8   :  { %v2489_v54 = vpop.f32.mrf.mxu1  ;;  %v2477_v55 = vadd.f32 %v2476_v53, %v2143_v51 }
 0x1a9   :  { %2566 = vmatmul.bf16.vlgmr.msrb.gmra.mxu3 %v2076_v48 }
 0x1aa   :  { %v2490_v57 = vadd.f32 %v2489_v54, %v2477_v55 }
 0x1af   :  { %v2478_v58 = vpop.f32.mrf.mxu0 }
 0x1b0   :  { %v2491_v26 = vpop.f32.mrf.mxu1 }
 0x1c7   :  { %v2528_v59 = vpop.f32.mrf.mxu0 }
 0x1c8   :  { %v2541_v60 = vpop.f32.mrf.mxu1  ;;  %v2529_v17 = vadd.f32 %v2528_v59, %v2144_v52 }
 0x1ca   :  { %v2542_v61 = vadd.f32 %v2541_v60, %v2529_v17 }
 0x1cf   :  { %v2530_v22 = vpop.f32.mrf.mxu0 }
 0x1d0   :  { %v2543_v62 = vpop.f32.mrf.mxu1 }
 0x1dd   :  { %v2502_v56 = vpop.f32.mrf.mxu2 }
 0x1de   :  { %v2503_v14 = vadd.f32 %v2502_v56, %v2490_v57 }
 0x1e5   :  { %v2504_v8 = vpop.f32.mrf.mxu2 }
 0x1ed   :  { %v2554_v10 = vpop.f32.mrf.mxu2 }
 0x1ee   :  { %v2555_v27 = vadd.f32 %v2554_v10, %v2542_v61 }
 0x1f5   :  { %v2556_v28 = vpop.f32.mrf.mxu2 }
 0x21c   :  { %v2515_v15 = vpop.f32.mrf.mxu3 }
 0x21d   :  { %v2516_v19 = vadd.f32 %v2515_v15, %v2503_v14 }
 0x21f   :  { %v2571_v20 = vmax.f32 %v2516_v19, 0.0 }
 0x221   :  { %v2573_v24 = vpack.c.bf16 %v2571_v20, %v2571_v20 }
 0x223   :  { %2715 = vmatmul.bf16.vlgmr.msra.gmra.mxu0 %v2573_v24 }
 0x224   :  { %v2517_v25 = vpop.f32.mrf.mxu3 }
 0x22c   :  { %v2567_v31 = vpop.f32.mrf.mxu3 }
 0x22d   :  { %v2568_v33 = vadd.f32 %v2567_v31, %v2555_v27 }
 0x22f   :  { %v2572_v36 = vmax.f32 %v2568_v33, 0.0 }
 0x231   :  { %v2574_v37 = vpack.c.bf16 %v2572_v36, %v2572_v36 }
 0x233   :  { %2728 = vmatmul.bf16.vlgmr.msra.gmra.mxu1 %v2574_v37 }
 0x234   :  { %v2569_v38 = vpop.f32.mrf.mxu3 }
 0x2a0   :  { %v2716_v39 = vpop.f32.mrf.mxu0 }
 0x2a1   :  { %v2717_v42 = vadd.f32 %v4423_v41, %v2716_v39 }
 0x2a8   :  { %v2718_v40 = vpop.f32.mrf.mxu0 }
 0x2b0   :  { %v2729_v3 = vpop.f32.mrf.mxu1 }
 0x2b1   :  { %v2730_v43 = vadd.f32 %v2729_v3, %v2717_v42 }
 0x2b3   :  { %2734 = vst.msk [vmem:[%s6216_s8] sm:$0x3] %vm2733_vm3, %v2730_v43 }
 0x2b8   :  { %v2731_v21 = vpop.f32.mrf.mxu1 }
 0x2b9   :  { %2739 = vsyncpa [#allocation3], 1 }

// kernel: tnet_forward.2
= control target key start
LH: loop header
LB: loop body
LE: loop exit
PB: predicated region body
PF: predicated region fallthrough
CT: control target
= control target key end

     0   :  { %11 = vsyncpa [#allocation3], 0  ;;  %s7033_s21 = smov 0   ;;  %s10917_s0 = inlined_call_operand.vmem [shape: f32[2,3,1024], index: 0, kind: input, shape index: {}]   ;;  %s10918_s1 = inlined_call_operand.vmem [shape: f32[64,3], index: 1, kind: input, shape index: {}]   ;;  %s10919_s2 = inlined_call_operand.vmem [shape: bf16[128,64], index: 2, kind: input, shape index: {}]   ;;  %s10920_s3 = inlined_call_operand.hbm [shape: bf16[1024,128], index: 3, kind: input, shape index: {}]   ;;  %s10921_s4 = inlined_call_operand.vmem [shape: f32[64,1], index: 4, kind: input, shape index: {}]   ;;  %s10922_s5 = inlined_call_operand.vmem [shape: f32[128,1], index: 5, kind: input, shape index: {}]   ;;  %s10923_s6 = inlined_call_operand.vmem [shape: f32[2,1024,1], index: 6, kind: output, shape index: {}]  }
   0x1 LB: > { %s196_s24 = sshll.u32 %s10920_s3, 4  ;;  %s7042_s25 = sadd.s32 4294967295, %s6990_s21   ;;  %s6990_s21 = sphi %s7033_s21, %s17_s21   ;;  %s197_s24 = int_to_ptr.hbm [resolvable:$true] %s196_s24 }
   0x2   : > { %p6461_p0 = scmp.ge.s32.totalorder %s6990_s21, 1  ;;  %p179_p1 = scmp.lt.s32.totalorder %s6990_s21, 3 }
   0x3   : > { %p6906_p2 = scmp.eq.s32.totalorder %s7042_s25, 0  ;;  %s6992_s26 = smov [#allocation2]  }
   0x4   : > { %p180_p3 = pnand %p6461_p0, %p179_p1  ;;  %s198_s27 = sshll.u32 %s6992_s26, 4  ;;  %s199_s27 = int_to_ptr.vmem [resolvable:$true] %s198_s27 }
   0x5   : > { %s6993_s28 = smov 64   ;;  %s6994_s29 = smov 4  }
   0x6   : > { %p6902_p4 = pneg %p180_p3  ;;  %228 = sbr.rel (%p180_p3) target bundleno = 2822 (0xb06), region = 44 }
   0x8   : > { %p6903_p5 = pnand %p6906_p2, %p6902_p4 }
   0xa   : > { %6905 = dma.hbm_to_vmem [thread:$0]  (!%p6903_p5), %s197_s24, 8192, %s199_s27, [#allocation3], %s6993_s28, %s6993_s28, %s6994_s29  }
   0xb   : > { %6985 = dma.done.wait (%p6906_p2), [#allocation3], 8192  }
   0xc   : > { %6987 = vsyncadd (%p6906_p2), [#allocation3], 4294959104  ;;  %v6995_v0 = vmov 0   ;;  %v6996_v1 = vmov 1   ;;  %v288_v2 = vld [vmem:[%s10921_s4 + $0x30] sm:$0xff]  ;;  %v289_v4 = vld [vmem:[%s10921_s4 + $0x38] sm:$0xff] }
   0xd   : > { %6923 = vset.pattern.permute.xlu1 %v6995_v0  ;;  %6922 = vset.pattern.permute.xlu0 %v6995_v0  ;;  %v280_v3 = vld [vmem:[%s10918_s1 + $0x30] sm:$0xff]  ;;  %v281_v5 = vld [vmem:[%s10918_s1 + $0x38] sm:$0xff]  ;;  %v279_v6 = vld [vmem:[%s10918_s1 + $0x28] sm:$0xff]  ;;  %v6997_v8 = vmov 2   ;;  %p259_p6 = scmp.lt.s32.totalorder %s7042_s25, 1  ;;  %vm1142_vm0 = vcmask 523264  }
   0xe   : > { %6924 = vset.pattern.permute.xlu2 %v6996_v1  ;;  %454 = vperm.xlu1 %6923, %v288_v2   ;;  %v278_v7 = vld [vmem:[%s10918_s1 + $0x20] sm:$0xff]  ;;  %v276_v10 = vld [vmem:[%s10918_s1 + $0x10] sm:$0xff]  ;;  %v287_v11 = vld [vmem:[%s10921_s4 + $0x28] sm:$0xff]  ;;  %vm2879_vm1 = vcmask 7168  }
   0xf   : > { %322 = vperm.xlu0 %6922, %v280_v3   ;;  %551 = vperm.xlu2 %6924, %v280_v3   ;;  %v286_v9 = vld [vmem:[%s10921_s4 + $0x20] sm:$0xff]  ;;  %v285_v12 = vld [vmem:[%s10921_s4 + $0x18] sm:$0xff]  ;;  %v284_v15 = vld [vmem:[%s10921_s4 + $0x10] sm:$0xff]  ;;  %s11962_s25 = smov (!%p259_p6, %s7042_s25), 1 }
  0x10   : > { %v274_v13 = vld [vmem:[%s10918_s1] sm:$0xff]  ;;  %v277_v14 = vld [vmem:[%s10918_s1 + $0x18] sm:$0xff]  ;;  %v275_v16 = vld [vmem:[%s10918_s1 + $0x8] sm:$0xff]  ;;  %s6824_s16 = sshll.u32 %s11962_s25, 5  ;;  %s6825_s26 = sshll.u32 %s11962_s25, 10 }
  0x11   : > { %v282_v17 = vld [vmem:[%s10921_s4] sm:$0xff]  ;;  %v283_v18 = vld [vmem:[%s10921_s4 + $0x8] sm:$0xff]  ;;  %s7120_s19 = scalar_lea.vmem %s10917_s0, %s6824_s16  ;;  %s9139_s29 = scalar_lea.vmem %s10923_s6, %s6825_s26 }
  0x12   : > { %v270_v20 = vld [vmem:[%s7120_s19] sm:$0x77]  ;;  %v271_v21 = vld [vmem:[%s7120_s19 + $0x8] sm:$0x77]  ;;  %v272_v30 = vld [vmem:[%s7120_s19 + $0x10] sm:$0x77] }
  0x13   : > { %v334_v22 = vperm.slane %v270_v20, 0  ;;  %v335_v24 = vperm.slane %v270_v20, 4  ;;  %v336_v25 = vperm.slane %v271_v21, 0  ;;  %v337_v26 = vperm.slane %v271_v21, 4  ;;  %v273_v46 = vld [vmem:[%s7120_s19 + $0x18] sm:$0x77] }
  0x14   : > { %v558_v27 = vperm.slane %v270_v20, 1  ;;  %v559_v28 = vperm.slane %v270_v20, 5  ;;  %v560_v29 = vperm.slane %v271_v21, 1  ;;  %v742_v32 = vperm.slane %v270_v20, 2 }
  0x15   : > { %v7128_v31 = vperm.slane %v334_v22, 0  ;;  %v561_v33 = vperm.slane %v271_v21, 5  ;;  %v7130_v34 = vperm.slane %v335_v24, 0  ;;  %v743_v35 = vperm.slane %v270_v20, 6 }
  0x16   : > { %459 = vperm.xlu1 %6923, %v289_v4   ;;  %v744_v36 = vperm.slane %v271_v21, 2  ;;  %v562_v37 = vperm.slane %v272_v30, 1  ;;  %v7133_v38 = vperm.slane %v336_v25, 0  ;;  %v7135_v39 = vperm.slane %v337_v26, 0 }
  0x17   : > { %327 = vperm.xlu0 %6922, %v281_v5   ;;  %555 = vperm.xlu2 %6924, %v281_v5   ;;  %v745_v40 = vperm.slane %v271_v21, 6  ;;  %v338_v41 = vperm.slane %v272_v30, 0  ;;  %v7137_v42 = vperm.slane %v558_v27, 1  ;;  %v7139_v43 = vperm.slane %v559_v28, 1 }
  0x18   : > { %v7141_v44 = vperm.slane %v560_v29, 1  ;;  %v746_v45 = vperm.slane %v272_v30, 2  ;;  %v7144_v47 = vperm.slane %v742_v32, 2  ;;  %v7146_v48 = vperm.slane %v561_v33, 1 }
  0x19   : > { %v563_v49 = vperm.slane %v272_v30, 5  ;;  %v564_v50 = vperm.slane %v273_v46, 1  ;;  %v7148_v51 = vperm.slane %v743_v35, 2  ;;  %v7150_v52 = vperm.slane %v744_v36, 2 }
  0x1a   : > { %11220 = vst [vmem:[#allocation5_spill] sm:$0xff] %v7144_v47  ;;  %v7152_v53 = vperm.slane %v562_v37, 1  ;;  %v339_v54 = vperm.slane %v272_v30, 4  ;;  %v7156_v56 = vperm.slane %v745_v40, 2  ;;  %v7158_v57 = vperm.slane %v338_v41, 0 }
  0x1b   : > { %11221 = vst [vmem:[#allocation6_spill] sm:$0xff] %v7148_v51  ;;  %v340_v58 = vperm.slane %v273_v46, 0  ;;  %v341_v59 = vperm.slane %v273_v46, 4  ;;  %v7164_v62 = vperm.slane %v746_v45, 2  ;;  %v565_v63 = vperm.slane %v273_v46, 5 }
  0x1c   : > { %11222 = vst [vmem:[#allocation7_spill] sm:$0xff] %v7150_v52  ;;  %v7168_v2 = vperm.slane %v564_v50, 1 }
  0x1d   : > { %11223 = vst [vmem:[#allocation8_spill] sm:$0xff] %v7156_v56 }
  0x1e   : > { %317 = vperm.xlu1 %6923, %v279_v6   ;;  %11224 = vst [vmem:[#allocation9_spill] sm:$0xff] %v7158_v57 }
  0x1f   : > { %312 = vperm.xlu0 %6922, %v278_v7   ;;  %6925 = vset.pattern.permute.xlu2 %v6997_v8  ;;  %11225 = vst [vmem:[#allocation10_spill] sm:$0xff] %v7164_v62 }
  0x20   : > { %735 = vperm.xlu2 %6925, %v280_v3   ;;  %11227 = vst [vmem:[#allocation12_spill] sm:$0xff] %v7168_v2  ;;  %v748_v3 = vperm.slane %v273_v46, 2 }
  0x22   : > { %v7206_v22 = vperm.slane %v748_v3, 2 }
  0x24   : > { %11233 = vst [vmem:[#allocation18_spill] sm:$0xff] %v7206_v22 }
  0x26   : > { %444 = vperm.xlu1 %6923, %v286_v9  }
  0x27   : > { %302 = vperm.xlu0 %6922, %v276_v10  }
  0x28   : > { %6926 = vset.pattern.permute.xlu2 %v6995_v0 }
  0x29   : > { %449 = vperm.xlu2 %6926, %v287_v11   ;;  %v7188_v11 = vperm.slane %v341_v59, 0 }
  0x2b   : > { %11230 = vst [vmem:[#allocation15_spill] sm:$0xff] %v7188_v11 }
  0x2e   : > { %6927 = vset.pattern.permute.xlu1 %v6996_v1 }
  0x2f   : > { %439 = vperm.xlu0 %6922, %v285_v12   ;;  %543 = vperm.xlu1 %6927, %v278_v7  }
  0x31   : > { %6928 = vset.pattern.permute.xlu2 %v6996_v1 }
  0x32   : > { %547 = vperm.xlu2 %6928, %v279_v6  }
  0x37   : > { %292 = vperm.xlu0 %6922, %v274_v13   ;;  %6929 = vset.pattern.permute.xlu1 %v6995_v0 }
  0x38   : > { %307 = vperm.xlu1 %6929, %v277_v14  }
  0x3a   : > { %6930 = vset.pattern.permute.xlu2 %v6997_v8 }
  0x3b   : > { %727 = vperm.xlu2 %6930, %v278_v7   ;;  %v7176_v7 = vperm.slane %v339_v54, 0 }
  0x3d   : > { %11228 = vst [vmem:[#allocation13_spill] sm:$0xff] %v7176_v7 }
  0x3f   : > { %6935 = vset.pattern.permute.xlu0 %v6997_v8 }
  0x40   : > { %739 = vperm.xlu0 %6935, %v281_v5   ;;  %6931 = vset.pattern.permute.xlu1 %v6997_v8 }
  0x41   : > { %731 = vperm.xlu1 %6931, %v279_v6  }
  0x43   : > { %6932 = vset.pattern.permute.xlu2 %v6995_v0 }
  0x44   : > { %434 = vperm.xlu2 %6932, %v284_v15   ;;  %v749_v15 = vperm.slane %v273_v46, 6 }
  0x48   : > { %723 = vperm.xlu0 %6935, %v277_v14  }
  0x49   : > { %6933 = vset.pattern.permute.xlu1 %v6996_v1 }
  0x4a   : > { %535 = vperm.xlu1 %6933, %v276_v10  }
  0x4c   : > { %6934 = vset.pattern.permute.xlu2 %v6996_v1 }
  0x4d   : > { %539 = vperm.xlu2 %6934, %v277_v14   ;;  %v7198_v14 = vperm.slane %v565_v63, 1 }
  0x4f   : > { %11231 = vst [vmem:[#allocation16_spill] sm:$0xff] %v7198_v14 }
  0x50   : > { %711 = vperm.xlu0 %6935, %v274_v13  }
  0x52   : > { %6936 = vset.pattern.permute.xlu1 %v6995_v0 }
  0x53   : > { %297 = vperm.xlu1 %6936, %v275_v16  }
  0x55   : > { %6937 = vset.pattern.permute.xlu2 %v6997_v8 }
  0x56   : > { %719 = vperm.xlu2 %6937, %v276_v10   ;;  %v7186_v10 = vperm.slane %v340_v58, 0 }
  0x58   : > { %6943 = vset.pattern.permute.xlu0 %v6995_v0  ;;  %11229 = vst [vmem:[#allocation14_spill] sm:$0xff] %v7186_v10 }
  0x5b   : > { %424 = vperm.xlu1 %6936, %v282_v17  }
  0x5e   : > { %6938 = vset.pattern.permute.xlu2 %v6995_v0 }
  0x5f   : > { %429 = vperm.xlu2 %6938, %v283_v18  }
  0x63   : > { %6939 = vset.pattern.permute.xlu1 %v6996_v1 }
  0x64   : > { %527 = vperm.xlu1 %6939, %v274_v13  }
  0x67   : > { %6940 = vset.pattern.permute.xlu2 %v6996_v1  ;;  %v747_v1 = vperm.slane %v272_v30, 6 }
  0x68   : > { %531 = vperm.xlu2 %6940, %v275_v16  }
  0x69   : > { %v7115_v19 = vpop.permute.xlu2 %551  ;;  %v7202_v20 = vperm.slane %v747_v1, 2 }
  0x6a   : > { %v630_v60 = vmul.f32 %v7137_v42, %v7115_v19  ;;  %v631_v61 = vmul.f32 %v7139_v43, %v7115_v19  ;;  %v632_v4 = vmul.f32 %v7141_v44, %v7115_v19  ;;  %v633_v5 = vmul.f32 %v7146_v48, %v7115_v19 }
  0x6b   : > { %v634_v6 = vmul.f32 %v7152_v53, %v7115_v19  ;;  %11232 = vst [vmem:[#allocation17_spill] sm:$0xff] %v7202_v20  ;;  %v636_v21 = vmul.f32 %v7168_v2, %v7115_v19  ;;  %v637_v46 = vmul.f32 %v7198_v14, %v7115_v19 }
  0x6c   : > { %6941 = vset.pattern.permute.xlu1 %v6997_v8 }
  0x6d   : > { %715 = vperm.xlu1 %6941, %v275_v16  }
  0x70   : > { %6942 = vset.pattern.permute.xlu2 %v6995_v0 }
  0x71   : > { %v7125_v23 = vpop.permute.xlu2 %555 }
  0x72   : > { %v7180_v8 = vmul.f32 %v7137_v42, %v7125_v23  ;;  %v7184_v9 = vmul.f32 %v7139_v43, %v7125_v23  ;;  %v7192_v12 = vmul.f32 %v7141_v44, %v7125_v23  ;;  %v7196_v13 = vmul.f32 %v7146_v48, %v7125_v23 }
  0x75   : > { %6944 = vset.pattern.permute.xlu1 %v6995_v0  ;;  %v7166_v0 = vperm.slane %v563_v49, 1  ;;  %v7220_v49 = vperm.slane %v749_v15, 2 }
  0x77   : > { %11226 = vst [vmem:[#allocation11_spill] sm:$0xff] %v7166_v0  ;;  %v635_v18 = vmul.f32 %v7166_v0, %v7115_v19 }
  0x7a   : > { %v7154_v55 = vpop.permute.xlu2 %735 }
  0x7b   : > { %v814_v50 = vmul.f32 %v7144_v47, %v7154_v55  ;;  %v815_v54 = vmul.f32 %v7148_v51, %v7154_v55  ;;  %v816_v3 = vmul.f32 %v7150_v52, %v7154_v55 }
  0x80   : > { %v455_v16 = vpop.permute.xlu1 %454 }
  0x81   : > { %v323_v17 = vpop.permute.xlu0 %322 }
  0x82   : > { %v406_v24 = vmul.f32 %v7128_v31, %v323_v17  ;;  %v407_v25 = vmul.f32 %v7130_v34, %v323_v17  ;;  %v408_v26 = vmul.f32 %v7133_v38, %v323_v17  ;;  %v409_v27 = vmul.f32 %v7135_v39, %v323_v17 }
  0x83   : > { %v410_v28 = vmul.f32 %v7158_v57, %v323_v17  ;;  %v411_v29 = vmul.f32 %v7176_v7, %v323_v17  ;;  %v412_v30 = vmul.f32 %v7186_v10, %v323_v17  ;;  %v413_v32 = vmul.f32 %v7188_v11, %v323_v17  ;;  %v7216_v33 = vpop.permute.xlu2 %449 }
  0x84   : > { %v510_v35 = vadd.f32 %v455_v16, %v406_v24  ;;  %v511_v36 = vadd.f32 %v455_v16, %v407_v25  ;;  %v512_v37 = vadd.f32 %v455_v16, %v408_v26  ;;  %v513_v40 = vadd.f32 %v455_v16, %v409_v27 }
  0x85   : > { %v514_v41 = vadd.f32 %v455_v16, %v410_v28  ;;  %v515_v45 = vadd.f32 %v455_v16, %v411_v29  ;;  %v516_v58 = vadd.f32 %v455_v16, %v412_v30  ;;  %v517_v59 = vadd.f32 %v455_v16, %v413_v32 }
  0x86   : > { %v694_v63 = vadd.f32 %v630_v60, %v510_v35  ;;  %v695_v1 = vadd.f32 %v631_v61, %v511_v36  ;;  %v817_v17 = vmul.f32 %v7156_v56, %v7154_v55  ;;  %v696_v24 = vadd.f32 %v632_v4, %v512_v37 }
  0x87   : > { %v697_v19 = vadd.f32 %v633_v5, %v513_v40  ;;  %v698_v15 = vadd.f32 %v634_v6, %v514_v41  ;;  %v818_v25 = vmul.f32 %v7164_v62, %v7154_v55  ;;  %v699_v28 = vadd.f32 %v635_v18, %v515_v45 }
  0x88   : > { %v7232_v26 = vpop.permute.xlu1 %459  ;;  %v819_v60 = vmul.f32 %v7202_v20, %v7154_v55  ;;  %v820_v61 = vmul.f32 %v7206_v22, %v7154_v55  ;;  %v821_v16 = vmul.f32 %v7220_v49, %v7154_v55  ;;  %v700_v6 = vadd.f32 %v636_v21, %v516_v58 }
  0x89   : > { %v328_v27 = vpop.permute.xlu0 %327  ;;  %v701_v29 = vadd.f32 %v637_v46, %v517_v59  ;;  %v7242_v30 = vadd.f32 %v814_v50, %v694_v63  ;;  %v7244_v32 = vadd.f32 %v815_v54, %v695_v1  ;;  %v7248_v36 = vadd.f32 %v816_v3, %v696_v24 }
  0x8a   : > { %v414_v4 = vmul.f32 %v7128_v31, %v328_v27  ;;  %v415_v5 = vmul.f32 %v7130_v34, %v328_v27  ;;  %v416_v18 = vmul.f32 %v7133_v38, %v328_v27  ;;  %v417_v35 = vmul.f32 %v7135_v39, %v328_v27 }
  0x8b   : > { %11234 = vst [vmem:[#allocation19_spill] sm:$0xff] %v7242_v30  ;;  %v7250_v37 = vadd.f32 %v817_v17, %v697_v19  ;;  %v642_v55 = vmul.f32 %v7152_v53, %v7125_v23  ;;  %v7254_v40 = vadd.f32 %v818_v25, %v698_v15  ;;  %v643_v46 = vmul.f32 %v7166_v0, %v7125_v23 }
  0x8c   : > { %11235 = vst [vmem:[#allocation20_spill] sm:$0xff] %v7244_v32  ;;  %v7256_v41 = vpop.permute.xlu2 %547  ;;  %v518_v21 = vadd.f32 %v7232_v26, %v414_v4  ;;  %v519_v45 = vadd.f32 %v7232_v26, %v415_v5  ;;  %v7262_v50 = vadd.f32 %v819_v60, %v699_v28  ;;  %v644_v54 = vmul.f32 %v7168_v2, %v7125_v23 }
  0x8d   : > { %11236 = vst [vmem:[#allocation21_spill] sm:$0xff] %v7248_v36  ;;  %v7266_v58 = vadd.f32 %v820_v61, %v700_v6  ;;  %v645_v59 = vmul.f32 %v7198_v14, %v7125_v23  ;;  %v7270_v63 = vadd.f32 %v821_v16, %v701_v29  ;;  %v520_v17 = vadd.f32 %v7232_v26, %v416_v18 }
  0x8e   : > { %11237 = vst [vmem:[#allocation22_spill] sm:$0xff] %v7250_v37  ;;  %v521_v24 = vadd.f32 %v7232_v26, %v417_v35  ;;  %v418_v25 = vmul.f32 %v7158_v57, %v328_v27  ;;  %v7285_v61 = vadd.f32 %v7180_v8, %v518_v21  ;;  %v7288_v16 = vadd.f32 %v7184_v9, %v519_v45 }
  0x8f   : > { %11238 = vst [vmem:[#allocation23_spill] sm:$0xff] %v7254_v40  ;;  %v419_v4 = vmul.f32 %v7176_v7, %v328_v27  ;;  %v622_v29 = vmul.f32 %v7137_v42, %v7256_v41  ;;  %v623_v8 = vmul.f32 %v7139_v43, %v7256_v41  ;;  %v7301_v35 = vadd.f32 %v7192_v12, %v520_v17 }
  0x90   : > { %11239 = vst [vmem:[#allocation24_spill] sm:$0xff] %v7262_v50  ;;  %v7280_v60 = vpop.permute.xlu1 %317  ;;  %v7304_v9 = vadd.f32 %v7196_v13, %v521_v24  ;;  %v624_v5 = vmul.f32 %v7141_v44, %v7256_v41  ;;  %v625_v28 = vmul.f32 %v7146_v48, %v7256_v41  ;;  %v420_v15 = vmul.f32 %v7186_v10, %v328_v27 }
  0x91   : > { %11240 = vst [vmem:[#allocation25_spill] sm:$0xff] %v7266_v58  ;;  %v7282_v23 = vpop.permute.xlu0 %312  ;;  %v398_v6 = vmul.f32 %v7128_v31, %v7280_v60  ;;  %v399_v18 = vmul.f32 %v7130_v34, %v7280_v60  ;;  %v400_v21 = vmul.f32 %v7133_v38, %v7280_v60  ;;  %v401_v45 = vmul.f32 %v7135_v39, %v7280_v60 }
  0x92   : > { %11241 = vst [vmem:[#allocation26_spill] sm:$0xff] %v7270_v63  ;;  %v421_v12 = vmul.f32 %v7188_v11, %v328_v27  ;;  %v522_v24 = vadd.f32 %v7232_v26, %v418_v25  ;;  %v523_v19 = vadd.f32 %v7232_v26, %v419_v4  ;;  %v390_v3 = vmul.f32 %v7128_v31, %v7282_v23 }
  0x93   : > { %11242 = vst [vmem:[#allocation27_spill] sm:$0xff] %v7285_v61  ;;  %v502_v17 = vadd.f32 %v7216_v33, %v398_v6  ;;  %v503_v13 = vadd.f32 %v7216_v33, %v399_v18  ;;  %v626_v50 = vmul.f32 %v7152_v53, %v7256_v41  ;;  %v627_v40 = vmul.f32 %v7166_v0, %v7256_v41 }
  0x94   : > { %11243 = vst [vmem:[#allocation28_spill] sm:$0xff] %v7288_v16  ;;  %v391_v6 = vmul.f32 %v7130_v34, %v7282_v23  ;;  %v392_v25 = vmul.f32 %v7133_v38, %v7282_v23  ;;  %v504_v4 = vadd.f32 %v7216_v33, %v400_v21  ;;  %v505_v18 = vadd.f32 %v7216_v33, %v401_v45 }
  0x95   : > { %11244 = vst [vmem:[#allocation29_spill] sm:$0xff] %v7301_v35  ;;  %v728_v27 = vpop.permute.xlu2 %727  ;;  %v393_v1 = vmul.f32 %v7135_v39, %v7282_v23  ;;  %v524_v58 = vadd.f32 %v7232_v26, %v420_v15  ;;  %v525_v63 = vadd.f32 %v7232_v26, %v421_v12  ;;  %v402_v37 = vmul.f32 %v7158_v57, %v7280_v60 }
  0x96   : > { %11245 = vst [vmem:[#allocation30_spill] sm:$0xff] %v7304_v9  ;;  %v7341_v30 = vadd.f32 %v622_v29, %v502_v17  ;;  %v7343_v9 = vadd.f32 %v623_v8, %v503_v13  ;;  %v7345_v21 = vadd.f32 %v642_v55, %v522_v24  ;;  %v7347_v45 = vadd.f32 %v643_v46, %v523_v19 }
  0x97   : > { %v798_v35 = vmul.f32 %v7144_v47, %v728_v27  ;;  %v799_v15 = vmul.f32 %v7148_v51, %v728_v27  ;;  %v394_v26 = vmul.f32 %v7158_v57, %v7282_v23  ;;  %v403_v12 = vmul.f32 %v7176_v7, %v7280_v60 }
  0x98   : > { %v445_v36 = vpop.permute.xlu1 %444  ;;  %11247 = vst [vmem:[#allocation32_spill] sm:$0xff] %v7341_v30  ;;  %v7355_v16 = vadd.f32 %v624_v5, %v504_v4  ;;  %v7358_v29 = vmul.f32 %v7150_v52, %v728_v27  ;;  %v7360_v8 = vadd.f32 %v625_v28, %v505_v18  ;;  %v7363_v55 = vmul.f32 %v7156_v56, %v728_v27 }
  0x99   : > { %v7339_v32 = vpop.permute.xlu0 %302  ;;  %11248 = vst [vmem:[#allocation33_spill] sm:$0xff] %v7343_v9  ;;  %v7365_v46 = vadd.f32 %v644_v54, %v524_v58  ;;  %v7367_v19 = vadd.f32 %v645_v59, %v525_v63  ;;  %v506_v17 = vadd.f32 %v7216_v33, %v402_v37  ;;  %v395_v13 = vmul.f32 %v7176_v7, %v7282_v23 }
  0x9a   : > { %11246 = vst [vmem:[#allocation31_spill] sm:$0xff] %v7339_v32  ;;  %v494_v24 = vadd.f32 %v445_v36, %v390_v3  ;;  %v495_v5 = vadd.f32 %v445_v36, %v391_v6  ;;  %v496_v4 = vadd.f32 %v445_v36, %v392_v25  ;;  %v497_v28 = vadd.f32 %v445_v36, %v393_v1 }
  0x9b   : > { %11249 = vst [vmem:[#allocation34_spill] sm:$0xff] %v7345_v21  ;;  %v374_v18 = vmul.f32 %v7128_v31, %v7339_v32  ;;  %v507_v54 = vadd.f32 %v7216_v33, %v403_v12  ;;  %v404_v58 = vmul.f32 %v7186_v10, %v7280_v60  ;;  %v375_v37 = vmul.f32 %v7130_v34, %v7339_v32 }
  0x9c   : > { %11250 = vst [vmem:[#allocation35_spill] sm:$0xff] %v7347_v45  ;;  %v396_v45 = vmul.f32 %v7186_v10, %v7282_v23  ;;  %v376_v59 = vmul.f32 %v7133_v38, %v7339_v32  ;;  %v377_v63 = vmul.f32 %v7135_v39, %v7339_v32  ;;  %v498_v3 = vadd.f32 %v445_v36, %v394_v26 }
  0x9d   : > { %11251 = vst [vmem:[#allocation36_spill] sm:$0xff] %v7355_v16  ;;  %v7385_v6 = vadd.f32 %v626_v50, %v506_v17  ;;  %v802_v1 = vmul.f32 %v7164_v62, %v728_v27  ;;  %v499_v25 = vadd.f32 %v445_v36, %v395_v13  ;;  %v803_v12 = vmul.f32 %v7202_v20, %v728_v27 }
  0x9e   : > { %11252 = vst [vmem:[#allocation37_spill] sm:$0xff] %v7360_v8  ;;  %v628_v21 = vmul.f32 %v7168_v2, %v7256_v41  ;;  %v804_v8 = vmul.f32 %v7206_v22, %v728_v27  ;;  %v397_v26 = vmul.f32 %v7188_v11, %v7282_v23  ;;  %v7398_v17 = vadd.f32 %v627_v40, %v507_v54 }
  0x9f   : > { %11253 = vst [vmem:[#allocation38_spill] sm:$0xff] %v7365_v46  ;;  %v500_v46 = vadd.f32 %v445_v36, %v396_v45  ;;  %v508_v13 = vadd.f32 %v7216_v33, %v404_v58  ;;  %v629_v20 = vmul.f32 %v7198_v14, %v7256_v41  ;;  %v805_v58 = vmul.f32 %v7220_v49, %v728_v27 }
  0xa0   : > { %11254 = vst [vmem:[#allocation39_spill] sm:$0xff] %v7367_v19  ;;  %v7389_v19 = vpop.permute.xlu2 %434 }
  0xa1   : > { %11255 = vst [vmem:[#allocation40_spill] sm:$0xff] %v7385_v6  ;;  %v7391_v10 = vpop.permute.xlu0 %439  ;;  %v544_v50 = vpop.permute.xlu1 %543  ;;  %v405_v6 = vmul.f32 %v7188_v11, %v7280_v60  ;;  %v7423_v27 = vadd.f32 %v7389_v19, %v375_v37 }
  0xa2   : > { %11256 = vst [vmem:[#allocation41_spill] sm:$0xff] %v7389_v19  ;;  %v614_v45 = vmul.f32 %v7137_v42, %v544_v50  ;;  %v615_v62 = vmul.f32 %v7139_v43, %v544_v50  ;;  %v616_v22 = vmul.f32 %v7141_v44, %v544_v50  ;;  %v617_v16 = vmul.f32 %v7146_v48, %v544_v50 }
  0xa3   : > { %11257 = vst [vmem:[#allocation42_spill] sm:$0xff] %v7391_v10  ;;  %v618_v23 = vmul.f32 %v7152_v53, %v544_v50  ;;  %v619_v40 = vmul.f32 %v7166_v0, %v544_v50  ;;  %v620_v54 = vmul.f32 %v7168_v2, %v544_v50  ;;  %v621_v41 = vmul.f32 %v7198_v14, %v544_v50 }
  0xa4   : > { %11258 = vst [vmem:[#allocation43_spill] sm:$0xff] %v7398_v17  ;;  %v678_v60 = vadd.f32 %v614_v45, %v494_v24  ;;  %v679_v11 = vadd.f32 %v615_v62, %v495_v5  ;;  %v501_v17 = vadd.f32 %v445_v36, %v397_v26  ;;  %v680_v9 = vadd.f32 %v616_v22, %v496_v4 }
  0xa5   : > { %v681_v30 = vadd.f32 %v617_v16, %v497_v28  ;;  %v682_v61 = vadd.f32 %v618_v23, %v498_v3  ;;  %v683_v56 = vadd.f32 %v619_v40, %v499_v25  ;;  %v684_v47 = vadd.f32 %v620_v54, %v500_v46 }
  0xa6   : > { %v7414_v52 = vadd.f32 %v798_v35, %v678_v60  ;;  %v7416_v51 = vadd.f32 %v799_v15, %v679_v11  ;;  %v509_v0 = vadd.f32 %v7216_v33, %v405_v6  ;;  %v7420_v2 = vadd.f32 %v7389_v19, %v374_v18  ;;  %v11280_v18 = vld [vmem:[#allocation27_spill] sm:$0xff] }
  0xa7   : > { %v7426_v62 = vadd.f32 %v7389_v19, %v376_v59  ;;  %v7429_v22 = vadd.f32 %v7389_v19, %v377_v63  ;;  %v7435_v11 = vadd.f32 %v628_v21, %v508_v13  ;;  %v685_v35 = vadd.f32 %v621_v41, %v501_v17 }
  0xa8   : > { %v7433_v16 = vpop.permute.xlu2 %539  ;;  %v378_v33 = vmul.f32 %v7158_v57, %v7339_v32  ;;  %v379_v15 = vmul.f32 %v7176_v7, %v7339_v32  ;;  %v7442_v46 = vadd.f32 %v7358_v29, %v680_v9  ;;  %v7445_v24 = vadd.f32 %v7363_v55, %v681_v30 }
  0xa9   : > { %v7431_v36 = vpop.permute.xlu0 %292  ;;  %11260 = vst [vmem:[#allocation45_spill] sm:$0xff] %v7433_v16  ;;  %v7447_v5 = vadd.f32 %v802_v1, %v682_v61  ;;  %v7449_v4 = vadd.f32 %v803_v12, %v683_v56  ;;  %v7455_v37 = vadd.f32 %v804_v8, %v684_v47  ;;  %v7457_v59 = vadd.f32 %v629_v20, %v509_v0 }
  0xaa   : > { %11259 = vst [vmem:[#allocation44_spill] sm:$0xff] %v7431_v36  ;;  %v7451_v28 = vpop.permute.xlu1 %307  ;;  %v606_v29 = vmul.f32 %v7137_v42, %v7433_v16  ;;  %v607_v47 = vmul.f32 %v7139_v43, %v7433_v16  ;;  %v608_v0 = vmul.f32 %v7141_v44, %v7433_v16  ;;  %v609_v20 = vmul.f32 %v7146_v48, %v7433_v16 }
  0xab   : > { %11261 = vst [vmem:[#allocation46_spill] sm:$0xff] %v7435_v11  ;;  %v382_v9 = vmul.f32 %v7128_v31, %v7451_v28  ;;  %v383_v30 = vmul.f32 %v7130_v34, %v7451_v28  ;;  %v384_v56 = vmul.f32 %v7133_v38, %v7451_v28  ;;  %v385_v61 = vmul.f32 %v7135_v39, %v7451_v28 }
  0xac   : > { %11262 = vst [vmem:[#allocation47_spill] sm:$0xff] %v7451_v28  ;;  %v7482_v1 = vmul.f32 %v7128_v31, %v7431_v36  ;;  %v7486_v25 = vmul.f32 %v7130_v34, %v7431_v36  ;;  %v386_v12 = vmul.f32 %v7158_v57, %v7451_v28  ;;  %v7492_v26 = vmul.f32 %v7133_v38, %v7431_v36 }
  0xad   : > { %11263 = vst [vmem:[#allocation48_spill] sm:$0xff] %v7457_v59  ;;  %v486_v8 = vadd.f32 %v7391_v10, %v382_v9  ;;  %v487_v55 = vadd.f32 %v7391_v10, %v383_v30  ;;  %v488_v63 = vadd.f32 %v7391_v10, %v384_v56  ;;  %v489_v3 = vadd.f32 %v7391_v10, %v385_v61  ;;  %v11274_v30 = vld [vmem:[#allocation5_spill] sm:$0xff]  ;;  %v11275_v61 = vld [vmem:[#allocation6_spill] sm:$0xff] }
  0xae   : > { %11264 = vst [vmem:[#allocation49_spill] sm:$0xff] %v7482_v1  ;;  %v7496_v50 = vmul.f32 %v7135_v39, %v7431_v36  ;;  %v7498_v17 = vadd.f32 %v805_v58, %v685_v35  ;;  %v7501_v13 = vadd.f32 %v7389_v19, %v378_v33  ;;  %v7511_v60 = vmul.f32 %v7152_v53, %v7433_v16  ;;  %v11282_v36 = vld [vmem:[#allocation29_spill] sm:$0xff] }
  0xaf   : > { %11265 = vst [vmem:[#allocation50_spill] sm:$0xff] %v7486_v25  ;;  %v670_v23 = vadd.f32 %v606_v29, %v486_v8  ;;  %v7505_v40 = vadd.f32 %v607_v47, %v487_v55  ;;  %v7507_v54 = vadd.f32 %v608_v0, %v488_v63  ;;  %v7515_v9 = vadd.f32 %v609_v20, %v489_v3  ;;  %v11276_v47 = vld [vmem:[#allocation7_spill] sm:$0xff]  ;;  %v11277_v20 = vld [vmem:[#allocation8_spill] sm:$0xff]  ;;  %v11287_v25 = vld [vmem:[#allocation37_spill] sm:$0xff] }
  0xb0   : > { %11266 = vst [vmem:[#allocation51_spill] sm:$0xff] %v7492_v26  ;;  %v7503_v45 = vpop.permute.xlu2 %719  ;;  %v7518_v58 = vadd.f32 %v7391_v10, %v386_v12  ;;  %v7522_v35 = vmul.f32 %v7176_v7, %v7451_v28  ;;  %v7525_v33 = vadd.f32 %v7389_v19, %v379_v15  ;;  %v11278_v12 = vld [vmem:[#allocation11_spill] sm:$0xff]  ;;  %v11281_v7 = vld [vmem:[#allocation28_spill] sm:$0xff]  ;;  %v11283_v19 = vld [vmem:[#allocation30_spill] sm:$0xff] }
  0xb1   : > { %11267 = vst [vmem:[#allocation52_spill] sm:$0xff] %v7496_v50  ;;  %v7539_v63 = vmul.f32 %v11274_v30, %v7503_v45  ;;  %v7543_v15 = vmul.f32 %v11275_v61, %v7503_v45  ;;  %v7547_v3 = vmul.f32 %v11276_v47, %v7503_v45  ;;  %v7551_v6 = vmul.f32 %v11278_v12, %v7433_v16  ;;  %v11286_v12 = vld [vmem:[#allocation36_spill] sm:$0xff] }
  0xb2   : > { %11268 = vst [vmem:[#allocation53_spill] sm:$0xff] %v7498_v17  ;;  %v7513_v41 = vpop.permute.xlu0 %739  ;;  %v11294_v17 = vld [vmem:[#allocation22_spill] sm:$0xff] }
  0xb3   : > { %11269 = vst [vmem:[#allocation54_spill] sm:$0xff] %v7501_v13  ;;  %v822_v56 = vmul.f32 %v11274_v30, %v7513_v41  ;;  %v823_v29 = vmul.f32 %v11275_v61, %v7513_v41  ;;  %v824_v0 = vmul.f32 %v11276_v47, %v7513_v41  ;;  %v825_v8 = vmul.f32 %v11277_v20, %v7513_v41  ;;  %v7535_v55 = vpop.permute.xlu1 %731 }
  0xb4   : > { %11270 = vst [vmem:[#allocation55_spill] sm:$0xff] %v7511_v60  ;;  %v806_v32 = vmul.f32 %v11274_v30, %v7535_v55  ;;  %v808_v50 = vmul.f32 %v11276_v47, %v7535_v55  ;;  %v809_v16 = vmul.f32 %v11277_v20, %v7535_v55  ;;  %v11295_v59 = vmax.f32 %v11294_v17, 0.0 }
  0xb5   : > { %11271 = vst [vmem:[#allocation56_spill] sm:$0xff] %v7518_v58  ;;  %v886_v21 = vadd.f32 %v822_v56, %v11280_v18  ;;  %v887_v57 = vadd.f32 %v823_v29, %v11281_v7  ;;  %v888_v14 = vadd.f32 %v824_v0, %v11282_v36  ;;  %v889_v28 = vadd.f32 %v825_v8, %v11283_v19  ;;  %v1021_v19 = vld [vmem:[%s10922_s5 + $0x78] sm:$0xff]  ;;  %v11285_v0 = vld [vmem:[#allocation33_spill] sm:$0xff]  ;;  %v11288_v58 = vld [vmem:[#allocation19_spill] sm:$0xff] }
  0xb6   : > { %11272 = vst [vmem:[#allocation57_spill] sm:$0xff] %v7522_v35  ;;  %v11284_v36 = vld [vmem:[#allocation32_spill] sm:$0xff]  ;;  %v872_v26 = vadd.f32 %v808_v50, %v11286_v12  ;;  %v873_v60 = vadd.f32 %v809_v16, %v11287_v25  ;;  %1099 = vperm.xlu0 %6943, %v1021_v19   ;;  %v11289_v1 = vmax.f32 %v11288_v58, 0.0  ;;  %v929_v16 = vmax.f32 %v7445_v24, 0.0  ;;  %v11297_v24 = vld [vmem:[#allocation10_spill] sm:$0xff] }
  0xb7   : > { %11273 = vst [vmem:[#allocation58_spill] sm:$0xff] %v7525_v33  ;;  %v807_v33 = vmul.f32 %v11275_v61, %v7535_v55  ;;  %v951_v18 = vmax.f32 %v887_v57, 0.0  ;;  %v952_v56 = vmax.f32 %v888_v14, 0.0  ;;  %v953_v7 = vmax.f32 %v889_v28, 0.0  ;;  %v11292_v28 = vld [vmem:[#allocation21_spill] sm:$0xff]  ;;  %v11298_v58 = vld [vmem:[#allocation26_spill] sm:$0xff] }
  0xb8   : > { %11279 = vst [vmem:[#allocation5_spill] sm:$0xff] %v7551_v6  ;;  %v950_v6 = vmax.f32 %v886_v21, 0.0  ;;  %v870_v29 = vadd.f32 %v806_v32, %v11284_v36  ;;  %v11290_v21 = vld [vmem:[#allocation20_spill] sm:$0xff]  ;;  %v11293_v35 = vmax.f32 %v11292_v28, 0.0  ;;  %v936_v50 = vmax.f32 %v872_v26, 0.0 }
  0xb9   : > { %v871_v8 = vadd.f32 %v807_v33, %v11285_v0  ;;  %v11291_v57 = vmax.f32 %v11290_v21, 0.0  ;;  %v1001_v11 = vpack.c.bf16 %v953_v7, %v11295_v59  ;;  %v937_v12 = vmax.f32 %v873_v60, 0.0 }
  0xba   : > { %v998_v10 = vpack.c.bf16 %v950_v6, %v11289_v1  ;;  %v1000_v13 = vpack.c.bf16 %v952_v56, %v11293_v35  ;;  %v7580_v32 = vpop.permute.xlu0 %723  ;;  %v934_v33 = vmax.f32 %v870_v29, 0.0  ;;  %v7583_v6 = vpop.permute.xlu2 %429  ;;  %v11296_v26 = vmax.f32 %v7414_v52, 0.0 }
  0xbb   : > { %v999_v14 = vpack.c.bf16 %v951_v18, %v11291_v57  ;;  %v935_v36 = vmax.f32 %v871_v8, 0.0  ;;  %v790_v1 = vmul.f32 %v11274_v30, %v7580_v32  ;;  %v791_v25 = vmul.f32 %v11275_v61, %v7580_v32  ;;  %1318 = vmatpush.bf16.msra.mxu3 %v1001_v11 }
  0xbc   : > { %1171 = vmatpush.bf16.msra.mxu0 %v998_v10  ;;  %v792_v59 = vmul.f32 %v11276_v47, %v7580_v32  ;;  %1269 = vmatpush.bf16.msra.mxu2 %v1000_v13  ;;  %v990_v17 = vpack.c.bf16 %v934_v33, %v11296_v26  ;;  %v785_v10 = vmul.f32 %v11277_v20, %v7503_v45  ;;  %v949_v35 = vmax.f32 %v11298_v58, 0.0  ;;  %v7598_v18 = vpop.permute.xlu1 %535  ;;  %v11321_v58 = vld [vmem:[#allocation54_spill] sm:$0xff] }
  0xbd   : > { %1220 = vmatpush.bf16.msra.mxu1 %v999_v14  ;;  %v826_v60 = vmul.f32 %v11297_v24, %v7513_v41  ;;  %v11299_v56 = vmax.f32 %v7416_v51, 0.0  ;;  %v11300_v19 = vmax.f32 %v7442_v46, 0.0  ;;  %v993_v11 = vpack.c.bf16 %v937_v12, %v929_v16  ;;  %v11301_v12 = vld [vmem:[#allocation17_spill] sm:$0xff] }
  0xbe   : > { %v854_v29 = vadd.f32 %v790_v1, %v670_v23  ;;  %v598_v52 = vmul.f32 %v7137_v42, %v7598_v18  ;;  %v599_v0 = vmul.f32 %v7139_v43, %v7598_v18  ;;  %v600_v8 = vmul.f32 %v7141_v44, %v7598_v18 }
  0xbf   : > { %v991_v7 = vpack.c.bf16 %v935_v36, %v11299_v56  ;;  %v992_v13 = vpack.c.bf16 %v936_v50, %v11300_v19  ;;  %v601_v21 = vmul.f32 %v7146_v48, %v7598_v18  ;;  %v855_v51 = vadd.f32 %v791_v25, %v7505_v40  ;;  %1319 = vmatpush.bf16.msra.mxu3 %v993_v11  ;;  %v1014_v36 = vld [vmem:[%s10922_s5 + $0x40] sm:$0xff]  ;;  %v11303_v11 = vld [vmem:[#allocation34_spill] sm:$0xff] }
  0xc0   : > { %1172 = vmatpush.bf16.msra.mxu0 %v990_v17  ;;  %v856_v46 = vadd.f32 %v792_v59, %v7507_v54  ;;  %v793_v23 = vmul.f32 %v11277_v20, %v7580_v32  ;;  %v930_v57 = vmax.f32 %v7447_v5, 0.0  ;;  %v662_v14 = vadd.f32 %v598_v52, %v7420_v2  ;;  %1064 = vperm.xlu0 %6943, %v1014_v36   ;;  %v11302_v2 = vld [vmem:[#allocation18_spill] sm:$0xff] }
  0xc1   : > { %1221 = vmatpush.bf16.msra.mxu1 %v991_v7  ;;  %1270 = vmatpush.bf16.msra.mxu2 %v992_v13  ;;  %v663_v28 = vadd.f32 %v599_v0, %v7423_v27  ;;  %v664_v33 = vadd.f32 %v600_v8, %v7426_v62  ;;  %v931_v40 = vmax.f32 %v7449_v4, 0.0  ;;  %v665_v54 = vadd.f32 %v601_v21, %v7429_v22  ;;  %v11304_v8 = vld [vmem:[#allocation35_spill] sm:$0xff]  ;;  %v11305_v21 = vld [vmem:[#allocation38_spill] sm:$0xff] }
  0xc2   : > { %v857_v50 = vadd.f32 %v793_v23, %v7515_v9  ;;  %v827_v16 = vmul.f32 %v11301_v12, %v7513_v41  ;;  %v828_v1 = vmul.f32 %v11302_v2, %v7513_v41  ;;  %v846_v27 = vadd.f32 %v7539_v63, %v662_v14  ;;  %v7635_v56 = vpop.permute.xlu0 %711  ;;  %v7638_v0 = vpop.permute.xlu2 %531 }
  0xc3   : > { %v847_v62 = vadd.f32 %v7543_v15, %v663_v28  ;;  %v848_v25 = vadd.f32 %v7547_v3, %v664_v33  ;;  %v829_v59 = vmul.f32 %v7220_v49, %v7513_v41  ;;  %v918_v26 = vmax.f32 %v854_v29, 0.0 }
  0xc4   : > { %v919_v22 = vmax.f32 %v855_v51, 0.0  ;;  %v920_v17 = vmax.f32 %v856_v46, 0.0  ;;  %v849_v9 = vadd.f32 %v785_v10, %v665_v54  ;;  %v910_v7 = vmax.f32 %v846_v27, 0.0 }
  0xc5   : > { %v911_v19 = vmax.f32 %v847_v62, 0.0  ;;  %v912_v13 = vmax.f32 %v848_v25, 0.0  ;;  %v890_v52 = vadd.f32 %v826_v60, %v11303_v11  ;;  %v921_v15 = vmax.f32 %v857_v50, 0.0  ;;  %v7642_v41 = vpop.permute.xlu1 %297  ;;  %v11306_v25 = vld [vmem:[#allocation39_spill] sm:$0xff] }
  0xc6   : > { %v913_v63 = vmax.f32 %v849_v9, 0.0  ;;  %v891_v3 = vadd.f32 %v827_v16, %v11304_v8  ;;  %v892_v23 = vadd.f32 %v828_v1, %v11305_v21  ;;  %v982_v29 = vpack.c.bf16 %v918_v26, %v910_v7 }
  0xc7   : > { %v983_v51 = vpack.c.bf16 %v919_v22, %v911_v19  ;;  %v984_v10 = vpack.c.bf16 %v920_v17, %v912_v13  ;;  %v7646_v46 = vmul.f32 %v11274_v30, %v7635_v56  ;;  %v366_v60 = vmul.f32 %v7128_v31, %v7642_v41  ;;  %v11307_v13 = vld [vmem:[#allocation23_spill] sm:$0xff] }
  0xc8   : > { %v985_v14 = vpack.c.bf16 %v921_v15, %v913_v63  ;;  %v367_v28 = vmul.f32 %v7130_v34, %v7642_v41  ;;  %v368_v33 = vmul.f32 %v7133_v38, %v7642_v41  ;;  %1173 = vmatpush.bf16.msra.mxu0 %v982_v29  ;;  %v590_v36 = vmul.f32 %v7137_v42, %v7638_v0 }
  0xc9   : > { %1222 = vmatpush.bf16.msra.mxu1 %v983_v51  ;;  %v7658_v54 = vmul.f32 %v11275_v61, %v7635_v56  ;;  %v369_v50 = vmul.f32 %v7135_v39, %v7642_v41  ;;  %v954_v16 = vmax.f32 %v890_v52, 0.0  ;;  %1271 = vmatpush.bf16.msra.mxu2 %v984_v10  ;;  %v591_v31 = vmul.f32 %v7139_v43, %v7638_v0  ;;  %v11309_v10 = vld [vmem:[#allocation24_spill] sm:$0xff] }
  0xca   : > { %1320 = vmatpush.bf16.msra.mxu3 %v985_v14  ;;  %v592_v34 = vmul.f32 %v7141_v44, %v7638_v0  ;;  %v7668_v38 = vmul.f32 %v11276_v47, %v7635_v56  ;;  %v470_v27 = vadd.f32 %v7583_v6, %v366_v60  ;;  %v471_v62 = vadd.f32 %v7583_v6, %v367_v28  ;;  %v1020_v28 = vld [vmem:[%s10922_s5 + $0x70] sm:$0xff] }
  0xcb   : > { %v955_v39 = vmax.f32 %v891_v3, 0.0  ;;  %v893_v26 = vadd.f32 %v829_v59, %v11306_v25  ;;  %v472_v22 = vadd.f32 %v7583_v6, %v368_v33  ;;  %v473_v17 = vadd.f32 %v7583_v6, %v369_v50  ;;  %v11312_v33 = vld [vmem:[#allocation40_spill] sm:$0xff]  ;;  %v11313_v25 = vld [vmem:[#allocation25_spill] sm:$0xff]  ;;  %1094 = vperm.xlu2 %6942, %v1020_v28  }
  0xcc   : > { %v593_v9 = vmul.f32 %v7146_v48, %v7638_v0  ;;  %v956_v7 = vmax.f32 %v892_v23, 0.0  ;;  %v7680_v19 = vmul.f32 %v11277_v20, %v7635_v56  ;;  %v11308_v11 = vmax.f32 %v11307_v13, 0.0 }
  0xcd   : > { %v957_v63 = vmax.f32 %v893_v26, 0.0  ;;  %v810_v59 = vmul.f32 %v11297_v24, %v7535_v55  ;;  %v811_v15 = vmul.f32 %v11301_v12, %v7535_v55  ;;  %v812_v8 = vmul.f32 %v11302_v2, %v7535_v55  ;;  %v7696_v23 = vpop.permute.xlu1 %424 }
  0xce   : > { %v7684_v52 = vpack.c.bf16 %v954_v16, %v11308_v11  ;;  %v813_v3 = vmul.f32 %v7220_v49, %v7535_v55  ;;  %v602_v21 = vmul.f32 %v7152_v53, %v7598_v18  ;;  %v7698_v29 = vadd.f32 %v590_v36, %v470_v27  ;;  %v11318_v11 = vld [vmem:[#allocation46_spill] sm:$0xff] }
  0xcf   : > { %v7700_v51 = vadd.f32 %v591_v31, %v471_v62  ;;  %v11310_v14 = vmax.f32 %v11309_v10, 0.0  ;;  %v874_v50 = vadd.f32 %v810_v59, %v11312_v33  ;;  %v7710_v55 = vadd.f32 %v592_v34, %v472_v22  ;;  %v1018_v22 = vld [vmem:[%s10922_s5 + $0x60] sm:$0xff] }
  0xd0   : > { %v7712_v16 = vadd.f32 %v593_v9, %v473_v17  ;;  %v11314_v26 = vmax.f32 %v11313_v25, 0.0  ;;  %v786_v31 = vmul.f32 %v11297_v24, %v7503_v45  ;;  %v7722_v27 = vpack.c.bf16 %v957_v63, %v949_v35  ;;  %v1013_v17 = vld [vmem:[%s10922_s5 + $0x38] sm:$0xff]  ;;  %v11320_v59 = vld [vmem:[#allocation53_spill] sm:$0xff]  ;;  %1084 = vperm.xlu1 %6944, %v1018_v22   ;;  %v11326_v25 = vld [vmem:[#allocation55_spill] sm:$0xff] }
  0xd1   : > { %v7704_v60 = vpack.c.bf16 %v955_v39, %v11310_v14  ;;  %v938_v62 = vmax.f32 %v874_v50, 0.0  ;;  %v11317_v39 = vld [vmem:[#allocation43_spill] sm:$0xff]  ;;  %v876_v34 = vadd.f32 %v812_v8, %v11318_v11  ;;  %v11319_v9 = vld [vmem:[#allocation48_spill] sm:$0xff]  ;;  %v933_v10 = vmax.f32 %v11320_v59, 0.0  ;;  %1059 = vperm.xlu0 %6943, %v1013_v17   ;;  %v11322_v63 = vld [vmem:[#allocation57_spill] sm:$0xff] }
  0xd2   : > { %v7716_v36 = vpack.c.bf16 %v956_v7, %v11314_v26  ;;  %11316 = vst [vmem:[#allocation8_spill] sm:$0xff] %v7722_v27  ;;  %v875_v13 = vadd.f32 %v811_v15, %v11317_v39  ;;  %v877_v7 = vadd.f32 %v813_v3, %v11319_v9  ;;  %v666_v35 = vadd.f32 %v602_v21, %v11321_v58  ;;  %v11323_v15 = vld [vmem:[#allocation42_spill] sm:$0xff]  ;;  %v11324_v8 = vld [vmem:[#allocation49_spill] sm:$0xff]  ;;  %v11325_v50 = vld [vmem:[#allocation56_spill] sm:$0xff] }
  0xd3   : > { %11311 = vst [vmem:[#allocation6_spill] sm:$0xff] %v7704_v60  ;;  %v491_v14 = vadd.f32 %v11323_v15, %v11322_v63  ;;  %v462_v28 = vadd.f32 %v7696_v23, %v11324_v8  ;;  %v674_v26 = vadd.f32 %v11326_v25, %v11325_v50  ;;  %v794_v39 = vmul.f32 %v11297_v24, %v7580_v32  ;;  %v11327_v3 = vld [vmem:[#allocation50_spill] sm:$0xff]  ;;  %v11328_v22 = vld [vmem:[#allocation51_spill] sm:$0xff]  ;;  %v11330_v58 = vld [vmem:[#allocation52_spill] sm:$0xff] }
  0xd4   : > { %11315 = vst [vmem:[#allocation7_spill] sm:$0xff] %v7716_v36  ;;  %v939_v33 = vmax.f32 %v875_v13, 0.0  ;;  %v463_v11 = vadd.f32 %v7696_v23, %v11327_v3  ;;  %v464_v17 = vadd.f32 %v7696_v23, %v11328_v22  ;;  %v850_v21 = vadd.f32 %v786_v31, %v666_v35  ;;  %v11329_v9 = vld [vmem:[#allocation11_spill] sm:$0xff]  ;;  %v1019_v25 = vld [vmem:[%s10922_s5 + $0x68] sm:$0xff]  ;;  %v11333_v22 = vld [vmem:[#allocation5_spill] sm:$0xff] }
  0xd5   : > { %v603_v59 = vmul.f32 %v11329_v9, %v7598_v18  ;;  %v465_v63 = vadd.f32 %v7696_v23, %v11330_v58  ;;  %v7753_v13 = vpack.c.bf16 %v938_v62, %v930_v57  ;;  %v940_v8 = vmax.f32 %v876_v34, 0.0  ;;  %v11332_v31 = vld [vmem:[#allocation58_spill] sm:$0xff]  ;;  %v11335_v62 = vld [vmem:[#allocation31_spill] sm:$0xff]  ;;  %1089 = vperm.xlu2 %6942, %v1019_v25  }
  0xd6   : > { %v787_v50 = vmul.f32 %v11301_v12, %v7503_v45  ;;  %v941_v3 = vmax.f32 %v877_v7, 0.0  ;;  %v675_v1 = vadd.f32 %v11333_v22, %v491_v14  ;;  %v795_v58 = vmul.f32 %v11301_v12, %v7580_v32  ;;  %v11336_v34 = vld [vmem:[#allocation14_spill] sm:$0xff]  ;;  %v11337_v27 = vld [vmem:[#allocation47_spill] sm:$0xff]  ;;  %v7772_v60 = vpop.permute.xlu1 %527  ;;  %v11338_v14 = vld [vmem:[#allocation12_spill] sm:$0xff] }
  0xd7   : > { %11331 = vst [vmem:[#allocation27_spill] sm:$0xff] %v7753_v13  ;;  %v667_v35 = vadd.f32 %v603_v59, %v11332_v31  ;;  %v7766_v5 = vpack.c.bf16 %v939_v33, %v931_v40  ;;  %v858_v57 = vadd.f32 %v794_v39, %v674_v26  ;;  %v380_v13 = vmul.f32 %v11336_v34, %v11335_v62 }
  0xd8   : > { %v388_v36 = vmul.f32 %v11336_v34, %v11337_v27  ;;  %v914_v7 = vmax.f32 %v850_v21, 0.0  ;;  %v859_v31 = vadd.f32 %v795_v58, %v675_v1  ;;  %v604_v22 = vmul.f32 %v11338_v14, %v7598_v18  ;;  %v11339_v21 = vld [vmem:[#allocation41_spill] sm:$0xff] }
  0xd9   : > { %11334 = vst [vmem:[#allocation28_spill] sm:$0xff] %v7766_v5  ;;  %v851_v59 = vadd.f32 %v787_v50, %v667_v35  ;;  %v582_v4 = vmul.f32 %v7137_v42, %v7772_v60  ;;  %v583_v40 = vmul.f32 %v7139_v43, %v7772_v60  ;;  %v584_v33 = vmul.f32 %v7141_v44, %v7772_v60  ;;  %v11340_v35 = vld [vmem:[#allocation45_spill] sm:$0xff] }
  0xda   : > { %v585_v26 = vmul.f32 %v7146_v48, %v7772_v60  ;;  %v484_v50 = vadd.f32 %v11339_v21, %v380_v13  ;;  %v492_v1 = vadd.f32 %v11323_v15, %v388_v36  ;;  %v612_v25 = vmul.f32 %v11338_v14, %v11340_v35 }
  0xdb   : > { %v915_v39 = vmax.f32 %v851_v59, 0.0  ;;  %v646_v58 = vadd.f32 %v582_v4, %v462_v28  ;;  %v647_v5 = vadd.f32 %v583_v40, %v463_v11  ;;  %v648_v42 = vadd.f32 %v584_v33, %v464_v17 }
  0xdc   : > { %v649_v34 = vadd.f32 %v585_v26, %v465_v63  ;;  %v11341_v43 = vmax.f32 %v7455_v37, 0.0  ;;  %v668_v44 = vadd.f32 %v604_v22, %v484_v50  ;;  %v788_v48 = vmul.f32 %v11302_v2, %v7503_v45  ;;  %v11342_v37 = vld [vmem:[#allocation15_spill] sm:$0xff] }
  0xdd   : > { %v796_v13 = vmul.f32 %v11302_v2, %v7580_v32  ;;  %v830_v36 = vadd.f32 %v7646_v46, %v646_v58  ;;  %v831_v59 = vadd.f32 %v7658_v54, %v647_v5  ;;  %v922_v14 = vmax.f32 %v858_v57, 0.0  ;;  %v1016_v54 = vld [vmem:[%s10922_s5 + $0x50] sm:$0xff] }
  0xde   : > { %v7790_v12 = vpack.c.bf16 %v940_v8, %v11341_v43  ;;  %v923_v28 = vmax.f32 %v859_v31, 0.0  ;;  %v7798_v11 = vpack.c.bf16 %v941_v3, %v933_v10  ;;  %v676_v17 = vadd.f32 %v612_v25, %v492_v1  ;;  %v1008_v10 = vld [vmem:[%s10922_s5 + $0x10] sm:$0xff]  ;;  %1074 = vperm.xlu1 %6944, %v1016_v54  }
  0xdf   : > { %v381_v63 = vmul.f32 %v11342_v37, %v11335_v62  ;;  %v389_v8 = vmul.f32 %v11342_v37, %v11337_v27  ;;  %v832_v22 = vadd.f32 %v7668_v38, %v648_v42  ;;  %v833_v4 = vadd.f32 %v7680_v19, %v649_v34  ;;  %1034 = vperm.xlu0 %6943, %v1008_v10   ;;  %v1017_v38 = vld [vmem:[%s10922_s5 + $0x58] sm:$0xff]  ;;  %v7823_v19 = vpop.permute.xlu1 %715 }
  0xe0   : > { %v7806_v40 = vpack.c.bf16 %v922_v14, %v914_v7  ;;  %v7808_v46 = vpack.c.bf16 %v923_v28, %v915_v39  ;;  %v894_v3 = vmax.f32 %v830_v36, 0.0  ;;  %v895_v5 = vmax.f32 %v831_v59, 0.0  ;;  %v11343_v7 = vld [vmem:[#allocation16_spill] sm:$0xff]  ;;  %1079 = vperm.xlu2 %6942, %v1017_v38   ;;  %v7868_v38 = vld [vmem:[%s10919_s2] sm:$0xff] }
  0xe1   : > { %v7816_v57 = vadd.f32 %v788_v48, %v668_v44  ;;  %v7818_v27 = vadd.f32 %v796_v13, %v676_v17  ;;  %v485_v62 = vadd.f32 %v11339_v21, %v381_v63  ;;  %v493_v34 = vadd.f32 %v11323_v15, %v389_v8  ;;  %v11344_v42 = vld [vmem:[#allocation44_spill] sm:$0xff] }
  0xe2   : > { %v605_v31 = vmul.f32 %v11343_v7, %v7598_v18  ;;  %v613_v14 = vmul.f32 %v11343_v7, %v11340_v35  ;;  %v774_v33 = vmul.f32 %v11274_v30, %v7823_v19  ;;  %v775_v26 = vmul.f32 %v11275_v61, %v7823_v19 }
  0xe3   : > { %v776_v39 = vmul.f32 %v11276_v47, %v7823_v19  ;;  %v777_v21 = vmul.f32 %v11277_v20, %v7823_v19  ;;  %v896_v15 = vmax.f32 %v832_v22, 0.0  ;;  %v897_v50 = vmax.f32 %v833_v4, 0.0  ;;  %v11345_v20 = vld [vmem:[#allocation9_spill] sm:$0xff] }
  0xe4   : > { %v669_v1 = vadd.f32 %v605_v31, %v485_v62  ;;  %v789_v18 = vmul.f32 %v7220_v49, %v7503_v45  ;;  %v838_v35 = vadd.f32 %v774_v33, %v7698_v29  ;;  %v839_v25 = vadd.f32 %v775_v26, %v7700_v51  ;;  %v1015_v45 = vld [vmem:[%s10922_s5 + $0x48] sm:$0xff] }
  0xe5   : > { %v840_v30 = vadd.f32 %v776_v39, %v7710_v55  ;;  %v841_v61 = vadd.f32 %v777_v21, %v7712_v16  ;;  %v677_v58 = vadd.f32 %v613_v14, %v493_v34  ;;  %v797_v47 = vmul.f32 %v7220_v49, %v7580_v32  ;;  %v1007_v16 = vld [vmem:[%s10922_s5 + $0x8] sm:$0xff] }
  0xe6   : > { %v362_v43 = vmul.f32 %v11345_v20, %v11344_v42  ;;  %v370_v44 = vmul.f32 %v11345_v20, %v7642_v41  ;;  %v902_v29 = vmax.f32 %v838_v35, 0.0  ;;  %v903_v51 = vmax.f32 %v839_v25, 0.0  ;;  %1069 = vperm.xlu1 %6944, %v1015_v45   ;;  %v11347_v33 = vld [vmem:[#allocation6_spill] sm:$0xff]  ;;  %v11350_v35 = vld [vmem:[#allocation17_spill] sm:$0xff]  ;;  %v1012_v45 = vld [vmem:[%s10922_s5 + $0x30] sm:$0xff] }
  0xe7   : > { %v904_v48 = vmax.f32 %v840_v30, 0.0  ;;  %v905_v55 = vmax.f32 %v841_v61, 0.0  ;;  %v853_v13 = vadd.f32 %v789_v18, %v669_v1  ;;  %v586_v59 = vmul.f32 %v7152_v53, %v7772_v60  ;;  %1029 = vperm.xlu0 %6943, %v1007_v16   ;;  %v11351_v61 = vld [vmem:[#allocation14_spill] sm:$0xff] }
  0xe8   : > { %v466_v32 = vadd.f32 %v7696_v23, %v362_v43  ;;  %v474_v36 = vadd.f32 %v7583_v6, %v370_v44  ;;  %v974_v28 = vpack.c.bf16 %v902_v29, %v894_v3  ;;  %v975_v17 = vpack.c.bf16 %v903_v51, %v895_v5  ;;  %v11346_v5 = vld [vmem:[#allocation13_spill] sm:$0xff]  ;;  %v11352_v43 = vld [vmem:[#allocation12_spill] sm:$0xff]  ;;  %v11353_v51 = vld [vmem:[#allocation27_spill] sm:$0xff]  ;;  %1054 = vperm.xlu2 %6942, %v1012_v45  }
  0xe9   : > { %v976_v63 = vpack.c.bf16 %v904_v48, %v896_v15  ;;  %v977_v8 = vpack.c.bf16 %v905_v55, %v897_v50  ;;  %v861_v22 = vadd.f32 %v797_v47, %v677_v58  ;;  %v594_v4 = vmul.f32 %v7152_v53, %v7638_v0  ;;  %v11348_v15 = vld [vmem:[#allocation7_spill] sm:$0xff]  ;;  %v11349_v50 = vld [vmem:[#allocation8_spill] sm:$0xff]  ;;  %v1010_v29 = vld [vmem:[%s10922_s5 + $0x20] sm:$0xff] }
  0xea   : > { %v650_v54 = vadd.f32 %v586_v59, %v466_v32  ;;  %v770_v10 = vmul.f32 %v11297_v24, %v7635_v56  ;;  %1174 = vmatpush.bf16.msra.mxu0 %v974_v28  ;;  %1223 = vmatpush.bf16.msra.mxu1 %v975_v17  ;;  %v778_v3 = vmul.f32 %v11297_v24, %v7823_v19  ;;  %v916_v24 = vmax.f32 %v7816_v57, 0.0  ;;  %v11354_v48 = vld [vmem:[#allocation28_spill] sm:$0xff] }
  0xeb   : > { %v363_v62 = vmul.f32 %v11346_v5, %v11344_v42  ;;  %v371_v53 = vmul.f32 %v11346_v5, %v7642_v41  ;;  %1272 = vmatpush.bf16.msra.mxu2 %v976_v63  ;;  %1321 = vmatpush.bf16.msra.mxu3 %v977_v8  ;;  %v658_v34 = vadd.f32 %v594_v4, %v474_v36  ;;  %v917_v1 = vmax.f32 %v853_v13, 0.0 }
  0xec   : > { %v834_v31 = vadd.f32 %v770_v10, %v650_v54  ;;  %v587_v14 = vmul.f32 %v11329_v9, %v7772_v60  ;;  %v595_v21 = vmul.f32 %v11329_v9, %v7638_v0  ;;  %v779_v25 = vmul.f32 %v11350_v35, %v7823_v19 }
  0xed   : > { %v467_v26 = vadd.f32 %v7696_v23, %v363_v62  ;;  %v475_v39 = vadd.f32 %v7583_v6, %v371_v53  ;;  %v842_v18 = vadd.f32 %v778_v3, %v658_v34  ;;  %6502 = vmatmul.msk.bf16.vlgmr.msra.gmra.mxu0 %vm1142_vm0, %v7868_v38  ;;  %6510 = vmatmul.msk.bf16.vlgmr.msra.gmra.mxu1 %vm1142_vm0, %v7868_v38  ;;  %v924_v9 = vmax.f32 %v7818_v27, 0.0 }
  0xee   : > { %1367 = vmatpush.bf16.msrb.mxu0 %v7684_v52  ;;  %1416 = vmatpush.bf16.msrb.mxu1 %v11347_v33  ;;  %v771_v52 = vmul.f32 %v11350_v35, %v7635_v56  ;;  %v364_v58 = vmul.f32 %v11351_v61, %v11344_v42  ;;  %v925_v47 = vmax.f32 %v861_v22, 0.0  ;;  %v372_v20 = vmul.f32 %v11351_v61, %v7642_v41 }
  0xef   : > { %1465 = vmatpush.bf16.msrb.mxu2 %v11348_v15  ;;  %1514 = vmatpush.bf16.msrb.mxu3 %v11349_v50  ;;  %v651_v57 = vadd.f32 %v587_v14, %v467_v26  ;;  %v659_v30 = vadd.f32 %v595_v21, %v475_v39  ;;  %v588_v44 = vmul.f32 %v11352_v43, %v7772_v60  ;;  %v906_v59 = vmax.f32 %v842_v18, 0.0  ;;  %v1006_v26 = vld [vmem:[%s10922_s5] sm:$0xff]  ;;  %v7965_v39 = vld [vmem:[%s10919_s2 + $0x10] sm:$0xff]  ;;  %v7978_v21 = vld [vmem:[%s10919_s2 + $0x18] sm:$0xff] }
  0xf0   : > { %6518 = vmatmul.msk.bf16.vlgmr.msra.gmra.mxu2 %vm1142_vm0, %v7868_v38  ;;  %6526 = vmatmul.msk.bf16.vlgmr.msra.gmra.mxu3 %vm1142_vm0, %v7868_v38  ;;  %v596_v27 = vmul.f32 %v11352_v43, %v7638_v0  ;;  %v468_v13 = vadd.f32 %v7696_v23, %v364_v58  ;;  %v988_v32 = vpack.c.bf16 %v924_v9, %v916_v24  ;;  %v898_v10 = vmax.f32 %v834_v31, 0.0  ;;  %v7991_v15 = vld [vmem:[%s10919_s2 + $0x20] sm:$0xff]  ;;  %v8004_v50 = vld [vmem:[%s10919_s2 + $0x28] sm:$0xff] }
  0xf1   : > { %v835_v55 = vadd.f32 %v771_v52, %v651_v57  ;;  %v843_v16 = vadd.f32 %v779_v25, %v659_v30  ;;  %v989_v36 = vpack.c.bf16 %v925_v47, %v917_v1  ;;  %v476_v28 = vadd.f32 %v7583_v6, %v372_v20  ;;  %1044 = vperm.xlu1 %6944, %v1010_v29   ;;  %v8023_v52 = vld [vmem:[%s10919_s2 + $0x30] sm:$0xff]  ;;  %v8042_v30 = vld [vmem:[%s10919_s2 + $0x38] sm:$0xff] }
  0xf2   : > { %1368 = vmatpush.bf16.msrb.mxu0 %v11353_v51  ;;  %1417 = vmatpush.bf16.msrb.mxu1 %v11354_v48  ;;  %v652_v63 = vadd.f32 %v588_v44, %v468_v13  ;;  %v772_v8 = vmul.f32 %v11302_v2, %v7635_v56  ;;  %v780_v22 = vmul.f32 %v11302_v2, %v7823_v19 }
  0xf3   : > { %1466 = vmatpush.bf16.msrb.mxu2 %v7790_v12  ;;  %1515 = vmatpush.bf16.msrb.mxu3 %v7798_v11  ;;  %v907_v17 = vmax.f32 %v843_v16, 0.0  ;;  %v660_v4 = vadd.f32 %v596_v27, %v476_v28  ;;  %v365_v12 = vmul.f32 %v11342_v37, %v11344_v42  ;;  %v373_v11 = vmul.f32 %v11342_v37, %v7642_v41 }
  0xf4   : > { %v589_v54 = vmul.f32 %v11343_v7, %v7772_v60  ;;  %v899_v3 = vmax.f32 %v835_v55, 0.0  ;;  %v836_v5 = vadd.f32 %v772_v8, %v652_v63  ;;  %v597_v2 = vmul.f32 %v11343_v7, %v7638_v0  ;;  %v1011_v0 = vld [vmem:[%s10922_s5 + $0x28] sm:$0xff] }
  0xf5   : > { %v844_v62 = vadd.f32 %v780_v22, %v660_v4  ;;  %v469_v42 = vadd.f32 %v7696_v23, %v365_v12  ;;  %v477_v41 = vadd.f32 %v7583_v6, %v373_v11  ;;  %v978_v37 = vpack.c.bf16 %v906_v59, %v898_v10  ;;  %v1009_v6 = vld [vmem:[%s10922_s5 + $0x18] sm:$0xff]  ;;  %1049 = vperm.xlu2 %6942, %v1011_v0  }
  0xf6   : > { %1369 = vmatpush.bf16.msrb.mxu0 %v7806_v40  ;;  %1418 = vmatpush.bf16.msrb.mxu1 %v7808_v46  ;;  %v979_v53 = vpack.c.bf16 %v907_v17, %v899_v3  ;;  %v900_v60 = vmax.f32 %v836_v5, 0.0  ;;  %v781_v40 = vmul.f32 %v7220_v49, %v7823_v19  ;;  %v773_v14 = vmul.f32 %v7220_v49, %v7635_v56  ;;  %v7949_v19 = vld [vmem:[%s10919_s2 + $0x8] sm:$0xff] }
  0xf7   : > { %1467 = vmatpush.bf16.msrb.mxu2 %v988_v32  ;;  %1516 = vmatpush.bf16.msrb.mxu3 %v989_v36  ;;  %v908_v46 = vmax.f32 %v844_v62, 0.0  ;;  %v653_v34 = vadd.f32 %v589_v54, %v469_v42  ;;  %v661_v31 = vadd.f32 %v597_v2, %v477_v41 }
  0xf9   : > { %v980_v23 = vpack.c.bf16 %v908_v46, %v900_v60  ;;  %v837_v7 = vadd.f32 %v773_v14, %v653_v34  ;;  %v845_v33 = vadd.f32 %v781_v40, %v661_v31  ;;  %1039 = vperm.xlu1 %6944, %v1009_v6  }
  0xfa   : > { %1370 = vmatpush.bf16.msrb.mxu0 %v978_v37  ;;  %1419 = vmatpush.bf16.msrb.mxu1 %v979_v53 }
  0xfb   : > { %1468 = vmatpush.bf16.msrb.mxu2 %v980_v23  ;;  %v901_v49 = vmax.f32 %v837_v7, 0.0  ;;  %v909_v56 = vmax.f32 %v845_v33, 0.0 }
  0xfd   : > { %v981_v24 = vpack.c.bf16 %v909_v56, %v901_v49  ;;  %6503 = vmatmul.msk.bf16.gmra.mxu0 %vm1142_vm0, %v7949_v19  ;;  %6511 = vmatmul.msk.bf16.gmra.mxu1 %vm1142_vm0, %v7949_v19 }
  0xfe   : > { %1024 = vperm.xlu2 %6942, %v1006_v26  }
  0xff   : > { %1517 = vmatpush.bf16.msrb.mxu3 %v981_v24 }
 0x100   : > { %6519 = vmatmul.msk.bf16.gmra.mxu2 %vm1142_vm0, %v7949_v19  ;;  %6527 = vmatmul.msk.bf16.gmra.mxu3 %vm1142_vm0, %v7949_v19 }
 0x10d   : > { %6504 = vmatmul.msk.bf16.gmra.mxu0 %vm1142_vm0, %v7965_v39  ;;  %6512 = vmatmul.msk.bf16.gmra.mxu1 %vm1142_vm0, %v7965_v39 }
 0x110   : > { %6520 = vmatmul.msk.bf16.gmra.mxu2 %vm1142_vm0, %v7965_v39  ;;  %6528 = vmatmul.msk.bf16.gmra.mxu3 %vm1142_vm0, %v7965_v39 }
 0x11d   : > { %6505 = vmatmul.msk.bf16.gmra.mxu0 %vm1142_vm0, %v7978_v21  ;;  %6513 = vmatmul.msk.bf16.gmra.mxu1 %vm1142_vm0, %v7978_v21 }
 0x120   : > { %6521 = vmatmul.msk.bf16.gmra.mxu2 %vm1142_vm0, %v7978_v21  ;;  %6529 = vmatmul.msk.bf16.gmra.mxu3 %vm1142_vm0, %v7978_v21 }
 0x125   : > { %v8006_v1 = vpop.permute.xlu2 %1094 }
 0x128   : > { %v8018_v35 = vpop.permute.xlu0 %1099 }
 0x12d   : > { %6506 = vmatmul.msk.bf16.gmra.mxu0 %vm1142_vm0, %v7991_v15  ;;  %6514 = vmatmul.msk.bf16.gmra.mxu1 %vm1142_vm0, %v7991_v15 }
 0x12f   : > { %v8016_v18 = vpop.permute.xlu2 %1089 }
 0x130   : > { %6522 = vmatmul.msk.bf16.gmra.mxu2 %vm1142_vm0, %v7991_v15  ;;  %6530 = vmatmul.msk.bf16.gmra.mxu3 %vm1142_vm0, %v7991_v15 }
 0x132   : > { %v8035_v9 = vpop.permute.xlu0 %1064 }
 0x13a   : > { %v8033_v25 = vpop.permute.xlu2 %1079 }
 0x13d   : > { %6507 = vmatmul.msk.bf16.gmra.mxu0 %vm1142_vm0, %v8004_v50  ;;  %6515 = vmatmul.msk.bf16.gmra.mxu1 %vm1142_vm0, %v8004_v50 }
 0x140   : > { %6523 = vmatmul.msk.bf16.gmra.mxu2 %vm1142_vm0, %v8004_v50  ;;  %6531 = vmatmul.msk.bf16.gmra.mxu3 %vm1142_vm0, %v8004_v50 }
 0x142   : > { %v8037_v57 = vpop.permute.xlu1 %1084  ;;  %v8044_v61 = vpop.permute.xlu2 %1054 }
 0x143   : > { %11355 = vst [vmem:[#allocation29_spill] sm:$0xff] %v8044_v61  ;;  %v8046_v58 = vpop.permute.xlu0 %1059 }
 0x144   : > { %11356 = vst [vmem:[#allocation30_spill] sm:$0xff] %v8046_v58 }
 0x14d   : > { %6508 = vmatmul.msk.bf16.gmra.mxu0 %vm1142_vm0, %v8023_v52  ;;  %6516 = vmatmul.msk.bf16.gmra.mxu1 %vm1142_vm0, %v8023_v52 }
 0x14f   : > { %v8058_v20 = vpop.permute.xlu2 %1049 }
 0x150   : > { %6524 = vmatmul.msk.bf16.gmra.mxu2 %vm1142_vm0, %v8023_v52  ;;  %6532 = vmatmul.msk.bf16.gmra.mxu3 %vm1142_vm0, %v8023_v52  ;;  %v8056_v47 = vpop.permute.xlu1 %1074  ;;  %11357 = vst [vmem:[#allocation32_spill] sm:$0xff] %v8058_v20 }
 0x151   : > { %v8060_v43 = vpop.permute.xlu0 %1034 }
 0x152   : > { %11358 = vst [vmem:[#allocation33_spill] sm:$0xff] %v8060_v43 }
 0x158   : > { %v8062_v45 = vpop.permute.xlu1 %1069  ;;  %v8070_v29 = vpop.permute.xlu2 %1024 }
 0x159   : > { %11359 = vst [vmem:[#allocation36_spill] sm:$0xff] %v8070_v29  ;;  %v8076_v55 = vpop.permute.xlu0 %1029 }
 0x15a   : > { %11360 = vst [vmem:[#allocation37_spill] sm:$0xff] %v8076_v55 }
 0x15d   : > { %6509 = vmatmul.msk.bf16.gmra.mxu0 %vm1142_vm0, %v8042_v30  ;;  %6517 = vmatmul.msk.bf16.gmra.mxu1 %vm1142_vm0, %v8042_v30 }
 0x160   : > { %6525 = vmatmul.msk.bf16.gmra.mxu2 %vm1142_vm0, %v8042_v30  ;;  %6533 = vmatmul.msk.bf16.gmra.mxu3 %vm1142_vm0, %v8042_v30 }
 0x163   : > { %v8080_v4 = vpop.permute.xlu1 %1044 }
 0x164   : > { %11361 = vst [vmem:[#allocation19_spill] sm:$0xff] %v8080_v4 }
 0x16a   : > { %v1176_v44 = vpop.f32.mrf.mxu0  ;;  %v1225_v27 = vpop.f32.mrf.mxu1 }
 0x16b   : > { %v1177_v51 = vadd.f32 %v1176_v44, %v8070_v29  ;;  %v1226_v48 = vadd.f32 %v1225_v27, %v8070_v29  ;;  %v8104_v14 = vpop.permute.xlu1 %1039 }
 0x16c   : > { %11366 = vst [vmem:[#allocation26_spill] sm:$0xff] %v8104_v14 }
 0x16d   : > { %6534 = vmatmul.msk.bf16.vlgmr.msrb.gmra.mxu0 %vm1142_vm0, %v7868_v38  ;;  %6542 = vmatmul.msk.bf16.vlgmr.msrb.gmra.mxu1 %vm1142_vm0, %v7868_v38  ;;  %v1559_v28 = vmax.f32 %v1177_v51, 0.0  ;;  %v1560_v63 = vmax.f32 %v1226_v48, 0.0 }
 0x170   : > { %6550 = vmatmul.msk.bf16.vlgmr.msrb.gmra.mxu2 %vm1142_vm0, %v7868_v38  ;;  %6558 = vmatmul.msk.bf16.vlgmr.msrb.gmra.mxu3 %vm1142_vm0, %v7868_v38 }
 0x172   : > { %v1178_v32 = vpop.f32.mrf.mxu0  ;;  %v1227_v36 = vpop.f32.mrf.mxu1 }
 0x173   : > { %v1274_v16 = vpop.f32.mrf.mxu2  ;;  %v1323_v13 = vpop.f32.mrf.mxu3  ;;  %v1179_v59 = vadd.f32 %v1178_v32, %v8076_v55  ;;  %v1228_v17 = vadd.f32 %v1227_v36, %v8076_v55 }
 0x174   : > { %v1275_v11 = vadd.f32 %v1274_v16, %v8070_v29  ;;  %v1324_v54 = vadd.f32 %v1323_v13, %v8070_v29 }
 0x175   : > { %v1567_v8 = vmax.f32 %v1179_v59, 0.0  ;;  %v1568_v22 = vmax.f32 %v1228_v17, 0.0 }
 0x176   : > { %v1561_v41 = vmax.f32 %v1275_v11, 0.0  ;;  %v1562_v37 = vmax.f32 %v1324_v54, 0.0 }
 0x177   : > { %v8082_v38 = vpack.c.bf16 %v1567_v8, %v1559_v28  ;;  %v8084_v12 = vpack.c.bf16 %v1568_v22, %v1560_v63 }
 0x179   : > { %11362 = vst [vmem:[#allocation20_spill] sm:$0xff] %v8082_v38 }
 0x17a   : > { %11363 = vst [vmem:[#allocation21_spill] sm:$0xff] %v8084_v12  ;;  %v1181_v62 = vpop.f32.mrf.mxu0  ;;  %v1230_v42 = vpop.f32.mrf.mxu1 }
 0x17b   : > { %v1276_v10 = vpop.f32.mrf.mxu2  ;;  %v1325_v3 = vpop.f32.mrf.mxu3  ;;  %v1182_v34 = vadd.f32 %v1181_v62, %v8060_v43  ;;  %v1231_v31 = vadd.f32 %v1230_v42, %v8060_v43 }
 0x17c   : > { %v1277_v5 = vadd.f32 %v1276_v10, %v8076_v55  ;;  %v1326_v2 = vadd.f32 %v1325_v3, %v8076_v55 }
 0x17d   : > { %6535 = vmatmul.msk.bf16.gmra.mxu0 %vm1142_vm0, %v7949_v19  ;;  %6543 = vmatmul.msk.bf16.gmra.mxu1 %vm1142_vm0, %v7949_v19  ;;  %v1575_v7 = vmax.f32 %v1182_v34, 0.0  ;;  %v1576_v56 = vmax.f32 %v1231_v31, 0.0 }
 0x17e   : > { %v1569_v53 = vmax.f32 %v1277_v5, 0.0  ;;  %v1570_v60 = vmax.f32 %v1326_v2, 0.0 }
 0x180   : > { %v8094_v40 = vpack.c.bf16 %v1569_v53, %v1561_v41  ;;  %v8096_v46 = vpack.c.bf16 %v1570_v60, %v1562_v37  ;;  %6551 = vmatmul.msk.bf16.gmra.mxu2 %vm1142_vm0, %v7949_v19  ;;  %6559 = vmatmul.msk.bf16.gmra.mxu3 %vm1142_vm0, %v7949_v19 }
 0x182   : > { %11364 = vst [vmem:[#allocation22_spill] sm:$0xff] %v8094_v40  ;;  %v1183_v23 = vpop.f32.mrf.mxu0  ;;  %v1232_v49 = vpop.f32.mrf.mxu1 }
 0x183   : > { %11365 = vst [vmem:[#allocation10_spill] sm:$0xff] %v8096_v46  ;;  %v1279_v0 = vpop.f32.mrf.mxu2  ;;  %v1328_v6 = vpop.f32.mrf.mxu3  ;;  %v1184_v33 = vadd.f32 %v1183_v23, %v8104_v14  ;;  %v1233_v24 = vadd.f32 %v1232_v49, %v8104_v14 }
 0x184   : > { %v1280_v19 = vadd.f32 %v1279_v0, %v8060_v43  ;;  %v1329_v48 = vadd.f32 %v1328_v6, %v8060_v43 }
 0x185   : > { %v1583_v26 = vmax.f32 %v1184_v33, 0.0  ;;  %v1584_v44 = vmax.f32 %v1233_v24, 0.0 }
 0x186   : > { %v1577_v17 = vmax.f32 %v1280_v19, 0.0  ;;  %v1578_v8 = vmax.f32 %v1329_v48, 0.0 }
 0x187   : > { %v8108_v27 = vpack.c.bf16 %v1583_v26, %v1575_v7  ;;  %v8111_v51 = vpack.c.bf16 %v1584_v44, %v1576_v56 }
 0x189   : > { %11367 = vst [vmem:[#allocation18_spill] sm:$0xff] %v8108_v27 }
 0x18a   : > { %11368 = vst [vmem:[#allocation34_spill] sm:$0xff] %v8111_v51  ;;  %v1186_v36 = vpop.f32.mrf.mxu0  ;;  %v1235_v28 = vpop.f32.mrf.mxu1 }
 0x18b   : > { %v1281_v16 = vpop.f32.mrf.mxu2  ;;  %v1330_v32 = vpop.f32.mrf.mxu3  ;;  %v1187_v10 = vadd.f32 %v1186_v36, %v8080_v4  ;;  %v1236_v3 = vadd.f32 %v1235_v28, %v8080_v4 }
 0x18c   : > { %v1282_v13 = vadd.f32 %v1281_v16, %v8104_v14  ;;  %v1331_v59 = vadd.f32 %v1330_v32, %v8104_v14 }
 0x18d   : > { %6536 = vmatmul.msk.bf16.gmra.mxu0 %vm1142_vm0, %v7965_v39  ;;  %6544 = vmatmul.msk.bf16.gmra.mxu1 %vm1142_vm0, %v7965_v39  ;;  %v1591_v42 = vmax.f32 %v1187_v10, 0.0  ;;  %v1592_v53 = vmax.f32 %v1236_v3, 0.0 }
 0x18e   : > { %v1585_v63 = vmax.f32 %v1282_v13, 0.0  ;;  %v1586_v22 = vmax.f32 %v1331_v59, 0.0 }
 0x190   : > { %v8120_v11 = vpack.c.bf16 %v1585_v63, %v1577_v17  ;;  %6552 = vmatmul.msk.bf16.gmra.mxu2 %vm1142_vm0, %v7965_v39  ;;  %v8124_v54 = vpack.c.bf16 %v1586_v22, %v1578_v8  ;;  %6560 = vmatmul.msk.bf16.gmra.mxu3 %vm1142_vm0, %v7965_v39 }
 0x192   : > { %11369 = vst [vmem:[#allocation35_spill] sm:$0xff] %v8120_v11  ;;  %v1188_v62 = vpop.f32.mrf.mxu0  ;;  %v1237_v37 = vpop.f32.mrf.mxu1 }
 0x193   : > { %11370 = vst [vmem:[#allocation38_spill] sm:$0xff] %v8124_v54  ;;  %v1284_v5 = vpop.f32.mrf.mxu2  ;;  %v1333_v2 = vpop.f32.mrf.mxu3  ;;  %v1189_v41 = vadd.f32 %v1188_v62, %v8058_v20  ;;  %v1238_v60 = vadd.f32 %v1237_v37, %v8058_v20 }
 0x194   : > { %v1285_v6 = vadd.f32 %v1284_v5, %v8080_v4  ;;  %v1334_v39 = vadd.f32 %v1333_v2, %v8080_v4 }
 0x195   : > { %v1599_v34 = vmax.f32 %v1189_v41, 0.0  ;;  %v1600_v31 = vmax.f32 %v1238_v60, 0.0 }
 0x196   : > { %v1593_v44 = vmax.f32 %v1285_v6, 0.0  ;;  %v1594_v48 = vmax.f32 %v1334_v39, 0.0 }
 0x197   : > { %v8132_v0 = vpack.c.bf16 %v1599_v34, %v1591_v42  ;;  %v8135_v23 = vpack.c.bf16 %v1600_v31, %v1592_v53 }
 0x199   : > { %11371 = vst [vmem:[#allocation39_spill] sm:$0xff] %v8132_v0 }
 0x19a   : > { %11372 = vst [vmem:[#allocation23_spill] sm:$0xff] %v8135_v23  ;;  %v1191_v56 = vpop.f32.mrf.mxu0  ;;  %v1240_v26 = vpop.f32.mrf.mxu1 }
 0x19b   : > { %v1286_v7 = vpop.f32.mrf.mxu2  ;;  %v1335_v49 = vpop.f32.mrf.mxu3  ;;  %v1192_v36 = vadd.f32 %v1191_v56, %v8044_v61  ;;  %v1241_v59 = vadd.f32 %v1240_v26, %v8044_v61 }
 0x19c   : > { %v1287_v33 = vadd.f32 %v1286_v7, %v8058_v20  ;;  %v1336_v24 = vadd.f32 %v1335_v49, %v8058_v20 }
 0x19d   : > { %6537 = vmatmul.msk.bf16.gmra.mxu0 %vm1142_vm0, %v7978_v21  ;;  %6545 = vmatmul.msk.bf16.gmra.mxu1 %vm1142_vm0, %v7978_v21  ;;  %v1607_v8 = vmax.f32 %v1192_v36, 0.0  ;;  %v1608_v3 = vmax.f32 %v1241_v59, 0.0 }
 0x19e   : > { %v1601_v19 = vmax.f32 %v1287_v33, 0.0  ;;  %v1602_v16 = vmax.f32 %v1336_v24, 0.0 }
 0x1a0   : > { %v8144_v13 = vpack.c.bf16 %v1601_v19, %v1593_v44  ;;  %6553 = vmatmul.msk.bf16.gmra.mxu2 %vm1142_vm0, %v7978_v21  ;;  %v8148_v32 = vpack.c.bf16 %v1602_v16, %v1594_v48  ;;  %6561 = vmatmul.msk.bf16.gmra.mxu3 %vm1142_vm0, %v7978_v21 }
 0x1a2   : > { %11373 = vst [vmem:[#allocation24_spill] sm:$0xff] %v8144_v13  ;;  %v1193_v63 = vpop.f32.mrf.mxu0  ;;  %v1242_v10 = vpop.f32.mrf.mxu1 }
 0x1a3   : > { %11374 = vst [vmem:[#allocation40_spill] sm:$0xff] %v8148_v32  ;;  %v1289_v28 = vpop.f32.mrf.mxu2  ;;  %v1338_v17 = vpop.f32.mrf.mxu3  ;;  %v1194_v22 = vadd.f32 %v1193_v63, %v8046_v58  ;;  %v1243_v5 = vadd.f32 %v1242_v10, %v8046_v58 }
 0x1a4   : > { %v1290_v41 = vadd.f32 %v1289_v28, %v8044_v61  ;;  %v1339_v21 = vadd.f32 %v1338_v17, %v8044_v61 }
 0x1a5   : > { %v1615_v2 = vmax.f32 %v1194_v22, 0.0  ;;  %v1616_v62 = vmax.f32 %v1243_v5, 0.0 }
 0x1a6   : > { %v1609_v7 = vmax.f32 %v1290_v41, 0.0  ;;  %v1610_v49 = vmax.f32 %v1339_v21, 0.0 }
 0x1a7   : > { %v8156_v42 = vpack.c.bf16 %v1615_v2, %v1607_v8  ;;  %v8159_v37 = vpack.c.bf16 %v1616_v62, %v1608_v3 }
 0x1a9   : > { %11375 = vst [vmem:[#allocation25_spill] sm:$0xff] %v8156_v42 }
 0x1aa   : > { %11376 = vst [vmem:[#allocation43_spill] sm:$0xff] %v8159_v37  ;;  %v1196_v31 = vpop.f32.mrf.mxu0  ;;  %v1245_v39 = vpop.f32.mrf.mxu1 }
 0x1ab   : > { %v1291_v53 = vpop.f32.mrf.mxu2  ;;  %v1340_v34 = vpop.f32.mrf.mxu3  ;;  %v8231_v43 = vadd.f32 %v1245_v39, %v8035_v9 }
 0x1ac   : > { %v1292_v60 = vadd.f32 %v1291_v53, %v8046_v58  ;;  %v1341_v6 = vadd.f32 %v1340_v34, %v8046_v58 }
 0x1ad   : > { %6538 = vmatmul.msk.bf16.gmra.mxu0 %vm1142_vm0, %v7991_v15  ;;  %6546 = vmatmul.msk.bf16.gmra.mxu1 %vm1142_vm0, %v7991_v15 }
 0x1ae   : > { %v1617_v33 = vmax.f32 %v1292_v60, 0.0  ;;  %v1618_v56 = vmax.f32 %v1341_v6, 0.0 }
 0x1b0   : > { %v8168_v24 = vpack.c.bf16 %v1617_v33, %v1609_v7  ;;  %6554 = vmatmul.msk.bf16.gmra.mxu2 %vm1142_vm0, %v7991_v15  ;;  %v8172_v26 = vpack.c.bf16 %v1618_v56, %v1610_v49  ;;  %6562 = vmatmul.msk.bf16.gmra.mxu3 %vm1142_vm0, %v7991_v15 }
 0x1b2   : > { %11377 = vst [vmem:[#allocation46_spill] sm:$0xff] %v8168_v24  ;;  %v8180_v48 = vpop.f32.mrf.mxu0  ;;  %v8182_v16 = vpop.f32.mrf.mxu1 }
 0x1b3   : > { %11378 = vst [vmem:[#allocation48_spill] sm:$0xff] %v8172_v26  ;;  %v8176_v44 = vpop.f32.mrf.mxu2  ;;  %v8178_v19 = vpop.f32.mrf.mxu3 }
 0x1ba   : > { %v1201_v28 = vpop.f32.mrf.mxu0  ;;  %v1250_v17 = vpop.f32.mrf.mxu1 }
 0x1bb   : > { %v8184_v36 = vpop.f32.mrf.mxu2  ;;  %v8186_v59 = vpop.f32.mrf.mxu3  ;;  %v1202_v55 = vadd.f32 %v1201_v28, %v8056_v47  ;;  %v1248_v28 = vadd.f32 %v8182_v16, %v8062_v45 }
 0x1bd   : > { %6539 = vmatmul.msk.bf16.gmra.mxu0 %vm1142_vm0, %v8004_v50  ;;  %6547 = vmatmul.msk.bf16.gmra.mxu1 %vm1142_vm0, %v8004_v50 }
 0x1c0   : > { %6555 = vmatmul.msk.bf16.gmra.mxu2 %vm1142_vm0, %v8004_v50  ;;  %6563 = vmatmul.msk.bf16.gmra.mxu3 %vm1142_vm0, %v8004_v50 }
 0x1c2   : > { %v1203_v8 = vpop.f32.mrf.mxu0  ;;  %v1252_v22 = vpop.f32.mrf.mxu1 }
 0x1c3   : > { %v8196_v15 = vpop.f32.mrf.mxu2  ;;  %v8198_v63 = vpop.f32.mrf.mxu3  ;;  %v1253_v39 = vadd.f32 %v1252_v22, %v8033_v25 }
 0x1ca   : > { %v1206_v5 = vpop.f32.mrf.mxu0  ;;  %v1255_v2 = vpop.f32.mrf.mxu1 }
 0x1cb   : > { %v8200_v10 = vpop.f32.mrf.mxu2  ;;  %v8202_v3 = vpop.f32.mrf.mxu3  ;;  %v1207_v61 = vadd.f32 %v1206_v5, %v8037_v57 }
 0x1cd   : > { %6540 = vmatmul.msk.bf16.gmra.mxu0 %vm1142_vm0, %v8023_v52  ;;  %6548 = vmatmul.msk.bf16.gmra.mxu1 %vm1142_vm0, %v8023_v52  ;;  %v1655_v54 = vmax.f32 %v1207_v61, 0.0 }
 0x1d0   : > { %6556 = vmatmul.msk.bf16.gmra.mxu2 %vm1142_vm0, %v8023_v52  ;;  %6564 = vmatmul.msk.bf16.gmra.mxu3 %vm1142_vm0, %v8023_v52  ;;  %v8223_v52 = vadd.f32 %v1196_v31, %v8035_v9 }
 0x1d2   : > { %v1208_v41 = vpop.f32.mrf.mxu0  ;;  %v1257_v21 = vpop.f32.mrf.mxu1 }
 0x1d3   : > { %v1304_v50 = vpop.f32.mrf.mxu2  ;;  %v8212_v62 = vpop.f32.mrf.mxu3  ;;  %v1209_v20 = vadd.f32 %v1208_v41, %v8016_v18  ;;  %v1258_v31 = vadd.f32 %v1257_v21, %v8016_v18  ;;  %v1251_v41 = vadd.f32 %v1250_v17, %v8056_v47  ;;  %v1639_v17 = vmax.f32 %v1202_v55, 0.0 }
 0x1d5   : > { %v1640_v61 = vmax.f32 %v1251_v41, 0.0 }
 0x1da   : > { %v1211_v34 = vpop.f32.mrf.mxu0  ;;  %v1260_v6 = vpop.f32.mrf.mxu1 }
 0x1db   : > { %v1306_v53 = vpop.f32.mrf.mxu2  ;;  %v1355_v60 = vpop.f32.mrf.mxu3  ;;  %v1212_v7 = vadd.f32 %v1211_v34, %v8006_v1  ;;  %v1261_v49 = vadd.f32 %v1260_v6, %v8006_v1 }
 0x1dc   : > { %v1356_v55 = vadd.f32 %v1355_v60, %v8016_v18 }
 0x1dd   : > { %6541 = vmatmul.msk.bf16.gmra.mxu0 %vm1142_vm0, %v8042_v30  ;;  %6549 = vmatmul.msk.bf16.gmra.mxu1 %vm1142_vm0, %v8042_v30  ;;  %v1671_v29 = vmax.f32 %v1212_v7, 0.0  ;;  %v1672_v46 = vmax.f32 %v1261_v49, 0.0 }
 0x1e0   : > { %6557 = vmatmul.msk.bf16.gmra.mxu2 %vm1142_vm0, %v8042_v30  ;;  %6565 = vmatmul.msk.bf16.gmra.mxu3 %vm1142_vm0, %v8042_v30  ;;  %v1256_v30 = vadd.f32 %v1255_v2, %v8037_v57  ;;  %v1663_v2 = vmax.f32 %v1209_v20, 0.0 }
 0x1e2   : > { %v1213_v58 = vpop.f32.mrf.mxu0  ;;  %v1262_v14 = vpop.f32.mrf.mxu1  ;;  %v1656_v21 = vmax.f32 %v1256_v30, 0.0 }
 0x1e3   : > { %v1309_v33 = vpop.f32.mrf.mxu2  ;;  %v1358_v56 = vpop.f32.mrf.mxu3  ;;  %v1214_v4 = vadd.f32 %v1213_v58, %v8018_v35  ;;  %v1263_v34 = vadd.f32 %v1262_v14, %v8018_v35  ;;  %v1204_v58 = vadd.f32 %v1203_v8, %v8033_v25  ;;  %v1664_v14 = vmax.f32 %v1258_v31, 0.0 }
 0x1e4   : > { %v1310_v6 = vadd.f32 %v1309_v33, %v8006_v1  ;;  %v1359_v8 = vadd.f32 %v1358_v56, %v8006_v1  ;;  %v8257_v33 = vpack.c.bf16 %v1663_v2, %v1655_v54  ;;  %v1305_v56 = vadd.f32 %v1304_v50, %v8037_v57 }
 0x1e5   : > { %v1679_v5 = vmax.f32 %v1214_v4, 0.0  ;;  %v1680_v40 = vmax.f32 %v1263_v34, 0.0  ;;  %v1199_v4 = vadd.f32 %v8180_v48, %v8062_v45  ;;  %v1647_v20 = vmax.f32 %v1204_v58, 0.0 }
 0x1e6   : > { %v1648_v48 = vmax.f32 %v1253_v39, 0.0  ;;  %11381 = vst [vmem:[#allocation57_spill] sm:$0xff] %v8257_v33  ;;  %v8264_v30 = vpack.c.bf16 %v1664_v14, %v1656_v21  ;;  %v1624_v34 = vmax.f32 %v8231_v43, 0.0  ;;  %v1674_v41 = vmax.f32 %v1359_v8, 0.0 }
 0x1e7   : > { %v8241_v11 = vpack.c.bf16 %v1679_v5, %v1671_v29  ;;  %v8244_v12 = vpack.c.bf16 %v1680_v40, %v1672_v46  ;;  %v1307_v29 = vadd.f32 %v1306_v53, %v8016_v18  ;;  %v1673_v53 = vmax.f32 %v1310_v6, 0.0 }
 0x1e8   : > { %11382 = vst [vmem:[#allocation42_spill] sm:$0xff] %v8264_v30  ;;  %v1354_v5 = vadd.f32 %v8212_v62, %v8037_v57  ;;  %v1631_v60 = vmax.f32 %v1199_v4, 0.0  ;;  %v1302_v58 = vadd.f32 %v8200_v10, %v8033_v25  ;;  %v8275_v50 = vpack.c.bf16 %v1647_v20, %v1639_v17 }
 0x1e9   : > { %11379 = vst [vmem:[#allocation53_spill] sm:$0xff] %v8241_v11  ;;  %1879 = vmatpush.bf16.msra.mxu0 %v8241_v11  ;;  %1968 = vmatpush.bf16.msra.mxu1 %v8244_v12  ;;  %v1665_v39 = vmax.f32 %v1307_v29, 0.0  ;;  %v1351_v43 = vadd.f32 %v8202_v3, %v8033_v25  ;;  %v1666_v6 = vmax.f32 %v1356_v55, 0.0  ;;  %v1632_v21 = vmax.f32 %v1248_v28, 0.0  ;;  %v6839_v11 = vld [vmem:[#allocation2 + $0x28] sm:$0xff] }
 0x1ea   : > { %11380 = vst [vmem:[#allocation54_spill] sm:$0xff] %v8244_v12  ;;  %v8255_v46 = vpop.f32.mrf.mxu0  ;;  %v8261_v49 = vpop.f32.mrf.mxu1  ;;  %v1300_v14 = vadd.f32 %v8196_v15, %v8056_v47  ;;  %v8283_v4 = vpack.c.bf16 %v1648_v48, %v1640_v61  ;;  %v1657_v10 = vmax.f32 %v1305_v56, 0.0  ;;  %v1349_v8 = vadd.f32 %v8198_v63, %v8056_v47 }
 0x1eb   : > { %v1311_v22 = vpop.f32.mrf.mxu2  ;;  %v1360_v40 = vpop.f32.mrf.mxu3  ;;  %11384 = vst [vmem:[#allocation56_spill] sm:$0xff] %v8275_v50  ;;  %v1658_v17 = vmax.f32 %v1354_v5, 0.0  ;;  %v1297_v3 = vadd.f32 %v8184_v36, %v8062_v45  ;;  %v1649_v28 = vmax.f32 %v1302_v58, 0.0  ;;  %v11390_v63 = vmax.f32 %v8223_v52, 0.0 }
 0x1ec   : > { %v1312_v7 = vadd.f32 %v1311_v22, %v8018_v35  ;;  %v1361_v16 = vadd.f32 %v1360_v40, %v8018_v35  ;;  %11386 = vst [vmem:[#allocation50_spill] sm:$0xff] %v8283_v4  ;;  %v8294_v15 = vpack.c.bf16 %v1665_v39, %v1657_v10  ;;  %v1650_v40 = vmax.f32 %v1351_v43, 0.0 }
 0x1ed   : > { %1880 = vmatpush.bf16.msra.mxu0 %v8257_v33  ;;  %1969 = vmatpush.bf16.msra.mxu1 %v8264_v30  ;;  %v8303_v29 = vpack.c.bf16 %v1631_v60, %v11390_v63  ;;  %v8307_v48 = vpack.c.bf16 %v1666_v6, %v1658_v17  ;;  %v1295_v55 = vadd.f32 %v8176_v44, %v8035_v9  ;;  %v1641_v56 = vmax.f32 %v1300_v14, 0.0  ;;  %v11403_v17 = vld [vmem:[#allocation21_spill] sm:$0xff] }
 0x1ee   : > { %v1681_v31 = vmax.f32 %v1312_v7, 0.0  ;;  %v1682_v54 = vmax.f32 %v1361_v16, 0.0  ;;  %11388 = vst [vmem:[#allocation11_spill] sm:$0xff] %v8294_v15  ;;  %v1346_v7 = vadd.f32 %v8186_v59, %v8062_v45  ;;  %v8313_v16 = vpack.c.bf16 %v1632_v21, %v1624_v34 }
 0x1ef   : > { %11391 = vst [vmem:[#allocation58_spill] sm:$0xff] %v8303_v29  ;;  %v1344_v52 = vadd.f32 %v8178_v19, %v8035_v9  ;;  %v1633_v59 = vmax.f32 %v1297_v3, 0.0  ;;  %v1625_v34 = vmax.f32 %v1295_v55, 0.0  ;;  %v11404_v3 = vld [vmem:[#allocation35_spill] sm:$0xff] }
 0x1f0   : > { %v8272_v2 = vpack.c.bf16 %v1681_v31, %v1673_v53  ;;  %v8279_v62 = vpack.c.bf16 %v1682_v54, %v1674_v41  ;;  %11392 = vst [vmem:[#allocation5_spill] sm:$0xff] %v8307_v48  ;;  %v1642_v53 = vmax.f32 %v1349_v8, 0.0  ;;  %v8320_v31 = vpack.c.bf16 %v1649_v28, %v1641_v56  ;;  %v8358_v8 = vld [vmem:[#allocation2] sm:$0xff]  ;;  %v11405_v28 = vld [vmem:[#allocation38_spill] sm:$0xff] }
 0x1f1   : > { %1881 = vmatpush.bf16.msra.mxu0 %v8275_v50  ;;  %1970 = vmatpush.bf16.msra.mxu1 %v8283_v4  ;;  %11393 = vst [vmem:[#allocation31_spill] sm:$0xff] %v8313_v16  ;;  %v1634_v5 = vmax.f32 %v1346_v7, 0.0  ;;  %v1626_v41 = vmax.f32 %v1344_v52, 0.0  ;;  %v8330_v54 = vpack.c.bf16 %v1633_v59, %v1625_v34  ;;  %v11408_v56 = vld [vmem:[#allocation22_spill] sm:$0xff] }
 0x1f2   : > { %11383 = vst [vmem:[#allocation49_spill] sm:$0xff] %v8272_v2  ;;  %2057 = vmatpush.bf16.msra.mxu2 %v8272_v2  ;;  %2146 = vmatpush.bf16.msra.mxu3 %v8279_v62  ;;  %v8299_v20 = vpop.f32.mrf.mxu0  ;;  %v8309_v36 = vpop.f32.mrf.mxu1  ;;  %v8323_v44 = vpack.c.bf16 %v1650_v40, %v1642_v53  ;;  %v11409_v52 = vld [vmem:[#allocation10_spill] sm:$0xff] }
 0x1f3   : > { %11385 = vst [vmem:[#allocation55_spill] sm:$0xff] %v8279_v62  ;;  %v8289_v22 = vpop.f32.mrf.mxu2  ;;  %v8296_v61 = vpop.f32.mrf.mxu3  ;;  %v8337_v39 = vpack.c.bf16 %v1634_v5, %v1626_v41  ;;  %v8387_v41 = vld [vmem:[#allocation2 + $0x8] sm:$0xff] }
 0x1f4   : > { %11387 = vst [vmem:[#allocation51_spill] sm:$0xff] %v8289_v22 }
 0x1f5   : > { %11389 = vst [vmem:[#allocation52_spill] sm:$0xff] %v8296_v61  ;;  %1882 = vmatpush.bf16.msra.mxu0 %v8303_v29  ;;  %1971 = vmatpush.bf16.msra.mxu1 %v8313_v16 }
 0x1f6   : > { %2058 = vmatpush.bf16.msra.mxu2 %v8294_v15  ;;  %2147 = vmatpush.bf16.msra.mxu3 %v8307_v48  ;;  %11394 = vst [vmem:[#allocation47_spill] sm:$0xff] %v8320_v31  ;;  %v6838_v15 = vld [vmem:[#allocation2 + $0x20] sm:$0xff] }
 0x1f7   : > { %11395 = vst [vmem:[#allocation41_spill] sm:$0xff] %v8323_v44 }
 0x1f8   : > { %11397 = vst [vmem:[#allocation15_spill] sm:$0xff] %v8330_v54 }
 0x1f9   : > { %1883 = vmatpush.bf16.msra.mxu0 %v8156_v42  ;;  %1972 = vmatpush.bf16.msra.mxu1 %v8159_v37  ;;  %11399 = vst [vmem:[#allocation44_spill] sm:$0xff] %v8337_v39 }
 0x1fa   : > { %2059 = vmatpush.bf16.msra.mxu2 %v8320_v31  ;;  %2148 = vmatpush.bf16.msra.mxu3 %v8323_v44  ;;  %v8335_v58 = vpop.f32.mrf.mxu0  ;;  %v8339_v43 = vpop.f32.mrf.mxu1  ;;  %11402 = vst [vmem:[#allocation6_spill] sm:$0xff] %v8358_v8 }
 0x1fb   : > { %v8327_v19 = vpop.f32.mrf.mxu2  ;;  %v8332_v60 = vpop.f32.mrf.mxu3  ;;  %11412 = vst [vmem:[#allocation12_spill] sm:$0xff] %v8387_v41 }
 0x1fc   : > { %11396 = vst [vmem:[#allocation45_spill] sm:$0xff] %v8327_v19 }
 0x1fd   : > { %11398 = vst [vmem:[#allocation16_spill] sm:$0xff] %v8332_v60  ;;  %1884 = vmatpush.bf16.msra.mxu0 %v8132_v0  ;;  %1973 = vmatpush.bf16.msra.mxu1 %v8135_v23 }
 0x1fe   : > { %2060 = vmatpush.bf16.msra.mxu2 %v8330_v54  ;;  %2149 = vmatpush.bf16.msra.mxu3 %v8337_v39  ;;  %v6837_v54 = vld [vmem:[#allocation2 + $0x18] sm:$0xff] }
 0x201   : > { %1885 = vmatpush.bf16.msra.mxu0 %v8108_v27  ;;  %1974 = vmatpush.bf16.msra.mxu1 %v8111_v51 }
 0x202   : > { %2061 = vmatpush.bf16.msra.mxu2 %v8168_v24  ;;  %2150 = vmatpush.bf16.msra.mxu3 %v8172_v26  ;;  %v8353_v14 = vpop.f32.mrf.mxu0  ;;  %v8355_v10 = vpop.f32.mrf.mxu1 }
 0x203   : > { %v8347_v6 = vpop.f32.mrf.mxu2  ;;  %v8350_v21 = vpop.f32.mrf.mxu3 }
 0x204   : > { %11400 = vst [vmem:[#allocation9_spill] sm:$0xff] %v8347_v6 }
 0x205   : > { %11401 = vst [vmem:[#allocation13_spill] sm:$0xff] %v8350_v21  ;;  %1886 = vmatpush.bf16.msra.mxu0 %v8082_v38  ;;  %1975 = vmatpush.bf16.msra.mxu1 %v11403_v17  ;;  %v11417_v21 = vld [vmem:[#allocation36_spill] sm:$0xff] }
 0x206   : > { %2062 = vmatpush.bf16.msra.mxu2 %v8144_v13  ;;  %2151 = vmatpush.bf16.msra.mxu3 %v8148_v32  ;;  %v8409_v13 = vld [vmem:[#allocation2 + $0x10] sm:$0xff]  ;;  %v8453_v6 = vadd.f32 %v8255_v46, %v11417_v21 }
 0x207   : > { %11416 = vst [vmem:[#allocation60_spill] sm:$0xff] %v8409_v13 }
 0x208   : > { %1887 = vmatmul.bf16.vlgmr.msra.gmra.mxu0 %v8358_v8  ;;  %1976 = vmatmul.bf16.vlgmr.msra.gmra.mxu1 %v8358_v8  ;;  %11418 = vst [vmem:[#allocation61_spill] sm:$0xff] %v8453_v6  ;;  %v11426_v6 = vld [vmem:[#allocation26_spill] sm:$0xff] }
 0x20a   : > { %2063 = vmatpush.bf16.msra.mxu2 %v11404_v3  ;;  %2152 = vmatpush.bf16.msra.mxu3 %v11405_v28  ;;  %v8371_v40 = vpop.f32.mrf.mxu0  ;;  %v8373_v55 = vpop.f32.mrf.mxu1 }
 0x20b   : > { %v8366_v63 = vpop.f32.mrf.mxu2  ;;  %v8369_v7 = vpop.f32.mrf.mxu3 }
 0x20c   : > { %11406 = vst [vmem:[#allocation7_spill] sm:$0xff] %v8366_v63 }
 0x20d   : > { %11407 = vst [vmem:[#allocation8_spill] sm:$0xff] %v8369_v7  ;;  %v11420_v7 = vld [vmem:[#allocation37_spill] sm:$0xff] }
 0x20e   : > { %2064 = vmatpush.bf16.msra.mxu2 %v11408_v56  ;;  %2153 = vmatpush.bf16.msra.mxu3 %v11409_v52  ;;  %v8461_v63 = vadd.f32 %v8299_v20, %v11420_v7  ;;  %v8481_v20 = vadd.f32 %v8355_v10, %v11426_v6 }
 0x210   : > { %11421 = vst [vmem:[#allocation63_spill] sm:$0xff] %v8461_v63 }
 0x211   : > { %2065 = vmatmul.bf16.vlgmr.msra.gmra.mxu2 %v8358_v8  ;;  %2154 = vmatmul.bf16.vlgmr.msra.gmra.mxu3 %v8358_v8  ;;  %11427 = vst [vmem:[#allocation67_spill] sm:$0xff] %v8481_v20 }
 0x212   : > { %v8383_v5 = vpop.f32.mrf.mxu0  ;;  %v8385_v34 = vpop.f32.mrf.mxu1 }
 0x213   : > { %v8379_v53 = vpop.f32.mrf.mxu2  ;;  %v8381_v59 = vpop.f32.mrf.mxu3 }
 0x214   : > { %11410 = vst [vmem:[#allocation17_spill] sm:$0xff] %v8379_v53  ;;  %v11423_v53 = vld [vmem:[#allocation33_spill] sm:$0xff] }
 0x215   : > { %11411 = vst [vmem:[#allocation14_spill] sm:$0xff] %v8381_v59  ;;  %v8465_v59 = vadd.f32 %v8309_v36, %v11420_v7  ;;  %v8473_v46 = vadd.f32 %v8339_v43, %v11423_v53  ;;  %v11428_v36 = vld [vmem:[#allocation19_spill] sm:$0xff]  ;;  %v11430_v7 = vld [vmem:[#allocation32_spill] sm:$0xff] }
 0x216   : > { %v8493_v43 = vadd.f32 %v8383_v5, %v11430_v7  ;;  %v8498_v10 = vadd.f32 %v8385_v34, %v11430_v7 }
 0x217   : > { %11422 = vst [vmem:[#allocation64_spill] sm:$0xff] %v8465_v59 }
 0x218   : > { %1892 = vmatmul.bf16.gmra.mxu0 %v8387_v41  ;;  %1981 = vmatmul.bf16.gmra.mxu1 %v8387_v41  ;;  %11425 = vst [vmem:[#allocation66_spill] sm:$0xff] %v8473_v46 }
 0x21a   : > { %v8395_v56 = vpop.f32.mrf.mxu0  ;;  %v8397_v8 = vpop.f32.mrf.mxu1 }
 0x21b   : > { %v8390_v28 = vpop.f32.mrf.mxu2  ;;  %v8393_v52 = vpop.f32.mrf.mxu3 }
 0x21c   : > { %11413 = vst [vmem:[#allocation27_spill] sm:$0xff] %v8390_v28 }
 0x21d   : > { %11414 = vst [vmem:[#allocation28_spill] sm:$0xff] %v8393_v52  ;;  %v8469_v52 = vadd.f32 %v8335_v58, %v11423_v53  ;;  %v8489_v58 = vadd.f32 %v8373_v55, %v11428_v36 }
 0x21f   : > { %11424 = vst [vmem:[#allocation65_spill] sm:$0xff] %v8469_v52 }
 0x220   : > { %11429 = vst [vmem:[#allocation68_spill] sm:$0xff] %v8489_v58 }
 0x221   : > { %2070 = vmatmul.bf16.gmra.mxu2 %v8387_v41  ;;  %2159 = vmatmul.bf16.gmra.mxu3 %v8387_v41 }
 0x222   : > { %v8405_v38 = vpop.f32.mrf.mxu0  ;;  %v8407_v32 = vpop.f32.mrf.mxu1 }
 0x223   : > { %v8401_v3 = vpop.f32.mrf.mxu2  ;;  %v8403_v17 = vpop.f32.mrf.mxu3 }
 0x224   : > { %11415 = vst [vmem:[#allocation59_spill] sm:$0xff] %v8403_v17 }
 0x228   : > { %1897 = vmatmul.bf16.gmra.mxu0 %v8409_v13  ;;  %1986 = vmatmul.bf16.gmra.mxu1 %v8409_v13 }
 0x22a   : > { %v8417_v26 = vpop.f32.mrf.mxu0  ;;  %v8419_v41 = vpop.f32.mrf.mxu1 }
 0x22b   : > { %v8412_v51 = vpop.f32.mrf.mxu2  ;;  %v8415_v27 = vpop.f32.mrf.mxu3 }
 0x231   : > { %2075 = vmatmul.bf16.gmra.mxu2 %v8409_v13  ;;  %2164 = vmatmul.bf16.gmra.mxu3 %v8409_v13 }
 0x232   : > { %v1394_v0 = vpop.f32.mrf.mxu0  ;;  %v8427_v39 = vpop.f32.mrf.mxu1 }
 0x233   : > { %v8423_v24 = vpop.f32.mrf.mxu2  ;;  %v8425_v23 = vpop.f32.mrf.mxu3 }
 0x238   : > { %1902 = vmatmul.bf16.gmra.mxu0 %v6837_v54  ;;  %1991 = vmatmul.bf16.gmra.mxu1 %v6837_v54 }
 0x23a   : > { %v8433_v44 = vpop.f32.mrf.mxu0  ;;  %v8435_v31 = vpop.f32.mrf.mxu1 }
 0x23b   : > { %v8429_v37 = vpop.f32.mrf.mxu2  ;;  %v8431_v42 = vpop.f32.mrf.mxu3 }
 0x241   : > { %2080 = vmatmul.bf16.gmra.mxu2 %v6837_v54  ;;  %2169 = vmatmul.bf16.gmra.mxu3 %v6837_v54 }
 0x242   : > { %v1399_v29 = vpop.f32.mrf.mxu0  ;;  %v1448_v48 = vpop.f32.mrf.mxu1 }
 0x243   : > { %v8437_v13 = vpop.f32.mrf.mxu2  ;;  %v8439_v16 = vpop.f32.mrf.mxu3 }
 0x248   : > { %1907 = vmatmul.bf16.gmra.mxu0 %v6838_v15  ;;  %1996 = vmatmul.bf16.gmra.mxu1 %v6838_v15 }
 0x24a   : > { %v1402_v62 = vpop.f32.mrf.mxu0  ;;  %v1451_v2 = vpop.f32.mrf.mxu1 }
 0x24b   : > { %v8441_v4 = vpop.f32.mrf.mxu2  ;;  %v8443_v50 = vpop.f32.mrf.mxu3  ;;  %v1452_v28 = vadd.f32 %v1451_v2, %v8037_v57  ;;  %v1398_v2 = vadd.f32 %v8433_v44, %v8056_v47 }
 0x251   : > { %2085 = vmatmul.bf16.gmra.mxu2 %v6838_v15  ;;  %2174 = vmatmul.bf16.gmra.mxu3 %v6838_v15  ;;  %v8457_v15 = vadd.f32 %v8261_v49, %v11417_v21  ;;  %v8477_v49 = vadd.f32 %v8353_v14, %v11426_v6  ;;  %v8485_v21 = vadd.f32 %v8371_v40, %v11428_v36  ;;  %v11432_v6 = vld [vmem:[#allocation30_spill] sm:$0xff]  ;;  %v8528_v36 = vld [vmem:[#allocation2 + $0x30] sm:$0xff] }
 0x252   : > { %v1404_v33 = vpop.f32.mrf.mxu0  ;;  %v1453_v12 = vpop.f32.mrf.mxu1  ;;  %v8515_v34 = vadd.f32 %v8407_v32, %v11432_v6  ;;  %v8532_v32 = vadd.f32 %v8419_v41, %v8035_v9 }
 0x253   : > { %v8445_v30 = vpop.f32.mrf.mxu2  ;;  %v8447_v54 = vpop.f32.mrf.mxu3  ;;  %11419 = vst [vmem:[#allocation62_spill] sm:$0xff] %v8457_v15  ;;  %v1405_v46 = vadd.f32 %v1404_v33, %v8016_v18  ;;  %v1454_v63 = vadd.f32 %v1453_v12, %v8016_v18  ;;  %v1403_v33 = vadd.f32 %v1402_v62, %v8037_v57  ;;  %v8539_v12 = vadd.f32 %v8427_v39, %v8062_v45 }
 0x255   : > { %v1667_v58 = vmax.f32 %v1405_v46, 0.0  ;;  %v1668_v62 = vmax.f32 %v1454_v63, 0.0  ;;  %v1659_v39 = vmax.f32 %v1403_v33, 0.0  ;;  %v1643_v33 = vmax.f32 %v1398_v2, 0.0 }
 0x258   : > { %1912 = vmatmul.bf16.gmra.mxu0 %v6839_v11  ;;  %2001 = vmatmul.bf16.gmra.mxu1 %v6839_v11 }
 0x25a   : > { %v1407_v60 = vpop.f32.mrf.mxu0  ;;  %v1456_v19 = vpop.f32.mrf.mxu1 }
 0x25b   : > { %v1502_v61 = vpop.f32.mrf.mxu2  ;;  %v8449_v22 = vpop.f32.mrf.mxu3  ;;  %v1408_v14 = vadd.f32 %v1407_v60, %v8006_v1  ;;  %v1457_v55 = vadd.f32 %v1456_v19, %v8006_v1  ;;  %v8511_v60 = vadd.f32 %v8405_v38, %v11432_v6  ;;  %v8524_v19 = vadd.f32 %v1394_v0, %v8062_v45 }
 0x25d   : > { %v1676_v0 = vmax.f32 %v1457_v55, 0.0  ;;  %v1635_v41 = vmax.f32 %v8524_v19, 0.0  ;;  %v8559_v19 = vpack.c.bf16 %v1667_v58, %v1659_v39 }
 0x25f   : > { %11435 = vst [vmem:[#allocation69_spill] sm:$0xff] %v8559_v19 }
 0x261   : > { %2090 = vmatmul.bf16.gmra.mxu2 %v6839_v11  ;;  %2179 = vmatmul.bf16.gmra.mxu3 %v6839_v11  ;;  %v11431_v11 = vld [vmem:[#allocation29_spill] sm:$0xff] }
 0x262   : > { %v8502_v53 = vadd.f32 %v8395_v56, %v11431_v11  ;;  %v8506_v40 = vadd.f32 %v8397_v8, %v11431_v11  ;;  %v1409_v5 = vpop.f32.mrf.mxu0  ;;  %v1458_v52 = vpop.f32.mrf.mxu1  ;;  %v8521_v8 = vadd.f32 %v8417_v26, %v8035_v9  ;;  %v1400_v26 = vadd.f32 %v1399_v29, %v8033_v25 }
 0x263   : > { %v1505_v15 = vpop.f32.mrf.mxu2  ;;  %v1554_v59 = vpop.f32.mrf.mxu3  ;;  %v1410_v56 = vadd.f32 %v1409_v5, %v8018_v35  ;;  %v1459_v38 = vadd.f32 %v1458_v52, %v8018_v35  ;;  %v1675_v5 = vmax.f32 %v1408_v14, 0.0  ;;  %v1449_v52 = vadd.f32 %v1448_v48, %v8033_v25 }
 0x264   : > { %v1506_v14 = vadd.f32 %v1505_v15, %v8006_v1  ;;  %v1447_v29 = vadd.f32 %v8435_v31, %v8056_v47  ;;  %v1555_v48 = vadd.f32 %v1554_v59, %v8006_v1  ;;  %v1651_v63 = vmax.f32 %v1400_v26, 0.0 }
 0x265   : > { %v1683_v20 = vmax.f32 %v1410_v56, 0.0  ;;  %v1684_v7 = vmax.f32 %v1459_v38, 0.0  ;;  %v1660_v15 = vmax.f32 %v1452_v28, 0.0  ;;  %v1652_v44 = vmax.f32 %v1449_v52, 0.0 }
 0x266   : > { %v1552_v1 = vadd.f32 %v8449_v22, %v8016_v18  ;;  %v1501_v59 = vadd.f32 %v8445_v30, %v8037_v57  ;;  %v1677_v28 = vmax.f32 %v1506_v14, 0.0  ;;  %v1678_v26 = vmax.f32 %v1555_v48, 0.0 }
 0x267   : > { %v8542_v17 = vpack.c.bf16 %v1683_v20, %v1675_v5  ;;  %v8546_v56 = vpack.c.bf16 %v1684_v7, %v1676_v0  ;;  %v1503_v7 = vadd.f32 %v1502_v61, %v8016_v18  ;;  %v8566_v38 = vpack.c.bf16 %v1668_v62, %v1660_v15 }
 0x268   : > { %1917 = vmatmul.bf16.gmra.mxu0 %v8528_v36  ;;  %2006 = vmatmul.bf16.gmra.mxu1 %v8528_v36  ;;  %v1550_v5 = vadd.f32 %v8447_v54, %v8037_v57  ;;  %v1644_v58 = vmax.f32 %v1447_v29, 0.0  ;;  %v1498_v18 = vadd.f32 %v8441_v4, %v8033_v25  ;;  %v8576_v30 = vpack.c.bf16 %v1651_v63, %v1643_v33  ;;  %v11451_v33 = vld [vmem:[#allocation32_spill] sm:$0xff] }
 0x269   : > { %11433 = vst [vmem:[#allocation29_spill] sm:$0xff] %v8542_v17  ;;  %2235 = vmatpush.bf16.msrb.mxu0 %v8542_v17  ;;  %2324 = vmatpush.bf16.msrb.mxu1 %v8546_v56  ;;  %v1547_v52 = vadd.f32 %v8443_v50, %v8033_v25  ;;  %v1670_v62 = vmax.f32 %v1552_v1, 0.0  ;;  %v1636_v54 = vmax.f32 %v8539_v12, 0.0  ;;  %v1496_v4 = vadd.f32 %v8437_v13, %v8056_v47 }
 0x26a   : > { %11434 = vst [vmem:[#allocation30_spill] sm:$0xff] %v8546_v56  ;;  %v8586_v14 = vpack.c.bf16 %v1652_v44, %v1644_v58  ;;  %v1661_v2 = vmax.f32 %v1501_v59, 0.0  ;;  %v1619_v29 = vmax.f32 %v8511_v60, 0.0  ;;  %v1627_v25 = vmax.f32 %v8521_v8, 0.0 }
 0x26b   : > { %v1507_v46 = vpop.f32.mrf.mxu2  ;;  %v1556_v55 = vpop.f32.mrf.mxu3  ;;  %11436 = vst [vmem:[#allocation70_spill] sm:$0xff] %v8566_v38  ;;  %v1545_v50 = vadd.f32 %v8439_v16, %v8056_v47  ;;  %v1662_v39 = vmax.f32 %v1550_v5, 0.0  ;;  %v1628_v13 = vmax.f32 %v8532_v32, 0.0  ;;  %v1493_v12 = vadd.f32 %v8429_v37, %v8062_v45  ;;  %v11452_v5 = vld [vmem:[#allocation27_spill] sm:$0xff] }
 0x26c   : > { %v1508_v20 = vadd.f32 %v1507_v46, %v8018_v35  ;;  %v1557_v31 = vadd.f32 %v1556_v55, %v8018_v35  ;;  %v1669_v35 = vmax.f32 %v1503_v7, 0.0  ;;  %11438 = vst [vmem:[#allocation72_spill] sm:$0xff] %v8576_v30  ;;  %v1653_v48 = vmax.f32 %v1498_v18, 0.0  ;;  %v8614_v7 = vld [vmem:[#allocation2 + $0x38] sm:$0xff] }
 0x26d   : > { %2236 = vmatpush.bf16.msrb.mxu0 %v8559_v19  ;;  %2325 = vmatpush.bf16.msrb.mxu1 %v8566_v38  ;;  %11440 = vst [vmem:[#allocation74_spill] sm:$0xff] %v8586_v14  ;;  %v8602_v60 = vpack.c.bf16 %v1635_v41, %v1627_v25  ;;  %v1542_v47 = vadd.f32 %v8431_v42, %v8062_v45  ;;  %v1654_v16 = vmax.f32 %v1547_v52, 0.0  ;;  %v1620_v63 = vmax.f32 %v8515_v34, 0.0 }
 0x26e   : > { %v1685_v61 = vmax.f32 %v1508_v20, 0.0  ;;  %v1686_v0 = vmax.f32 %v1557_v31, 0.0  ;;  %v8599_v46 = vpack.c.bf16 %v1669_v35, %v1661_v2  ;;  %v8606_v8 = vpack.c.bf16 %v1670_v62, %v1662_v39  ;;  %v11457_v62 = vld [vmem:[#allocation19_spill] sm:$0xff] }
 0x26f   : > { %11442 = vst [vmem:[#allocation76_spill] sm:$0xff] %v8602_v60  ;;  %v1491_v32 = vadd.f32 %v8423_v24, %v8035_v9  ;;  %v8611_v15 = vpack.c.bf16 %v1636_v54, %v1628_v13  ;;  %v1645_v37 = vmax.f32 %v1496_v4, 0.0  ;;  %v1603_v41 = vmax.f32 %v8493_v43, 0.0  ;;  %v11458_v54 = vld [vmem:[#allocation17_spill] sm:$0xff] }
 0x270   : > { %v8573_v22 = vpack.c.bf16 %v1685_v61, %v1677_v28  ;;  %v8580_v57 = vpack.c.bf16 %v1686_v0, %v1678_v26  ;;  %11441 = vst [vmem:[#allocation75_spill] sm:$0xff] %v8599_v46  ;;  %v1611_v20 = vmax.f32 %v8502_v53, 0.0  ;;  %v1540_v45 = vadd.f32 %v8425_v23, %v8035_v9  ;;  %v11462_v13 = vld [vmem:[#allocation65_spill] sm:$0xff] }
 0x271   : > { %2095 = vmatmul.bf16.gmra.mxu2 %v8528_v36  ;;  %2184 = vmatmul.bf16.gmra.mxu3 %v8528_v36  ;;  %11443 = vst [vmem:[#allocation77_spill] sm:$0xff] %v8606_v8  ;;  %v1646_v42 = vmax.f32 %v1545_v50, 0.0  ;;  %v1612_v24 = vmax.f32 %v8506_v40, 0.0  ;;  %v1488_v34 = vadd.f32 %v8412_v51, %v11432_v6  ;;  %v1637_v55 = vmax.f32 %v1493_v12, 0.0  ;;  %v11461_v50 = vld [vmem:[#allocation63_spill] sm:$0xff] }
 0x272   : > { %11437 = vst [vmem:[#allocation71_spill] sm:$0xff] %v8573_v22  ;;  %2413 = vmatpush.bf16.msrb.mxu2 %v8573_v22  ;;  %2502 = vmatpush.bf16.msrb.mxu3 %v8580_v57  ;;  %v8625_v44 = vpack.c.bf16 %v1653_v48, %v1645_v37  ;;  %v1604_v53 = vmax.f32 %v8498_v10, 0.0  ;;  %v1537_v9 = vadd.f32 %v8415_v27, %v11432_v6  ;;  %v1638_v23 = vmax.f32 %v1542_v47, 0.0  ;;  %v11449_v27 = vld [vmem:[#allocation59_spill] sm:$0xff]  ;;  %v11463_v48 = vld [vmem:[#allocation14_spill] sm:$0xff] }
 0x273   : > { %11439 = vst [vmem:[#allocation73_spill] sm:$0xff] %v8580_v57  ;;  %2237 = vmatpush.bf16.msrb.mxu0 %v8576_v30  ;;  %2326 = vmatpush.bf16.msrb.mxu1 %v8586_v14  ;;  %v8631_v43 = vpack.c.bf16 %v1654_v16, %v1646_v42  ;;  %v1486_v1 = vadd.f32 %v8401_v3, %v11431_v11  ;;  %v1629_v51 = vmax.f32 %v1491_v32, 0.0  ;;  %v1587_v10 = vmax.f32 %v8477_v49, 0.0  ;;  %v11450_v3 = vld [vmem:[#allocation68_spill] sm:$0xff]  ;;  %v11465_v37 = vld [vmem:[#allocation26_spill] sm:$0xff] }
 0x274   : > { %11444 = vst [vmem:[#allocation78_spill] sm:$0xff] %v8611_v15  ;;  %v8635_v40 = vpack.c.bf16 %v1619_v29, %v1611_v20  ;;  %v8637_v31 = vpack.c.bf16 %v1620_v63, %v1612_v24  ;;  %v1595_v59 = vmax.f32 %v8485_v21, 0.0  ;;  %v1535_v6 = vadd.f32 %v11449_v27, %v11431_v11  ;;  %v11454_v21 = vld [vmem:[#allocation67_spill] sm:$0xff]  ;;  %v11455_v11 = vld [vmem:[#allocation28_spill] sm:$0xff]  ;;  %v11464_v63 = vld [vmem:[#allocation66_spill] sm:$0xff] }
 0x275   : > { %11445 = vst [vmem:[#allocation79_spill] sm:$0xff] %v8625_v44  ;;  %v1630_v28 = vmax.f32 %v1540_v45, 0.0  ;;  %v1596_v61 = vmax.f32 %v11450_v3, 0.0  ;;  %v1483_v26 = vadd.f32 %v11452_v5, %v11451_v33  ;;  %v1621_v0 = vmax.f32 %v1488_v34, 0.0  ;;  %v11468_v24 = vld [vmem:[#allocation64_spill] sm:$0xff]  ;;  %v11475_v3 = vld [vmem:[#allocation61_spill] sm:$0xff] }
 0x276   : > { %2414 = vmatpush.bf16.msrb.mxu2 %v8599_v46  ;;  %2503 = vmatpush.bf16.msrb.mxu3 %v8606_v8  ;;  %11446 = vst [vmem:[#allocation80_spill] sm:$0xff] %v8631_v43  ;;  %v8650_v58 = vpack.c.bf16 %v1637_v55, %v1629_v51  ;;  %v1588_v49 = vmax.f32 %v11454_v21, 0.0  ;;  %v1532_v18 = vadd.f32 %v11455_v11, %v11451_v33  ;;  %v1622_v35 = vmax.f32 %v1537_v9, 0.0  ;;  %v11469_v55 = vld [vmem:[#allocation8_spill] sm:$0xff]  ;;  %v11472_v51 = vld [vmem:[#allocation9_spill] sm:$0xff] }
 0x277   : > { %2238 = vmatpush.bf16.msrb.mxu0 %v8602_v60  ;;  %2327 = vmatpush.bf16.msrb.mxu1 %v8611_v15  ;;  %11447 = vst [vmem:[#allocation81_spill] sm:$0xff] %v8635_v40  ;;  %v8657_v52 = vpack.c.bf16 %v1638_v23, %v1630_v28  ;;  %v1481_v4 = vadd.f32 %v11458_v54, %v11457_v62  ;;  %v1613_v25 = vmax.f32 %v1486_v1, 0.0  ;;  %v1571_v39 = vmax.f32 %v11461_v50, 0.0  ;;  %v11471_v1 = vld [vmem:[#allocation33_spill] sm:$0xff]  ;;  %v11483_v50 = vld [vmem:[#allocation36_spill] sm:$0xff] }
 0x278   : > { %11448 = vst [vmem:[#allocation82_spill] sm:$0xff] %v8637_v31  ;;  %1922 = vmatmul.bf16.gmra.mxu0 %v8614_v7  ;;  %2011 = vmatmul.bf16.gmra.mxu1 %v8614_v7  ;;  %v8661_v2 = vpack.c.bf16 %v1603_v41, %v1595_v59  ;;  %v8663_v29 = vpack.c.bf16 %v1604_v53, %v1596_v61  ;;  %v1579_v12 = vmax.f32 %v11462_v13, 0.0  ;;  %v1614_v16 = vmax.f32 %v1535_v6, 0.0  ;;  %v11466_v41 = vld [vmem:[#allocation7_spill] sm:$0xff]  ;;  %v11476_v33 = vld [vmem:[#allocation13_spill] sm:$0xff] }
 0x279   : > { %11453 = vst [vmem:[#allocation59_spill] sm:$0xff] %v8650_v58  ;;  %v1530_v47 = vadd.f32 %v11463_v48, %v11457_v62  ;;  %v1580_v32 = vmax.f32 %v11464_v63, 0.0  ;;  %v1478_v20 = vadd.f32 %v11466_v41, %v11465_v37  ;;  %v1605_v45 = vmax.f32 %v1483_v26, 0.0  ;;  %v11478_v11 = vld [vmem:[#allocation37_spill] sm:$0xff]  ;;  %v11481_v62 = vld [vmem:[#allocation16_spill] sm:$0xff]  ;;  %v11484_v13 = vld [vmem:[#allocation51_spill] sm:$0xff] }
 0x27a   : > { %2415 = vmatpush.bf16.msrb.mxu2 %v8625_v44  ;;  %2504 = vmatpush.bf16.msrb.mxu3 %v8631_v43  ;;  %11456 = vst [vmem:[#allocation68_spill] sm:$0xff] %v8657_v52  ;;  %v8674_v42 = vpack.c.bf16 %v1621_v0, %v1613_v25  ;;  %v1572_v34 = vmax.f32 %v11468_v24, 0.0  ;;  %v1527_v53 = vadd.f32 %v11469_v55, %v11465_v37  ;;  %v1606_v9 = vmax.f32 %v1532_v18, 0.0  ;;  %v11477_v0 = vld [vmem:[#allocation62_spill] sm:$0xff]  ;;  %v8714_v63 = vld [vmem:[#allocation2 + $0x40] sm:$0xff] }
 0x27b   : > { %2239 = vmatpush.bf16.msrb.mxu0 %v8635_v40  ;;  %2328 = vmatpush.bf16.msrb.mxu1 %v8637_v31  ;;  %11459 = vst [vmem:[#allocation32_spill] sm:$0xff] %v8661_v2  ;;  %v8681_v23 = vpack.c.bf16 %v1622_v35, %v1614_v16  ;;  %v1476_v59 = vadd.f32 %v11472_v51, %v11471_v1  ;;  %v1597_v28 = vmax.f32 %v1481_v4, 0.0  ;;  %v1563_v61 = vmax.f32 %v11475_v3, 0.0 }
 0x27c   : > { %11460 = vst [vmem:[#allocation27_spill] sm:$0xff] %v8663_v29  ;;  %v8686_v27 = vpack.c.bf16 %v1587_v10, %v1579_v12  ;;  %v8688_v6 = vpack.c.bf16 %v1588_v49, %v1580_v32  ;;  %v1525_v5 = vadd.f32 %v11476_v33, %v11471_v1  ;;  %v1598_v26 = vmax.f32 %v1530_v47, 0.0  ;;  %v11479_v10 = vld [vmem:[#allocation45_spill] sm:$0xff]  ;;  %v11487_v32 = vld [vmem:[#allocation52_spill] sm:$0xff]  ;;  %v11495_v33 = vld [vmem:[#allocation42_spill] sm:$0xff] }
 0x27d   : > { %11467 = vst [vmem:[#allocation67_spill] sm:$0xff] %v8674_v42  ;;  %v1564_v21 = vmax.f32 %v11477_v0, 0.0  ;;  %v1473_v18 = vadd.f32 %v11479_v10, %v11478_v11  ;;  %v1589_v49 = vmax.f32 %v1478_v20, 0.0  ;;  %v8699_v35 = vpack.c.bf16 %v1605_v45, %v1597_v28  ;;  %v11497_v0 = vld [vmem:[#allocation55_spill] sm:$0xff] }
 0x27e   : > { %2416 = vmatpush.bf16.msrb.mxu2 %v8650_v58  ;;  %2505 = vmatpush.bf16.msrb.mxu3 %v8657_v52  ;;  %11470 = vst [vmem:[#allocation28_spill] sm:$0xff] %v8681_v23  ;;  %v1522_v54 = vadd.f32 %v11481_v62, %v11478_v11  ;;  %v1590_v4 = vmax.f32 %v1527_v53, 0.0  ;;  %v8705_v25 = vpack.c.bf16 %v1606_v9, %v1598_v26  ;;  %v1581_v16 = vmax.f32 %v1476_v59, 0.0  ;;  %v11490_v53 = vld [vmem:[#allocation53_spill] sm:$0xff]  ;;  %v11491_v9 = vld [vmem:[#allocation54_spill] sm:$0xff]  ;;  %v11498_v11 = vld [vmem:[#allocation56_spill] sm:$0xff] }
 0x27f   : > { %2240 = vmatpush.bf16.msrb.mxu0 %v8661_v2  ;;  %2329 = vmatpush.bf16.msrb.mxu1 %v8663_v29  ;;  %11473 = vst [vmem:[#allocation19_spill] sm:$0xff] %v8686_v27  ;;  %v1471_v12 = vadd.f32 %v11484_v13, %v11483_v50  ;;  %v8709_v48 = vpack.c.bf16 %v1571_v39, %v1563_v61  ;;  %v1582_v41 = vmax.f32 %v1525_v5, 0.0  ;;  %v1573_v45 = vmax.f32 %v1473_v18, 0.0  ;;  %v11494_v61 = vld [vmem:[#allocation57_spill] sm:$0xff]  ;;  %v11499_v18 = vld [vmem:[#allocation50_spill] sm:$0xff] }
 0x280   : > { %11474 = vst [vmem:[#allocation17_spill] sm:$0xff] %v8688_v6  ;;  %v8711_v47 = vpack.c.bf16 %v1572_v34, %v1564_v21  ;;  %v1520_v37 = vadd.f32 %v11487_v32, %v11483_v50  ;;  %v8719_v24 = vpack.c.bf16 %v1589_v49, %v1581_v16  ;;  %v1574_v34 = vmax.f32 %v1522_v54, 0.0  ;;  %v11496_v5 = vld [vmem:[#allocation49_spill] sm:$0xff]  ;;  %v11500_v49 = vld [vmem:[#allocation11_spill] sm:$0xff]  ;;  %v11502_v50 = vld [vmem:[#allocation58_spill] sm:$0xff] }
 0x281   : > { %2100 = vmatmul.bf16.gmra.mxu2 %v8614_v7  ;;  %2189 = vmatmul.bf16.gmra.mxu3 %v8614_v7  ;;  %11480 = vst [vmem:[#allocation63_spill] sm:$0xff] %v8699_v35  ;;  %v8723_v55 = vpack.c.bf16 %v1590_v4, %v1582_v41  ;;  %v1565_v51 = vmax.f32 %v1471_v12, 0.0  ;;  %v11501_v62 = vld [vmem:[#allocation5_spill] sm:$0xff]  ;;  %v11503_v12 = vld [vmem:[#allocation31_spill] sm:$0xff]  ;;  %v8753_v16 = vld [vmem:[#allocation2 + $0x48] sm:$0xff] }
 0x282   : > { %2417 = vmatpush.bf16.msrb.mxu2 %v8674_v42  ;;  %2506 = vmatpush.bf16.msrb.mxu3 %v8681_v23  ;;  %11482 = vst [vmem:[#allocation65_spill] sm:$0xff] %v8705_v25  ;;  %v1566_v59 = vmax.f32 %v1520_v37, 0.0  ;;  %v11504_v37 = vld [vmem:[#allocation47_spill] sm:$0xff] }
 0x283   : > { %2241 = vmatpush.bf16.msrb.mxu0 %v8686_v27  ;;  %2330 = vmatpush.bf16.msrb.mxu1 %v8688_v6  ;;  %11485 = vst [vmem:[#allocation14_spill] sm:$0xff] %v8709_v48  ;;  %v8731_v28 = vpack.c.bf16 %v1573_v45, %v1565_v51  ;;  %v11508_v51 = vld [vmem:[#allocation15_spill] sm:$0xff] }
 0x284   : > { %11486 = vst [vmem:[#allocation66_spill] sm:$0xff] %v8711_v47  ;;  %v8733_v3 = vpack.c.bf16 %v1574_v34, %v1566_v59  ;;  %v11509_v59 = vld [vmem:[#allocation44_spill] sm:$0xff] }
 0x285   : > { %v1888_v20 = vpop.f32.mrf.mxu0  ;;  %11488 = vst [vmem:[#allocation26_spill] sm:$0xff] %v8719_v24  ;;  %v1977_v39 = vpop.f32.mrf.mxu1 }
 0x286   : > { %2418 = vmatpush.bf16.msrb.mxu2 %v8699_v35  ;;  %2507 = vmatpush.bf16.msrb.mxu3 %v8705_v25  ;;  %11489 = vst [vmem:[#allocation7_spill] sm:$0xff] %v8723_v55  ;;  %v2591_v1 = vmax.f32 %v1888_v20, %v1977_v39  ;;  %v11505_v20 = vld [vmem:[#allocation41_spill] sm:$0xff] }
 0x287   : > { %2242 = vmatpush.bf16.msrb.mxu0 %v8709_v48  ;;  %2331 = vmatpush.bf16.msrb.mxu1 %v8711_v47  ;;  %11492 = vst [vmem:[#allocation64_spill] sm:$0xff] %v8731_v28  ;;  %v11506_v39 = vld [vmem:[#allocation25_spill] sm:$0xff] }
 0x288   : > { %1927 = vmatmul.bf16.gmra.mxu0 %v8714_v63  ;;  %2016 = vmatmul.bf16.gmra.mxu1 %v8714_v63  ;;  %11493 = vst [vmem:[#allocation8_spill] sm:$0xff] %v8733_v3 }
 0x28a   : > { %2419 = vmatpush.bf16.msrb.mxu2 %v8719_v24  ;;  %2508 = vmatpush.bf16.msrb.mxu3 %v8723_v55 }
 0x28b   : > { %3040 = vmatpush.bf16.msra.mxu0 %v11490_v53  ;;  %3129 = vmatpush.bf16.msra.mxu1 %v11491_v9 }
 0x28d   : > { %v1890_v26 = vpop.f32.mrf.mxu0  ;;  %v1979_v21 = vpop.f32.mrf.mxu1 }
 0x28e   : > { %2420 = vmatpush.bf16.msrb.mxu2 %v8731_v28  ;;  %2509 = vmatpush.bf16.msrb.mxu3 %v8733_v3  ;;  %v2592_v10 = vmax.f32 %v1890_v26, %v1979_v21 }
 0x28f   : > { %3041 = vmatpush.bf16.msra.mxu0 %v11494_v61  ;;  %3130 = vmatpush.bf16.msra.mxu1 %v11495_v33  ;;  %v8827_v33 = vld [vmem:[#allocation2 + $0x60] sm:$0xff] }
 0x290   : > { %11528 = vst [vmem:[#allocation62_spill] sm:$0xff] %v8827_v33 }
 0x291   : > { %2105 = vmatmul.bf16.gmra.mxu2 %v8714_v63  ;;  %2194 = vmatmul.bf16.gmra.mxu3 %v8714_v63 }
 0x292   : > { %3218 = vmatpush.bf16.msra.mxu2 %v11496_v5  ;;  %3307 = vmatpush.bf16.msra.mxu3 %v11497_v0 }
 0x293   : > { %3042 = vmatpush.bf16.msra.mxu0 %v11498_v11  ;;  %3131 = vmatpush.bf16.msra.mxu1 %v11499_v18 }
 0x294   : > { %v2066_v54 = vpop.f32.mrf.mxu2  ;;  %v8750_v13 = vpop.f32.mrf.mxu3 }
 0x295   : > { %v8747_v4 = vmax.f32 %v2591_v1, %v2066_v54  ;;  %v1893_v41 = vpop.f32.mrf.mxu0  ;;  %v1982_v45 = vpop.f32.mrf.mxu1  ;;  %v11507_v1 = vld [vmem:[#allocation43_spill] sm:$0xff] }
 0x296   : > { %3219 = vmatpush.bf16.msra.mxu2 %v11500_v49  ;;  %3308 = vmatpush.bf16.msra.mxu3 %v11501_v62  ;;  %v2593_v34 = vmax.f32 %v1893_v41, %v1982_v45  ;;  %v11510_v54 = vld [vmem:[#allocation39_spill] sm:$0xff]  ;;  %v11512_v45 = vld [vmem:[#allocation46_spill] sm:$0xff] }
 0x297   : > { %3043 = vmatpush.bf16.msra.mxu0 %v11502_v50  ;;  %3132 = vmatpush.bf16.msra.mxu1 %v11503_v12  ;;  %v11519_v12 = vld [vmem:[#allocation21_spill] sm:$0xff]  ;;  %v8787_v50 = vld [vmem:[#allocation2 + $0x50] sm:$0xff] }
 0x298   : > { %1932 = vmatmul.bf16.gmra.mxu0 %v8753_v16  ;;  %2021 = vmatmul.bf16.gmra.mxu1 %v8753_v16 }
 0x29a   : > { %3220 = vmatpush.bf16.msra.mxu2 %v11504_v37  ;;  %3309 = vmatpush.bf16.msra.mxu3 %v11505_v20  ;;  %v11511_v20 = vld [vmem:[#allocation23_spill] sm:$0xff] }
 0x29b   : > { %3044 = vmatpush.bf16.msra.mxu0 %v11506_v39  ;;  %3133 = vmatpush.bf16.msra.mxu1 %v11507_v1  ;;  %v11513_v39 = vld [vmem:[#allocation48_spill] sm:$0xff] }
 0x29c   : > { %v2068_v26 = vpop.f32.mrf.mxu2  ;;  %v8768_v32 = vpop.f32.mrf.mxu3 }
 0x29d   : > { %v8765_v21 = vmax.f32 %v2592_v10, %v2068_v26  ;;  %v1895_v1 = vpop.f32.mrf.mxu0  ;;  %v11515_v26 = vld [vmem:[#allocation34_spill] sm:$0xff] }
 0x29e   : > { %3221 = vmatpush.bf16.msra.mxu2 %v11508_v51  ;;  %3310 = vmatpush.bf16.msra.mxu3 %v11509_v59  ;;  %v1984_v51 = vpop.f32.mrf.mxu1  ;;  %v11514_v59 = vld [vmem:[#allocation18_spill] sm:$0xff] }
 0x29f   : > { %3045 = vmatpush.bf16.msra.mxu0 %v11510_v54  ;;  %3134 = vmatpush.bf16.msra.mxu1 %v11511_v20  ;;  %v2594_v10 = vmax.f32 %v1895_v1, %v1984_v51  ;;  %v11516_v54 = vld [vmem:[#allocation24_spill] sm:$0xff]  ;;  %v11520_v51 = vld [vmem:[#allocation35_spill] sm:$0xff] }
 0x2a0   : > { %v11517_v20 = vld [vmem:[#allocation40_spill] sm:$0xff] }
 0x2a1   : > { %2110 = vmatmul.bf16.gmra.mxu2 %v8753_v16  ;;  %2199 = vmatmul.bf16.gmra.mxu3 %v8753_v16 }
 0x2a2   : > { %3222 = vmatpush.bf16.msra.mxu2 %v11512_v45  ;;  %3311 = vmatpush.bf16.msra.mxu3 %v11513_v39  ;;  %v11518_v45 = vld [vmem:[#allocation20_spill] sm:$0xff] }
 0x2a3   : > { %3046 = vmatpush.bf16.msra.mxu0 %v11514_v59  ;;  %3135 = vmatpush.bf16.msra.mxu1 %v11515_v26 }
 0x2a4   : > { %v2071_v41 = vpop.f32.mrf.mxu2  ;;  %v8784_v39 = vpop.f32.mrf.mxu3 }
 0x2a5   : > { %v8781_v37 = vmax.f32 %v2593_v34, %v2071_v41  ;;  %v1898_v26 = vpop.f32.mrf.mxu0  ;;  %v11522_v34 = vld [vmem:[#allocation22_spill] sm:$0xff] }
 0x2a6   : > { %3223 = vmatpush.bf16.msra.mxu2 %v11516_v54  ;;  %3312 = vmatpush.bf16.msra.mxu3 %v11517_v20  ;;  %v11521_v54 = vld [vmem:[#allocation38_spill] sm:$0xff]  ;;  %v1987_v20 = vpop.f32.mrf.mxu1 }
 0x2a7   : > { %3047 = vmatpush.bf16.msra.mxu0 %v11518_v45  ;;  %3136 = vmatpush.bf16.msra.mxu1 %v11519_v12  ;;  %v2595_v59 = vmax.f32 %v1898_v26, %v1987_v20  ;;  %v11523_v41 = vld [vmem:[#allocation10_spill] sm:$0xff] }
 0x2a8   : > { %1937 = vmatmul.bf16.gmra.mxu0 %v8787_v50  ;;  %2026 = vmatmul.bf16.gmra.mxu1 %v8787_v50 }
 0x2aa   : > { %3224 = vmatpush.bf16.msra.mxu2 %v11520_v51  ;;  %3313 = vmatpush.bf16.msra.mxu3 %v11521_v54 }
 0x2ac   : > { %v2073_v12 = vpop.f32.mrf.mxu2  ;;  %v8799_v62 = vpop.f32.mrf.mxu3 }
 0x2ad   : > { %v8797_v45 = vmax.f32 %v2594_v10, %v2073_v12  ;;  %v1900_v51 = vpop.f32.mrf.mxu0 }
 0x2ae   : > { %3225 = vmatpush.bf16.msra.mxu2 %v11522_v34  ;;  %3314 = vmatpush.bf16.msra.mxu3 %v11523_v41  ;;  %v1989_v54 = vpop.f32.mrf.mxu1  ;;  %v8809_v41 = vld [vmem:[#allocation2 + $0x58] sm:$0xff] }
 0x2af   : > { %v2596_v20 = vmax.f32 %v1900_v51, %v1989_v54  ;;  %11524 = vst [vmem:[#allocation33_spill] sm:$0xff] %v8809_v41 }
 0x2b1   : > { %2115 = vmatmul.bf16.gmra.mxu2 %v8787_v50  ;;  %2204 = vmatmul.bf16.gmra.mxu3 %v8787_v50 }
 0x2b4   : > { %v2076_v26 = vpop.f32.mrf.mxu2  ;;  %v8807_v34 = vpop.f32.mrf.mxu3 }
 0x2b5   : > { %v8805_v49 = vmax.f32 %v2595_v59, %v2076_v26  ;;  %v1903_v10 = vpop.f32.mrf.mxu0 }
 0x2b6   : > { %v1992_v18 = vpop.f32.mrf.mxu1 }
 0x2b7   : > { %v2597_v1 = vmax.f32 %v1903_v10, %v1992_v18 }
 0x2b8   : > { %1942 = vmatmul.bf16.gmra.mxu0 %v8809_v41  ;;  %2031 = vmatmul.bf16.gmra.mxu1 %v8809_v41 }
 0x2bc   : > { %v2078_v54 = vpop.f32.mrf.mxu2  ;;  %v8817_v11 = vpop.f32.mrf.mxu3 }
 0x2bd   : > { %v8815_v51 = vmax.f32 %v2596_v20, %v2078_v54  ;;  %11525 = vst [vmem:[#allocation9_spill] sm:$0xff] %v8817_v11  ;;  %v1905_v26 = vpop.f32.mrf.mxu0  ;;  %v11543_v11 = vld [vmem:[#allocation6_spill] sm:$0xff] }
 0x2be   : > { %v1994_v0 = vpop.f32.mrf.mxu1 }
 0x2bf   : > { %v2598_v12 = vmax.f32 %v1905_v26, %v1994_v0 }
 0x2c1   : > { %2120 = vmatmul.bf16.gmra.mxu2 %v8809_v41  ;;  %2209 = vmatmul.bf16.gmra.mxu3 %v8809_v41 }
 0x2c4   : > { %v2081_v18 = vpop.f32.mrf.mxu2  ;;  %v8825_v5 = vpop.f32.mrf.mxu3 }
 0x2c5   : > { %v8823_v10 = vmax.f32 %v2597_v1, %v2081_v18  ;;  %11527 = vst [vmem:[#allocation13_spill] sm:$0xff] %v8825_v5  ;;  %v1908_v54 = vpop.f32.mrf.mxu0 }
 0x2c6   : > { %v1997_v61 = vpop.f32.mrf.mxu1 }
 0x2c7   : > { %11526 = vst [vmem:[#allocation61_spill] sm:$0xff] %v8823_v10  ;;  %v2599_v59 = vmax.f32 %v1908_v54, %v1997_v61  ;;  %v8845_v10 = vld [vmem:[#allocation2 + $0x68] sm:$0xff] }
 0x2c8   : > { %1947 = vmatmul.bf16.gmra.mxu0 %v8827_v33  ;;  %2036 = vmatmul.bf16.gmra.mxu1 %v8827_v33  ;;  %11533 = vst [vmem:[#allocation51_spill] sm:$0xff] %v8845_v10 }
 0x2cc   : > { %v2083_v0 = vpop.f32.mrf.mxu2  ;;  %v8835_v9 = vpop.f32.mrf.mxu3 }
 0x2cd   : > { %v8833_v26 = vmax.f32 %v2598_v12, %v2083_v0  ;;  %11530 = vst [vmem:[#allocation45_spill] sm:$0xff] %v8835_v9  ;;  %v1910_v18 = vpop.f32.mrf.mxu0 }
 0x2ce   : > { %v1999_v53 = vpop.f32.mrf.mxu1 }
 0x2cf   : > { %11529 = vst [vmem:[#allocation37_spill] sm:$0xff] %v8833_v26  ;;  %v2600_v20 = vmax.f32 %v1910_v18, %v1999_v53 }
 0x2d1   : > { %2125 = vmatmul.bf16.gmra.mxu2 %v8827_v33  ;;  %2214 = vmatmul.bf16.gmra.mxu3 %v8827_v33 }
 0x2d4   : > { %v2086_v61 = vpop.f32.mrf.mxu2  ;;  %v8843_v5 = vpop.f32.mrf.mxu3 }
 0x2d5   : > { %v8841_v54 = vmax.f32 %v2599_v59, %v2086_v61  ;;  %11532 = vst [vmem:[#allocation36_spill] sm:$0xff] %v8843_v5  ;;  %v1913_v0 = vpop.f32.mrf.mxu0 }
 0x2d6   : > { %v2002_v41 = vpop.f32.mrf.mxu1 }
 0x2d7   : > { %11531 = vst [vmem:[#allocation16_spill] sm:$0xff] %v8841_v54  ;;  %v2601_v1 = vmax.f32 %v1913_v0, %v2002_v41  ;;  %v8863_v54 = vld [vmem:[#allocation2 + $0x70] sm:$0xff] }
 0x2d8   : > { %1952 = vmatmul.bf16.gmra.mxu0 %v8845_v10  ;;  %2041 = vmatmul.bf16.gmra.mxu1 %v8845_v10  ;;  %11538 = vst [vmem:[#allocation86_spill] sm:$0xff] %v8863_v54 }
 0x2dc   : > { %v2088_v53 = vpop.f32.mrf.mxu2  ;;  %v8853_v33 = vpop.f32.mrf.mxu3 }
 0x2dd   : > { %v8851_v18 = vmax.f32 %v2600_v20, %v2088_v53  ;;  %11535 = vst [vmem:[#allocation83_spill] sm:$0xff] %v8853_v33  ;;  %v1915_v61 = vpop.f32.mrf.mxu0 }
 0x2de   : > { %v2004_v9 = vpop.f32.mrf.mxu1 }
 0x2df   : > { %11534 = vst [vmem:[#allocation52_spill] sm:$0xff] %v8851_v18  ;;  %v2602_v12 = vmax.f32 %v1915_v61, %v2004_v9 }
 0x2e1   : > { %2130 = vmatmul.bf16.gmra.mxu2 %v8845_v10  ;;  %2219 = vmatmul.bf16.gmra.mxu3 %v8845_v10 }
 0x2e4   : > { %v2091_v41 = vpop.f32.mrf.mxu2  ;;  %v8861_v5 = vpop.f32.mrf.mxu3 }
 0x2e5   : > { %v8859_v0 = vmax.f32 %v2601_v1, %v2091_v41  ;;  %11537 = vst [vmem:[#allocation85_spill] sm:$0xff] %v8861_v5  ;;  %v1918_v53 = vpop.f32.mrf.mxu0 }
 0x2e6   : > { %v2007_v26 = vpop.f32.mrf.mxu1 }
 0x2e7   : > { %11536 = vst [vmem:[#allocation84_spill] sm:$0xff] %v8859_v0  ;;  %v2603_v59 = vmax.f32 %v1918_v53, %v2007_v26  ;;  %v8881_v0 = vld [vmem:[#allocation2 + $0x78] sm:$0xff] }
 0x2e8   : > { %1957 = vmatmul.bf16.gmra.mxu0 %v8863_v54  ;;  %2046 = vmatmul.bf16.gmra.mxu1 %v8863_v54 }
 0x2ec   : > { %v2093_v9 = vpop.f32.mrf.mxu2  ;;  %v8871_v10 = vpop.f32.mrf.mxu3 }
 0x2ed   : > { %v8869_v61 = vmax.f32 %v2602_v12, %v2093_v9  ;;  %11540 = vst [vmem:[#allocation88_spill] sm:$0xff] %v8871_v10  ;;  %v1920_v41 = vpop.f32.mrf.mxu0 }
 0x2ee   : > { %v2009_v33 = vpop.f32.mrf.mxu1 }
 0x2ef   : > { %11539 = vst [vmem:[#allocation87_spill] sm:$0xff] %v8869_v61  ;;  %v2604_v20 = vmax.f32 %v1920_v41, %v2009_v33 }
 0x2f1   : > { %2135 = vmatmul.bf16.gmra.mxu2 %v8863_v54  ;;  %2224 = vmatmul.bf16.gmra.mxu3 %v8863_v54 }
 0x2f4   : > { %v2096_v26 = vpop.f32.mrf.mxu2  ;;  %v8879_v5 = vpop.f32.mrf.mxu3 }
 0x2f5   : > { %v8877_v53 = vmax.f32 %v2603_v59, %v2096_v26  ;;  %11542 = vst [vmem:[#allocation90_spill] sm:$0xff] %v8879_v5  ;;  %v1923_v9 = vpop.f32.mrf.mxu0 }
 0x2f6   : > { %v2012_v18 = vpop.f32.mrf.mxu1 }
 0x2f7   : > { %11541 = vst [vmem:[#allocation89_spill] sm:$0xff] %v8877_v53  ;;  %v2605_v1 = vmax.f32 %v1923_v9, %v2012_v18 }
 0x2f8   : > { %1962 = vmatmul.bf16.gmra.mxu0 %v8881_v0  ;;  %2051 = vmatmul.bf16.gmra.mxu1 %v8881_v0 }
 0x2fc   : > { %v2098_v33 = vpop.f32.mrf.mxu2  ;;  %v8889_v54 = vpop.f32.mrf.mxu3 }
 0x2fd   : > { %v8887_v41 = vmax.f32 %v2604_v20, %v2098_v33  ;;  %v1925_v26 = vpop.f32.mrf.mxu0 }
 0x2fe   : > { %v2014_v10 = vpop.f32.mrf.mxu1 }
 0x2ff   : > { %v2606_v12 = vmax.f32 %v1925_v26, %v2014_v10 }
 0x301   : > { %2140 = vmatmul.bf16.gmra.mxu2 %v8881_v0  ;;  %2229 = vmatmul.bf16.gmra.mxu3 %v8881_v0 }
 0x304   : > { %v2101_v18 = vpop.f32.mrf.mxu2  ;;  %v8897_v5 = vpop.f32.mrf.mxu3 }
 0x305   : > { %v8895_v9 = vmax.f32 %v2605_v1, %v2101_v18  ;;  %v1928_v33 = vpop.f32.mrf.mxu0 }
 0x306   : > { %v2017_v53 = vpop.f32.mrf.mxu1 }
 0x307   : > { %v2607_v61 = vmax.f32 %v1928_v33, %v2017_v53 }
 0x308   : > { %2243 = vmatmul.bf16.vlgmr.msrb.gmra.mxu0 %v11543_v11  ;;  %2332 = vmatmul.bf16.vlgmr.msrb.gmra.mxu1 %v11543_v11 }
 0x309   : > { %3396 = vmatpush.bf16.msrb.mxu0 %v8542_v17  ;;  %3485 = vmatpush.bf16.msrb.mxu1 %v8546_v56 }
 0x30c   : > { %v2103_v10 = vpop.f32.mrf.mxu2  ;;  %v8907_v1 = vpop.f32.mrf.mxu3 }
 0x30d   : > { %v8905_v26 = vmax.f32 %v2606_v12, %v2103_v10  ;;  %3397 = vmatpush.bf16.msrb.mxu0 %v8559_v19  ;;  %v1930_v20 = vpop.f32.mrf.mxu0  ;;  %3486 = vmatpush.bf16.msrb.mxu1 %v8566_v38 }
 0x30e   : > { %v2019_v53 = vpop.f32.mrf.mxu1 }
 0x30f   : > { %v2608_v33 = vmax.f32 %v1930_v20, %v2019_v53 }
 0x311   : > { %2421 = vmatmul.bf16.vlgmr.msrb.gmra.mxu2 %v11543_v11  ;;  %2510 = vmatmul.bf16.vlgmr.msrb.gmra.mxu3 %v11543_v11 }
 0x312   : > { %3574 = vmatpush.bf16.msrb.mxu2 %v8573_v22  ;;  %3663 = vmatpush.bf16.msrb.mxu3 %v8580_v57 }
 0x313   : > { %3398 = vmatpush.bf16.msrb.mxu0 %v8576_v30  ;;  %3487 = vmatpush.bf16.msrb.mxu1 %v8586_v14 }
 0x314   : > { %v2106_v12 = vpop.f32.mrf.mxu2  ;;  %v8921_v18 = vpop.f32.mrf.mxu3 }
 0x315   : > { %v8919_v10 = vmax.f32 %v2607_v61, %v2106_v12  ;;  %v1933_v20 = vpop.f32.mrf.mxu0  ;;  %v11544_v61 = vld [vmem:[#allocation12_spill] sm:$0xff] }
 0x316   : > { %3575 = vmatpush.bf16.msrb.mxu2 %v8599_v46  ;;  %3664 = vmatpush.bf16.msrb.mxu3 %v8606_v8  ;;  %v2022_v53 = vpop.f32.mrf.mxu1 }
 0x317   : > { %3399 = vmatpush.bf16.msrb.mxu0 %v8602_v60  ;;  %3488 = vmatpush.bf16.msrb.mxu1 %v8611_v15  ;;  %v2609_v59 = vmax.f32 %v1933_v20, %v2022_v53 }
 0x318   : > { %2248 = vmatmul.bf16.gmra.mxu0 %v11544_v61  ;;  %2337 = vmatmul.bf16.gmra.mxu1 %v11544_v61 }
 0x31a   : > { %3576 = vmatpush.bf16.msrb.mxu2 %v8625_v44  ;;  %3665 = vmatpush.bf16.msrb.mxu3 %v8631_v43  ;;  %v6948_v44 = vld [vmem:[#allocation2 + $0x28] sm:$0xff] }
 0x31b   : > { %3400 = vmatpush.bf16.msrb.mxu0 %v8635_v40  ;;  %3489 = vmatpush.bf16.msrb.mxu1 %v8637_v31 }
 0x31c   : > { %v2108_v12 = vpop.f32.mrf.mxu2  ;;  %v8937_v60 = vpop.f32.mrf.mxu3 }
 0x31d   : > { %v8935_v11 = vmax.f32 %v2608_v33, %v2108_v12  ;;  %v1935_v53 = vpop.f32.mrf.mxu0 }
 0x31e   : > { %3577 = vmatpush.bf16.msrb.mxu2 %v8650_v58  ;;  %3666 = vmatpush.bf16.msrb.mxu3 %v8657_v52  ;;  %v2024_v40 = vpop.f32.mrf.mxu1 }
 0x31f   : > { %3401 = vmatpush.bf16.msrb.mxu0 %v8661_v2  ;;  %3490 = vmatpush.bf16.msrb.mxu1 %v8663_v29  ;;  %v2610_v31 = vmax.f32 %v1935_v53, %v2024_v40  ;;  %v6947_v2 = vld [vmem:[#allocation2 + $0x20] sm:$0xff] }
 0x321   : > { %2426 = vmatmul.bf16.gmra.mxu2 %v11544_v61  ;;  %2515 = vmatmul.bf16.gmra.mxu3 %v11544_v61 }
 0x322   : > { %3578 = vmatpush.bf16.msrb.mxu2 %v8674_v42  ;;  %3667 = vmatpush.bf16.msrb.mxu3 %v8681_v23 }
 0x323   : > { %3402 = vmatpush.bf16.msrb.mxu0 %v8686_v27  ;;  %3491 = vmatpush.bf16.msrb.mxu1 %v8688_v6  ;;  %v6946_v6 = vld [vmem:[#allocation2 + $0x18] sm:$0xff] }
 0x324   : > { %v2111_v33 = vpop.f32.mrf.mxu2  ;;  %v8953_v20 = vpop.f32.mrf.mxu3 }
 0x325   : > { %v8951_v12 = vmax.f32 %v2609_v59, %v2111_v33  ;;  %v1938_v61 = vpop.f32.mrf.mxu0  ;;  %v11545_v59 = vld [vmem:[#allocation60_spill] sm:$0xff] }
 0x326   : > { %3579 = vmatpush.bf16.msrb.mxu2 %v8699_v35  ;;  %3668 = vmatpush.bf16.msrb.mxu3 %v8705_v25  ;;  %v2027_v53 = vpop.f32.mrf.mxu1 }
 0x327   : > { %3403 = vmatpush.bf16.msrb.mxu0 %v8709_v48  ;;  %3492 = vmatpush.bf16.msrb.mxu1 %v8711_v47  ;;  %v2611_v27 = vmax.f32 %v1938_v61, %v2027_v53 }
 0x328   : > { %2253 = vmatmul.bf16.gmra.mxu0 %v11545_v59  ;;  %2342 = vmatmul.bf16.gmra.mxu1 %v11545_v59 }
 0x32a   : > { %3580 = vmatpush.bf16.msrb.mxu2 %v8719_v24  ;;  %3669 = vmatpush.bf16.msrb.mxu3 %v8723_v55  ;;  %v6945_v24 = vld [vmem:[#allocation2 + $0x10] sm:$0xff] }
 0x32c   : > { %v2113_v33 = vpop.f32.mrf.mxu2  ;;  %v8967_v35 = vpop.f32.mrf.mxu3 }
 0x32d   : > { %v8965_v25 = vmax.f32 %v2610_v31, %v2113_v33  ;;  %v1940_v53 = vpop.f32.mrf.mxu0 }
 0x32e   : > { %3581 = vmatpush.bf16.msrb.mxu2 %v8731_v28  ;;  %3670 = vmatpush.bf16.msrb.mxu3 %v8733_v3  ;;  %v2029_v40 = vpop.f32.mrf.mxu1 }
 0x32f   : > { %v2612_v47 = vmax.f32 %v1940_v53, %v2029_v40 }
 0x331   : > { %2431 = vmatmul.bf16.gmra.mxu2 %v6945_v24  ;;  %2520 = vmatmul.bf16.gmra.mxu3 %v6945_v24 }
 0x334   : > { %v2116_v55 = vpop.f32.mrf.mxu2  ;;  %v8975_v31 = vpop.f32.mrf.mxu3 }
 0x335   : > { %v8973_v59 = vmax.f32 %v2611_v27, %v2116_v55  ;;  %v1943_v28 = vpop.f32.mrf.mxu0 }
 0x336   : > { %v2032_v48 = vpop.f32.mrf.mxu1 }
 0x337   : > { %v2613_v3 = vmax.f32 %v1943_v28, %v2032_v48 }
 0x338   : > { %2258 = vmatmul.bf16.gmra.mxu0 %v6946_v6  ;;  %2347 = vmatmul.bf16.gmra.mxu1 %v6946_v6 }
 0x33c   : > { %v2118_v61 = vpop.f32.mrf.mxu2  ;;  %v8981_v42 = vpop.f32.mrf.mxu3 }
 0x33d   : > { %v8979_v23 = vmax.f32 %v2612_v47, %v2118_v61  ;;  %v1945_v24 = vpop.f32.mrf.mxu0 }
 0x33e   : > { %v2034_v55 = vpop.f32.mrf.mxu1 }
 0x33f   : > { %v2614_v40 = vmax.f32 %v1945_v24, %v2034_v55 }
 0x341   : > { %2436 = vmatmul.bf16.gmra.mxu2 %v6946_v6  ;;  %2525 = vmatmul.bf16.gmra.mxu3 %v6946_v6 }
 0x344   : > { %v2121_v53 = vpop.f32.mrf.mxu2  ;;  %v8987_v48 = vpop.f32.mrf.mxu3 }
 0x345   : > { %v8985_v33 = vmax.f32 %v2613_v3, %v2121_v53  ;;  %v1948_v47 = vpop.f32.mrf.mxu0 }
 0x346   : > { %v2037_v61 = vpop.f32.mrf.mxu1 }
 0x347   : > { %v2615_v29 = vmax.f32 %v1948_v47, %v2037_v61 }
 0x348   : > { %2263 = vmatmul.bf16.gmra.mxu0 %v6947_v2  ;;  %2352 = vmatmul.bf16.gmra.mxu1 %v6947_v2 }
 0x34c   : > { %v2123_v27 = vpop.f32.mrf.mxu2  ;;  %v8993_v58 = vpop.f32.mrf.mxu3 }
 0x34d   : > { %v8991_v52 = vmax.f32 %v2614_v40, %v2123_v27  ;;  %v1950_v3 = vpop.f32.mrf.mxu0 }
 0x34e   : > { %v2039_v24 = vpop.f32.mrf.mxu1 }
 0x34f   : > { %v2616_v55 = vmax.f32 %v1950_v3, %v2039_v24 }
 0x351   : > { %2441 = vmatmul.bf16.gmra.mxu2 %v6947_v2  ;;  %2530 = vmatmul.bf16.gmra.mxu3 %v6947_v2 }
 0x354   : > { %v2126_v53 = vpop.f32.mrf.mxu2  ;;  %v8999_v47 = vpop.f32.mrf.mxu3 }
 0x355   : > { %v8997_v28 = vmax.f32 %v2615_v29, %v2126_v53  ;;  %v1953_v27 = vpop.f32.mrf.mxu0 }
 0x356   : > { %v2042_v40 = vpop.f32.mrf.mxu1 }
 0x357   : > { %v2617_v43 = vmax.f32 %v1953_v27, %v2042_v40  ;;  %v6949_v40 = vld [vmem:[#allocation2 + $0x30] sm:$0xff] }
 0x358   : > { %2268 = vmatmul.bf16.gmra.mxu0 %v6948_v44  ;;  %2357 = vmatmul.bf16.gmra.mxu1 %v6948_v44 }
 0x35c   : > { %v2128_v6 = vpop.f32.mrf.mxu2  ;;  %v9005_v8 = vpop.f32.mrf.mxu3 }
 0x35d   : > { %v9003_v15 = vmax.f32 %v2616_v55, %v2128_v6  ;;  %v1955_v29 = vpop.f32.mrf.mxu0 }
 0x35e   : > { %v2044_v3 = vpop.f32.mrf.mxu1 }
 0x35f   : > { %v2618_v24 = vmax.f32 %v1955_v29, %v2044_v3 }
 0x361   : > { %2446 = vmatmul.bf16.gmra.mxu2 %v6948_v44  ;;  %2535 = vmatmul.bf16.gmra.mxu3 %v6948_v44 }
 0x364   : > { %v2131_v53 = vpop.f32.mrf.mxu2  ;;  %v9011_v27 = vpop.f32.mrf.mxu3 }
 0x365   : > { %v9009_v61 = vmax.f32 %v2617_v43, %v2131_v53  ;;  %v1958_v6 = vpop.f32.mrf.mxu0 }
 0x366   : > { %v2047_v55 = vpop.f32.mrf.mxu1 }
 0x367   : > { %v2619_v46 = vmax.f32 %v1958_v6, %v2047_v55 }
 0x368   : > { %2273 = vmatmul.bf16.gmra.mxu0 %v8528_v36  ;;  %2362 = vmatmul.bf16.gmra.mxu1 %v8528_v36 }
 0x36c   : > { %v2133_v2 = vpop.f32.mrf.mxu2  ;;  %v9019_v29 = vpop.f32.mrf.mxu3 }
 0x36d   : > { %v9017_v14 = vmax.f32 %v2618_v24, %v2133_v2  ;;  %v1960_v43 = vpop.f32.mrf.mxu0 }
 0x36e   : > { %v2049_v3 = vpop.f32.mrf.mxu1 }
 0x36f   : > { %v2620_v53 = vmax.f32 %v1960_v43, %v2049_v3 }
 0x371   : > { %2451 = vmatmul.bf16.gmra.mxu2 %v8528_v36  ;;  %2540 = vmatmul.bf16.gmra.mxu3 %v6949_v40 }
 0x374   : > { %v2136_v6 = vpop.f32.mrf.mxu2  ;;  %v9026_v30 = vpop.f32.mrf.mxu3 }
 0x375   : > { %v9024_v55 = vmax.f32 %v2619_v46, %v2136_v6  ;;  %v1963_v24 = vpop.f32.mrf.mxu0 }
 0x376   : > { %v2052_v57 = vpop.f32.mrf.mxu1 }
 0x377   : > { %v2621_v22 = vmax.f32 %v1963_v24, %v2052_v57 }
 0x378   : > { %2278 = vmatmul.bf16.gmra.mxu0 %v8614_v7  ;;  %2367 = vmatmul.bf16.gmra.mxu1 %v8614_v7 }
 0x37c   : > { %v2138_v44 = vpop.f32.mrf.mxu2  ;;  %v9034_v43 = vpop.f32.mrf.mxu3 }
 0x37d   : > { %v9032_v36 = vmax.f32 %v2620_v53, %v2138_v44  ;;  %11546 = vst [vmem:[#allocation6_spill] sm:$0xff] %v9034_v43  ;;  %v1965_v40 = vpop.f32.mrf.mxu0 }
 0x37e   : > { %v2054_v3 = vpop.f32.mrf.mxu1 }
 0x37f   : > { %v2622_v6 = vmax.f32 %v1965_v40, %v2054_v3 }
 0x381   : > { %2456 = vmatmul.bf16.gmra.mxu2 %v8614_v7  ;;  %2545 = vmatmul.bf16.gmra.mxu3 %v8614_v7 }
 0x384   : > { %v2141_v57 = vpop.f32.mrf.mxu2  ;;  %v9042_v2 = vpop.f32.mrf.mxu3 }
 0x385   : > { %v9040_v24 = vmax.f32 %v2621_v22, %v2141_v57  ;;  %11548 = vst [vmem:[#allocation60_spill] sm:$0xff] %v9042_v2  ;;  %v2244_v53 = vpop.f32.mrf.mxu0  ;;  %v11549_v22 = vmax.f32 %v8747_v4, %v8750_v13 }
 0x386   : > { %v2333_v38 = vpop.f32.mrf.mxu1 }
 0x387   : > { %11547 = vst [vmem:[#allocation12_spill] sm:$0xff] %v9040_v24  ;;  %v2687_v7 = vmax.f32 %v11549_v22, %v2244_v53 }
 0x388   : > { %2283 = vmatmul.bf16.gmra.mxu0 %v8714_v63  ;;  %2372 = vmatmul.bf16.gmra.mxu1 %v8714_v63 }
 0x389   : > { %v2719_v56 = vmax.f32 %v2687_v7, %v2333_v38 }
 0x38c   : > { %v2143_v46 = vpop.f32.mrf.mxu2  ;;  %v9050_v40 = vpop.f32.mrf.mxu3 }
 0x38d   : > { %v9048_v19 = vmax.f32 %v2622_v6, %v2143_v46  ;;  %v2246_v57 = vpop.f32.mrf.mxu0  ;;  %v11550_v6 = vmax.f32 %v8765_v21, %v8768_v32 }
 0x38e   : > { %v2335_v44 = vpop.f32.mrf.mxu1 }
 0x38f   : > { %v2688_v24 = vmax.f32 %v11550_v6, %v2246_v57 }
 0x391   : > { %2461 = vmatmul.bf16.gmra.mxu2 %v8714_v63  ;;  %2550 = vmatmul.bf16.gmra.mxu3 %v8714_v63  ;;  %v2720_v53 = vmax.f32 %v2688_v24, %v2335_v44  ;;  %v11552_v44 = vmax.f32 %v8797_v45, %v8799_v62 }
 0x394   : > { %v2422_v17 = vpop.f32.mrf.mxu2  ;;  %v2511_v46 = vpop.f32.mrf.mxu3 }
 0x395   : > { %v2751_v2 = vmax.f32 %v2719_v56, %v2422_v17  ;;  %v2249_v4 = vpop.f32.mrf.mxu0  ;;  %v11551_v17 = vmax.f32 %v8781_v37, %v8784_v39 }
 0x396   : > { %v2338_v13 = vpop.f32.mrf.mxu1 }
 0x397   : > { %v2783_v43 = vmax.f32 %v2751_v2, %v2511_v46  ;;  %v2689_v56 = vmax.f32 %v11551_v17, %v2249_v4 }
 0x398   : > { %2288 = vmatmul.bf16.gmra.mxu0 %v8753_v16  ;;  %2377 = vmatmul.bf16.gmra.mxu1 %v8753_v16 }
 0x399   : > { %2815 = vmax.xlane.f32.xlu1 %v2783_v43  ;;  %v2721_v21 = vmax.f32 %v2689_v56, %v2338_v13  ;;  %v11553_v13 = vmax.f32 %v8805_v49, %v8807_v34  ;;  %v11556_v34 = vld [vmem:[#allocation33_spill] sm:$0xff] }
 0x39c   : > { %v2424_v22 = vpop.f32.mrf.mxu2  ;;  %v2513_v63 = vpop.f32.mrf.mxu3 }
 0x39d   : > { %v2752_v3 = vmax.f32 %v2720_v53, %v2424_v22  ;;  %v2251_v38 = vpop.f32.mrf.mxu0 }
 0x39e   : > { %v2340_v32 = vpop.f32.mrf.mxu1  ;;  %v2690_v57 = vmax.f32 %v11552_v44, %v2251_v38 }
 0x39f   : > { %v2784_v7 = vmax.f32 %v2752_v3, %v2513_v63 }
 0x3a0   : > { %v2722_v39 = vmax.f32 %v2690_v57, %v2340_v32 }
 0x3a1   : > { %2466 = vmatmul.bf16.gmra.mxu2 %v8753_v16  ;;  %2817 = vmax.xlane.f32.xlu2 %v2784_v7  ;;  %v11554_v7 = vld [vmem:[#allocation9_spill] sm:$0xff] }
 0x3a2   : > { %2555 = vmatmul.bf16.gmra.mxu3 %v8753_v16  ;;  %v11555_v32 = vmax.f32 %v8815_v51, %v11554_v7 }
 0x3a4   : > { %v2427_v2 = vpop.f32.mrf.mxu2  ;;  %v2516_v24 = vpop.f32.mrf.mxu3 }
 0x3a5   : > { %v2753_v43 = vmax.f32 %v2721_v21, %v2427_v2  ;;  %v2254_v6 = vpop.f32.mrf.mxu0 }
 0x3a6   : > { %v2343_v37 = vpop.f32.mrf.mxu1  ;;  %v2691_v53 = vmax.f32 %v11553_v13, %v2254_v6  ;;  %v11558_v6 = vld [vmem:[#allocation13_spill] sm:$0xff] }
 0x3a7   : > { %v2785_v46 = vmax.f32 %v2753_v43, %v2516_v24 }
 0x3a8   : > { %2293 = vmatmul.bf16.gmra.mxu0 %v8787_v50  ;;  %2382 = vmatmul.bf16.gmra.mxu1 %v8787_v50  ;;  %v2723_v45 = vmax.f32 %v2691_v53, %v2343_v37 }
 0x3a9   : > { %2819 = vmax.xlane.f32.xlu0 %v2785_v46  ;;  %v11557_v46 = vld [vmem:[#allocation61_spill] sm:$0xff] }
 0x3aa   : > { %v11559_v37 = vmax.f32 %v11557_v46, %v11558_v6 }
 0x3ac   : > { %v2429_v3 = vpop.f32.mrf.mxu2  ;;  %v2518_v16 = vpop.f32.mrf.mxu3 }
 0x3ad   : > { %v2754_v4 = vmax.f32 %v2722_v39, %v2429_v3  ;;  %v2256_v22 = vpop.f32.mrf.mxu0 }
 0x3ae   : > { %v2345_v62 = vpop.f32.mrf.mxu1  ;;  %v2692_v21 = vmax.f32 %v11555_v32, %v2256_v22  ;;  %v11563_v32 = vld [vmem:[#allocation62_spill] sm:$0xff] }
 0x3af   : > { %v2786_v63 = vmax.f32 %v2754_v4, %v2518_v16 }
 0x3b0   : > { %v2724_v24 = vmax.f32 %v2692_v21, %v2345_v62  ;;  %v11561_v62 = vld [vmem:[#allocation45_spill] sm:$0xff] }
 0x3b1   : > { %2471 = vmatmul.bf16.gmra.mxu2 %v8787_v50  ;;  %2821 = vmax.xlane.f32.xlu2 %v2786_v63  ;;  %v11560_v63 = vld [vmem:[#allocation37_spill] sm:$0xff] }
 0x3b2   : > { %2560 = vmatmul.bf16.gmra.mxu3 %v8787_v50 }
 0x3b4   : > { %v2432_v17 = vpop.f32.mrf.mxu2  ;;  %v2521_v38 = vpop.f32.mrf.mxu3 }
 0x3b5   : > { %v2755_v56 = vmax.f32 %v2723_v45, %v2432_v17  ;;  %v2259_v43 = vpop.f32.mrf.mxu0  ;;  %v11562_v45 = vmax.f32 %v11560_v63, %v11561_v62 }
 0x3b6   : > { %v2348_v49 = vpop.f32.mrf.mxu1  ;;  %v2693_v39 = vmax.f32 %v11559_v37, %v2259_v43 }
 0x3b7   : > { %v2787_v2 = vmax.f32 %v2755_v56, %v2521_v38 }
 0x3b8   : > { %2298 = vmatmul.bf16.gmra.mxu0 %v11556_v34  ;;  %2387 = vmatmul.bf16.gmra.mxu1 %v11556_v34  ;;  %v2725_v16 = vmax.f32 %v2693_v39, %v2348_v49  ;;  %v11564_v49 = vld [vmem:[#allocation16_spill] sm:$0xff] }
 0x3b9   : > { %2823 = vmax.xlane.f32.xlu1 %v2787_v2 }
 0x3bc   : > { %v2434_v44 = vpop.f32.mrf.mxu2  ;;  %v2523_v50 = vpop.f32.mrf.mxu3 }
 0x3bd   : > { %v2756_v57 = vmax.f32 %v2724_v24, %v2434_v44  ;;  %v2261_v3 = vpop.f32.mrf.mxu0  ;;  %v11565_v24 = vld [vmem:[#allocation36_spill] sm:$0xff] }
 0x3be   : > { %v2350_v51 = vpop.f32.mrf.mxu1  ;;  %v2694_v17 = vmax.f32 %v11562_v45, %v2261_v3  ;;  %v11566_v44 = vmax.f32 %v11564_v49, %v11565_v24  ;;  %v11570_v45 = vld [vmem:[#allocation51_spill] sm:$0xff] }
 0x3bf   : > { %v2788_v4 = vmax.f32 %v2756_v57, %v2523_v50 }
 0x3c0   : > { %v2726_v21 = vmax.f32 %v2694_v17, %v2350_v51  ;;  %v11567_v51 = vld [vmem:[#allocation52_spill] sm:$0xff] }
 0x3c1   : > { %2476 = vmatmul.bf16.gmra.mxu2 %v11556_v34  ;;  %2825 = vmax.xlane.f32.xlu2 %v2788_v4 }
 0x3c2   : > { %2565 = vmatmul.bf16.gmra.mxu3 %v11556_v34 }
 0x3c4   : > { %v2437_v13 = vpop.f32.mrf.mxu2  ;;  %v2526_v22 = vpop.f32.mrf.mxu3 }
 0x3c5   : > { %v2757_v53 = vmax.f32 %v2725_v16, %v2437_v13  ;;  %v2264_v38 = vpop.f32.mrf.mxu0  ;;  %v11568_v16 = vld [vmem:[#allocation83_spill] sm:$0xff] }
 0x3c6   : > { %v2353_v7 = vpop.f32.mrf.mxu1  ;;  %v2695_v57 = vmax.f32 %v11566_v44, %v2264_v38  ;;  %v11569_v13 = vmax.f32 %v11567_v51, %v11568_v16 }
 0x3c7   : > { %v2789_v56 = vmax.f32 %v2757_v53, %v2526_v22 }
 0x3c8   : > { %2303 = vmatmul.bf16.gmra.mxu0 %v11563_v32  ;;  %2392 = vmatmul.bf16.gmra.mxu1 %v11563_v32  ;;  %v2727_v37 = vmax.f32 %v2695_v57, %v2353_v7  ;;  %v11571_v7 = vld [vmem:[#allocation84_spill] sm:$0xff] }
 0x3c9   : > { %2827 = vmax.xlane.f32.xlu0 %v2789_v56 }
 0x3cc   : > { %v2439_v2 = vpop.f32.mrf.mxu2  ;;  %v2528_v34 = vpop.f32.mrf.mxu3 }
 0x3cd   : > { %v2758_v43 = vmax.f32 %v2726_v21, %v2439_v2  ;;  %v2266_v50 = vpop.f32.mrf.mxu0  ;;  %v11572_v21 = vld [vmem:[#allocation85_spill] sm:$0xff] }
 0x3ce   : > { %v2355_v6 = vpop.f32.mrf.mxu1  ;;  %v2696_v53 = vmax.f32 %v11569_v13, %v2266_v50  ;;  %v11573_v2 = vmax.f32 %v11571_v7, %v11572_v21  ;;  %v11577_v13 = vld [vmem:[#allocation86_spill] sm:$0xff] }
 0x3cf   : > { %v2790_v46 = vmax.f32 %v2758_v43, %v2528_v34 }
 0x3d0   : > { %v2728_v17 = vmax.f32 %v2696_v53, %v2355_v6  ;;  %v11574_v6 = vld [vmem:[#allocation87_spill] sm:$0xff] }
 0x3d1   : > { %2481 = vmatmul.bf16.gmra.mxu2 %v11563_v32  ;;  %2829 = vmax.xlane.f32.xlu1 %v2790_v46 }
 0x3d2   : > { %2570 = vmatmul.bf16.gmra.mxu3 %v11563_v32 }
 0x3d4   : > { %v2442_v39 = vpop.f32.mrf.mxu2  ;;  %v2531_v4 = vpop.f32.mrf.mxu3 }
 0x3d5   : > { %v2759_v3 = vmax.f32 %v2727_v37, %v2442_v39  ;;  %v2269_v63 = vpop.f32.mrf.mxu0  ;;  %v11575_v37 = vld [vmem:[#allocation88_spill] sm:$0xff] }
 0x3d6   : > { %v2358_v62 = vpop.f32.mrf.mxu1  ;;  %v2697_v43 = vmax.f32 %v11573_v2, %v2269_v63  ;;  %v11576_v39 = vmax.f32 %v11574_v6, %v11575_v37 }
 0x3d7   : > { %v2791_v22 = vmax.f32 %v2759_v3, %v2531_v4 }
 0x3d8   : > { %2308 = vmatmul.bf16.gmra.mxu0 %v11570_v45  ;;  %2397 = vmatmul.bf16.gmra.mxu1 %v11570_v45  ;;  %v2729_v44 = vmax.f32 %v2697_v43, %v2358_v62  ;;  %v11578_v62 = vld [vmem:[#allocation89_spill] sm:$0xff] }
 0x3d9   : > { %2831 = vmax.xlane.f32.xlu2 %v2791_v22 }
 0x3dc   : > { %v2444_v56 = vpop.f32.mrf.mxu2  ;;  %v2533_v32 = vpop.f32.mrf.mxu3 }
 0x3dd   : > { %v2760_v38 = vmax.f32 %v2728_v17, %v2444_v56  ;;  %v2271_v34 = vpop.f32.mrf.mxu0  ;;  %v11579_v17 = vld [vmem:[#allocation90_spill] sm:$0xff] }
 0x3de   : > { %v2360_v24 = vpop.f32.mrf.mxu1  ;;  %v2698_v3 = vmax.f32 %v11576_v39, %v2271_v34  ;;  %v11580_v56 = vmax.f32 %v11578_v62, %v11579_v17  ;;  %v11583_v62 = vmax.f32 %v8905_v26, %v8907_v1  ;;  %v11585_v26 = vld [vmem:[#allocation54_spill] sm:$0xff] }
 0x3df   : > { %v2792_v49 = vmax.f32 %v2760_v38, %v2533_v32 }
 0x3e0   : > { %v2730_v53 = vmax.f32 %v2698_v3, %v2360_v24  ;;  %v11581_v24 = vmax.f32 %v8887_v41, %v8889_v54 }
 0x3e1   : > { %2486 = vmatmul.bf16.gmra.mxu2 %v11570_v45  ;;  %2833 = vmax.xlane.f32.xlu0 %v2792_v49 }
 0x3e2   : > { %2575 = vmatmul.bf16.gmra.mxu3 %v11570_v45 }
 0x3e4   : > { %v2447_v57 = vpop.f32.mrf.mxu2  ;;  %v2536_v46 = vpop.f32.mrf.mxu3 }
 0x3e5   : > { %v2761_v50 = vmax.f32 %v2729_v44, %v2447_v57  ;;  %v2274_v51 = vpop.f32.mrf.mxu0 }
 0x3e6   : > { %v2363_v16 = vpop.f32.mrf.mxu1  ;;  %v2699_v38 = vmax.f32 %v11580_v56, %v2274_v51 }
 0x3e7   : > { %v2793_v4 = vmax.f32 %v2761_v50, %v2536_v46 }
 0x3e8   : > { %2313 = vmatmul.bf16.gmra.mxu0 %v11577_v13  ;;  %2402 = vmatmul.bf16.gmra.mxu1 %v11577_v13  ;;  %v2731_v2 = vmax.f32 %v2699_v38, %v2363_v16  ;;  %v11584_v38 = vld [vmem:[#allocation53_spill] sm:$0xff] }
 0x3e9   : > { %2835 = vmax.xlane.f32.xlu1 %v2793_v4  ;;  %v11582_v4 = vmax.f32 %v8895_v9, %v8897_v5 }
 0x3ec   : > { %v2449_v22 = vpop.f32.mrf.mxu2  ;;  %v2538_v45 = vpop.f32.mrf.mxu3 }
 0x3ed   : > { %v2762_v63 = vmax.f32 %v2730_v53, %v2449_v22  ;;  %v2276_v32 = vpop.f32.mrf.mxu0 }
 0x3ee   : > { %v2365_v21 = vpop.f32.mrf.mxu1  ;;  %v2700_v44 = vmax.f32 %v11581_v24, %v2276_v32 }
 0x3ef   : > { %v2794_v7 = vmax.f32 %v2762_v63, %v2538_v45  ;;  %v9129_v45 = vld [vmem:[#allocation2 + $0x80] sm:$0xff] }
 0x3f0   : > { %v2732_v6 = vmax.f32 %v2700_v44, %v2365_v21  ;;  %v11588_v44 = vld [vmem:[#allocation42_spill] sm:$0xff] }
 0x3f1   : > { %2491 = vmatmul.bf16.gmra.mxu2 %v11577_v13  ;;  %2837 = vmax.xlane.f32.xlu2 %v2794_v7 }
 0x3f2   : > { %2580 = vmatmul.bf16.gmra.mxu3 %v11577_v13 }
 0x3f4   : > { %v2452_v43 = vpop.f32.mrf.mxu2  ;;  %v2541_v49 = vpop.f32.mrf.mxu3 }
 0x3f5   : > { %v2763_v34 = vmax.f32 %v2731_v2, %v2452_v43  ;;  %v2279_v50 = vpop.f32.mrf.mxu0  ;;  %v11586_v2 = vmax.f32 %v8919_v10, %v8921_v18  ;;  %v11591_v18 = vld [vmem:[#allocation56_spill] sm:$0xff]  ;;  %v11592_v10 = vld [vmem:[#allocation50_spill] sm:$0xff] }
 0x3f6   : > { %v2368_v46 = vpop.f32.mrf.mxu1  ;;  %v2701_v51 = vmax.f32 %v11582_v4, %v2279_v50  ;;  %v11589_v50 = vld [vmem:[#allocation49_spill] sm:$0xff] }
 0x3f7   : > { %v2795_v57 = vmax.f32 %v2763_v34, %v2541_v49  ;;  %v11587_v34 = vld [vmem:[#allocation57_spill] sm:$0xff] }
 0x3f8   : > { %2318 = vmatmul.bf16.gmra.mxu0 %v8881_v0  ;;  %2407 = vmatmul.bf16.gmra.mxu1 %v8881_v0  ;;  %v2733_v13 = vmax.f32 %v2701_v51, %v2368_v46  ;;  %v11593_v51 = vld [vmem:[#allocation11_spill] sm:$0xff] }
 0x3f9   : > { %2839 = vmax.xlane.f32.xlu0 %v2795_v57 }
 0x3fc   : > { %v2454_v37 = vpop.f32.mrf.mxu2  ;;  %v2543_v3 = vpop.f32.mrf.mxu3 }
 0x3fd   : > { %v2764_v39 = vmax.f32 %v2732_v6, %v2454_v37  ;;  %v2281_v16 = vpop.f32.mrf.mxu0  ;;  %v11590_v6 = vld [vmem:[#allocation55_spill] sm:$0xff] }
 0x3fe   : > { %v2370_v41 = vpop.f32.mrf.mxu1  ;;  %v2702_v5 = vmax.f32 %v11583_v62, %v2281_v16  ;;  %v9160_v16 = vld [vmem:[#allocation2 + $0x88] sm:$0xff]  ;;  %v11597_v62 = vld [vmem:[#allocation31_spill] sm:$0xff] }
 0x3ff   : > { %v2796_v54 = vmax.f32 %v2764_v39, %v2543_v3 }
 0x401   : > { %2496 = vmatmul.bf16.gmra.mxu2 %v8881_v0  ;;  %2841 = vmax.xlane.f32.xlu1 %v2796_v54  ;;  %v11594_v54 = vmax.f32 %v8935_v11, %v8937_v60  ;;  %v11600_v60 = vld [vmem:[#allocation25_spill] sm:$0xff]  ;;  %v11601_v11 = vld [vmem:[#allocation43_spill] sm:$0xff] }
 0x402   : > { %2585 = vmatmul.bf16.gmra.mxu3 %v8881_v0  ;;  %v2734_v0 = vmax.f32 %v2702_v5, %v2370_v41 }
 0x404   : > { %v2457_v53 = vpop.f32.mrf.mxu2  ;;  %v2546_v63 = vpop.f32.mrf.mxu3 }
 0x405   : > { %v2765_v22 = vmax.f32 %v2733_v13, %v2457_v53  ;;  %v2284_v17 = vpop.f32.mrf.mxu0  ;;  %v11595_v13 = vld [vmem:[#allocation5_spill] sm:$0xff] }
 0x406   : > { %v2373_v56 = vpop.f32.mrf.mxu1  ;;  %v2703_v43 = vmax.f32 %v11586_v2, %v2284_v17  ;;  %v11603_v2 = vmax.f32 %v8951_v12, %v8953_v20  ;;  %v11608_v20 = vld [vmem:[#allocation48_spill] sm:$0xff]  ;;  %v11609_v12 = vld [vmem:[#allocation18_spill] sm:$0xff] }
 0x407   : > { %v2797_v9 = vmax.f32 %v2765_v22, %v2546_v63  ;;  %v11596_v22 = vld [vmem:[#allocation58_spill] sm:$0xff] }
 0x408   : > { %3048 = vmatmul.bf16.vlgmr.msra.gmra.mxu0 %v9129_v45  ;;  %3137 = vmatmul.bf16.vlgmr.msra.gmra.mxu1 %v9129_v45  ;;  %v2735_v46 = vmax.f32 %v2703_v43, %v2373_v56  ;;  %v11599_v56 = vld [vmem:[#allocation41_spill] sm:$0xff] }
 0x409   : > { %2843 = vmax.xlane.f32.xlu2 %v2797_v9  ;;  %4200 = vmatpush.bf16.msra.mxu0 %v11584_v38  ;;  %v11598_v9 = vld [vmem:[#allocation47_spill] sm:$0xff] }
 0x40a   : > { %4289 = vmatpush.bf16.msra.mxu1 %v11585_v26 }
 0x40c   : > { %v2459_v1 = vpop.f32.mrf.mxu2  ;;  %v2816_v32 = vpop.xlane.xlu1 %2815 }
 0x40d   : > { %v2766_v7 = vmax.f32 %v2734_v0, %v2459_v1  ;;  %2880 = vst.msk [vmem:[%s9139_s29] sm:$0xff] %vm2879_vm1, %v2816_v32  ;;  %v2548_v21 = vpop.f32.mrf.mxu3  ;;  %4201 = vmatpush.bf16.msra.mxu0 %v11587_v34  ;;  %v2286_v49 = vpop.f32.mrf.mxu0  ;;  %v11656_v34 = vld [vmem:[#allocation27_spill] sm:$0xff] }
 0x40e   : > { %4290 = vmatpush.bf16.msra.mxu1 %v11588_v44  ;;  %v2375_v57 = vpop.f32.mrf.mxu1  ;;  %v2704_v41 = vmax.f32 %v11594_v54, %v2286_v49  ;;  %v11604_v49 = vld [vmem:[#allocation44_spill] sm:$0xff]  ;;  %v11610_v54 = vld [vmem:[#allocation34_spill] sm:$0xff]  ;;  %v11644_v44 = vld [vmem:[#allocation77_spill] sm:$0xff] }
 0x40f   : > { %v2798_v24 = vmax.f32 %v2766_v7, %v2548_v21  ;;  %v11602_v21 = vld [vmem:[#allocation15_spill] sm:$0xff] }
 0x410   : > { %v2736_v17 = vmax.f32 %v2704_v41, %v2375_v57 }
 0x411   : > { %3226 = vmatmul.bf16.vlgmr.msra.gmra.mxu2 %v9129_v45  ;;  %2845 = vmax.xlane.f32.xlu0 %v2798_v24 }
 0x412   : > { %3315 = vmatmul.bf16.vlgmr.msra.gmra.mxu3 %v9129_v45  ;;  %4378 = vmatpush.bf16.msra.mxu2 %v11589_v50 }
 0x413   : > { %4467 = vmatpush.bf16.msra.mxu3 %v11590_v6  ;;  %4202 = vmatpush.bf16.msra.mxu0 %v11591_v18 }
 0x414   : > { %4291 = vmatpush.bf16.msra.mxu1 %v11592_v10  ;;  %v2462_v37 = vpop.f32.mrf.mxu2  ;;  %v2818_v39 = vpop.xlane.xlu2 %2817 }
 0x415   : > { %v2767_v3 = vmax.f32 %v2735_v46, %v2462_v37  ;;  %2881 = vst.msk [vmem:[%s9139_s29 + $0x8] sm:$0xff] %vm2879_vm1, %v2818_v39  ;;  %v2551_v4 = vpop.f32.mrf.mxu3  ;;  %v2289_v63 = vpop.f32.mrf.mxu0  ;;  %v11605_v46 = vld [vmem:[#allocation39_spill] sm:$0xff] }
 0x416   : > { %4379 = vmatpush.bf16.msra.mxu2 %v11593_v51  ;;  %v2378_v5 = vpop.f32.mrf.mxu1  ;;  %v2705_v43 = vmax.f32 %v11603_v2, %v2289_v63  ;;  %v11606_v37 = vld [vmem:[#allocation23_spill] sm:$0xff] }
 0x417   : > { %4468 = vmatpush.bf16.msra.mxu3 %v11595_v13  ;;  %v2799_v53 = vmax.f32 %v2767_v3, %v2551_v4  ;;  %4203 = vmatpush.bf16.msra.mxu0 %v11596_v22  ;;  %v11607_v3 = vld [vmem:[#allocation46_spill] sm:$0xff] }
 0x418   : > { %4292 = vmatpush.bf16.msra.mxu1 %v11597_v62  ;;  %3053 = vmatmul.bf16.gmra.mxu0 %v9160_v16  ;;  %v2737_v4 = vmax.f32 %v2705_v43, %v2378_v5 }
 0x419   : > { %2847 = vmax.xlane.f32.xlu1 %v2799_v53  ;;  %3142 = vmatmul.bf16.gmra.mxu1 %v9160_v16 }
 0x41a   : > { %4380 = vmatpush.bf16.msra.mxu2 %v11598_v9 }
 0x41b   : > { %4469 = vmatpush.bf16.msra.mxu3 %v11599_v56  ;;  %4204 = vmatpush.bf16.msra.mxu0 %v11600_v60 }
 0x41c   : > { %4293 = vmatpush.bf16.msra.mxu1 %v11601_v11  ;;  %v2464_v0 = vpop.f32.mrf.mxu2  ;;  %v2820_v1 = vpop.xlane.xlu0 %2819 }
 0x41d   : > { %v2768_v32 = vmax.f32 %v2736_v17, %v2464_v0  ;;  %2882 = vst.msk [vmem:[%s9139_s29 + $0x10] sm:$0xff] %vm2879_vm1, %v2820_v1  ;;  %v2553_v7 = vpop.f32.mrf.mxu3  ;;  %v2291_v24 = vpop.f32.mrf.mxu0  ;;  %v11611_v0 = vld [vmem:[#allocation24_spill] sm:$0xff]  ;;  %v9192_v1 = vld [vmem:[#allocation2 + $0x90] sm:$0xff] }
 0x41e   : > { %4381 = vmatpush.bf16.msra.mxu2 %v11602_v21  ;;  %v2380_v39 = vpop.f32.mrf.mxu1 }
 0x41f   : > { %4470 = vmatpush.bf16.msra.mxu3 %v11604_v49  ;;  %v2800_v57 = vmax.f32 %v2768_v32, %v2553_v7  ;;  %4205 = vmatpush.bf16.msra.mxu0 %v11605_v46  ;;  %v11612_v32 = vmax.f32 %v8965_v25, %v8967_v35  ;;  %v11613_v7 = vld [vmem:[#allocation40_spill] sm:$0xff] }
 0x420   : > { %4294 = vmatpush.bf16.msra.mxu1 %v11606_v37 }
 0x421   : > { %3231 = vmatmul.bf16.gmra.mxu2 %v9160_v16  ;;  %2849 = vmax.xlane.f32.xlu2 %v2800_v57  ;;  %v2706_v5 = vmax.f32 %v11612_v32, %v2291_v24  ;;  %v11614_v57 = vld [vmem:[#allocation20_spill] sm:$0xff]  ;;  %v11619_v32 = vmax.f32 %v8973_v59, %v8975_v31  ;;  %v11621_v31 = vmax.f32 %v8979_v23, %v8981_v42 }
 0x422   : > { %3320 = vmatmul.bf16.gmra.mxu3 %v9160_v16  ;;  %4382 = vmatpush.bf16.msra.mxu2 %v11607_v3  ;;  %v9215_v59 = vld [vmem:[#allocation2 + $0x98] sm:$0xff]  ;;  %v11622_v42 = vmax.f32 %v8985_v33, %v8987_v48  ;;  %v11623_v33 = vmax.f32 %v8991_v52, %v8993_v58  ;;  %v11624_v58 = vmax.f32 %v8997_v28, %v8999_v47 }
 0x423   : > { %4471 = vmatpush.bf16.msra.mxu3 %v11608_v20  ;;  %4206 = vmatpush.bf16.msra.mxu0 %v11609_v12  ;;  %v11625_v28 = vmax.f32 %v9003_v15, %v9005_v8  ;;  %v11626_v8 = vmax.f32 %v9009_v61, %v9011_v27  ;;  %v11627_v61 = vmax.f32 %v9017_v14, %v9019_v29 }
 0x424   : > { %4295 = vmatpush.bf16.msra.mxu1 %v11610_v54  ;;  %v2467_v41 = vpop.f32.mrf.mxu2  ;;  %v2822_v53 = vpop.xlane.xlu2 %2821  ;;  %v11615_v54 = vld [vmem:[#allocation21_spill] sm:$0xff]  ;;  %v11628_v14 = vmax.f32 %v9024_v55, %v9026_v30  ;;  %v11629_v30 = vld [vmem:[#allocation6_spill] sm:$0xff] }
 0x425   : > { %v2769_v63 = vmax.f32 %v2737_v4, %v2467_v41  ;;  %2883 = vst.msk [vmem:[%s9139_s29 + $0x18] sm:$0xff] %vm2879_vm1, %v2822_v53  ;;  %v2556_v17 = vpop.f32.mrf.mxu3  ;;  %v2294_v43 = vpop.f32.mrf.mxu0  ;;  %v11616_v41 = vld [vmem:[#allocation35_spill] sm:$0xff]  ;;  %v2738_v53 = vmax.f32 %v2706_v5, %v2380_v39  ;;  %v11630_v55 = vmax.f32 %v9032_v36, %v11629_v30 }
 0x426   : > { %4383 = vmatpush.bf16.msra.mxu2 %v11611_v0  ;;  %v2383_v4 = vpop.f32.mrf.mxu1  ;;  %v11617_v0 = vld [vmem:[#allocation38_spill] sm:$0xff] }
 0x427   : > { %4472 = vmatpush.bf16.msra.mxu3 %v11613_v7  ;;  %v2801_v2 = vmax.f32 %v2769_v63, %v2556_v17  ;;  %4207 = vmatpush.bf16.msra.mxu0 %v11614_v57  ;;  %v11618_v17 = vld [vmem:[#allocation22_spill] sm:$0xff] }
 0x428   : > { %4296 = vmatpush.bf16.msra.mxu1 %v11615_v54  ;;  %3058 = vmatmul.bf16.gmra.mxu0 %v9192_v1 }
 0x429   : > { %2851 = vmax.xlane.f32.xlu0 %v2801_v2  ;;  %3147 = vmatmul.bf16.gmra.mxu1 %v9192_v1  ;;  %v2707_v2 = vmax.f32 %v11619_v32, %v2294_v43 }
 0x42a   : > { %4384 = vmatpush.bf16.msra.mxu2 %v11616_v41  ;;  %v11620_v41 = vld [vmem:[#allocation10_spill] sm:$0xff] }
 0x42b   : > { %4473 = vmatpush.bf16.msra.mxu3 %v11617_v0 }
 0x42c   : > { %v2469_v35 = vpop.f32.mrf.mxu2  ;;  %v2824_v25 = vpop.xlane.xlu1 %2823 }
 0x42d   : > { %v2770_v24 = vmax.f32 %v2738_v53, %v2469_v35  ;;  %2884 = vst.msk [vmem:[%s9139_s29 + $0x20] sm:$0xff] %vm2879_vm1, %v2824_v25  ;;  %v2558_v63 = vpop.f32.mrf.mxu3  ;;  %v2296_v39 = vpop.f32.mrf.mxu0  ;;  %v2739_v53 = vmax.f32 %v2707_v2, %v2383_v4 }
 0x42e   : > { %4385 = vmatpush.bf16.msra.mxu2 %v11618_v17  ;;  %v2385_v0 = vpop.f32.mrf.mxu1  ;;  %v2708_v43 = vmax.f32 %v11621_v31, %v2296_v39 }
 0x42f   : > { %4474 = vmatpush.bf16.msra.mxu3 %v11620_v41  ;;  %v2802_v5 = vmax.f32 %v2770_v24, %v2558_v63 }
 0x430   : > { %v2740_v4 = vmax.f32 %v2708_v43, %v2385_v0 }
 0x431   : > { %3236 = vmatmul.bf16.gmra.mxu2 %v9192_v1  ;;  %2853 = vmax.xlane.f32.xlu1 %v2802_v5 }
 0x432   : > { %3325 = vmatmul.bf16.gmra.mxu3 %v9192_v1 }
 0x434   : > { %v2472_v35 = vpop.f32.mrf.mxu2  ;;  %v2826_v25 = vpop.xlane.xlu2 %2825 }
 0x435   : > { %v2771_v54 = vmax.f32 %v2739_v53, %v2472_v35  ;;  %2885 = vst.msk [vmem:[%s9139_s29 + $0x28] sm:$0xff] %vm2879_vm1, %v2826_v25  ;;  %v2561_v17 = vpop.f32.mrf.mxu3  ;;  %v2299_v63 = vpop.f32.mrf.mxu0 }
 0x436   : > { %v2388_v32 = vpop.f32.mrf.mxu1  ;;  %v2709_v23 = vmax.f32 %v11622_v42, %v2299_v63 }
 0x437   : > { %v2803_v24 = vmax.f32 %v2771_v54, %v2561_v17 }
 0x438   : > { %3063 = vmatmul.bf16.gmra.mxu0 %v9215_v59  ;;  %v2741_v0 = vmax.f32 %v2709_v23, %v2388_v32 }
 0x439   : > { %2855 = vmax.xlane.f32.xlu2 %v2803_v24  ;;  %3152 = vmatmul.bf16.gmra.mxu1 %v9215_v59 }
 0x43c   : > { %v2474_v2 = vpop.f32.mrf.mxu2  ;;  %v2828_v5 = vpop.xlane.xlu0 %2827 }
 0x43d   : > { %v2772_v53 = vmax.f32 %v2740_v4, %v2474_v2  ;;  %2886 = vst.msk [vmem:[%s9139_s29 + $0x30] sm:$0xff] %vm2879_vm1, %v2828_v5  ;;  %v2563_v35 = vpop.f32.mrf.mxu3  ;;  %v2301_v54 = vpop.f32.mrf.mxu0  ;;  %v9231_v4 = vld [vmem:[#allocation2 + $0xa0] sm:$0xff] }
 0x43e   : > { %v2390_v39 = vpop.f32.mrf.mxu1  ;;  %v2710_v48 = vmax.f32 %v11623_v33, %v2301_v54  ;;  %v9247_v33 = vld [vmem:[#allocation2 + $0xa8] sm:$0xff] }
 0x43f   : > { %v2804_v17 = vmax.f32 %v2772_v53, %v2563_v35 }
 0x440   : > { %v2742_v32 = vmax.f32 %v2710_v48, %v2390_v39 }
 0x441   : > { %3241 = vmatmul.bf16.gmra.mxu2 %v9215_v59  ;;  %2857 = vmax.xlane.f32.xlu0 %v2804_v17 }
 0x442   : > { %3330 = vmatmul.bf16.gmra.mxu3 %v9215_v59 }
 0x444   : > { %v2477_v25 = vpop.f32.mrf.mxu2  ;;  %v2830_v31 = vpop.xlane.xlu1 %2829 }
 0x445   : > { %v2773_v43 = vmax.f32 %v2741_v0, %v2477_v25  ;;  %2887 = vst.msk [vmem:[%s9139_s29 + $0x38] sm:$0xff] %vm2879_vm1, %v2830_v31  ;;  %v2566_v24 = vpop.f32.mrf.mxu3  ;;  %v2304_v2 = vpop.f32.mrf.mxu0 }
 0x446   : > { %v2393_v5 = vpop.f32.mrf.mxu1  ;;  %v2711_v52 = vmax.f32 %v11624_v58, %v2304_v2 }
 0x447   : > { %v2805_v63 = vmax.f32 %v2773_v43, %v2566_v24 }
 0x448   : > { %3068 = vmatmul.bf16.gmra.mxu0 %v9231_v4  ;;  %v2743_v39 = vmax.f32 %v2711_v52, %v2393_v5 }
 0x449   : > { %2859 = vmax.xlane.f32.xlu1 %v2805_v63  ;;  %3157 = vmatmul.bf16.gmra.mxu1 %v9231_v4 }
 0x44c   : > { %v2479_v53 = vpop.f32.mrf.mxu2  ;;  %v2832_v35 = vpop.xlane.xlu2 %2831 }
 0x44d   : > { %v2774_v42 = vmax.f32 %v2742_v32, %v2479_v53  ;;  %2888 = vst.msk [vmem:[%s9139_s29 + $0x40] sm:$0xff] %vm2879_vm1, %v2832_v35  ;;  %v2568_v23 = vpop.f32.mrf.mxu3  ;;  %v2306_v54 = vpop.f32.mrf.mxu0 }
 0x44e   : > { %v2395_v0 = vpop.f32.mrf.mxu1  ;;  %v2712_v47 = vmax.f32 %v11625_v28, %v2306_v54 }
 0x44f   : > { %v2806_v17 = vmax.f32 %v2774_v42, %v2568_v23 }
 0x450   : > { %v2744_v5 = vmax.f32 %v2712_v47, %v2395_v0 }
 0x451   : > { %3246 = vmatmul.bf16.gmra.mxu2 %v9231_v4  ;;  %2861 = vmax.xlane.f32.xlu2 %v2806_v17 }
 0x452   : > { %3335 = vmatmul.bf16.gmra.mxu3 %v9231_v4 }
 0x454   : > { %v2482_v25 = vpop.f32.mrf.mxu2  ;;  %v2834_v31 = vpop.xlane.xlu0 %2833 }
 0x455   : > { %v2775_v43 = vmax.f32 %v2743_v39, %v2482_v25  ;;  %2889 = vst.msk [vmem:[%s9139_s29 + $0x48] sm:$0xff] %vm2879_vm1, %v2834_v31  ;;  %v2571_v24 = vpop.f32.mrf.mxu3  ;;  %v2309_v63 = vpop.f32.mrf.mxu0  ;;  %v9263_v31 = vld [vmem:[#allocation2 + $0xb0] sm:$0xff] }
 0x456   : > { %v2398_v2 = vpop.f32.mrf.mxu1  ;;  %v2713_v15 = vmax.f32 %v11626_v8, %v2309_v63 }
 0x457   : > { %v2807_v48 = vmax.f32 %v2775_v43, %v2571_v24 }
 0x458   : > { %3073 = vmatmul.bf16.gmra.mxu0 %v9247_v33  ;;  %v2745_v54 = vmax.f32 %v2713_v15, %v2398_v2 }
 0x459   : > { %2863 = vmax.xlane.f32.xlu0 %v2807_v48  ;;  %3162 = vmatmul.bf16.gmra.mxu1 %v9247_v33 }
 0x45c   : > { %v2484_v32 = vpop.f32.mrf.mxu2  ;;  %v2836_v53 = vpop.xlane.xlu1 %2835 }
 0x45d   : > { %v2776_v35 = vmax.f32 %v2744_v5, %v2484_v32  ;;  %2890 = vst.msk [vmem:[%s9139_s29 + $0x50] sm:$0xff] %vm2879_vm1, %v2836_v53  ;;  %v2573_v42 = vpop.f32.mrf.mxu3  ;;  %v2311_v23 = vpop.f32.mrf.mxu0 }
 0x45e   : > { %v2400_v52 = vpop.f32.mrf.mxu1  ;;  %v2714_v27 = vmax.f32 %v11627_v61, %v2311_v23 }
 0x45f   : > { %v2808_v58 = vmax.f32 %v2776_v35, %v2573_v42 }
 0x460   : > { %v2746_v47 = vmax.f32 %v2714_v27, %v2400_v52  ;;  %v9279_v52 = vld [vmem:[#allocation2 + $0xb8] sm:$0xff] }
 0x461   : > { %3251 = vmatmul.bf16.gmra.mxu2 %v9247_v33  ;;  %2865 = vmax.xlane.f32.xlu1 %v2808_v58 }
 0x462   : > { %3340 = vmatmul.bf16.gmra.mxu3 %v9247_v33 }
 0x464   : > { %v2487_v17 = vpop.f32.mrf.mxu2  ;;  %v2838_v0 = vpop.xlane.xlu2 %2837 }
 0x465   : > { %v2777_v39 = vmax.f32 %v2745_v54, %v2487_v17  ;;  %2891 = vst.msk [vmem:[%s9139_s29 + $0x58] sm:$0xff] %vm2879_vm1, %v2838_v0  ;;  %v2576_v25 = vpop.f32.mrf.mxu3  ;;  %v2314_v24 = vpop.f32.mrf.mxu0 }
 0x466   : > { %v2403_v28 = vpop.f32.mrf.mxu1  ;;  %v2715_v29 = vmax.f32 %v11628_v14, %v2314_v24 }
 0x467   : > { %v2809_v43 = vmax.f32 %v2777_v39, %v2576_v25 }
 0x468   : > { %3078 = vmatmul.bf16.gmra.mxu0 %v9263_v31  ;;  %v2747_v42 = vmax.f32 %v2715_v29, %v2403_v28  ;;  %v11631_v28 = vld [vmem:[#allocation12_spill] sm:$0xff] }
 0x469   : > { %2867 = vmax.xlane.f32.xlu2 %v2809_v43  ;;  %3167 = vmatmul.bf16.gmra.mxu1 %v9263_v31 }
 0x46c   : > { %v2489_v48 = vpop.f32.mrf.mxu2  ;;  %v2840_v63 = vpop.xlane.xlu0 %2839 }
 0x46d   : > { %v2778_v2 = vmax.f32 %v2746_v47, %v2489_v48  ;;  %2892 = vst.msk [vmem:[%s9139_s29 + $0x60] sm:$0xff] %vm2879_vm1, %v2840_v63  ;;  %v2578_v5 = vpop.f32.mrf.mxu3  ;;  %v2316_v32 = vpop.f32.mrf.mxu0  ;;  %v11632_v47 = vld [vmem:[#allocation60_spill] sm:$0xff] }
 0x46e   : > { %v2405_v35 = vpop.f32.mrf.mxu1  ;;  %v2716_v54 = vmax.f32 %v11630_v55, %v2316_v32  ;;  %v11633_v36 = vmax.f32 %v11631_v28, %v11632_v47 }
 0x46f   : > { %v2810_v53 = vmax.f32 %v2778_v2, %v2578_v5 }
 0x470   : > { %v2748_v25 = vmax.f32 %v2716_v54, %v2405_v35 }
 0x471   : > { %3256 = vmatmul.bf16.gmra.mxu2 %v9263_v31  ;;  %2869 = vmax.xlane.f32.xlu0 %v2810_v53 }
 0x472   : > { %3345 = vmatmul.bf16.gmra.mxu3 %v9263_v31 }
 0x474   : > { %v2492_v8 = vpop.f32.mrf.mxu2  ;;  %v2842_v15 = vpop.xlane.xlu1 %2841 }
 0x475   : > { %v2779_v23 = vmax.f32 %v2747_v42, %v2492_v8  ;;  %2893 = vst.msk [vmem:[%s9139_s29 + $0x68] sm:$0xff] %vm2879_vm1, %v2842_v15  ;;  %v2581_v58 = vpop.f32.mrf.mxu3  ;;  %v2319_v0 = vpop.f32.mrf.mxu0  ;;  %v9295_v42 = vld [vmem:[#allocation2 + $0xc0] sm:$0xff]  ;;  %v11634_v8 = vmax.f32 %v9048_v19, %v9050_v40 }
 0x476   : > { %v2408_v39 = vpop.f32.mrf.mxu1  ;;  %v2717_v48 = vmax.f32 %v11633_v36, %v2319_v0  ;;  %v9312_v36 = vld [vmem:[#allocation2 + $0xc8] sm:$0xff] }
 0x477   : > { %v2811_v17 = vmax.f32 %v2779_v23, %v2581_v58 }
 0x478   : > { %3083 = vmatmul.bf16.gmra.mxu0 %v9279_v52  ;;  %v2749_v14 = vmax.f32 %v2717_v48, %v2408_v39 }
 0x479   : > { %2871 = vmax.xlane.f32.xlu1 %v2811_v17  ;;  %3172 = vmatmul.bf16.gmra.mxu1 %v9279_v52 }
 0x47c   : > { %v2494_v61 = vpop.f32.mrf.mxu2  ;;  %v2844_v27 = vpop.xlane.xlu2 %2843 }
 0x47d   : > { %v2780_v43 = vmax.f32 %v2748_v25, %v2494_v61  ;;  %2894 = vst.msk [vmem:[%s9139_s29 + $0x70] sm:$0xff] %vm2879_vm1, %v2844_v27  ;;  %v2583_v24 = vpop.f32.mrf.mxu3  ;;  %v2321_v63 = vpop.f32.mrf.mxu0 }
 0x47e   : > { %v2410_v5 = vpop.f32.mrf.mxu1  ;;  %v2718_v15 = vmax.f32 %v11634_v8, %v2321_v63 }
 0x47f   : > { %v2812_v2 = vmax.f32 %v2780_v43, %v2583_v24 }
 0x480   : > { %v2750_v54 = vmax.f32 %v2718_v15, %v2410_v5 }
 0x481   : > { %3261 = vmatmul.bf16.gmra.mxu2 %v9279_v52  ;;  %2873 = vmax.xlane.f32.xlu2 %v2812_v2 }
 0x482   : > { %3350 = vmatmul.bf16.gmra.mxu3 %v9279_v52 }
 0x484   : > { %v2497_v29 = vpop.f32.mrf.mxu2  ;;  %v2846_v32 = vpop.xlane.xlu0 %2845 }
 0x485   : > { %v2781_v53 = vmax.f32 %v2749_v14, %v2497_v29  ;;  %2895 = vst.msk [vmem:[%s9139_s29 + $0x78] sm:$0xff] %vm2879_vm1, %v2846_v32  ;;  %v2586_v35 = vpop.f32.mrf.mxu3  ;;  %v3049_v58 = vpop.f32.mrf.mxu0 }
 0x486   : > { %v3138_v30 = vpop.f32.mrf.mxu1 }
 0x487   : > { %v2813_v23 = vmax.f32 %v2781_v53, %v2586_v35  ;;  %v3752_v55 = vmax.f32 %v3049_v58, %v3138_v30 }
 0x488   : > { %3088 = vmatmul.bf16.gmra.mxu0 %v9295_v42 }
 0x489   : > { %2875 = vmax.xlane.f32.xlu0 %v2813_v23  ;;  %3177 = vmatmul.bf16.gmra.mxu1 %v9295_v42 }
 0x48c   : > { %v2499_v17 = vpop.f32.mrf.mxu2  ;;  %v2848_v0 = vpop.xlane.xlu1 %2847 }
 0x48d   : > { %v2782_v39 = vmax.f32 %v2750_v54, %v2499_v17  ;;  %2896 = vst.msk [vmem:[%s9139_s29 + $0x80] sm:$0xff] %vm2879_vm1, %v2848_v0  ;;  %v2588_v25 = vpop.f32.mrf.mxu3  ;;  %v3051_v61 = vpop.f32.mrf.mxu0  ;;  %v9334_v17 = vld [vmem:[#allocation2 + $0xd0] sm:$0xff] }
 0x48e   : > { %v3140_v40 = vpop.f32.mrf.mxu1 }
 0x48f   : > { %v2814_v19 = vmax.f32 %v2782_v39, %v2588_v25  ;;  %v3753_v27 = vmax.f32 %v3051_v61, %v3140_v40 }
 0x491   : > { %3266 = vmatmul.bf16.gmra.mxu2 %v9295_v42  ;;  %2877 = vmax.xlane.f32.xlu1 %v2814_v19 }
 0x492   : > { %3355 = vmatmul.bf16.gmra.mxu3 %v9295_v42 }
 0x494   : > { %v3227_v43 = vpop.f32.mrf.mxu2  ;;  %v2850_v24 = vpop.xlane.xlu2 %2849 }
 0x495   : > { %v9306_v28 = vmax.f32 %v3752_v55, %v3227_v43  ;;  %2897 = vst.msk [vmem:[%s9139_s29 + $0x88] sm:$0xff] %vm2879_vm1, %v2850_v24  ;;  %v9310_v47 = vpop.f32.mrf.mxu3  ;;  %v3054_v63 = vpop.f32.mrf.mxu0 }
 0x496   : > { %v3143_v2 = vpop.f32.mrf.mxu1 }
 0x497   : > { %v3754_v5 = vmax.f32 %v3054_v63, %v3143_v2 }
 0x498   : > { %3093 = vmatmul.bf16.gmra.mxu0 %v9312_v36 }
 0x499   : > { %3182 = vmatmul.bf16.gmra.mxu1 %v9312_v36 }
 0x49c   : > { %v3229_v14 = vpop.f32.mrf.mxu2  ;;  %v2852_v29 = vpop.xlane.xlu0 %2851 }
 0x49d   : > { %v9318_v32 = vmax.f32 %v3753_v27, %v3229_v14  ;;  %2898 = vst.msk [vmem:[%s9139_s29 + $0x90] sm:$0xff] %vm2879_vm1, %v2852_v29  ;;  %v9322_v53 = vpop.f32.mrf.mxu3  ;;  %v3056_v8 = vpop.f32.mrf.mxu0 }
 0x49e   : > { %v3145_v15 = vpop.f32.mrf.mxu1 }
 0x49f   : > { %v3755_v23 = vmax.f32 %v3056_v8, %v3145_v15 }
 0x4a1   : > { %3271 = vmatmul.bf16.gmra.mxu2 %v9312_v36 }
 0x4a2   : > { %3360 = vmatmul.bf16.gmra.mxu3 %v9312_v36 }
 0x4a4   : > { %v3232_v58 = vpop.f32.mrf.mxu2  ;;  %v2854_v30 = vpop.xlane.xlu1 %2853 }
 0x4a5   : > { %v9328_v55 = vmax.f32 %v3754_v5, %v3232_v58  ;;  %2899 = vst.msk [vmem:[%s9139_s29 + $0x98] sm:$0xff] %vm2879_vm1, %v2854_v30  ;;  %v9332_v54 = vpop.f32.mrf.mxu3  ;;  %v3059_v39 = vpop.f32.mrf.mxu0 }
 0x4a6   : > { %v3148_v25 = vpop.f32.mrf.mxu1 }
 0x4a7   : > { %v3756_v61 = vmax.f32 %v3059_v39, %v3148_v25 }
 0x4a8   : > { %3098 = vmatmul.bf16.gmra.mxu0 %v9334_v17 }
 0x4a9   : > { %3187 = vmatmul.bf16.gmra.mxu1 %v9334_v17 }
 0x4ac   : > { %v3234_v19 = vpop.f32.mrf.mxu2  ;;  %v2856_v40 = vpop.xlane.xlu2 %2855 }
 0x4ad   : > { %v9340_v27 = vmax.f32 %v3755_v23, %v3234_v19  ;;  %2900 = vst.msk [vmem:[%s9139_s29 + $0xa0] sm:$0xff] %vm2879_vm1, %v2856_v40  ;;  %v9344_v43 = vpop.f32.mrf.mxu3  ;;  %v3061_v63 = vpop.f32.mrf.mxu0  ;;  %v9356_v23 = vld [vmem:[#allocation2 + $0xd8] sm:$0xff] }
 0x4ae   : > { %v3150_v2 = vpop.f32.mrf.mxu1 }
 0x4af   : > { %v3757_v5 = vmax.f32 %v3061_v63, %v3150_v2 }
 0x4b1   : > { %3276 = vmatmul.bf16.gmra.mxu2 %v9334_v17 }
 0x4b2   : > { %3365 = vmatmul.bf16.gmra.mxu3 %v9334_v17 }
 0x4b4   : > { %v3237_v14 = vpop.f32.mrf.mxu2  ;;  %v2858_v29 = vpop.xlane.xlu0 %2857 }
 0x4b5   : > { %v9350_v8 = vmax.f32 %v3756_v61, %v3237_v14  ;;  %2901 = vst.msk [vmem:[%s9139_s29 + $0xa8] sm:$0xff] %vm2879_vm1, %v2858_v29  ;;  %v9354_v15 = vpop.f32.mrf.mxu3  ;;  %v3064_v30 = vpop.f32.mrf.mxu0 }
 0x4b6   : > { %v3153_v39 = vpop.f32.mrf.mxu1 }
 0x4b7   : > { %v3758_v25 = vmax.f32 %v3064_v30, %v3153_v39 }
 0x4b8   : > { %3103 = vmatmul.bf16.gmra.mxu0 %v9356_v23 }
 0x4b9   : > { %3192 = vmatmul.bf16.gmra.mxu1 %v9356_v23 }
 0x4bc   : > { %v3239_v19 = vpop.f32.mrf.mxu2  ;;  %v2860_v61 = vpop.xlane.xlu1 %2859 }
 0x4bd   : > { %v9362_v40 = vmax.f32 %v3757_v5, %v3239_v19  ;;  %2902 = vst.msk [vmem:[%s9139_s29 + $0xb0] sm:$0xff] %vm2879_vm1, %v2860_v61  ;;  %v9366_v63 = vpop.f32.mrf.mxu3  ;;  %v3066_v14 = vpop.f32.mrf.mxu0  ;;  %v9378_v19 = vld [vmem:[#allocation2 + $0xe0] sm:$0xff] }
 0x4be   : > { %v3155_v29 = vpop.f32.mrf.mxu1 }
 0x4bf   : > { %v3759_v30 = vmax.f32 %v3066_v14, %v3155_v29 }
 0x4c1   : > { %3281 = vmatmul.bf16.gmra.mxu2 %v9356_v23 }
 0x4c2   : > { %3370 = vmatmul.bf16.gmra.mxu3 %v9356_v23 }
 0x4c4   : > { %v3242_v39 = vpop.f32.mrf.mxu2  ;;  %v2862_v58 = vpop.xlane.xlu2 %2861 }
 0x4c5   : > { %v9372_v24 = vmax.f32 %v3758_v25, %v3242_v39  ;;  %2903 = vst.msk [vmem:[%s9139_s29 + $0xb8] sm:$0xff] %vm2879_vm1, %v2862_v58  ;;  %v9376_v5 = vpop.f32.mrf.mxu3  ;;  %v3069_v2 = vpop.f32.mrf.mxu0 }
 0x4c6   : > { %v3158_v0 = vpop.f32.mrf.mxu1 }
 0x4c7   : > { %v3760_v35 = vmax.f32 %v3069_v2, %v3158_v0 }
 0x4c8   : > { %3108 = vmatmul.bf16.gmra.mxu0 %v9378_v19 }
 0x4c9   : > { %3197 = vmatmul.bf16.gmra.mxu1 %v9378_v19 }
 0x4cc   : > { %v3244_v14 = vpop.f32.mrf.mxu2  ;;  %v2864_v25 = vpop.xlane.xlu0 %2863 }
 0x4cd   : > { %v9384_v29 = vmax.f32 %v3759_v30, %v3244_v14  ;;  %2904 = vst.msk [vmem:[%s9139_s29 + $0xc0] sm:$0xff] %vm2879_vm1, %v2864_v25  ;;  %v9388_v58 = vpop.f32.mrf.mxu3  ;;  %v3071_v61 = vpop.f32.mrf.mxu0  ;;  %v9400_v14 = vld [vmem:[#allocation2 + $0xe8] sm:$0xff] }
 0x4ce   : > { %v3160_v48 = vpop.f32.mrf.mxu1 }
 0x4cf   : > { %v3761_v0 = vmax.f32 %v3071_v61, %v3160_v48 }
 0x4d1   : > { %3286 = vmatmul.bf16.gmra.mxu2 %v9378_v19 }
 0x4d2   : > { %3375 = vmatmul.bf16.gmra.mxu3 %v9378_v19 }
 0x4d4   : > { %v3247_v2 = vpop.f32.mrf.mxu2  ;;  %v2866_v41 = vpop.xlane.xlu1 %2865 }
 0x4d5   : > { %v9394_v57 = vmax.f32 %v3760_v35, %v3247_v2  ;;  %2905 = vst.msk [vmem:[%s9139_s29 + $0xc8] sm:$0xff] %vm2879_vm1, %v2866_v41  ;;  %v9398_v30 = vpop.f32.mrf.mxu3  ;;  %v3074_v39 = vpop.f32.mrf.mxu0 }
 0x4d6   : > { %v3163_v7 = vpop.f32.mrf.mxu1 }
 0x4d7   : > { %v3762_v12 = vmax.f32 %v3074_v39, %v3163_v7 }
 0x4d8   : > { %3113 = vmatmul.bf16.gmra.mxu0 %v9400_v14 }
 0x4d9   : > { %3202 = vmatmul.bf16.gmra.mxu1 %v9400_v14 }
 0x4dc   : > { %v3249_v48 = vpop.f32.mrf.mxu2  ;;  %v2868_v35 = vpop.xlane.xlu2 %2867 }
 0x4dd   : > { %v9406_v61 = vmax.f32 %v3761_v0, %v3249_v48  ;;  %2906 = vst.msk [vmem:[%s9139_s29 + $0xd0] sm:$0xff] %vm2879_vm1, %v2868_v35  ;;  %v9410_v41 = vpop.f32.mrf.mxu3  ;;  %v3076_v25 = vpop.f32.mrf.mxu0  ;;  %v9422_v48 = vld [vmem:[#allocation2 + $0xf0] sm:$0xff] }
 0x4de   : > { %v3165_v20 = vpop.f32.mrf.mxu1 }
 0x4df   : > { %v3763_v7 = vmax.f32 %v3076_v25, %v3165_v20 }
 0x4e1   : > { %3291 = vmatmul.bf16.gmra.mxu2 %v9400_v14 }
 0x4e2   : > { %3380 = vmatmul.bf16.gmra.mxu3 %v9400_v14 }
 0x4e4   : > { %v3252_v39 = vpop.f32.mrf.mxu2  ;;  %v2870_v3 = vpop.xlane.xlu0 %2869 }
 0x4e5   : > { %v9416_v37 = vmax.f32 %v3762_v12, %v3252_v39  ;;  %2907 = vst.msk [vmem:[%s9139_s29 + $0xd8] sm:$0xff] %vm2879_vm1, %v2870_v3  ;;  %v9420_v0 = vpop.f32.mrf.mxu3  ;;  %v3079_v2 = vpop.f32.mrf.mxu0 }
 0x4e6   : > { %v3168_v46 = vpop.f32.mrf.mxu1 }
 0x4e7   : > { %v3764_v49 = vmax.f32 %v3079_v2, %v3168_v46 }
 0x4e8   : > { %3118 = vmatmul.bf16.gmra.mxu0 %v9422_v48 }
 0x4e9   : > { %3207 = vmatmul.bf16.gmra.mxu1 %v9422_v48 }
 0x4ec   : > { %v3254_v20 = vpop.f32.mrf.mxu2  ;;  %v2872_v12 = vpop.xlane.xlu1 %2871 }
 0x4ed   : > { %v9428_v25 = vmax.f32 %v3763_v7, %v3254_v20  ;;  %2908 = vst.msk [vmem:[%s9139_s29 + $0xe0] sm:$0xff] %vm2879_vm1, %v2872_v12  ;;  %v9432_v3 = vpop.f32.mrf.mxu3  ;;  %v3081_v35 = vpop.f32.mrf.mxu0  ;;  %v9444_v20 = vld [vmem:[#allocation2 + $0xf8] sm:$0xff] }
 0x4ee   : > { %v3170_v21 = vpop.f32.mrf.mxu1 }
 0x4ef   : > { %v3765_v46 = vmax.f32 %v3081_v35, %v3170_v21 }
 0x4f1   : > { %3296 = vmatmul.bf16.gmra.mxu2 %v9422_v48 }
 0x4f2   : > { %3385 = vmatmul.bf16.gmra.mxu3 %v9422_v48 }
 0x4f4   : > { %v3257_v2 = vpop.f32.mrf.mxu2  ;;  %v2874_v11 = vpop.xlane.xlu2 %2873 }
 0x4f5   : > { %v9438_v60 = vmax.f32 %v3764_v49, %v3257_v2  ;;  %2909 = vst.msk [vmem:[%s9139_s29 + $0xe8] sm:$0xff] %vm2879_vm1, %v2874_v11  ;;  %v9442_v7 = vpop.f32.mrf.mxu3  ;;  %v3084_v39 = vpop.f32.mrf.mxu0 }
 0x4f6   : > { %v3173_v56 = vpop.f32.mrf.mxu1 }
 0x4f7   : > { %v3766_v9 = vmax.f32 %v3084_v39, %v3173_v56 }
 0x4f8   : > { %3123 = vmatmul.bf16.gmra.mxu0 %v9444_v20 }
 0x4f9   : > { %3212 = vmatmul.bf16.gmra.mxu1 %v9444_v20 }
 0x4fc   : > { %v3259_v21 = vpop.f32.mrf.mxu2  ;;  %v2876_v49 = vpop.xlane.xlu0 %2875 }
 0x4fd   : > { %v9450_v35 = vmax.f32 %v3765_v46, %v3259_v21  ;;  %2910 = vst.msk [vmem:[%s9139_s29 + $0xf0] sm:$0xff] %vm2879_vm1, %v2876_v49  ;;  %v9454_v11 = vpop.f32.mrf.mxu3  ;;  %v3086_v12 = vpop.f32.mrf.mxu0  ;;  %v11637_v21 = vld [vmem:[#allocation69_spill] sm:$0xff] }
 0x4fe   : > { %v3175_v62 = vpop.f32.mrf.mxu1 }
 0x4ff   : > { %v3767_v56 = vmax.f32 %v3086_v12, %v3175_v62  ;;  %v11635_v62 = vld [vmem:[#allocation29_spill] sm:$0xff]  ;;  %v11636_v12 = vld [vmem:[#allocation30_spill] sm:$0xff] }
 0x501   : > { %3301 = vmatmul.bf16.gmra.mxu2 %v9444_v20 }
 0x502   : > { %3390 = vmatmul.bf16.gmra.mxu3 %v9444_v20 }
 0x504   : > { %v3262_v39 = vpop.f32.mrf.mxu2  ;;  %v2878_v22 = vpop.xlane.xlu1 %2877 }
 0x505   : > { %v9460_v13 = vmax.f32 %v3766_v9, %v3262_v39  ;;  %2911 = vst.msk [vmem:[%s9139_s29 + $0xf8] sm:$0xff] %vm2879_vm1, %v2878_v22  ;;  %v9464_v46 = vpop.f32.mrf.mxu3  ;;  %v3089_v49 = vpop.f32.mrf.mxu0 }
 0x506   : > { %v3178_v2 = vpop.f32.mrf.mxu1 }
 0x507   : > { %v3768_v51 = vmax.f32 %v3089_v49, %v3178_v2  ;;  %v11638_v2 = vld [vmem:[#allocation70_spill] sm:$0xff] }
 0x508   : > { %3404 = vmatmul.bf16.vlgmr.msrb.gmra.mxu0 %v9129_v45 }
 0x509   : > { %3493 = vmatmul.bf16.vlgmr.msrb.gmra.mxu1 %v9129_v45  ;;  %4556 = vmatpush.bf16.msrb.mxu0 %v11635_v62  ;;  %v11642_v62 = vld [vmem:[#allocation74_spill] sm:$0xff] }
 0x50a   : > { %4645 = vmatpush.bf16.msrb.mxu1 %v11636_v12  ;;  %v11639_v12 = vld [vmem:[#allocation71_spill] sm:$0xff] }
 0x50c   : > { %v3264_v9 = vpop.f32.mrf.mxu2 }
 0x50d   : > { %v9472_v39 = vmax.f32 %v3767_v56, %v3264_v9  ;;  %v9474_v22 = vpop.f32.mrf.mxu3  ;;  %4557 = vmatpush.bf16.msrb.mxu0 %v11637_v21  ;;  %v3091_v18 = vpop.f32.mrf.mxu0  ;;  %v11640_v56 = vld [vmem:[#allocation73_spill] sm:$0xff]  ;;  %v11641_v9 = vld [vmem:[#allocation72_spill] sm:$0xff] }
 0x50e   : > { %4646 = vmatpush.bf16.msrb.mxu1 %v11638_v2  ;;  %v3180_v49 = vpop.f32.mrf.mxu1  ;;  %v11643_v2 = vld [vmem:[#allocation75_spill] sm:$0xff] }
 0x50f   : > { %v3769_v6 = vmax.f32 %v3091_v18, %v3180_v49  ;;  %v11645_v18 = vld [vmem:[#allocation76_spill] sm:$0xff] }
 0x511   : > { %3582 = vmatmul.bf16.vlgmr.msrb.gmra.mxu2 %v9129_v45  ;;  %4558 = vmatpush.bf16.msrb.mxu0 %v11641_v9 }
 0x512   : > { %3671 = vmatmul.bf16.vlgmr.msrb.gmra.mxu3 %v9129_v45  ;;  %4734 = vmatpush.bf16.msrb.mxu2 %v11639_v12 }
 0x513   : > { %4823 = vmatpush.bf16.msrb.mxu3 %v11640_v56  ;;  %4647 = vmatpush.bf16.msrb.mxu1 %v11642_v62  ;;  %v11646_v56 = vld [vmem:[#allocation78_spill] sm:$0xff]  ;;  %v11647_v62 = vld [vmem:[#allocation79_spill] sm:$0xff] }
 0x514   : > { %v3267_v10 = vpop.f32.mrf.mxu2 }
 0x515   : > { %v9486_v50 = vmax.f32 %v3768_v51, %v3267_v10  ;;  %v9488_v21 = vpop.f32.mrf.mxu3  ;;  %4559 = vmatpush.bf16.msrb.mxu0 %v11645_v18  ;;  %v3094_v49 = vpop.f32.mrf.mxu0  ;;  %v11648_v10 = vld [vmem:[#allocation80_spill] sm:$0xff]  ;;  %v11649_v51 = vld [vmem:[#allocation81_spill] sm:$0xff] }
 0x516   : > { %4735 = vmatpush.bf16.msrb.mxu2 %v11643_v2  ;;  %v3183_v9 = vpop.f32.mrf.mxu1 }
 0x517   : > { %4824 = vmatpush.bf16.msrb.mxu3 %v11644_v44  ;;  %4648 = vmatpush.bf16.msrb.mxu1 %v11646_v56  ;;  %v3770_v12 = vmax.f32 %v3094_v49, %v3183_v9  ;;  %v11650_v44 = vld [vmem:[#allocation82_spill] sm:$0xff]  ;;  %v11653_v56 = vld [vmem:[#allocation59_spill] sm:$0xff]  ;;  %v11654_v9 = vld [vmem:[#allocation68_spill] sm:$0xff] }
 0x518   : > { %3409 = vmatmul.bf16.gmra.mxu0 %v9160_v16 }
 0x519   : > { %3498 = vmatmul.bf16.gmra.mxu1 %v9160_v16  ;;  %4560 = vmatpush.bf16.msrb.mxu0 %v11649_v51 }
 0x51a   : > { %4736 = vmatpush.bf16.msrb.mxu2 %v11647_v62 }
 0x51b   : > { %4825 = vmatpush.bf16.msrb.mxu3 %v11648_v10  ;;  %4649 = vmatpush.bf16.msrb.mxu1 %v11650_v44  ;;  %v11655_v10 = vld [vmem:[#allocation32_spill] sm:$0xff] }
 0x51c   : > { %v3269_v45 = vpop.f32.mrf.mxu2 }
 0x51d   : > { %v9502_v2 = vmax.f32 %v3769_v6, %v3269_v45  ;;  %v9504_v18 = vpop.f32.mrf.mxu3  ;;  %v3096_v62 = vpop.f32.mrf.mxu0  ;;  %4561 = vmatpush.bf16.msrb.mxu0 %v11655_v10  ;;  %v11657_v6 = vld [vmem:[#allocation67_spill] sm:$0xff]  ;;  %v11658_v45 = vld [vmem:[#allocation28_spill] sm:$0xff] }
 0x51e   : > { %11652 = vst [vmem:[#allocation33_spill] sm:$0xff] %v9504_v18  ;;  %4737 = vmatpush.bf16.msrb.mxu2 %v11653_v56  ;;  %v3185_v51 = vpop.f32.mrf.mxu1  ;;  %v11659_v56 = vld [vmem:[#allocation19_spill] sm:$0xff] }
 0x51f   : > { %11651 = vst [vmem:[#allocation9_spill] sm:$0xff] %v9502_v2  ;;  %4826 = vmatpush.bf16.msrb.mxu3 %v11654_v9  ;;  %4650 = vmatpush.bf16.msrb.mxu1 %v11656_v34  ;;  %v3771_v44 = vmax.f32 %v3096_v62, %v3185_v51  ;;  %v11660_v9 = vld [vmem:[#allocation17_spill] sm:$0xff]  ;;  %v11663_v34 = vld [vmem:[#allocation63_spill] sm:$0xff]  ;;  %v11665_v51 = vld [vmem:[#allocation14_spill] sm:$0xff] }
 0x520   : > { %v11664_v2 = vld [vmem:[#allocation65_spill] sm:$0xff] }
 0x521   : > { %3587 = vmatmul.bf16.gmra.mxu2 %v9160_v16  ;;  %4562 = vmatpush.bf16.msrb.mxu0 %v11659_v56 }
 0x522   : > { %3676 = vmatmul.bf16.gmra.mxu3 %v9160_v16  ;;  %4738 = vmatpush.bf16.msrb.mxu2 %v11657_v6  ;;  %v11670_v16 = vld [vmem:[#allocation64_spill] sm:$0xff] }
 0x523   : > { %4827 = vmatpush.bf16.msrb.mxu3 %v11658_v45  ;;  %4651 = vmatpush.bf16.msrb.mxu1 %v11660_v9  ;;  %v11666_v45 = vld [vmem:[#allocation66_spill] sm:$0xff] }
 0x524   : > { %v3272_v49 = vpop.f32.mrf.mxu2  ;;  %v11667_v9 = vld [vmem:[#allocation26_spill] sm:$0xff] }
 0x525   : > { %v9518_v18 = vmax.f32 %v3770_v12, %v3272_v49  ;;  %v9520_v10 = vpop.f32.mrf.mxu3  ;;  %v3099_v62 = vpop.f32.mrf.mxu0  ;;  %4563 = vmatpush.bf16.msrb.mxu0 %v11665_v51  ;;  %v11668_v12 = vld [vmem:[#allocation7_spill] sm:$0xff]  ;;  %v11671_v51 = vld [vmem:[#allocation8_spill] sm:$0xff] }
 0x526   : > { %11662 = vst [vmem:[#allocation13_spill] sm:$0xff] %v9520_v10  ;;  %4739 = vmatpush.bf16.msrb.mxu2 %v11663_v34  ;;  %v3188_v56 = vpop.f32.mrf.mxu1 }
 0x527   : > { %11661 = vst [vmem:[#allocation61_spill] sm:$0xff] %v9518_v18  ;;  %4828 = vmatpush.bf16.msrb.mxu3 %v11664_v2  ;;  %4652 = vmatpush.bf16.msrb.mxu1 %v11666_v45  ;;  %v3772_v6 = vmax.f32 %v3099_v62, %v3188_v56 }
 0x528   : > { %3414 = vmatmul.bf16.gmra.mxu0 %v9192_v1 }
 0x529   : > { %3503 = vmatmul.bf16.gmra.mxu1 %v9192_v1 }
 0x52a   : > { %4740 = vmatpush.bf16.msrb.mxu2 %v11667_v9 }
 0x52b   : > { %4829 = vmatpush.bf16.msrb.mxu3 %v11668_v12 }
 0x52c   : > { %v3274_v49 = vpop.f32.mrf.mxu2 }
 0x52d   : > { %v9532_v2 = vmax.f32 %v3771_v44, %v3274_v49  ;;  %v9534_v34 = vpop.f32.mrf.mxu3  ;;  %v3101_v62 = vpop.f32.mrf.mxu0 }
 0x52e   : > { %11669 = vst [vmem:[#allocation37_spill] sm:$0xff] %v9534_v34  ;;  %4741 = vmatpush.bf16.msrb.mxu2 %v11670_v16  ;;  %v3190_v9 = vpop.f32.mrf.mxu1 }
 0x52f   : > { %4830 = vmatpush.bf16.msrb.mxu3 %v11671_v51  ;;  %v3773_v45 = vmax.f32 %v3101_v62, %v3190_v9 }
 0x531   : > { %3592 = vmatmul.bf16.gmra.mxu2 %v9192_v1 }
 0x532   : > { %3681 = vmatmul.bf16.gmra.mxu3 %v9192_v1 }
 0x534   : > { %v3277_v12 = vpop.f32.mrf.mxu2 }
 0x535   : > { %v9542_v10 = vmax.f32 %v3772_v6, %v3277_v12  ;;  %v9544_v44 = vpop.f32.mrf.mxu3  ;;  %v3104_v16 = vpop.f32.mrf.mxu0 }
 0x536   : > { %11673 = vst [vmem:[#allocation62_spill] sm:$0xff] %v9544_v44  ;;  %v3193_v51 = vpop.f32.mrf.mxu1 }
 0x537   : > { %11672 = vst [vmem:[#allocation45_spill] sm:$0xff] %v9542_v10  ;;  %v3774_v18 = vmax.f32 %v3104_v16, %v3193_v51 }
 0x538   : > { %3419 = vmatmul.bf16.gmra.mxu0 %v9215_v59 }
 0x539   : > { %3508 = vmatmul.bf16.gmra.mxu1 %v9215_v59 }
 0x53c   : > { %v3279_v56 = vpop.f32.mrf.mxu2 }
 0x53d   : > { %v9550_v34 = vmax.f32 %v3773_v45, %v3279_v56  ;;  %v9552_v9 = vpop.f32.mrf.mxu3  ;;  %v3106_v6 = vpop.f32.mrf.mxu0 }
 0x53e   : > { %11674 = vst [vmem:[#allocation16_spill] sm:$0xff] %v9552_v9  ;;  %v3195_v12 = vpop.f32.mrf.mxu1 }
 0x53f   : > { %v3775_v62 = vmax.f32 %v3106_v6, %v3195_v12 }
 0x541   : > { %3597 = vmatmul.bf16.gmra.mxu2 %v9215_v59 }
 0x542   : > { %3686 = vmatmul.bf16.gmra.mxu3 %v9215_v59 }
 0x544   : > { %v3282_v16 = vpop.f32.mrf.mxu2 }
 0x545   : > { %v9558_v51 = vmax.f32 %v3774_v18, %v3282_v16  ;;  %v9560_v49 = vpop.f32.mrf.mxu3  ;;  %v3109_v56 = vpop.f32.mrf.mxu0 }
 0x546   : > { %11676 = vst [vmem:[#allocation52_spill] sm:$0xff] %v9560_v49  ;;  %v3198_v44 = vpop.f32.mrf.mxu1 }
 0x547   : > { %11675 = vst [vmem:[#allocation36_spill] sm:$0xff] %v9558_v51  ;;  %v3776_v10 = vmax.f32 %v3109_v56, %v3198_v44 }
 0x548   : > { %3424 = vmatmul.bf16.gmra.mxu0 %v9231_v4 }
 0x549   : > { %3513 = vmatmul.bf16.gmra.mxu1 %v9231_v4 }
 0x54c   : > { %v3284_v1 = vpop.f32.mrf.mxu2 }
 0x54d   : > { %v9566_v9 = vmax.f32 %v3775_v62, %v3284_v1  ;;  %v9568_v6 = vpop.f32.mrf.mxu3  ;;  %v3111_v18 = vpop.f32.mrf.mxu0 }
 0x54e   : > { %11677 = vst [vmem:[#allocation83_spill] sm:$0xff] %v9568_v6  ;;  %v3200_v12 = vpop.f32.mrf.mxu1 }
 0x54f   : > { %v3777_v16 = vmax.f32 %v3111_v18, %v3200_v12 }
 0x551   : > { %3602 = vmatmul.bf16.gmra.mxu2 %v9231_v4 }
 0x552   : > { %3691 = vmatmul.bf16.gmra.mxu3 %v9231_v4 }
 0x554   : > { %v3287_v44 = vpop.f32.mrf.mxu2 }
 0x555   : > { %v9574_v56 = vmax.f32 %v3776_v10, %v3287_v44  ;;  %v9576_v45 = vpop.f32.mrf.mxu3  ;;  %v3114_v62 = vpop.f32.mrf.mxu0 }
 0x556   : > { %11679 = vst [vmem:[#allocation84_spill] sm:$0xff] %v9576_v45  ;;  %v3203_v49 = vpop.f32.mrf.mxu1 }
 0x557   : > { %11678 = vst [vmem:[#allocation51_spill] sm:$0xff] %v9574_v56  ;;  %v3778_v51 = vmax.f32 %v3114_v62, %v3203_v49 }
 0x558   : > { %3429 = vmatmul.bf16.gmra.mxu0 %v9247_v33 }
 0x559   : > { %3518 = vmatmul.bf16.gmra.mxu1 %v9247_v33 }
 0x55c   : > { %v3289_v59 = vpop.f32.mrf.mxu2 }
 0x55d   : > { %v9582_v6 = vmax.f32 %v3777_v16, %v3289_v59  ;;  %v9584_v18 = vpop.f32.mrf.mxu3  ;;  %v3116_v10 = vpop.f32.mrf.mxu0 }
 0x55e   : > { %11680 = vst [vmem:[#allocation85_spill] sm:$0xff] %v9584_v18  ;;  %v3205_v12 = vpop.f32.mrf.mxu1 }
 0x55f   : > { %v3779_v44 = vmax.f32 %v3116_v10, %v3205_v12 }
 0x561   : > { %3607 = vmatmul.bf16.gmra.mxu2 %v9247_v33 }
 0x562   : > { %3696 = vmatmul.bf16.gmra.mxu3 %v9247_v33 }
 0x564   : > { %v3292_v49 = vpop.f32.mrf.mxu2 }
 0x565   : > { %v9590_v62 = vmax.f32 %v3778_v51, %v3292_v49  ;;  %v9592_v1 = vpop.f32.mrf.mxu3  ;;  %v3119_v16 = vpop.f32.mrf.mxu0 }
 0x566   : > { %11682 = vst [vmem:[#allocation88_spill] sm:$0xff] %v9592_v1  ;;  %v3208_v45 = vpop.f32.mrf.mxu1 }
 0x567   : > { %11681 = vst [vmem:[#allocation87_spill] sm:$0xff] %v9590_v62  ;;  %v3780_v56 = vmax.f32 %v3119_v16, %v3208_v45 }
 0x568   : > { %3434 = vmatmul.bf16.gmra.mxu0 %v9263_v31 }
 0x569   : > { %3523 = vmatmul.bf16.gmra.mxu1 %v9263_v31 }
 0x56c   : > { %v3294_v4 = vpop.f32.mrf.mxu2 }
 0x56d   : > { %v9598_v18 = vmax.f32 %v3779_v44, %v3294_v4  ;;  %v9600_v10 = vpop.f32.mrf.mxu3  ;;  %v3121_v51 = vpop.f32.mrf.mxu0 }
 0x56e   : > { %11684 = vst [vmem:[#allocation89_spill] sm:$0xff] %v9600_v10  ;;  %v3210_v12 = vpop.f32.mrf.mxu1 }
 0x56f   : > { %11683 = vst [vmem:[#allocation86_spill] sm:$0xff] %v9598_v18  ;;  %v3781_v49 = vmax.f32 %v3121_v51, %v3210_v12 }
 0x571   : > { %3612 = vmatmul.bf16.gmra.mxu2 %v9263_v31 }
 0x572   : > { %3701 = vmatmul.bf16.gmra.mxu3 %v9263_v31 }
 0x574   : > { %v3297_v45 = vpop.f32.mrf.mxu2 }
 0x575   : > { %v9606_v16 = vmax.f32 %v3780_v56, %v3297_v45  ;;  %v9608_v59 = vpop.f32.mrf.mxu3  ;;  %v3124_v44 = vpop.f32.mrf.mxu0 }
 0x576   : > { %11686 = vst [vmem:[#allocation53_spill] sm:$0xff] %v9608_v59  ;;  %v3213_v1 = vpop.f32.mrf.mxu1 }
 0x577   : > { %11685 = vst [vmem:[#allocation90_spill] sm:$0xff] %v9606_v16  ;;  %v3782_v62 = vmax.f32 %v3124_v44, %v3213_v1 }
 0x578   : > { %3439 = vmatmul.bf16.gmra.mxu0 %v9279_v52 }
 0x579   : > { %3528 = vmatmul.bf16.gmra.mxu1 %v9279_v52 }
 0x57c   : > { %v3299_v33 = vpop.f32.mrf.mxu2 }
 0x57d   : > { %v9614_v10 = vmax.f32 %v3781_v49, %v3299_v33  ;;  %v9616_v51 = vpop.f32.mrf.mxu3  ;;  %v3126_v56 = vpop.f32.mrf.mxu0 }
 0x57e   : > { %11688 = vst [vmem:[#allocation6_spill] sm:$0xff] %v9616_v51  ;;  %v3215_v12 = vpop.f32.mrf.mxu1 }
 0x57f   : > { %11687 = vst [vmem:[#allocation54_spill] sm:$0xff] %v9614_v10  ;;  %v3783_v45 = vmax.f32 %v3126_v56, %v3215_v12 }
 0x581   : > { %3617 = vmatmul.bf16.gmra.mxu2 %v9279_v52 }
 0x582   : > { %3706 = vmatmul.bf16.gmra.mxu3 %v9279_v52  ;;  %v11691_v52 = vmax.f32 %v9306_v28, %v9310_v47 }
 0x584   : > { %v3302_v1 = vpop.f32.mrf.mxu2 }
 0x585   : > { %v9622_v44 = vmax.f32 %v3782_v62, %v3302_v1  ;;  %v9624_v4 = vpop.f32.mrf.mxu3  ;;  %v3405_v49 = vpop.f32.mrf.mxu0 }
 0x586   : > { %11690 = vst [vmem:[#allocation60_spill] sm:$0xff] %v9624_v4  ;;  %v3494_v59 = vpop.f32.mrf.mxu1  ;;  %v3848_v62 = vmax.f32 %v11691_v52, %v3405_v49 }
 0x587   : > { %11689 = vst [vmem:[#allocation12_spill] sm:$0xff] %v9622_v44 }
 0x588   : > { %3444 = vmatmul.bf16.gmra.mxu0 %v9295_v42  ;;  %v3880_v4 = vmax.f32 %v3848_v62, %v3494_v59  ;;  %v11693_v59 = vmax.f32 %v9328_v55, %v9332_v54 }
 0x589   : > { %3533 = vmatmul.bf16.gmra.mxu1 %v9295_v42 }
 0x58c   : > { %v3304_v31 = vpop.f32.mrf.mxu2 }
 0x58d   : > { %v9630_v51 = vmax.f32 %v3783_v45, %v3304_v31  ;;  %v9632_v56 = vpop.f32.mrf.mxu3  ;;  %v3407_v1 = vpop.f32.mrf.mxu0  ;;  %v11692_v45 = vmax.f32 %v9318_v32, %v9322_v53 }
 0x58e   : > { %v3496_v33 = vpop.f32.mrf.mxu1 }
 0x58f   : > { %v3849_v16 = vmax.f32 %v11692_v45, %v3407_v1 }
 0x591   : > { %3622 = vmatmul.bf16.gmra.mxu2 %v9295_v42  ;;  %v3881_v49 = vmax.f32 %v3849_v16, %v3496_v33  ;;  %v11694_v33 = vmax.f32 %v9340_v27, %v9344_v43 }
 0x592   : > { %3711 = vmatmul.bf16.gmra.mxu3 %v9295_v42 }
 0x594   : > { %v3583_v44 = vpop.f32.mrf.mxu2 }
 0x595   : > { %v3912_v10 = vmax.f32 %v3880_v4, %v3583_v44  ;;  %v3672_v31 = vpop.f32.mrf.mxu3  ;;  %v3410_v28 = vpop.f32.mrf.mxu0 }
 0x596   : > { %v3499_v47 = vpop.f32.mrf.mxu1  ;;  %v3850_v4 = vmax.f32 %v11693_v59, %v3410_v28 }
 0x597   : > { %v3944_v18 = vmax.f32 %v3912_v10, %v3672_v31 }
 0x598   : > { %3449 = vmatmul.bf16.gmra.mxu0 %v9312_v36  ;;  %v3882_v53 = vmax.f32 %v3850_v4, %v3499_v47  ;;  %v11695_v47 = vmax.f32 %v9350_v8, %v9354_v15 }
 0x599   : > { %3976 = vmax.xlane.f32.xlu2 %v3944_v18  ;;  %3538 = vmatmul.bf16.gmra.mxu1 %v9312_v36 }
 0x59c   : > { %v3585_v52 = vpop.f32.mrf.mxu2 }
 0x59d   : > { %v3913_v12 = vmax.f32 %v3881_v49, %v3585_v52  ;;  %v3674_v42 = vpop.f32.mrf.mxu3  ;;  %v3412_v44 = vpop.f32.mrf.mxu0 }
 0x59e   : > { %v3501_v32 = vpop.f32.mrf.mxu1  ;;  %v3851_v1 = vmax.f32 %v11694_v33, %v3412_v44  ;;  %v11697_v33 = vmax.f32 %v9372_v24, %v9376_v5 }
 0x59f   : > { %v3945_v62 = vmax.f32 %v3913_v12, %v3674_v42 }
 0x5a0   : > { %v3883_v54 = vmax.f32 %v3851_v1, %v3501_v32 }
 0x5a1   : > { %3627 = vmatmul.bf16.gmra.mxu2 %v9312_v36  ;;  %3978 = vmax.xlane.f32.xlu0 %v3945_v62  ;;  %v11696_v62 = vmax.f32 %v9362_v40, %v9366_v63 }
 0x5a2   : > { %3716 = vmatmul.bf16.gmra.mxu3 %v9312_v36 }
 0x5a4   : > { %v3588_v18 = vpop.f32.mrf.mxu2 }
 0x5a5   : > { %v3914_v10 = vmax.f32 %v3882_v53, %v3588_v18  ;;  %v3677_v16 = vpop.f32.mrf.mxu3  ;;  %v3415_v45 = vpop.f32.mrf.mxu0 }
 0x5a6   : > { %v3504_v55 = vpop.f32.mrf.mxu1  ;;  %v3852_v49 = vmax.f32 %v11695_v47, %v3415_v45 }
 0x5a7   : > { %v3946_v31 = vmax.f32 %v3914_v10, %v3677_v16 }
 0x5a8   : > { %3454 = vmatmul.bf16.gmra.mxu0 %v9334_v17  ;;  %v3884_v43 = vmax.f32 %v3852_v49, %v3504_v55 }
 0x5a9   : > { %3980 = vmax.xlane.f32.xlu1 %v3946_v31  ;;  %3543 = vmatmul.bf16.gmra.mxu1 %v9334_v17 }
 0x5ac   : > { %v3590_v12 = vpop.f32.mrf.mxu2 }
 0x5ad   : > { %v3915_v28 = vmax.f32 %v3883_v54, %v3590_v12  ;;  %v3679_v36 = vpop.f32.mrf.mxu3  ;;  %v3417_v52 = vpop.f32.mrf.mxu0 }
 0x5ae   : > { %v3506_v27 = vpop.f32.mrf.mxu1  ;;  %v3853_v32 = vmax.f32 %v11696_v62, %v3417_v52 }
 0x5af   : > { %v3947_v42 = vmax.f32 %v3915_v28, %v3679_v36  ;;  %v11698_v28 = vmax.f32 %v9384_v29, %v9388_v58 }
 0x5b0   : > { %v3885_v15 = vmax.f32 %v3853_v32, %v3506_v27  ;;  %v11699_v27 = vmax.f32 %v9394_v57, %v9398_v30 }
 0x5b1   : > { %3632 = vmatmul.bf16.gmra.mxu2 %v9334_v17  ;;  %3982 = vmax.xlane.f32.xlu2 %v3947_v42 }
 0x5b2   : > { %3721 = vmatmul.bf16.gmra.mxu3 %v9334_v17 }
 0x5b4   : > { %v3593_v59 = vpop.f32.mrf.mxu2 }
 0x5b5   : > { %v3916_v4 = vmax.f32 %v3884_v43, %v3593_v59  ;;  %v3682_v44 = vpop.f32.mrf.mxu3  ;;  %v3420_v18 = vpop.f32.mrf.mxu0 }
 0x5b6   : > { %v3509_v8 = vpop.f32.mrf.mxu1  ;;  %v3854_v1 = vmax.f32 %v11697_v33, %v3420_v18 }
 0x5b7   : > { %v3948_v53 = vmax.f32 %v3916_v4, %v3682_v44 }
 0x5b8   : > { %3459 = vmatmul.bf16.gmra.mxu0 %v9356_v23  ;;  %v3886_v63 = vmax.f32 %v3854_v1, %v3509_v8 }
 0x5b9   : > { %3984 = vmax.xlane.f32.xlu0 %v3948_v53  ;;  %3548 = vmatmul.bf16.gmra.mxu1 %v9356_v23  ;;  %v11700_v53 = vmax.f32 %v9406_v61, %v9410_v41 }
 0x5bc   : > { %v3595_v10 = vpop.f32.mrf.mxu2 }
 0x5bd   : > { %v3917_v16 = vmax.f32 %v3885_v15, %v3595_v10  ;;  %v3684_v17 = vpop.f32.mrf.mxu3  ;;  %v3422_v31 = vpop.f32.mrf.mxu0 }
 0x5be   : > { %v3511_v40 = vpop.f32.mrf.mxu1  ;;  %v3855_v36 = vmax.f32 %v11698_v28, %v3422_v31 }
 0x5bf   : > { %v3949_v45 = vmax.f32 %v3917_v16, %v3684_v17  ;;  %v11701_v17 = vmax.f32 %v9416_v37, %v9420_v0 }
 0x5c0   : > { %v3887_v5 = vmax.f32 %v3855_v36, %v3511_v40 }
 0x5c1   : > { %3637 = vmatmul.bf16.gmra.mxu2 %v9356_v23  ;;  %3986 = vmax.xlane.f32.xlu1 %v3949_v45 }
 0x5c2   : > { %3726 = vmatmul.bf16.gmra.mxu3 %v9356_v23 }
 0x5c4   : > { %v3598_v55 = vpop.f32.mrf.mxu2 }
 0x5c5   : > { %v3918_v54 = vmax.f32 %v3886_v63, %v3598_v55  ;;  %v3687_v12 = vpop.f32.mrf.mxu3  ;;  %v3425_v49 = vpop.f32.mrf.mxu0  ;;  %v11702_v55 = vmax.f32 %v9428_v25, %v9432_v3 }
 0x5c6   : > { %v3514_v24 = vpop.f32.mrf.mxu1  ;;  %v3856_v43 = vmax.f32 %v11699_v27, %v3425_v49  ;;  %v11703_v49 = vmax.f32 %v9438_v60, %v9442_v7 }
 0x5c7   : > { %v3950_v47 = vmax.f32 %v3918_v54, %v3687_v12 }
 0x5c8   : > { %3464 = vmatmul.bf16.gmra.mxu0 %v9378_v19  ;;  %v3888_v58 = vmax.f32 %v3856_v43, %v3514_v24  ;;  %v11704_v43 = vmax.f32 %v9450_v35, %v9454_v11 }
 0x5c9   : > { %3988 = vmax.xlane.f32.xlu2 %v3950_v47  ;;  %3553 = vmatmul.bf16.gmra.mxu1 %v9378_v19 }
 0x5cc   : > { %v3600_v52 = vpop.f32.mrf.mxu2 }
 0x5cd   : > { %v3919_v42 = vmax.f32 %v3887_v5, %v3600_v52  ;;  %v3689_v23 = vpop.f32.mrf.mxu3  ;;  %v3427_v59 = vpop.f32.mrf.mxu0 }
 0x5ce   : > { %v3516_v29 = vpop.f32.mrf.mxu1  ;;  %v3857_v18 = vmax.f32 %v11700_v53, %v3427_v59 }
 0x5cf   : > { %v3951_v4 = vmax.f32 %v3919_v42, %v3689_v23 }
 0x5d0   : > { %v3889_v30 = vmax.f32 %v3857_v18, %v3516_v29 }
 0x5d1   : > { %3642 = vmatmul.bf16.gmra.mxu2 %v9378_v19  ;;  %3990 = vmax.xlane.f32.xlu0 %v3951_v4 }
 0x5d2   : > { %3731 = vmatmul.bf16.gmra.mxu3 %v9378_v19 }
 0x5d4   : > { %v3603_v44 = vpop.f32.mrf.mxu2 }
 0x5d5   : > { %v3920_v62 = vmax.f32 %v3888_v58, %v3603_v44  ;;  %v3692_v32 = vpop.f32.mrf.mxu3  ;;  %v3430_v15 = vpop.f32.mrf.mxu0 }
 0x5d6   : > { %v3519_v57 = vpop.f32.mrf.mxu1  ;;  %v3858_v33 = vmax.f32 %v11701_v17, %v3430_v15 }
 0x5d7   : > { %v3952_v8 = vmax.f32 %v3920_v62, %v3692_v32  ;;  %v11705_v62 = vmax.f32 %v9460_v13, %v9464_v46 }
 0x5d8   : > { %3469 = vmatmul.bf16.gmra.mxu0 %v9400_v14  ;;  %v3890_v41 = vmax.f32 %v3858_v33, %v3519_v57 }
 0x5d9   : > { %3992 = vmax.xlane.f32.xlu1 %v3952_v8  ;;  %3558 = vmatmul.bf16.gmra.mxu1 %v9400_v14 }
 0x5dc   : > { %v3605_v10 = vpop.f32.mrf.mxu2 }
 0x5dd   : > { %v3921_v16 = vmax.f32 %v3889_v30, %v3605_v10  ;;  %v3694_v19 = vpop.f32.mrf.mxu3  ;;  %v3432_v1 = vpop.f32.mrf.mxu0  ;;  %v9711_v30 = vld [vmem:[#allocation2 + $0x100] sm:$0xff]  ;;  %v11706_v10 = vmax.f32 %v9472_v39, %v9474_v22  ;;  %v11707_v22 = vmax.f32 %v9486_v50, %v9488_v21  ;;  %v11712_v50 = vld [vmem:[#allocation56_spill] sm:$0xff]  ;;  %v11713_v21 = vld [vmem:[#allocation50_spill] sm:$0xff] }
 0x5de   : > { %v3521_v61 = vpop.f32.mrf.mxu1  ;;  %v3859_v54 = vmax.f32 %v11702_v55, %v3432_v1  ;;  %v11711_v55 = vld [vmem:[#allocation55_spill] sm:$0xff] }
 0x5df   : > { %v3953_v31 = vmax.f32 %v3921_v16, %v3694_v19 }
 0x5e0   : > { %v3891_v0 = vmax.f32 %v3859_v54, %v3521_v61  ;;  %v11708_v61 = vld [vmem:[#allocation57_spill] sm:$0xff] }
 0x5e1   : > { %3647 = vmatmul.bf16.gmra.mxu2 %v9400_v14  ;;  %3994 = vmax.xlane.f32.xlu2 %v3953_v31 }
 0x5e2   : > { %3736 = vmatmul.bf16.gmra.mxu3 %v9400_v14 }
 0x5e4   : > { %v3608_v45 = vpop.f32.mrf.mxu2 }
 0x5e5   : > { %v3922_v40 = vmax.f32 %v3890_v41, %v3608_v45  ;;  %v3697_v63 = vpop.f32.mrf.mxu3  ;;  %v3435_v28 = vpop.f32.mrf.mxu0 }
 0x5e6   : > { %v3524_v37 = vpop.f32.mrf.mxu1  ;;  %v3860_v24 = vmax.f32 %v11703_v49, %v3435_v28 }
 0x5e7   : > { %v3954_v12 = vmax.f32 %v3922_v40, %v3697_v63  ;;  %v11709_v40 = vld [vmem:[#allocation42_spill] sm:$0xff] }
 0x5e8   : > { %3474 = vmatmul.bf16.gmra.mxu0 %v9422_v48  ;;  %v3892_v3 = vmax.f32 %v3860_v24, %v3524_v37 }
 0x5e9   : > { %3996 = vmax.xlane.f32.xlu0 %v3954_v12  ;;  %3563 = vmatmul.bf16.gmra.mxu1 %v9422_v48 }
 0x5ec   : > { %v3610_v36 = vpop.f32.mrf.mxu2 }
 0x5ed   : > { %v3923_v47 = vmax.f32 %v3891_v0, %v3610_v36  ;;  %v3699_v14 = vpop.f32.mrf.mxu3  ;;  %v3437_v5 = vpop.f32.mrf.mxu0  ;;  %v11714_v0 = vld [vmem:[#allocation11_spill] sm:$0xff]  ;;  %v9736_v36 = vld [vmem:[#allocation2 + $0x108] sm:$0xff] }
 0x5ee   : > { %v3526_v25 = vpop.f32.mrf.mxu1  ;;  %v3861_v59 = vmax.f32 %v11704_v43, %v3437_v5  ;;  %v11718_v5 = vld [vmem:[#allocation5_spill] sm:$0xff] }
 0x5ef   : > { %v3955_v52 = vmax.f32 %v3923_v47, %v3699_v14  ;;  %v11715_v47 = vld [vmem:[#allocation9_spill] sm:$0xff] }
 0x5f0   : > { %v3893_v7 = vmax.f32 %v3861_v59, %v3526_v25  ;;  %v11716_v14 = vld [vmem:[#allocation33_spill] sm:$0xff]  ;;  %v11719_v25 = vld [vmem:[#allocation58_spill] sm:$0xff] }
 0x5f1   : > { %3652 = vmatmul.bf16.gmra.mxu2 %v9422_v48  ;;  %3998 = vmax.xlane.f32.xlu1 %v3955_v52  ;;  %v11717_v49 = vmax.f32 %v11715_v47, %v11716_v14  ;;  %v11722_v59 = vld [vmem:[#allocation41_spill] sm:$0xff]  ;;  %v11744_v47 = vld [vmem:[#allocation22_spill] sm:$0xff] }
 0x5f2   : > { %3741 = vmatmul.bf16.gmra.mxu3 %v9422_v48  ;;  %v11745_v14 = vld [vmem:[#allocation45_spill] sm:$0xff] }
 0x5f4   : > { %v3613_v42 = vpop.f32.mrf.mxu2 }
 0x5f5   : > { %v3924_v23 = vmax.f32 %v3892_v3, %v3613_v42  ;;  %v3702_v27 = vpop.f32.mrf.mxu3  ;;  %v3440_v29 = vpop.f32.mrf.mxu0  ;;  %v11720_v42 = vld [vmem:[#allocation31_spill] sm:$0xff] }
 0x5f6   : > { %v3529_v60 = vpop.f32.mrf.mxu1  ;;  %v3862_v32 = vmax.f32 %v11705_v62, %v3440_v29  ;;  %v11724_v29 = vld [vmem:[#allocation43_spill] sm:$0xff]  ;;  %v11726_v62 = vld [vmem:[#allocation61_spill] sm:$0xff] }
 0x5f7   : > { %v3956_v4 = vmax.f32 %v3924_v23, %v3702_v27  ;;  %v11721_v27 = vld [vmem:[#allocation47_spill] sm:$0xff] }
 0x5f8   : > { %3479 = vmatmul.bf16.gmra.mxu0 %v9444_v20  ;;  %v3894_v11 = vmax.f32 %v3862_v32, %v3529_v60  ;;  %v11727_v32 = vld [vmem:[#allocation13_spill] sm:$0xff] }
 0x5f9   : > { %4000 = vmax.xlane.f32.xlu2 %v3956_v4  ;;  %3568 = vmatmul.bf16.gmra.mxu1 %v9444_v20  ;;  %v11723_v4 = vld [vmem:[#allocation25_spill] sm:$0xff] }
 0x5fc   : > { %v3615_v58 = vpop.f32.mrf.mxu2 }
 0x5fd   : > { %v3925_v44 = vmax.f32 %v3893_v7, %v3615_v58  ;;  %v3704_v48 = vpop.f32.mrf.mxu3  ;;  %v3442_v53 = vpop.f32.mrf.mxu0 }
 0x5fe   : > { %v3531_v35 = vpop.f32.mrf.mxu1  ;;  %v3863_v13 = vmax.f32 %v11706_v10, %v3442_v53  ;;  %v11728_v53 = vmax.f32 %v11726_v62, %v11727_v32 }
 0x5ff   : > { %v3957_v18 = vmax.f32 %v3925_v44, %v3704_v48  ;;  %v11725_v48 = vld [vmem:[#allocation15_spill] sm:$0xff] }
 0x600   : > { %v3895_v17 = vmax.f32 %v3863_v13, %v3531_v35  ;;  %v11729_v35 = vld [vmem:[#allocation44_spill] sm:$0xff]  ;;  %v11732_v13 = vld [vmem:[#allocation46_spill] sm:$0xff] }
 0x601   : > { %3657 = vmatmul.bf16.gmra.mxu2 %v9444_v20  ;;  %4002 = vmax.xlane.f32.xlu0 %v3957_v18 }
 0x602   : > { %3746 = vmatmul.bf16.gmra.mxu3 %v9444_v20 }
 0x604   : > { %v3618_v8 = vpop.f32.mrf.mxu2 }
 0x605   : > { %v3926_v15 = vmax.f32 %v3894_v11, %v3618_v8  ;;  %v3707_v57 = vpop.f32.mrf.mxu3  ;;  %v3445_v16 = vpop.f32.mrf.mxu0 }
 0x606   : > { %v3534_v19 = vpop.f32.mrf.mxu1  ;;  %v3864_v31 = vmax.f32 %v11707_v22, %v3445_v16  ;;  %v11733_v16 = vld [vmem:[#allocation48_spill] sm:$0xff] }
 0x607   : > { %v3958_v46 = vmax.f32 %v3926_v15, %v3707_v57  ;;  %v11730_v15 = vld [vmem:[#allocation39_spill] sm:$0xff]  ;;  %v11736_v22 = vld [vmem:[#allocation24_spill] sm:$0xff] }
 0x608   : > { %4208 = vmatmul.bf16.vlgmr.msra.gmra.mxu0 %v9711_v30  ;;  %v3896_v63 = vmax.f32 %v3864_v31, %v3534_v19  ;;  %v11731_v57 = vld [vmem:[#allocation23_spill] sm:$0xff]  ;;  %v11734_v19 = vld [vmem:[#allocation18_spill] sm:$0xff] }
 0x609   : > { %4004 = vmax.xlane.f32.xlu1 %v3958_v46  ;;  %4297 = vmatmul.bf16.vlgmr.msra.gmra.mxu1 %v9711_v30  ;;  %v9768_v31 = vld [vmem:[#allocation2 + $0x110] sm:$0xff] }
 0x60a   : > { %5360 = vmatpush.bf16.msra.mxu0 %v11584_v38  ;;  %5449 = vmatpush.bf16.msra.mxu1 %v11585_v26  ;;  %v11710_v26 = vld [vmem:[#allocation49_spill] sm:$0xff] }
 0x60c   : > { %v3620_v20 = vpop.f32.mrf.mxu2  ;;  %v3977_v33 = vpop.xlane.xlu2 %3976 }
 0x60d   : > { %v3927_v1 = vmax.f32 %v3895_v17, %v3620_v20  ;;  %4040 = vst.msk [vmem:[%s9139_s29 + $0x100] sm:$0xff] %vm2879_vm1, %v3977_v33  ;;  %v3709_v39 = vpop.f32.mrf.mxu3  ;;  %v3447_v41 = vpop.f32.mrf.mxu0  ;;  %v11735_v17 = vld [vmem:[#allocation34_spill] sm:$0xff] }
 0x60e   : > { %5361 = vmatpush.bf16.msra.mxu0 %v11708_v61  ;;  %5450 = vmatpush.bf16.msra.mxu1 %v11709_v40  ;;  %v3536_v38 = vpop.f32.mrf.mxu1  ;;  %v3865_v24 = vmax.f32 %v11717_v49, %v3447_v41  ;;  %v11737_v61 = vld [vmem:[#allocation37_spill] sm:$0xff]  ;;  %v11739_v40 = vld [vmem:[#allocation40_spill] sm:$0xff]  ;;  %v11746_v49 = vld [vmem:[#allocation62_spill] sm:$0xff] }
 0x60f   : > { %v3959_v45 = vmax.f32 %v3927_v1, %v3709_v39  ;;  %v11738_v41 = vmax.f32 %v9532_v2, %v11737_v61 }
 0x610   : > { %v3897_v43 = vmax.f32 %v3865_v24, %v3536_v38  ;;  %v11747_v24 = vmax.f32 %v11745_v14, %v11746_v49 }
 0x611   : > { %4386 = vmatmul.bf16.vlgmr.msra.gmra.mxu2 %v9711_v30  ;;  %4006 = vmax.xlane.f32.xlu2 %v3959_v45 }
 0x612   : > { %4475 = vmatmul.bf16.vlgmr.msra.gmra.mxu3 %v9711_v30  ;;  %5538 = vmatpush.bf16.msra.mxu2 %v11710_v26 }
 0x613   : > { %5627 = vmatpush.bf16.msra.mxu3 %v11711_v55  ;;  %5362 = vmatpush.bf16.msra.mxu0 %v11712_v50  ;;  %v11741_v55 = vld [vmem:[#allocation21_spill] sm:$0xff] }
 0x614   : > { %5451 = vmatpush.bf16.msra.mxu1 %v11713_v21  ;;  %v3623_v54 = vpop.f32.mrf.mxu2  ;;  %v3979_v12 = vpop.xlane.xlu0 %3978  ;;  %v11742_v21 = vld [vmem:[#allocation35_spill] sm:$0xff] }
 0x615   : > { %v3928_v28 = vmax.f32 %v3896_v63, %v3623_v54  ;;  %4041 = vst.msk [vmem:[%s9139_s29 + $0x108] sm:$0xff] %vm2879_vm1, %v3979_v12  ;;  %v3712_v37 = vpop.f32.mrf.mxu3  ;;  %v3450_v3 = vpop.f32.mrf.mxu0  ;;  %v11740_v63 = vld [vmem:[#allocation20_spill] sm:$0xff]  ;;  %v11743_v12 = vld [vmem:[#allocation38_spill] sm:$0xff] }
 0x616   : > { %5539 = vmatpush.bf16.msra.mxu2 %v11714_v0  ;;  %v3539_v23 = vpop.f32.mrf.mxu1  ;;  %v3866_v18 = vmax.f32 %v11728_v53, %v3450_v3 }
 0x617   : > { %5628 = vmatpush.bf16.msra.mxu3 %v11718_v5  ;;  %v3960_v52 = vmax.f32 %v3928_v28, %v3712_v37  ;;  %5363 = vmatpush.bf16.msra.mxu0 %v11719_v25 }
 0x618   : > { %5452 = vmatpush.bf16.msra.mxu1 %v11720_v42  ;;  %4213 = vmatmul.bf16.gmra.mxu0 %v9736_v36  ;;  %v3898_v46 = vmax.f32 %v3866_v18, %v3539_v23 }
 0x619   : > { %4008 = vmax.xlane.f32.xlu0 %v3960_v52  ;;  %4302 = vmatmul.bf16.gmra.mxu1 %v9736_v36  ;;  %v11748_v52 = vld [vmem:[#allocation10_spill] sm:$0xff] }
 0x61a   : > { %5540 = vmatpush.bf16.msra.mxu2 %v11721_v27 }
 0x61b   : > { %5629 = vmatpush.bf16.msra.mxu3 %v11722_v59  ;;  %5364 = vmatpush.bf16.msra.mxu0 %v11723_v4 }
 0x61c   : > { %5453 = vmatpush.bf16.msra.mxu1 %v11724_v29  ;;  %v3625_v60 = vpop.f32.mrf.mxu2  ;;  %v3981_v7 = vpop.xlane.xlu1 %3980  ;;  %v9791_v29 = vld [vmem:[#allocation2 + $0x118] sm:$0xff] }
 0x61d   : > { %v3929_v58 = vmax.f32 %v3897_v43, %v3625_v60  ;;  %4042 = vst.msk [vmem:[%s9139_s29 + $0x110] sm:$0xff] %vm2879_vm1, %v3981_v7  ;;  %v3714_v44 = vpop.f32.mrf.mxu3  ;;  %v3452_v11 = vpop.f32.mrf.mxu0  ;;  %v11749_v60 = vld [vmem:[#allocation16_spill] sm:$0xff] }
 0x61e   : > { %5541 = vmatpush.bf16.msra.mxu2 %v11725_v48  ;;  %v3541_v10 = vpop.f32.mrf.mxu1  ;;  %v3867_v45 = vmax.f32 %v11738_v41, %v3452_v11  ;;  %v11750_v7 = vmax.f32 %v9550_v34, %v11749_v60 }
 0x61f   : > { %5630 = vmatpush.bf16.msra.mxu3 %v11729_v35  ;;  %v3961_v8 = vmax.f32 %v3929_v58, %v3714_v44  ;;  %5365 = vmatpush.bf16.msra.mxu0 %v11730_v15  ;;  %v11752_v15 = vld [vmem:[#allocation52_spill] sm:$0xff] }
 0x620   : > { %5454 = vmatpush.bf16.msra.mxu1 %v11731_v57  ;;  %v3899_v54 = vmax.f32 %v3867_v45, %v3541_v10 }
 0x621   : > { %4391 = vmatmul.bf16.gmra.mxu2 %v9736_v36  ;;  %4010 = vmax.xlane.f32.xlu1 %v3961_v8  ;;  %v11751_v8 = vld [vmem:[#allocation36_spill] sm:$0xff] }
 0x622   : > { %4480 = vmatmul.bf16.gmra.mxu3 %v9736_v36  ;;  %5542 = vmatpush.bf16.msra.mxu2 %v11732_v13  ;;  %v11753_v34 = vmax.f32 %v11751_v8, %v11752_v15 }
 0x623   : > { %5631 = vmatpush.bf16.msra.mxu3 %v11733_v16  ;;  %5366 = vmatpush.bf16.msra.mxu0 %v11734_v19 }
 0x624   : > { %5455 = vmatpush.bf16.msra.mxu1 %v11735_v17  ;;  %v3628_v20 = vpop.f32.mrf.mxu2  ;;  %v3983_v33 = vpop.xlane.xlu2 %3982 }
 0x625   : > { %v3930_v1 = vmax.f32 %v3898_v46, %v3628_v20  ;;  %4043 = vst.msk [vmem:[%s9139_s29 + $0x118] sm:$0xff] %vm2879_vm1, %v3983_v33  ;;  %v3717_v39 = vpop.f32.mrf.mxu3  ;;  %v3455_v26 = vpop.f32.mrf.mxu0 }
 0x626   : > { %5543 = vmatpush.bf16.msra.mxu2 %v11736_v22  ;;  %v3544_v50 = vpop.f32.mrf.mxu1  ;;  %v3868_v5 = vmax.f32 %v11747_v24, %v3455_v26 }
 0x627   : > { %5632 = vmatpush.bf16.msra.mxu3 %v11739_v40  ;;  %v3962_v38 = vmax.f32 %v3930_v1, %v3717_v39  ;;  %5367 = vmatpush.bf16.msra.mxu0 %v11740_v63  ;;  %v9807_v1 = vld [vmem:[#allocation2 + $0x120] sm:$0xff]  ;;  %v11754_v39 = vld [vmem:[#allocation83_spill] sm:$0xff] }
 0x628   : > { %5456 = vmatpush.bf16.msra.mxu1 %v11741_v55  ;;  %4218 = vmatmul.bf16.gmra.mxu0 %v9768_v31  ;;  %v3900_v23 = vmax.f32 %v3868_v5, %v3544_v50  ;;  %v11755_v22 = vmax.f32 %v9566_v9, %v11754_v39  ;;  %v9823_v5 = vld [vmem:[#allocation2 + $0x128] sm:$0xff] }
 0x629   : > { %4012 = vmax.xlane.f32.xlu2 %v3962_v38  ;;  %4307 = vmatmul.bf16.gmra.mxu1 %v9768_v31 }
 0x62a   : > { %5544 = vmatpush.bf16.msra.mxu2 %v11742_v21  ;;  %v11756_v21 = vld [vmem:[#allocation51_spill] sm:$0xff] }
 0x62b   : > { %5633 = vmatpush.bf16.msra.mxu3 %v11743_v12 }
 0x62c   : > { %v3630_v2 = vpop.f32.mrf.mxu2  ;;  %v3985_v28 = vpop.xlane.xlu0 %3984 }
 0x62d   : > { %v3931_v37 = vmax.f32 %v3899_v54, %v3630_v2  ;;  %4044 = vst.msk [vmem:[%s9139_s29 + $0x120] sm:$0xff] %vm2879_vm1, %v3985_v28  ;;  %v3719_v0 = vpop.f32.mrf.mxu3  ;;  %v3457_v25 = vpop.f32.mrf.mxu0  ;;  %v11757_v54 = vld [vmem:[#allocation84_spill] sm:$0xff] }
 0x62e   : > { %5545 = vmatpush.bf16.msra.mxu2 %v11744_v47  ;;  %v3546_v42 = vpop.f32.mrf.mxu1  ;;  %v3869_v58 = vmax.f32 %v11750_v7, %v3457_v25  ;;  %v11758_v9 = vmax.f32 %v11756_v21, %v11757_v54 }
 0x62f   : > { %5634 = vmatpush.bf16.msra.mxu3 %v11748_v52  ;;  %v3963_v3 = vmax.f32 %v3931_v37, %v3719_v0  ;;  %v11759_v52 = vld [vmem:[#allocation85_spill] sm:$0xff] }
 0x630   : > { %v3901_v32 = vmax.f32 %v3869_v58, %v3546_v42  ;;  %v11760_v25 = vmax.f32 %v9582_v6, %v11759_v52  ;;  %v11761_v58 = vld [vmem:[#allocation87_spill] sm:$0xff] }
 0x631   : > { %4396 = vmatmul.bf16.gmra.mxu2 %v9768_v31  ;;  %4014 = vmax.xlane.f32.xlu0 %v3963_v3 }
 0x632   : > { %4485 = vmatmul.bf16.gmra.mxu3 %v9768_v31 }
 0x634   : > { %v3633_v27 = vpop.f32.mrf.mxu2  ;;  %v3987_v43 = vpop.xlane.xlu1 %3986 }
 0x635   : > { %v3932_v59 = vmax.f32 %v3900_v23, %v3633_v27  ;;  %4045 = vst.msk [vmem:[%s9139_s29 + $0x128] sm:$0xff] %vm2879_vm1, %v3987_v43  ;;  %v3722_v4 = vpop.f32.mrf.mxu3  ;;  %v3460_v48 = vpop.f32.mrf.mxu0 }
 0x636   : > { %v3549_v62 = vpop.f32.mrf.mxu1  ;;  %v3870_v57 = vmax.f32 %v11753_v34, %v3460_v48  ;;  %v9839_v34 = vld [vmem:[#allocation2 + $0x130] sm:$0xff] }
 0x637   : > { %v3964_v44 = vmax.f32 %v3932_v59, %v3722_v4 }
 0x638   : > { %4223 = vmatmul.bf16.gmra.mxu0 %v9791_v29  ;;  %v3902_v16 = vmax.f32 %v3870_v57, %v3549_v62  ;;  %v11764_v57 = vld [vmem:[#allocation86_spill] sm:$0xff] }
 0x639   : > { %4016 = vmax.xlane.f32.xlu1 %v3964_v44  ;;  %4312 = vmatmul.bf16.gmra.mxu1 %v9791_v29  ;;  %v11762_v44 = vld [vmem:[#allocation88_spill] sm:$0xff] }
 0x63a   : > { %v11763_v6 = vmax.f32 %v11761_v58, %v11762_v44 }
 0x63c   : > { %v3635_v53 = vpop.f32.mrf.mxu2  ;;  %v3989_v18 = vpop.xlane.xlu2 %3988 }
 0x63d   : > { %v3933_v35 = vmax.f32 %v3901_v32, %v3635_v53  ;;  %4046 = vst.msk [vmem:[%s9139_s29 + $0x130] sm:$0xff] %vm2879_vm1, %v3989_v18  ;;  %v3724_v11 = vpop.f32.mrf.mxu3  ;;  %v3462_v10 = vpop.f32.mrf.mxu0 }
 0x63e   : > { %v3551_v46 = vpop.f32.mrf.mxu1  ;;  %v3871_v61 = vmax.f32 %v11755_v22, %v3462_v10  ;;  %v11765_v10 = vld [vmem:[#allocation89_spill] sm:$0xff] }
 0x63f   : > { %v3965_v13 = vmax.f32 %v3933_v35, %v3724_v11 }
 0x640   : > { %v3903_v38 = vmax.f32 %v3871_v61, %v3551_v46 }
 0x641   : > { %4401 = vmatmul.bf16.gmra.mxu2 %v9791_v29  ;;  %4018 = vmax.xlane.f32.xlu2 %v3965_v13  ;;  %v11766_v13 = vmax.f32 %v11764_v57, %v11765_v10 }
 0x642   : > { %4490 = vmatmul.bf16.gmra.mxu3 %v9791_v29 }
 0x644   : > { %v3638_v19 = vpop.f32.mrf.mxu2  ;;  %v3991_v17 = vpop.xlane.xlu0 %3990 }
 0x645   : > { %v3934_v20 = vmax.f32 %v3902_v16, %v3638_v19  ;;  %4047 = vst.msk [vmem:[%s9139_s29 + $0x138] sm:$0xff] %vm2879_vm1, %v3991_v17  ;;  %v3727_v33 = vpop.f32.mrf.mxu3  ;;  %v3465_v45 = vpop.f32.mrf.mxu0 }
 0x646   : > { %v3554_v40 = vpop.f32.mrf.mxu1  ;;  %v3872_v12 = vmax.f32 %v11758_v9, %v3465_v45  ;;  %v11768_v45 = vld [vmem:[#allocation53_spill] sm:$0xff] }
 0x647   : > { %v3966_v41 = vmax.f32 %v3934_v20, %v3727_v33 }
 0x648   : > { %4228 = vmatmul.bf16.gmra.mxu0 %v9807_v1  ;;  %v3904_v0 = vmax.f32 %v3872_v12, %v3554_v40 }
 0x649   : > { %4020 = vmax.xlane.f32.xlu0 %v3966_v41  ;;  %4317 = vmatmul.bf16.gmra.mxu1 %v9807_v1  ;;  %v11767_v41 = vld [vmem:[#allocation90_spill] sm:$0xff] }
 0x64a   : > { %v11769_v40 = vmax.f32 %v11767_v41, %v11768_v45  ;;  %v9888_v41 = vld [vmem:[#allocation2 + $0x148] sm:$0xff]  ;;  %v11804_v45 = vld [vmem:[#allocation65_spill] sm:$0xff] }
 0x64c   : > { %v3640_v26 = vpop.f32.mrf.mxu2  ;;  %v3993_v63 = vpop.xlane.xlu1 %3992 }
 0x64d   : > { %v3935_v55 = vmax.f32 %v3903_v38, %v3640_v26  ;;  %4048 = vst.msk [vmem:[%s9139_s29 + $0x140] sm:$0xff] %vm2879_vm1, %v3993_v63  ;;  %v3729_v50 = vpop.f32.mrf.mxu3  ;;  %v3467_v2 = vpop.f32.mrf.mxu0 }
 0x64e   : > { %v3556_v37 = vpop.f32.mrf.mxu1  ;;  %v3873_v3 = vmax.f32 %v11760_v25, %v3467_v2  ;;  %v9855_v2 = vld [vmem:[#allocation2 + $0x138] sm:$0xff] }
 0x64f   : > { %v3967_v28 = vmax.f32 %v3935_v55, %v3729_v50 }
 0x650   : > { %v3905_v43 = vmax.f32 %v3873_v3, %v3556_v37  ;;  %v11771_v37 = vld [vmem:[#allocation6_spill] sm:$0xff] }
 0x651   : > { %4406 = vmatmul.bf16.gmra.mxu2 %v9807_v1  ;;  %4022 = vmax.xlane.f32.xlu1 %v3967_v28  ;;  %v11770_v28 = vld [vmem:[#allocation54_spill] sm:$0xff] }
 0x652   : > { %4495 = vmatmul.bf16.gmra.mxu3 %v9807_v1 }
 0x654   : > { %v3643_v47 = vpop.f32.mrf.mxu2  ;;  %v3995_v14 = vpop.xlane.xlu2 %3994 }
 0x655   : > { %v3936_v49 = vmax.f32 %v3904_v0, %v3643_v47  ;;  %4049 = vst.msk [vmem:[%s9139_s29 + $0x148] sm:$0xff] %vm2879_vm1, %v3995_v14  ;;  %v3732_v24 = vpop.f32.mrf.mxu3  ;;  %v3470_v23 = vpop.f32.mrf.mxu0  ;;  %v11772_v0 = vmax.f32 %v11770_v28, %v11771_v37 }
 0x656   : > { %v3559_v27 = vpop.f32.mrf.mxu1  ;;  %v3874_v48 = vmax.f32 %v11763_v6, %v3470_v23 }
 0x657   : > { %v3968_v42 = vmax.f32 %v3936_v49, %v3732_v24 }
 0x658   : > { %4233 = vmatmul.bf16.gmra.mxu0 %v9823_v5  ;;  %v3906_v18 = vmax.f32 %v3874_v48, %v3559_v27  ;;  %v11773_v27 = vld [vmem:[#allocation12_spill] sm:$0xff] }
 0x659   : > { %4024 = vmax.xlane.f32.xlu2 %v3968_v42  ;;  %4322 = vmatmul.bf16.gmra.mxu1 %v9823_v5 }
 0x65c   : > { %v3645_v59 = vpop.f32.mrf.mxu2  ;;  %v3997_v4 = vpop.xlane.xlu0 %3996 }
 0x65d   : > { %v3937_v60 = vmax.f32 %v3905_v43, %v3645_v59  ;;  %4050 = vst.msk [vmem:[%s9139_s29 + $0x150] sm:$0xff] %vm2879_vm1, %v3997_v4  ;;  %v3734_v7 = vpop.f32.mrf.mxu3  ;;  %v3472_v62 = vpop.f32.mrf.mxu0  ;;  %v11774_v43 = vld [vmem:[#allocation60_spill] sm:$0xff] }
 0x65e   : > { %v3561_v53 = vpop.f32.mrf.mxu1  ;;  %v3875_v46 = vmax.f32 %v11766_v13, %v3472_v62  ;;  %v11775_v59 = vmax.f32 %v11773_v27, %v11774_v43 }
 0x65f   : > { %v3969_v32 = vmax.f32 %v3937_v60, %v3734_v7 }
 0x660   : > { %v3907_v20 = vmax.f32 %v3875_v46, %v3561_v53  ;;  %v9871_v53 = vld [vmem:[#allocation2 + $0x140] sm:$0xff] }
 0x661   : > { %4411 = vmatmul.bf16.gmra.mxu2 %v9823_v5  ;;  %4026 = vmax.xlane.f32.xlu0 %v3969_v32 }
 0x662   : > { %4500 = vmatmul.bf16.gmra.mxu3 %v9823_v5 }
 0x664   : > { %v3648_v35 = vpop.f32.mrf.mxu2  ;;  %v3999_v11 = vpop.xlane.xlu1 %3998 }
 0x665   : > { %v3938_v8 = vmax.f32 %v3906_v18, %v3648_v35  ;;  %4051 = vst.msk [vmem:[%s9139_s29 + $0x158] sm:$0xff] %vm2879_vm1, %v3999_v11  ;;  %v3737_v15 = vpop.f32.mrf.mxu3  ;;  %v3475_v19 = vpop.f32.mrf.mxu0  ;;  %v11776_v18 = vmax.f32 %v9630_v51, %v9632_v56 }
 0x666   : > { %v3564_v17 = vpop.f32.mrf.mxu1  ;;  %v3876_v38 = vmax.f32 %v11769_v40, %v3475_v19 }
 0x667   : > { %v3970_v16 = vmax.f32 %v3938_v8, %v3737_v15 }
 0x668   : > { %4238 = vmatmul.bf16.gmra.mxu0 %v9839_v34  ;;  %v3908_v50 = vmax.f32 %v3876_v38, %v3564_v17 }
 0x669   : > { %4028 = vmax.xlane.f32.xlu1 %v3970_v16  ;;  %4327 = vmatmul.bf16.gmra.mxu1 %v9839_v34 }
 0x66c   : > { %v3650_v33 = vpop.f32.mrf.mxu2  ;;  %v4001_v39 = vpop.xlane.xlu2 %4000 }
 0x66d   : > { %v3939_v22 = vmax.f32 %v3907_v20, %v3650_v33  ;;  %4052 = vst.msk [vmem:[%s9139_s29 + $0x160] sm:$0xff] %vm2879_vm1, %v4001_v39  ;;  %v3739_v61 = vpop.f32.mrf.mxu3  ;;  %v3477_v26 = vpop.f32.mrf.mxu0 }
 0x66e   : > { %v3566_v55 = vpop.f32.mrf.mxu1  ;;  %v3877_v47 = vmax.f32 %v11772_v0, %v3477_v26 }
 0x66f   : > { %v3971_v63 = vmax.f32 %v3939_v22, %v3739_v61 }
 0x670   : > { %v3909_v52 = vmax.f32 %v3877_v47, %v3566_v55 }
 0x671   : > { %4416 = vmatmul.bf16.gmra.mxu2 %v9839_v34  ;;  %4030 = vmax.xlane.f32.xlu2 %v3971_v63 }
 0x672   : > { %4505 = vmatmul.bf16.gmra.mxu3 %v9839_v34 }
 0x674   : > { %v3653_v21 = vpop.f32.mrf.mxu2  ;;  %v4003_v54 = vpop.xlane.xlu0 %4002 }
 0x675   : > { %v3940_v9 = vmax.f32 %v3908_v50, %v3653_v21  ;;  %4053 = vst.msk [vmem:[%s9139_s29 + $0x168] sm:$0xff] %vm2879_vm1, %v4003_v54  ;;  %v3742_v12 = vpop.f32.mrf.mxu3  ;;  %v3480_v49 = vpop.f32.mrf.mxu0 }
 0x676   : > { %v3569_v24 = vpop.f32.mrf.mxu1  ;;  %v3878_v4 = vmax.f32 %v11775_v59, %v3480_v49  ;;  %v9910_v49 = vld [vmem:[#allocation2 + $0x150] sm:$0xff]  ;;  %v11786_v59 = vld [vmem:[#allocation77_spill] sm:$0xff] }
 0x677   : > { %v3972_v14 = vmax.f32 %v3940_v9, %v3742_v12 }
 0x678   : > { %4243 = vmatmul.bf16.gmra.mxu0 %v9855_v2  ;;  %v3910_v44 = vmax.f32 %v3878_v4, %v3569_v24 }
 0x679   : > { %4032 = vmax.xlane.f32.xlu0 %v3972_v14  ;;  %4332 = vmatmul.bf16.gmra.mxu1 %v9855_v2 }
 0x67c   : > { %v3655_v25 = vpop.f32.mrf.mxu2  ;;  %v4005_v3 = vpop.xlane.xlu1 %4004 }
 0x67d   : > { %v3941_v42 = vmax.f32 %v3909_v52, %v3655_v25  ;;  %4054 = vst.msk [vmem:[%s9139_s29 + $0x170] sm:$0xff] %vm2879_vm1, %v4005_v3  ;;  %v3744_v23 = vpop.f32.mrf.mxu3  ;;  %v3482_v60 = vpop.f32.mrf.mxu0 }
 0x67e   : > { %v3571_v58 = vpop.f32.mrf.mxu1  ;;  %v3879_v35 = vmax.f32 %v11776_v18, %v3482_v60 }
 0x67f   : > { %v3973_v7 = vmax.f32 %v3941_v42, %v3744_v23 }
 0x680   : > { %v3911_v10 = vmax.f32 %v3879_v35, %v3571_v58 }
 0x681   : > { %4421 = vmatmul.bf16.gmra.mxu2 %v9855_v2  ;;  %4034 = vmax.xlane.f32.xlu1 %v3973_v7 }
 0x682   : > { %4510 = vmatmul.bf16.gmra.mxu3 %v9855_v2 }
 0x684   : > { %v3658_v6 = vpop.f32.mrf.mxu2  ;;  %v4007_v48 = vpop.xlane.xlu2 %4006 }
 0x685   : > { %v3942_v62 = vmax.f32 %v3910_v44, %v3658_v6  ;;  %4055 = vst.msk [vmem:[%s9139_s29 + $0x178] sm:$0xff] %vm2879_vm1, %v4007_v48  ;;  %v3747_v32 = vpop.f32.mrf.mxu3  ;;  %v4209_v8 = vpop.f32.mrf.mxu0 }
 0x686   : > { %v4298_v15 = vpop.f32.mrf.mxu1 }
 0x687   : > { %v3974_v11 = vmax.f32 %v3942_v62, %v3747_v32  ;;  %v4912_v57 = vmax.f32 %v4209_v8, %v4298_v15  ;;  %v9932_v62 = vld [vmem:[#allocation2 + $0x158] sm:$0xff] }
 0x688   : > { %4248 = vmatmul.bf16.gmra.mxu0 %v9871_v53 }
 0x689   : > { %4036 = vmax.xlane.f32.xlu2 %v3974_v11  ;;  %4337 = vmatmul.bf16.gmra.mxu1 %v9871_v53 }
 0x68c   : > { %v3660_v13 = vpop.f32.mrf.mxu2  ;;  %v4009_v46 = vpop.xlane.xlu0 %4008 }
 0x68d   : > { %v3943_v16 = vmax.f32 %v3911_v10, %v3660_v13  ;;  %4056 = vst.msk [vmem:[%s9139_s29 + $0x180] sm:$0xff] %vm2879_vm1, %v4009_v46  ;;  %v3749_v19 = vpop.f32.mrf.mxu3  ;;  %v4211_v17 = vpop.f32.mrf.mxu0 }
 0x68e   : > { %v4300_v56 = vpop.f32.mrf.mxu1 }
 0x68f   : > { %v3975_v51 = vmax.f32 %v3943_v16, %v3749_v19  ;;  %v4913_v20 = vmax.f32 %v4211_v17, %v4300_v56 }
 0x691   : > { %4426 = vmatmul.bf16.gmra.mxu2 %v9871_v53  ;;  %4038 = vmax.xlane.f32.xlu0 %v3975_v51 }
 0x692   : > { %4515 = vmatmul.bf16.gmra.mxu3 %v9871_v53 }
 0x694   : > { %v4387_v33 = vpop.f32.mrf.mxu2  ;;  %v4011_v39 = vpop.xlane.xlu1 %4010 }
 0x695   : > { %v9882_v22 = vmax.f32 %v4912_v57, %v4387_v33  ;;  %4057 = vst.msk [vmem:[%s9139_s29 + $0x188] sm:$0xff] %vm2879_vm1, %v4011_v39  ;;  %v9886_v61 = vpop.f32.mrf.mxu3  ;;  %v4214_v40 = vpop.f32.mrf.mxu0  ;;  %v9954_v33 = vld [vmem:[#allocation2 + $0x160] sm:$0xff] }
 0x696   : > { %v4303_v38 = vpop.f32.mrf.mxu1 }
 0x697   : > { %v4914_v26 = vmax.f32 %v4214_v40, %v4303_v38 }
 0x698   : > { %4253 = vmatmul.bf16.gmra.mxu0 %v9888_v41 }
 0x699   : > { %4342 = vmatmul.bf16.gmra.mxu1 %v9888_v41 }
 0x69c   : > { %v4389_v63 = vpop.f32.mrf.mxu2  ;;  %v4013_v55 = vpop.xlane.xlu2 %4012 }
 0x69d   : > { %v9894_v50 = vmax.f32 %v4913_v20, %v4389_v63  ;;  %4058 = vst.msk [vmem:[%s9139_s29 + $0x190] sm:$0xff] %vm2879_vm1, %v4013_v55  ;;  %v9898_v21 = vpop.f32.mrf.mxu3  ;;  %v4216_v9 = vpop.f32.mrf.mxu0 }
 0x69e   : > { %v4305_v12 = vpop.f32.mrf.mxu1 }
 0x69f   : > { %v4915_v28 = vmax.f32 %v4216_v9, %v4305_v12 }
 0x6a1   : > { %4431 = vmatmul.bf16.gmra.mxu2 %v9888_v41 }
 0x6a2   : > { %4520 = vmatmul.bf16.gmra.mxu3 %v9888_v41 }
 0x6a4   : > { %v4392_v37 = vpop.f32.mrf.mxu2  ;;  %v4015_v0 = vpop.xlane.xlu0 %4014 }
 0x6a5   : > { %v9904_v47 = vmax.f32 %v4914_v26, %v4392_v37  ;;  %4059 = vst.msk [vmem:[%s9139_s29 + $0x198] sm:$0xff] %vm2879_vm1, %v4015_v0  ;;  %v9908_v14 = vpop.f32.mrf.mxu3  ;;  %v4219_v52 = vpop.f32.mrf.mxu0 }
 0x6a6   : > { %v4308_v25 = vpop.f32.mrf.mxu1 }
 0x6a7   : > { %v4916_v3 = vmax.f32 %v4219_v52, %v4308_v25 }
 0x6a8   : > { %4258 = vmatmul.bf16.gmra.mxu0 %v9910_v49 }
 0x6a9   : > { %4347 = vmatmul.bf16.gmra.mxu1 %v9910_v49 }
 0x6ac   : > { %v4394_v42 = vpop.f32.mrf.mxu2  ;;  %v4017_v23 = vpop.xlane.xlu1 %4016 }
 0x6ad   : > { %v9916_v27 = vmax.f32 %v4915_v28, %v4394_v42  ;;  %4060 = vst.msk [vmem:[%s9139_s29 + $0x1a0] sm:$0xff] %vm2879_vm1, %v4017_v23  ;;  %v9920_v43 = vpop.f32.mrf.mxu3  ;;  %v4221_v4 = vpop.f32.mrf.mxu0 }
 0x6ae   : > { %v4310_v60 = vpop.f32.mrf.mxu1 }
 0x6af   : > { %v4917_v7 = vmax.f32 %v4221_v4, %v4310_v60  ;;  %v9976_v4 = vld [vmem:[#allocation2 + $0x168] sm:$0xff] }
 0x6b1   : > { %4436 = vmatmul.bf16.gmra.mxu2 %v9910_v49 }
 0x6b2   : > { %4525 = vmatmul.bf16.gmra.mxu3 %v9910_v49 }
 0x6b4   : > { %v4397_v58 = vpop.f32.mrf.mxu2  ;;  %v4019_v44 = vpop.xlane.xlu2 %4018 }
 0x6b5   : > { %v9926_v6 = vmax.f32 %v4916_v3, %v4397_v58  ;;  %4061 = vst.msk [vmem:[%s9139_s29 + $0x1a8] sm:$0xff] %vm2879_vm1, %v4019_v44  ;;  %v9930_v48 = vpop.f32.mrf.mxu3  ;;  %v4224_v18 = vpop.f32.mrf.mxu0 }
 0x6b6   : > { %v4313_v35 = vpop.f32.mrf.mxu1 }
 0x6b7   : > { %v4918_v11 = vmax.f32 %v4224_v18, %v4313_v35 }
 0x6b8   : > { %4263 = vmatmul.bf16.gmra.mxu0 %v9932_v62 }
 0x6b9   : > { %4352 = vmatmul.bf16.gmra.mxu1 %v9932_v62 }
 0x6bc   : > { %v4399_v8 = vpop.f32.mrf.mxu2  ;;  %v4021_v15 = vpop.xlane.xlu0 %4020 }
 0x6bd   : > { %v9938_v57 = vmax.f32 %v4917_v7, %v4399_v8  ;;  %4062 = vst.msk [vmem:[%s9139_s29 + $0x1b0] sm:$0xff] %vm2879_vm1, %v4021_v15  ;;  %v9942_v10 = vpop.f32.mrf.mxu3  ;;  %v4226_v46 = vpop.f32.mrf.mxu0 }
 0x6be   : > { %v4315_v16 = vpop.f32.mrf.mxu1 }
 0x6bf   : > { %v4919_v19 = vmax.f32 %v4226_v46, %v4315_v16 }
 0x6c1   : > { %4441 = vmatmul.bf16.gmra.mxu2 %v9932_v62 }
 0x6c2   : > { %4530 = vmatmul.bf16.gmra.mxu3 %v9932_v62 }
 0x6c4   : > { %v4402_v17 = vpop.f32.mrf.mxu2  ;;  %v4023_v51 = vpop.xlane.xlu1 %4022 }
 0x6c5   : > { %v9948_v56 = vmax.f32 %v4918_v11, %v4402_v17  ;;  %4063 = vst.msk [vmem:[%s9139_s29 + $0x1b8] sm:$0xff] %vm2879_vm1, %v4023_v51  ;;  %v9952_v20 = vpop.f32.mrf.mxu3  ;;  %v4229_v40 = vpop.f32.mrf.mxu0 }
 0x6c6   : > { %v4318_v38 = vpop.f32.mrf.mxu1 }
 0x6c7   : > { %v4920_v26 = vmax.f32 %v4229_v40, %v4318_v38 }
 0x6c8   : > { %4268 = vmatmul.bf16.gmra.mxu0 %v9954_v33 }
 0x6c9   : > { %4357 = vmatmul.bf16.gmra.mxu1 %v9954_v33 }
 0x6cc   : > { %v4404_v63 = vpop.f32.mrf.mxu2  ;;  %v4025_v55 = vpop.xlane.xlu2 %4024 }
 0x6cd   : > { %v9960_v9 = vmax.f32 %v4919_v19, %v4404_v63  ;;  %4064 = vst.msk [vmem:[%s9139_s29 + $0x1c0] sm:$0xff] %vm2879_vm1, %v4025_v55  ;;  %v9964_v12 = vpop.f32.mrf.mxu3  ;;  %v4231_v37 = vpop.f32.mrf.mxu0 }
 0x6ce   : > { %v4320_v0 = vpop.f32.mrf.mxu1 }
 0x6cf   : > { %v4921_v52 = vmax.f32 %v4231_v37, %v4320_v0 }
 0x6d1   : > { %4446 = vmatmul.bf16.gmra.mxu2 %v9954_v33 }
 0x6d2   : > { %4535 = vmatmul.bf16.gmra.mxu3 %v9954_v33 }
 0x6d4   : > { %v4407_v25 = vpop.f32.mrf.mxu2  ;;  %v4027_v3 = vpop.xlane.xlu0 %4026 }
 0x6d5   : > { %v9970_v42 = vmax.f32 %v4920_v26, %v4407_v25  ;;  %4065 = vst.msk [vmem:[%s9139_s29 + $0x1c8] sm:$0xff] %vm2879_vm1, %v4027_v3  ;;  %v9974_v23 = vpop.f32.mrf.mxu3  ;;  %v4234_v7 = vpop.f32.mrf.mxu0  ;;  %v9998_v26 = vld [vmem:[#allocation2 + $0x170] sm:$0xff] }
 0x6d6   : > { %v4323_v58 = vpop.f32.mrf.mxu1 }
 0x6d7   : > { %v4922_v44 = vmax.f32 %v4234_v7, %v4323_v58 }
 0x6d8   : > { %4273 = vmatmul.bf16.gmra.mxu0 %v9976_v4 }
 0x6d9   : > { %4362 = vmatmul.bf16.gmra.mxu1 %v9976_v4 }
 0x6dc   : > { %v4409_v18 = vpop.f32.mrf.mxu2  ;;  %v4029_v35 = vpop.xlane.xlu1 %4028 }
 0x6dd   : > { %v9982_v11 = vmax.f32 %v4921_v52, %v4409_v18  ;;  %4066 = vst.msk [vmem:[%s9139_s29 + $0x1d0] sm:$0xff] %vm2879_vm1, %v4029_v35  ;;  %v9986_v8 = vpop.f32.mrf.mxu3  ;;  %v4236_v46 = vpop.f32.mrf.mxu0 }
 0x6de   : > { %v4325_v16 = vpop.f32.mrf.mxu1 }
 0x6df   : > { %v4923_v19 = vmax.f32 %v4236_v46, %v4325_v16 }
 0x6e1   : > { %4451 = vmatmul.bf16.gmra.mxu2 %v9976_v4 }
 0x6e2   : > { %4540 = vmatmul.bf16.gmra.mxu3 %v9976_v4 }
 0x6e4   : > { %v4412_v17 = vpop.f32.mrf.mxu2  ;;  %v4031_v51 = vpop.xlane.xlu2 %4030 }
 0x6e5   : > { %v9992_v40 = vmax.f32 %v4922_v44, %v4412_v17  ;;  %4067 = vst.msk [vmem:[%s9139_s29 + $0x1d8] sm:$0xff] %vm2879_vm1, %v4031_v51  ;;  %v9996_v38 = vpop.f32.mrf.mxu3  ;;  %v4239_v55 = vpop.f32.mrf.mxu0  ;;  %v10020_v51 = vld [vmem:[#allocation2 + $0x178] sm:$0xff] }
 0x6e6   : > { %v4328_v37 = vpop.f32.mrf.mxu1 }
 0x6e7   : > { %v4924_v0 = vmax.f32 %v4239_v55, %v4328_v37 }
 0x6e8   : > { %4278 = vmatmul.bf16.gmra.mxu0 %v9998_v26 }
 0x6e9   : > { %4367 = vmatmul.bf16.gmra.mxu1 %v9998_v26 }
 0x6ec   : > { %v4414_v52 = vpop.f32.mrf.mxu2  ;;  %v4033_v25 = vpop.xlane.xlu0 %4032 }
 0x6ed   : > { %v10004_v3 = vmax.f32 %v4923_v19, %v4414_v52  ;;  %4068 = vst.msk [vmem:[%s9139_s29 + $0x1e0] sm:$0xff] %vm2879_vm1, %v4033_v25  ;;  %v10008_v7 = vpop.f32.mrf.mxu3  ;;  %v4241_v44 = vpop.f32.mrf.mxu0 }
 0x6ee   : > { %v4330_v18 = vpop.f32.mrf.mxu1 }
 0x6ef   : > { %v4925_v35 = vmax.f32 %v4241_v44, %v4330_v18 }
 0x6f1   : > { %4456 = vmatmul.bf16.gmra.mxu2 %v9998_v26 }
 0x6f2   : > { %4545 = vmatmul.bf16.gmra.mxu3 %v9998_v26 }
 0x6f4   : > { %v4417_v46 = vpop.f32.mrf.mxu2  ;;  %v4035_v16 = vpop.xlane.xlu1 %4034 }
 0x6f5   : > { %v10014_v17 = vmax.f32 %v4924_v0, %v4417_v46  ;;  %4069 = vst.msk [vmem:[%s9139_s29 + $0x1e8] sm:$0xff] %vm2879_vm1, %v4035_v16  ;;  %v10018_v19 = vpop.f32.mrf.mxu3  ;;  %v4244_v37 = vpop.f32.mrf.mxu0 }
 0x6f6   : > { %v4333_v52 = vpop.f32.mrf.mxu1 }
 0x6f7   : > { %v4926_v25 = vmax.f32 %v4244_v37, %v4333_v52 }
 0x6f8   : > { %4283 = vmatmul.bf16.gmra.mxu0 %v10020_v51 }
 0x6f9   : > { %4372 = vmatmul.bf16.gmra.mxu1 %v10020_v51 }
 0x6fc   : > { %v4419_v44 = vpop.f32.mrf.mxu2  ;;  %v4037_v0 = vpop.xlane.xlu2 %4036 }
 0x6fd   : > { %v10026_v18 = vmax.f32 %v4925_v35, %v4419_v44  ;;  %4070 = vst.msk [vmem:[%s9139_s29 + $0x1f0] sm:$0xff] %vm2879_vm1, %v4037_v0  ;;  %v10030_v46 = vpop.f32.mrf.mxu3  ;;  %v4246_v55 = vpop.f32.mrf.mxu0  ;;  %v11779_v44 = vld [vmem:[#allocation69_spill] sm:$0xff] }
 0x6fe   : > { %v4335_v58 = vpop.f32.mrf.mxu1 }
 0x6ff   : > { %v4927_v37 = vmax.f32 %v4246_v55, %v4335_v58  ;;  %v11777_v58 = vld [vmem:[#allocation29_spill] sm:$0xff]  ;;  %v11778_v55 = vld [vmem:[#allocation30_spill] sm:$0xff] }
 0x701   : > { %4461 = vmatmul.bf16.gmra.mxu2 %v10020_v51 }
 0x702   : > { %4550 = vmatmul.bf16.gmra.mxu3 %v10020_v51 }
 0x704   : > { %v4422_v52 = vpop.f32.mrf.mxu2  ;;  %v4039_v63 = vpop.xlane.xlu0 %4038 }
 0x705   : > { %v10036_v15 = vmax.f32 %v4926_v25, %v4422_v52  ;;  %4071 = vst.msk [vmem:[%s9139_s29 + $0x1f8] sm:$0xff] %vm2879_vm1, %v4039_v63  ;;  %v10040_v35 = vpop.f32.mrf.mxu3  ;;  %v4249_v0 = vpop.f32.mrf.mxu0 }
 0x706   : > { %v4338_v16 = vpop.f32.mrf.mxu1 }
 0x707   : > { %v4928_v60 = vmax.f32 %v4249_v0, %v4338_v16  ;;  %v11780_v16 = vld [vmem:[#allocation70_spill] sm:$0xff] }
 0x708   : > { %4564 = vmatmul.bf16.vlgmr.msrb.gmra.mxu0 %v9711_v30 }
 0x709   : > { %4653 = vmatmul.bf16.vlgmr.msrb.gmra.mxu1 %v9711_v30  ;;  %5716 = vmatpush.bf16.msrb.mxu0 %v11777_v58  ;;  %v11781_v58 = vld [vmem:[#allocation71_spill] sm:$0xff] }
 0x70a   : > { %5805 = vmatpush.bf16.msrb.mxu1 %v11778_v55  ;;  %v11783_v55 = vld [vmem:[#allocation72_spill] sm:$0xff] }
 0x70c   : > { %v4424_v25 = vpop.f32.mrf.mxu2 }
 0x70d   : > { %v10048_v52 = vmax.f32 %v4927_v37, %v4424_v25  ;;  %v10050_v63 = vpop.f32.mrf.mxu3  ;;  %5717 = vmatpush.bf16.msrb.mxu0 %v11779_v44  ;;  %v4251_v39 = vpop.f32.mrf.mxu0  ;;  %v11782_v37 = vld [vmem:[#allocation73_spill] sm:$0xff]  ;;  %v11784_v25 = vld [vmem:[#allocation74_spill] sm:$0xff] }
 0x70e   : > { %5806 = vmatpush.bf16.msrb.mxu1 %v11780_v16  ;;  %v4340_v0 = vpop.f32.mrf.mxu1  ;;  %v11785_v16 = vld [vmem:[#allocation75_spill] sm:$0xff] }
 0x70f   : > { %v4929_v13 = vmax.f32 %v4251_v39, %v4340_v0  ;;  %v11787_v39 = vld [vmem:[#allocation76_spill] sm:$0xff] }
 0x711   : > { %4742 = vmatmul.bf16.vlgmr.msrb.gmra.mxu2 %v9711_v30  ;;  %5718 = vmatpush.bf16.msrb.mxu0 %v11783_v55 }
 0x712   : > { %4831 = vmatmul.bf16.vlgmr.msrb.gmra.mxu3 %v9711_v30  ;;  %5894 = vmatpush.bf16.msrb.mxu2 %v11781_v58  ;;  %v11788_v58 = vld [vmem:[#allocation78_spill] sm:$0xff]  ;;  %v11798_v30 = vld [vmem:[#allocation28_spill] sm:$0xff] }
 0x713   : > { %5983 = vmatpush.bf16.msrb.mxu3 %v11782_v37  ;;  %5807 = vmatpush.bf16.msrb.mxu1 %v11784_v25  ;;  %v11789_v25 = vld [vmem:[#allocation79_spill] sm:$0xff] }
 0x714   : > { %v4427_v28 = vpop.f32.mrf.mxu2 }
 0x715   : > { %v10062_v32 = vmax.f32 %v4928_v60, %v4427_v28  ;;  %v10064_v44 = vpop.f32.mrf.mxu3  ;;  %5719 = vmatpush.bf16.msrb.mxu0 %v11787_v39  ;;  %v4254_v0 = vpop.f32.mrf.mxu0  ;;  %v11790_v28 = vld [vmem:[#allocation80_spill] sm:$0xff]  ;;  %v11791_v60 = vld [vmem:[#allocation81_spill] sm:$0xff] }
 0x716   : > { %5895 = vmatpush.bf16.msrb.mxu2 %v11785_v16  ;;  %v4343_v37 = vpop.f32.mrf.mxu1  ;;  %v11792_v16 = vld [vmem:[#allocation82_spill] sm:$0xff] }
 0x717   : > { %5984 = vmatpush.bf16.msrb.mxu3 %v11786_v59  ;;  %5808 = vmatpush.bf16.msrb.mxu1 %v11788_v58  ;;  %v4930_v55 = vmax.f32 %v4254_v0, %v4343_v37  ;;  %v11793_v58 = vld [vmem:[#allocation59_spill] sm:$0xff]  ;;  %v11794_v0 = vld [vmem:[#allocation68_spill] sm:$0xff] }
 0x718   : > { %4569 = vmatmul.bf16.gmra.mxu0 %v9736_v36 }
 0x719   : > { %5720 = vmatpush.bf16.msrb.mxu0 %v11791_v60  ;;  %4658 = vmatmul.bf16.gmra.mxu1 %v9736_v36  ;;  %v11796_v60 = vld [vmem:[#allocation27_spill] sm:$0xff] }
 0x71a   : > { %5896 = vmatpush.bf16.msrb.mxu2 %v11789_v25  ;;  %v11795_v25 = vld [vmem:[#allocation32_spill] sm:$0xff] }
 0x71b   : > { %5985 = vmatpush.bf16.msrb.mxu3 %v11790_v28  ;;  %5809 = vmatpush.bf16.msrb.mxu1 %v11792_v16 }
 0x71c   : > { %v4429_v59 = vpop.f32.mrf.mxu2 }
 0x71d   : > { %v10077_v24 = vmax.f32 %v4929_v13, %v4429_v59  ;;  %v10080_v39 = vpop.f32.mrf.mxu3  ;;  %5721 = vmatpush.bf16.msrb.mxu0 %v11795_v25  ;;  %v4256_v28 = vpop.f32.mrf.mxu0  ;;  %v11797_v59 = vld [vmem:[#allocation67_spill] sm:$0xff] }
 0x71e   : > { %5897 = vmatpush.bf16.msrb.mxu2 %v11793_v58  ;;  %v4345_v16 = vpop.f32.mrf.mxu1  ;;  %v11799_v58 = vld [vmem:[#allocation19_spill] sm:$0xff] }
 0x71f   : > { %5986 = vmatpush.bf16.msrb.mxu3 %v11794_v0  ;;  %5810 = vmatpush.bf16.msrb.mxu1 %v11796_v60  ;;  %v4931_v13 = vmax.f32 %v4256_v28, %v4345_v16  ;;  %v11800_v0 = vld [vmem:[#allocation17_spill] sm:$0xff]  ;;  %v11803_v60 = vld [vmem:[#allocation63_spill] sm:$0xff]  ;;  %v11805_v16 = vld [vmem:[#allocation14_spill] sm:$0xff] }
 0x720   : > { %v11810_v28 = vld [vmem:[#allocation64_spill] sm:$0xff] }
 0x721   : > { %4747 = vmatmul.bf16.gmra.mxu2 %v9736_v36  ;;  %5722 = vmatpush.bf16.msrb.mxu0 %v11799_v58 }
 0x722   : > { %5898 = vmatpush.bf16.msrb.mxu2 %v11797_v59  ;;  %4836 = vmatmul.bf16.gmra.mxu3 %v9736_v36 }
 0x723   : > { %5987 = vmatpush.bf16.msrb.mxu3 %v11798_v30  ;;  %5811 = vmatpush.bf16.msrb.mxu1 %v11800_v0  ;;  %v11806_v30 = vld [vmem:[#allocation66_spill] sm:$0xff] }
 0x724   : > { %v4432_v37 = vpop.f32.mrf.mxu2  ;;  %v11807_v0 = vld [vmem:[#allocation26_spill] sm:$0xff] }
 0x725   : > { %v10094_v54 = vmax.f32 %v4930_v55, %v4432_v37  ;;  %v10096_v25 = vpop.f32.mrf.mxu3  ;;  %5723 = vmatpush.bf16.msrb.mxu0 %v11805_v16  ;;  %v4259_v36 = vpop.f32.mrf.mxu0  ;;  %v11808_v55 = vld [vmem:[#allocation7_spill] sm:$0xff]  ;;  %v11811_v16 = vld [vmem:[#allocation8_spill] sm:$0xff] }
 0x726   : > { %11802 = vst [vmem:[#allocation42_spill] sm:$0xff] %v10096_v25  ;;  %5899 = vmatpush.bf16.msrb.mxu2 %v11803_v60  ;;  %v4348_v59 = vpop.f32.mrf.mxu1 }
 0x727   : > { %11801 = vst [vmem:[#allocation57_spill] sm:$0xff] %v10094_v54  ;;  %5988 = vmatpush.bf16.msrb.mxu3 %v11804_v45  ;;  %5812 = vmatpush.bf16.msrb.mxu1 %v11806_v30  ;;  %v4932_v58 = vmax.f32 %v4259_v36, %v4348_v59 }
 0x728   : > { %4574 = vmatmul.bf16.gmra.mxu0 %v9768_v31 }
 0x729   : > { %4663 = vmatmul.bf16.gmra.mxu1 %v9768_v31 }
 0x72a   : > { %5900 = vmatpush.bf16.msrb.mxu2 %v11807_v0 }
 0x72b   : > { %5989 = vmatpush.bf16.msrb.mxu3 %v11808_v55 }
 0x72c   : > { %v4434_v37 = vpop.f32.mrf.mxu2 }
 0x72d   : > { %v10107_v60 = vmax.f32 %v4931_v13, %v4434_v37  ;;  %v10110_v45 = vpop.f32.mrf.mxu3  ;;  %v4261_v30 = vpop.f32.mrf.mxu0 }
 0x72e   : > { %11809 = vst [vmem:[#allocation49_spill] sm:$0xff] %v10110_v45  ;;  %5901 = vmatpush.bf16.msrb.mxu2 %v11810_v28  ;;  %v4350_v59 = vpop.f32.mrf.mxu1 }
 0x72f   : > { %5990 = vmatpush.bf16.msrb.mxu3 %v11811_v16  ;;  %v4933_v0 = vmax.f32 %v4261_v30, %v4350_v59 }
 0x731   : > { %4752 = vmatmul.bf16.gmra.mxu2 %v9768_v31 }
 0x732   : > { %4841 = vmatmul.bf16.gmra.mxu3 %v9768_v31 }
 0x734   : > { %v4437_v13 = vpop.f32.mrf.mxu2 }
 0x735   : > { %v10118_v55 = vmax.f32 %v4932_v58, %v4437_v13  ;;  %v10120_v37 = vpop.f32.mrf.mxu3  ;;  %v4264_v25 = vpop.f32.mrf.mxu0 }
 0x736   : > { %11813 = vst [vmem:[#allocation56_spill] sm:$0xff] %v10120_v37  ;;  %v4353_v16 = vpop.f32.mrf.mxu1 }
 0x737   : > { %11812 = vst [vmem:[#allocation55_spill] sm:$0xff] %v10118_v55  ;;  %v4934_v54 = vmax.f32 %v4264_v25, %v4353_v16 }
 0x738   : > { %4579 = vmatmul.bf16.gmra.mxu0 %v9791_v29 }
 0x739   : > { %4668 = vmatmul.bf16.gmra.mxu1 %v9791_v29 }
 0x73c   : > { %v4439_v36 = vpop.f32.mrf.mxu2 }
 0x73d   : > { %v10125_v45 = vmax.f32 %v4933_v0, %v4439_v36  ;;  %v10128_v30 = vpop.f32.mrf.mxu3  ;;  %v4266_v58 = vpop.f32.mrf.mxu0 }
 0x73e   : > { %11814 = vst [vmem:[#allocation50_spill] sm:$0xff] %v10128_v30  ;;  %v4355_v59 = vpop.f32.mrf.mxu1 }
 0x73f   : > { %v4935_v13 = vmax.f32 %v4266_v58, %v4355_v59 }
 0x741   : > { %4757 = vmatmul.bf16.gmra.mxu2 %v9791_v29 }
 0x742   : > { %4846 = vmatmul.bf16.gmra.mxu3 %v9791_v29 }
 0x744   : > { %v4442_v25 = vpop.f32.mrf.mxu2 }
 0x745   : > { %v10134_v16 = vmax.f32 %v4934_v54, %v4442_v25  ;;  %v10136_v28 = vpop.f32.mrf.mxu3  ;;  %v4269_v0 = vpop.f32.mrf.mxu0 }
 0x746   : > { %11816 = vst [vmem:[#allocation9_spill] sm:$0xff] %v10136_v28  ;;  %v4358_v37 = vpop.f32.mrf.mxu1 }
 0x747   : > { %11815 = vst [vmem:[#allocation11_spill] sm:$0xff] %v10134_v16  ;;  %v4936_v55 = vmax.f32 %v4269_v0, %v4358_v37 }
 0x748   : > { %4584 = vmatmul.bf16.gmra.mxu0 %v9807_v1 }
 0x749   : > { %4673 = vmatmul.bf16.gmra.mxu1 %v9807_v1 }
 0x74c   : > { %v4444_v31 = vpop.f32.mrf.mxu2 }
 0x74d   : > { %v10141_v30 = vmax.f32 %v4935_v13, %v4444_v31  ;;  %v10144_v58 = vpop.f32.mrf.mxu3  ;;  %v4271_v54 = vpop.f32.mrf.mxu0 }
 0x74e   : > { %11817 = vst [vmem:[#allocation33_spill] sm:$0xff] %v10144_v58  ;;  %v4360_v59 = vpop.f32.mrf.mxu1 }
 0x74f   : > { %v4937_v25 = vmax.f32 %v4271_v54, %v4360_v59 }
 0x751   : > { %4762 = vmatmul.bf16.gmra.mxu2 %v9807_v1 }
 0x752   : > { %4851 = vmatmul.bf16.gmra.mxu3 %v9807_v1 }
 0x754   : > { %v4447_v37 = vpop.f32.mrf.mxu2 }
 0x755   : > { %v10150_v0 = vmax.f32 %v4936_v55, %v4447_v37  ;;  %v10152_v36 = vpop.f32.mrf.mxu3  ;;  %v4274_v13 = vpop.f32.mrf.mxu0 }
 0x756   : > { %11819 = vst [vmem:[#allocation58_spill] sm:$0xff] %v10152_v36  ;;  %v4363_v28 = vpop.f32.mrf.mxu1 }
 0x757   : > { %11818 = vst [vmem:[#allocation5_spill] sm:$0xff] %v10150_v0  ;;  %v4938_v16 = vmax.f32 %v4274_v13, %v4363_v28 }
 0x758   : > { %4589 = vmatmul.bf16.gmra.mxu0 %v9823_v5 }
 0x759   : > { %4678 = vmatmul.bf16.gmra.mxu1 %v9823_v5 }
 0x75c   : > { %v4449_v29 = vpop.f32.mrf.mxu2 }
 0x75d   : > { %v10157_v58 = vmax.f32 %v4937_v25, %v4449_v29  ;;  %v10160_v54 = vpop.f32.mrf.mxu3  ;;  %v4276_v55 = vpop.f32.mrf.mxu0 }
 0x75e   : > { %11820 = vst [vmem:[#allocation31_spill] sm:$0xff] %v10160_v54  ;;  %v4365_v59 = vpop.f32.mrf.mxu1 }
 0x75f   : > { %v4939_v37 = vmax.f32 %v4276_v55, %v4365_v59 }
 0x761   : > { %4767 = vmatmul.bf16.gmra.mxu2 %v9823_v5 }
 0x762   : > { %4856 = vmatmul.bf16.gmra.mxu3 %v9823_v5 }
 0x764   : > { %v4452_v28 = vpop.f32.mrf.mxu2 }
 0x765   : > { %v10166_v13 = vmax.f32 %v4938_v16, %v4452_v28  ;;  %v10168_v31 = vpop.f32.mrf.mxu3  ;;  %v4279_v25 = vpop.f32.mrf.mxu0 }
 0x766   : > { %11822 = vst [vmem:[#allocation41_spill] sm:$0xff] %v10168_v31  ;;  %v4368_v36 = vpop.f32.mrf.mxu1 }
 0x767   : > { %11821 = vst [vmem:[#allocation47_spill] sm:$0xff] %v10166_v13  ;;  %v4940_v0 = vmax.f32 %v4279_v25, %v4368_v36 }
 0x768   : > { %4594 = vmatmul.bf16.gmra.mxu0 %v9839_v34 }
 0x769   : > { %4683 = vmatmul.bf16.gmra.mxu1 %v9839_v34 }
 0x76c   : > { %v4454_v1 = vpop.f32.mrf.mxu2 }
 0x76d   : > { %v10173_v54 = vmax.f32 %v4939_v37, %v4454_v1  ;;  %v10176_v55 = vpop.f32.mrf.mxu3  ;;  %v4281_v16 = vpop.f32.mrf.mxu0 }
 0x76e   : > { %11824 = vst [vmem:[#allocation43_spill] sm:$0xff] %v10176_v55  ;;  %v4370_v59 = vpop.f32.mrf.mxu1 }
 0x76f   : > { %11823 = vst [vmem:[#allocation25_spill] sm:$0xff] %v10173_v54  ;;  %v4941_v28 = vmax.f32 %v4281_v16, %v4370_v59 }
 0x771   : > { %4772 = vmatmul.bf16.gmra.mxu2 %v9839_v34 }
 0x772   : > { %4861 = vmatmul.bf16.gmra.mxu3 %v9839_v34 }
 0x774   : > { %v4457_v36 = vpop.f32.mrf.mxu2 }
 0x775   : > { %v10182_v25 = vmax.f32 %v4940_v0, %v4457_v36  ;;  %v10184_v29 = vpop.f32.mrf.mxu3  ;;  %v4284_v37 = vpop.f32.mrf.mxu0 }
 0x776   : > { %11826 = vst [vmem:[#allocation61_spill] sm:$0xff] %v10184_v29  ;;  %v4373_v31 = vpop.f32.mrf.mxu1 }
 0x777   : > { %11825 = vst [vmem:[#allocation15_spill] sm:$0xff] %v10182_v25  ;;  %v4942_v13 = vmax.f32 %v4284_v37, %v4373_v31 }
 0x778   : > { %4599 = vmatmul.bf16.gmra.mxu0 %v9855_v2 }
 0x779   : > { %4688 = vmatmul.bf16.gmra.mxu1 %v9855_v2 }
 0x77c   : > { %v4459_v5 = vpop.f32.mrf.mxu2 }
 0x77d   : > { %v10189_v55 = vmax.f32 %v4941_v28, %v4459_v5  ;;  %v10192_v16 = vpop.f32.mrf.mxu3  ;;  %v4286_v0 = vpop.f32.mrf.mxu0 }
 0x77e   : > { %11828 = vst [vmem:[#allocation44_spill] sm:$0xff] %v10192_v16  ;;  %v4375_v59 = vpop.f32.mrf.mxu1 }
 0x77f   : > { %11827 = vst [vmem:[#allocation13_spill] sm:$0xff] %v10189_v55  ;;  %v4943_v36 = vmax.f32 %v4286_v0, %v4375_v59  ;;  %v11832_v55 = vmax.f32 %v9894_v50, %v9898_v21 }
 0x781   : > { %4777 = vmatmul.bf16.gmra.mxu2 %v9855_v2 }
 0x782   : > { %4866 = vmatmul.bf16.gmra.mxu3 %v9855_v2  ;;  %v11831_v2 = vmax.f32 %v9882_v22, %v9886_v61 }
 0x784   : > { %v4462_v31 = vpop.f32.mrf.mxu2 }
 0x785   : > { %v10198_v37 = vmax.f32 %v4942_v13, %v4462_v31  ;;  %v10200_v1 = vpop.f32.mrf.mxu3  ;;  %v4565_v28 = vpop.f32.mrf.mxu0 }
 0x786   : > { %11830 = vst [vmem:[#allocation23_spill] sm:$0xff] %v10200_v1  ;;  %v4654_v29 = vpop.f32.mrf.mxu1  ;;  %v5008_v13 = vmax.f32 %v11831_v2, %v4565_v28 }
 0x787   : > { %11829 = vst [vmem:[#allocation39_spill] sm:$0xff] %v10198_v37 }
 0x788   : > { %4604 = vmatmul.bf16.gmra.mxu0 %v9871_v53  ;;  %v5040_v1 = vmax.f32 %v5008_v13, %v4654_v29  ;;  %v11833_v29 = vmax.f32 %v9904_v47, %v9908_v14 }
 0x789   : > { %4693 = vmatmul.bf16.gmra.mxu1 %v9871_v53 }
 0x78c   : > { %v4464_v34 = vpop.f32.mrf.mxu2 }
 0x78d   : > { %v10205_v16 = vmax.f32 %v4943_v36, %v4464_v34  ;;  %v10208_v0 = vpop.f32.mrf.mxu3  ;;  %v4567_v31 = vpop.f32.mrf.mxu0 }
 0x78e   : > { %v4656_v5 = vpop.f32.mrf.mxu1  ;;  %v5009_v25 = vmax.f32 %v11832_v55, %v4567_v31 }
 0x790   : > { %v5041_v28 = vmax.f32 %v5009_v25, %v4656_v5 }
 0x791   : > { %4782 = vmatmul.bf16.gmra.mxu2 %v9871_v53 }
 0x792   : > { %4871 = vmatmul.bf16.gmra.mxu3 %v9871_v53 }
 0x794   : > { %v4743_v34 = vpop.f32.mrf.mxu2 }
 0x795   : > { %v5072_v36 = vmax.f32 %v5040_v1, %v4743_v34  ;;  %v4832_v37 = vpop.f32.mrf.mxu3  ;;  %v4570_v22 = vpop.f32.mrf.mxu0 }
 0x796   : > { %v4659_v61 = vpop.f32.mrf.mxu1  ;;  %v5010_v1 = vmax.f32 %v11833_v29, %v4570_v22 }
 0x797   : > { %v5104_v54 = vmax.f32 %v5072_v36, %v4832_v37  ;;  %v11834_v37 = vmax.f32 %v9916_v27, %v9920_v43 }
 0x798   : > { %4609 = vmatmul.bf16.gmra.mxu0 %v9888_v41  ;;  %v5042_v21 = vmax.f32 %v5010_v1, %v4659_v61  ;;  %v11835_v61 = vmax.f32 %v9926_v6, %v9930_v48 }
 0x799   : > { %5136 = vmax.xlane.f32.xlu1 %v5104_v54  ;;  %4698 = vmatmul.bf16.gmra.mxu1 %v9888_v41 }
 0x79c   : > { %v4745_v2 = vpop.f32.mrf.mxu2 }
 0x79d   : > { %v5073_v59 = vmax.f32 %v5041_v28, %v4745_v2  ;;  %v4834_v53 = vpop.f32.mrf.mxu3  ;;  %v4572_v13 = vpop.f32.mrf.mxu0 }
 0x79e   : > { %v4661_v50 = vpop.f32.mrf.mxu1  ;;  %v5011_v5 = vmax.f32 %v11834_v37, %v4572_v13  ;;  %v11837_v37 = vmax.f32 %v9948_v56, %v9952_v20 }
 0x79f   : > { %v5105_v34 = vmax.f32 %v5073_v59, %v4834_v53 }
 0x7a0   : > { %v5043_v14 = vmax.f32 %v5011_v5, %v4661_v50 }
 0x7a1   : > { %4787 = vmatmul.bf16.gmra.mxu2 %v9888_v41  ;;  %5138 = vmax.xlane.f32.xlu2 %v5105_v34  ;;  %v11836_v34 = vmax.f32 %v9938_v57, %v9942_v10 }
 0x7a2   : > { %4876 = vmatmul.bf16.gmra.mxu3 %v9888_v41 }
 0x7a4   : > { %v4748_v54 = vpop.f32.mrf.mxu2 }
 0x7a5   : > { %v5074_v55 = vmax.f32 %v5042_v21, %v4748_v54  ;;  %v4837_v25 = vpop.f32.mrf.mxu3  ;;  %v4575_v36 = vpop.f32.mrf.mxu0 }
 0x7a6   : > { %v4664_v47 = vpop.f32.mrf.mxu1  ;;  %v5012_v28 = vmax.f32 %v11835_v61, %v4575_v36 }
 0x7a7   : > { %v5106_v31 = vmax.f32 %v5074_v55, %v4837_v25 }
 0x7a8   : > { %4614 = vmatmul.bf16.gmra.mxu0 %v9910_v49  ;;  %v5044_v43 = vmax.f32 %v5012_v28, %v4664_v47 }
 0x7a9   : > { %5140 = vmax.xlane.f32.xlu0 %v5106_v31  ;;  %4703 = vmatmul.bf16.gmra.mxu1 %v9910_v49 }
 0x7ac   : > { %v4750_v59 = vpop.f32.mrf.mxu2 }
 0x7ad   : > { %v5075_v22 = vmax.f32 %v5043_v14, %v4750_v59  ;;  %v4839_v41 = vpop.f32.mrf.mxu3  ;;  %v4577_v2 = vpop.f32.mrf.mxu0 }
 0x7ae   : > { %v4666_v27 = vpop.f32.mrf.mxu1  ;;  %v5013_v50 = vmax.f32 %v11836_v34, %v4577_v2 }
 0x7af   : > { %v5107_v53 = vmax.f32 %v5075_v22, %v4839_v41  ;;  %v11838_v22 = vmax.f32 %v9960_v9, %v9964_v12 }
 0x7b0   : > { %v5045_v48 = vmax.f32 %v5013_v50, %v4666_v27  ;;  %v11839_v27 = vmax.f32 %v9970_v42, %v9974_v23 }
 0x7b1   : > { %4792 = vmatmul.bf16.gmra.mxu2 %v9910_v49  ;;  %5142 = vmax.xlane.f32.xlu1 %v5107_v53 }
 0x7b2   : > { %4881 = vmatmul.bf16.gmra.mxu3 %v9910_v49 }
 0x7b4   : > { %v4753_v29 = vpop.f32.mrf.mxu2 }
 0x7b5   : > { %v5076_v1 = vmax.f32 %v5044_v43, %v4753_v29  ;;  %v4842_v13 = vpop.f32.mrf.mxu3  ;;  %v4580_v54 = vpop.f32.mrf.mxu0 }
 0x7b6   : > { %v4669_v6 = vpop.f32.mrf.mxu1  ;;  %v5014_v5 = vmax.f32 %v11837_v37, %v4580_v54 }
 0x7b7   : > { %v5108_v21 = vmax.f32 %v5076_v1, %v4842_v13 }
 0x7b8   : > { %4619 = vmatmul.bf16.gmra.mxu0 %v9932_v62  ;;  %v5046_v10 = vmax.f32 %v5014_v5, %v4669_v6 }
 0x7b9   : > { %5144 = vmax.xlane.f32.xlu2 %v5108_v21  ;;  %4708 = vmatmul.bf16.gmra.mxu1 %v9932_v62  ;;  %v11840_v21 = vmax.f32 %v9982_v11, %v9986_v8 }
 0x7bc   : > { %v4755_v55 = vpop.f32.mrf.mxu2 }
 0x7bd   : > { %v5077_v25 = vmax.f32 %v5045_v48, %v4755_v55  ;;  %v4844_v49 = vpop.f32.mrf.mxu3  ;;  %v4582_v31 = vpop.f32.mrf.mxu0 }
 0x7be   : > { %v4671_v57 = vpop.f32.mrf.mxu1  ;;  %v5015_v41 = vmax.f32 %v11838_v22, %v4582_v31 }
 0x7bf   : > { %v5109_v36 = vmax.f32 %v5077_v25, %v4844_v49  ;;  %v11841_v49 = vmax.f32 %v9992_v40, %v9996_v38 }
 0x7c0   : > { %v5047_v20 = vmax.f32 %v5015_v41, %v4671_v57 }
 0x7c1   : > { %4797 = vmatmul.bf16.gmra.mxu2 %v9932_v62  ;;  %5146 = vmax.xlane.f32.xlu0 %v5109_v36 }
 0x7c2   : > { %4886 = vmatmul.bf16.gmra.mxu3 %v9932_v62 }
 0x7c4   : > { %v4758_v47 = vpop.f32.mrf.mxu2 }
 0x7c5   : > { %v5078_v14 = vmax.f32 %v5046_v10, %v4758_v47  ;;  %v4847_v59 = vpop.f32.mrf.mxu3  ;;  %v4585_v28 = vpop.f32.mrf.mxu0  ;;  %v11842_v47 = vmax.f32 %v10004_v3, %v10008_v7 }
 0x7c6   : > { %v4674_v56 = vpop.f32.mrf.mxu1  ;;  %v5016_v43 = vmax.f32 %v11839_v27, %v4585_v28  ;;  %v11843_v28 = vmax.f32 %v10014_v17, %v10018_v19 }
 0x7c7   : > { %v5110_v61 = vmax.f32 %v5078_v14, %v4847_v59 }
 0x7c8   : > { %4624 = vmatmul.bf16.gmra.mxu0 %v9954_v33  ;;  %v5048_v12 = vmax.f32 %v5016_v43, %v4674_v56  ;;  %v11844_v43 = vmax.f32 %v10026_v18, %v10030_v46 }
 0x7c9   : > { %5148 = vmax.xlane.f32.xlu1 %v5110_v61  ;;  %4713 = vmatmul.bf16.gmra.mxu1 %v9954_v33 }
 0x7cc   : > { %v4760_v2 = vpop.f32.mrf.mxu2 }
 0x7cd   : > { %v5079_v53 = vmax.f32 %v5047_v20, %v4760_v2  ;;  %v4849_v62 = vpop.f32.mrf.mxu3  ;;  %v4587_v29 = vpop.f32.mrf.mxu0 }
 0x7ce   : > { %v4676_v9 = vpop.f32.mrf.mxu1  ;;  %v5017_v54 = vmax.f32 %v11840_v21, %v4587_v29 }
 0x7cf   : > { %v5111_v1 = vmax.f32 %v5079_v53, %v4849_v62 }
 0x7d0   : > { %v5049_v23 = vmax.f32 %v5017_v54, %v4676_v9 }
 0x7d1   : > { %4802 = vmatmul.bf16.gmra.mxu2 %v9954_v33  ;;  %5150 = vmax.xlane.f32.xlu2 %v5111_v1 }
 0x7d2   : > { %4891 = vmatmul.bf16.gmra.mxu3 %v9954_v33 }
 0x7d4   : > { %v4763_v13 = vpop.f32.mrf.mxu2 }
 0x7d5   : > { %v5080_v34 = vmax.f32 %v5048_v12, %v4763_v13  ;;  %v4852_v50 = vpop.f32.mrf.mxu3  ;;  %v4590_v48 = vpop.f32.mrf.mxu0 }
 0x7d6   : > { %v4679_v42 = vpop.f32.mrf.mxu1  ;;  %v5018_v37 = vmax.f32 %v11841_v49, %v4590_v48 }
 0x7d7   : > { %v5112_v6 = vmax.f32 %v5080_v34, %v4852_v50  ;;  %v11845_v34 = vmax.f32 %v10036_v15, %v10040_v35 }
 0x7d8   : > { %4629 = vmatmul.bf16.gmra.mxu0 %v9976_v4  ;;  %v5050_v8 = vmax.f32 %v5018_v37, %v4679_v42 }
 0x7d9   : > { %5152 = vmax.xlane.f32.xlu0 %v5112_v6  ;;  %4718 = vmatmul.bf16.gmra.mxu1 %v9976_v4 }
 0x7dc   : > { %v4765_v55 = vpop.f32.mrf.mxu2 }
 0x7dd   : > { %v5081_v25 = vmax.f32 %v5049_v23, %v4765_v55  ;;  %v4854_v33 = vpop.f32.mrf.mxu3  ;;  %v4592_v5 = vpop.f32.mrf.mxu0  ;;  %v10287_v23 = vld [vmem:[#allocation2 + $0x180] sm:$0xff]  ;;  %v11846_v55 = vmax.f32 %v10048_v52, %v10050_v63  ;;  %v11847_v52 = vmax.f32 %v10062_v32, %v10064_v44  ;;  %v11848_v32 = vmax.f32 %v10077_v24, %v10080_v39 }
 0x7de   : > { %v4681_v11 = vpop.f32.mrf.mxu1  ;;  %v5019_v14 = vmax.f32 %v11842_v47, %v4592_v5 }
 0x7df   : > { %v5113_v31 = vmax.f32 %v5081_v25, %v4854_v33 }
 0x7e0   : > { %v5051_v38 = vmax.f32 %v5019_v14, %v4681_v11 }
 0x7e1   : > { %4807 = vmatmul.bf16.gmra.mxu2 %v9976_v4  ;;  %5154 = vmax.xlane.f32.xlu1 %v5113_v31 }
 0x7e2   : > { %4896 = vmatmul.bf16.gmra.mxu3 %v9976_v4 }
 0x7e4   : > { %v4768_v36 = vpop.f32.mrf.mxu2 }
 0x7e5   : > { %v5082_v57 = vmax.f32 %v5050_v8, %v4768_v36  ;;  %v4857_v10 = vpop.f32.mrf.mxu3  ;;  %v4595_v22 = vpop.f32.mrf.mxu0 }
 0x7e6   : > { %v4684_v40 = vpop.f32.mrf.mxu1  ;;  %v5020_v56 = vmax.f32 %v11843_v28, %v4595_v22  ;;  %v10303_v22 = vld [vmem:[#allocation2 + $0x188] sm:$0xff] }
 0x7e7   : > { %v5114_v59 = vmax.f32 %v5082_v57, %v4857_v10 }
 0x7e8   : > { %4634 = vmatmul.bf16.gmra.mxu0 %v9998_v26  ;;  %v5052_v7 = vmax.f32 %v5020_v56, %v4684_v40 }
 0x7e9   : > { %5156 = vmax.xlane.f32.xlu2 %v5114_v59  ;;  %4723 = vmatmul.bf16.gmra.mxu1 %v9998_v26 }
 0x7ec   : > { %v4770_v41 = vpop.f32.mrf.mxu2 }
 0x7ed   : > { %v5083_v61 = vmax.f32 %v5051_v38, %v4770_v41  ;;  %v4859_v4 = vpop.f32.mrf.mxu3  ;;  %v4597_v20 = vpop.f32.mrf.mxu0 }
 0x7ee   : > { %v4686_v3 = vpop.f32.mrf.mxu1  ;;  %v5021_v29 = vmax.f32 %v11844_v43, %v4597_v20 }
 0x7ef   : > { %v5115_v2 = vmax.f32 %v5083_v61, %v4859_v4 }
 0x7f0   : > { %v5053_v19 = vmax.f32 %v5021_v29, %v4686_v3  ;;  %v11850_v3 = vld [vmem:[#allocation42_spill] sm:$0xff] }
 0x7f1   : > { %4812 = vmatmul.bf16.gmra.mxu2 %v9998_v26  ;;  %5158 = vmax.xlane.f32.xlu0 %v5115_v2  ;;  %v11849_v2 = vld [vmem:[#allocation57_spill] sm:$0xff] }
 0x7f2   : > { %4901 = vmatmul.bf16.gmra.mxu3 %v9998_v26  ;;  %v11851_v24 = vmax.f32 %v11849_v2, %v11850_v3 }
 0x7f4   : > { %v4773_v53 = vpop.f32.mrf.mxu2 }
 0x7f5   : > { %v5084_v62 = vmax.f32 %v5052_v7, %v4773_v53  ;;  %v4862_v27 = vpop.f32.mrf.mxu3  ;;  %v4600_v9 = vpop.f32.mrf.mxu0 }
 0x7f6   : > { %v4689_v17 = vpop.f32.mrf.mxu1  ;;  %v5022_v50 = vmax.f32 %v11845_v34, %v4600_v9 }
 0x7f7   : > { %v5116_v1 = vmax.f32 %v5084_v62, %v4862_v27 }
 0x7f8   : > { %4639 = vmatmul.bf16.gmra.mxu0 %v10020_v51  ;;  %v5054_v46 = vmax.f32 %v5022_v50, %v4689_v17  ;;  %v10319_v17 = vld [vmem:[#allocation2 + $0x190] sm:$0xff] }
 0x7f9   : > { %5160 = vmax.xlane.f32.xlu1 %v5116_v1  ;;  %4728 = vmatmul.bf16.gmra.mxu1 %v10020_v51 }
 0x7fc   : > { %v4775_v12 = vpop.f32.mrf.mxu2 }
 0x7fd   : > { %v5085_v13 = vmax.f32 %v5053_v19, %v4775_v12  ;;  %v4864_v26 = vpop.f32.mrf.mxu3  ;;  %v4602_v21 = vpop.f32.mrf.mxu0  ;;  %v11852_v19 = vld [vmem:[#allocation49_spill] sm:$0xff] }
 0x7fe   : > { %v4691_v18 = vpop.f32.mrf.mxu1  ;;  %v5023_v15 = vmax.f32 %v11846_v55, %v4602_v21  ;;  %v11853_v12 = vmax.f32 %v10107_v60, %v11852_v19 }
 0x7ff   : > { %v5117_v54 = vmax.f32 %v5085_v13, %v4864_v26 }
 0x800   : > { %v5055_v49 = vmax.f32 %v5023_v15, %v4691_v18 }
 0x801   : > { %4817 = vmatmul.bf16.gmra.mxu2 %v10020_v51  ;;  %5162 = vmax.xlane.f32.xlu2 %v5117_v54 }
 0x802   : > { %4906 = vmatmul.bf16.gmra.mxu3 %v10020_v51 }
 0x804   : > { %v4778_v6 = vpop.f32.mrf.mxu2 }
 0x805   : > { %v5086_v48 = vmax.f32 %v5054_v46, %v4778_v6  ;;  %v4867_v42 = vpop.f32.mrf.mxu3  ;;  %v4605_v25 = vpop.f32.mrf.mxu0 }
 0x806   : > { %v4694_v33 = vpop.f32.mrf.mxu1  ;;  %v5024_v63 = vmax.f32 %v11847_v52, %v4605_v25  ;;  %v11857_v52 = vld [vmem:[#allocation50_spill] sm:$0xff] }
 0x807   : > { %v5118_v35 = vmax.f32 %v5086_v48, %v4867_v42  ;;  %v11854_v48 = vld [vmem:[#allocation55_spill] sm:$0xff]  ;;  %v11855_v42 = vld [vmem:[#allocation56_spill] sm:$0xff] }
 0x808   : > { %5368 = vmatmul.bf16.vlgmr.msra.gmra.mxu0 %v10287_v23  ;;  %v5056_v57 = vmax.f32 %v5024_v63, %v4694_v33  ;;  %v11856_v60 = vmax.f32 %v11854_v48, %v11855_v42  ;;  %v11858_v63 = vmax.f32 %v10125_v45, %v11857_v52 }
 0x809   : > { %5164 = vmax.xlane.f32.xlu0 %v5118_v35  ;;  %5457 = vmatmul.bf16.vlgmr.msra.gmra.mxu1 %v10287_v23 }
 0x80c   : > { %v4780_v37 = vpop.f32.mrf.mxu2  ;;  %v5137_v51 = vpop.xlane.xlu1 %5136 }
 0x80d   : > { %v5087_v5 = vmax.f32 %v5055_v49, %v4780_v37  ;;  %5200 = vst.msk [vmem:[%s9139_s29 + $0x200] sm:$0xff] %vm2879_vm1, %v5137_v51  ;;  %v4869_v31 = vpop.f32.mrf.mxu3  ;;  %v4607_v11 = vpop.f32.mrf.mxu0 }
 0x80e   : > { %v4696_v36 = vpop.f32.mrf.mxu1  ;;  %v5025_v44 = vmax.f32 %v11848_v32, %v4607_v11 }
 0x80f   : > { %v5119_v8 = vmax.f32 %v5087_v5, %v4869_v31  ;;  %v10335_v31 = vld [vmem:[#allocation2 + $0x198] sm:$0xff] }
 0x810   : > { %v5057_v61 = vmax.f32 %v5025_v44, %v4696_v36  ;;  %v11859_v44 = vld [vmem:[#allocation11_spill] sm:$0xff] }
 0x811   : > { %5546 = vmatmul.bf16.vlgmr.msra.gmra.mxu2 %v10287_v23  ;;  %5166 = vmax.xlane.f32.xlu1 %v5119_v8 }
 0x812   : > { %5635 = vmatmul.bf16.vlgmr.msra.gmra.mxu3 %v10287_v23 }
 0x814   : > { %v4783_v10 = vpop.f32.mrf.mxu2  ;;  %v5139_v47 = vpop.xlane.xlu2 %5138 }
 0x815   : > { %v5088_v14 = vmax.f32 %v5056_v57, %v4783_v10  ;;  %5201 = vst.msk [vmem:[%s9139_s29 + $0x208] sm:$0xff] %vm2879_vm1, %v5139_v47  ;;  %v4872_v59 = vpop.f32.mrf.mxu3  ;;  %v4610_v38 = vpop.f32.mrf.mxu0 }
 0x816   : > { %v4699_v41 = vpop.f32.mrf.mxu1  ;;  %v5026_v39 = vmax.f32 %v11851_v24, %v4610_v38  ;;  %v10351_v24 = vld [vmem:[#allocation2 + $0x1a0] sm:$0xff] }
 0x817   : > { %v5120_v40 = vmax.f32 %v5088_v14, %v4872_v59 }
 0x818   : > { %5373 = vmatmul.bf16.gmra.mxu0 %v10303_v22  ;;  %v5058_v27 = vmax.f32 %v5026_v39, %v4699_v41  ;;  %v11862_v39 = vld [vmem:[#allocation33_spill] sm:$0xff] }
 0x819   : > { %5168 = vmax.xlane.f32.xlu2 %v5120_v40  ;;  %5462 = vmatmul.bf16.gmra.mxu1 %v10303_v22  ;;  %v11860_v40 = vld [vmem:[#allocation9_spill] sm:$0xff] }
 0x81a   : > { %v11861_v45 = vmax.f32 %v11859_v44, %v11860_v40 }
 0x81c   : > { %v4785_v4 = vpop.f32.mrf.mxu2  ;;  %v5141_v28 = vpop.xlane.xlu0 %5140 }
 0x81d   : > { %v5089_v56 = vmax.f32 %v5057_v61, %v4785_v4  ;;  %5202 = vst.msk [vmem:[%s9139_s29 + $0x210] sm:$0xff] %vm2879_vm1, %v5141_v28  ;;  %v4874_v20 = vpop.f32.mrf.mxu3  ;;  %v4612_v7 = vpop.f32.mrf.mxu0 }
 0x81e   : > { %v4701_v62 = vpop.f32.mrf.mxu1  ;;  %v5027_v13 = vmax.f32 %v11853_v12, %v4612_v7  ;;  %v11863_v7 = vmax.f32 %v10141_v30, %v11862_v39 }
 0x81f   : > { %v5121_v53 = vmax.f32 %v5089_v56, %v4874_v20 }
 0x820   : > { %v5059_v21 = vmax.f32 %v5027_v13, %v4701_v62  ;;  %v11864_v13 = vld [vmem:[#allocation5_spill] sm:$0xff] }
 0x821   : > { %5551 = vmatmul.bf16.gmra.mxu2 %v10303_v22  ;;  %5170 = vmax.xlane.f32.xlu0 %v5121_v53 }
 0x822   : > { %5640 = vmatmul.bf16.gmra.mxu3 %v10303_v22 }
 0x824   : > { %v4788_v43 = vpop.f32.mrf.mxu2  ;;  %v5143_v29 = vpop.xlane.xlu1 %5142 }
 0x825   : > { %v5090_v1 = vmax.f32 %v5058_v27, %v4788_v43  ;;  %5203 = vst.msk [vmem:[%s9139_s29 + $0x218] sm:$0xff] %vm2879_vm1, %v5143_v29  ;;  %v4877_v9 = vpop.f32.mrf.mxu3  ;;  %v4615_v34 = vpop.f32.mrf.mxu0 }
 0x826   : > { %v4704_v50 = vpop.f32.mrf.mxu1  ;;  %v5028_v55 = vmax.f32 %v11856_v60, %v4615_v34  ;;  %v10367_v60 = vld [vmem:[#allocation2 + $0x1a8] sm:$0xff] }
 0x827   : > { %v5122_v26 = vmax.f32 %v5090_v1, %v4877_v9 }
 0x828   : > { %5378 = vmatmul.bf16.gmra.mxu0 %v10319_v17  ;;  %v5060_v33 = vmax.f32 %v5028_v55, %v4704_v50  ;;  %v11867_v55 = vld [vmem:[#allocation31_spill] sm:$0xff] }
 0x829   : > { %5172 = vmax.xlane.f32.xlu1 %v5122_v26  ;;  %5467 = vmatmul.bf16.gmra.mxu1 %v10319_v17  ;;  %v11865_v26 = vld [vmem:[#allocation58_spill] sm:$0xff] }
 0x82a   : > { %v11866_v30 = vmax.f32 %v11864_v13, %v11865_v26 }
 0x82c   : > { %v4790_v54 = vpop.f32.mrf.mxu2  ;;  %v5145_v18 = vpop.xlane.xlu2 %5144 }
 0x82d   : > { %v5091_v46 = vmax.f32 %v5059_v21, %v4790_v54  ;;  %5204 = vst.msk [vmem:[%s9139_s29 + $0x220] sm:$0xff] %vm2879_vm1, %v5145_v18  ;;  %v4879_v6 = vpop.f32.mrf.mxu3  ;;  %v4617_v15 = vpop.f32.mrf.mxu0 }
 0x82e   : > { %v4706_v25 = vpop.f32.mrf.mxu1  ;;  %v5029_v11 = vmax.f32 %v11858_v63, %v4617_v15  ;;  %v11868_v15 = vmax.f32 %v10157_v58, %v11867_v55 }
 0x82f   : > { %v5123_v35 = vmax.f32 %v5091_v46, %v4879_v6 }
 0x830   : > { %v5061_v10 = vmax.f32 %v5029_v11, %v4706_v25  ;;  %v11869_v11 = vld [vmem:[#allocation47_spill] sm:$0xff] }
 0x831   : > { %5556 = vmatmul.bf16.gmra.mxu2 %v10319_v17  ;;  %5174 = vmax.xlane.f32.xlu2 %v5123_v35 }
 0x832   : > { %5645 = vmatmul.bf16.gmra.mxu3 %v10319_v17 }
 0x834   : > { %v4793_v49 = vpop.f32.mrf.mxu2  ;;  %v5147_v37 = vpop.xlane.xlu0 %5146 }
 0x835   : > { %v5092_v51 = vmax.f32 %v5060_v33, %v4793_v49  ;;  %5205 = vst.msk [vmem:[%s9139_s29 + $0x228] sm:$0xff] %vm2879_vm1, %v5147_v37  ;;  %v4882_v5 = vpop.f32.mrf.mxu3  ;;  %v4620_v36 = vpop.f32.mrf.mxu0 }
 0x836   : > { %v4709_v57 = vpop.f32.mrf.mxu1  ;;  %v5030_v38 = vmax.f32 %v11861_v45, %v4620_v36  ;;  %v10383_v45 = vld [vmem:[#allocation2 + $0x1b0] sm:$0xff] }
 0x837   : > { %v5124_v8 = vmax.f32 %v5092_v51, %v4882_v5 }
 0x838   : > { %5383 = vmatmul.bf16.gmra.mxu0 %v10335_v31  ;;  %v5062_v28 = vmax.f32 %v5030_v38, %v4709_v57  ;;  %v11872_v38 = vld [vmem:[#allocation25_spill] sm:$0xff] }
 0x839   : > { %5176 = vmax.xlane.f32.xlu0 %v5124_v8  ;;  %5472 = vmatmul.bf16.gmra.mxu1 %v10335_v31  ;;  %v11870_v8 = vld [vmem:[#allocation41_spill] sm:$0xff] }
 0x83a   : > { %v11871_v58 = vmax.f32 %v11869_v11, %v11870_v8 }
 0x83c   : > { %v4795_v47 = vpop.f32.mrf.mxu2  ;;  %v5149_v14 = vpop.xlane.xlu1 %5148 }
 0x83d   : > { %v5093_v59 = vmax.f32 %v5061_v10, %v4795_v47  ;;  %5206 = vst.msk [vmem:[%s9139_s29 + $0x230] sm:$0xff] %vm2879_vm1, %v5149_v14  ;;  %v4884_v32 = vpop.f32.mrf.mxu3  ;;  %v4622_v41 = vpop.f32.mrf.mxu0 }
 0x83e   : > { %v4711_v4 = vpop.f32.mrf.mxu1  ;;  %v5031_v53 = vmax.f32 %v11863_v7, %v4622_v41  ;;  %v11873_v41 = vld [vmem:[#allocation43_spill] sm:$0xff] }
 0x83f   : > { %v5125_v61 = vmax.f32 %v5093_v59, %v4884_v32 }
 0x840   : > { %v5063_v29 = vmax.f32 %v5031_v53, %v4711_v4 }
 0x841   : > { %5561 = vmatmul.bf16.gmra.mxu2 %v10335_v31  ;;  %5178 = vmax.xlane.f32.xlu1 %v5125_v61  ;;  %v11874_v61 = vmax.f32 %v11872_v38, %v11873_v41 }
 0x842   : > { %5650 = vmatmul.bf16.gmra.mxu3 %v10335_v31 }
 0x844   : > { %v4798_v56 = vpop.f32.mrf.mxu2  ;;  %v5151_v20 = vpop.xlane.xlu2 %5150 }
 0x845   : > { %v5094_v2 = vmax.f32 %v5062_v28, %v4798_v56  ;;  %5207 = vst.msk [vmem:[%s9139_s29 + $0x238] sm:$0xff] %vm2879_vm1, %v5151_v20  ;;  %v4887_v3 = vpop.f32.mrf.mxu3  ;;  %v4625_v27 = vpop.f32.mrf.mxu0 }
 0x846   : > { %v4714_v43 = vpop.f32.mrf.mxu1  ;;  %v5032_v34 = vmax.f32 %v11866_v30, %v4625_v27  ;;  %v11876_v27 = vld [vmem:[#allocation61_spill] sm:$0xff] }
 0x847   : > { %v5126_v62 = vmax.f32 %v5094_v2, %v4887_v3 }
 0x848   : > { %5388 = vmatmul.bf16.gmra.mxu0 %v10351_v24  ;;  %v5064_v18 = vmax.f32 %v5032_v34, %v4714_v43 }
 0x849   : > { %5180 = vmax.xlane.f32.xlu2 %v5126_v62  ;;  %5477 = vmatmul.bf16.gmra.mxu1 %v10351_v24  ;;  %v11875_v62 = vld [vmem:[#allocation15_spill] sm:$0xff] }
 0x84a   : > { %v11877_v43 = vmax.f32 %v11875_v62, %v11876_v27  ;;  %v10432_v62 = vld [vmem:[#allocation2 + $0x1c8] sm:$0xff] }
 0x84c   : > { %v4800_v1 = vpop.f32.mrf.mxu2  ;;  %v5153_v9 = vpop.xlane.xlu0 %5152 }
 0x84d   : > { %v5095_v19 = vmax.f32 %v5063_v29, %v4800_v1  ;;  %5208 = vst.msk [vmem:[%s9139_s29 + $0x240] sm:$0xff] %vm2879_vm1, %v5153_v9  ;;  %v4889_v12 = vpop.f32.mrf.mxu3  ;;  %v4627_v50 = vpop.f32.mrf.mxu0 }
 0x84e   : > { %v4716_v54 = vpop.f32.mrf.mxu1  ;;  %v5033_v35 = vmax.f32 %v11868_v15, %v4627_v50  ;;  %v10399_v50 = vld [vmem:[#allocation2 + $0x1b8] sm:$0xff] }
 0x84f   : > { %v5127_v21 = vmax.f32 %v5095_v19, %v4889_v12 }
 0x850   : > { %v5065_v37 = vmax.f32 %v5033_v35, %v4716_v54  ;;  %v11879_v54 = vld [vmem:[#allocation44_spill] sm:$0xff] }
 0x851   : > { %5566 = vmatmul.bf16.gmra.mxu2 %v10351_v24  ;;  %5182 = vmax.xlane.f32.xlu0 %v5127_v21  ;;  %v11878_v21 = vld [vmem:[#allocation13_spill] sm:$0xff] }
 0x852   : > { %5655 = vmatmul.bf16.gmra.mxu3 %v10351_v24 }
 0x854   : > { %v4803_v46 = vpop.f32.mrf.mxu2  ;;  %v5155_v6 = vpop.xlane.xlu1 %5154 }
 0x855   : > { %v5096_v48 = vmax.f32 %v5064_v18, %v4803_v46  ;;  %5209 = vst.msk [vmem:[%s9139_s29 + $0x248] sm:$0xff] %vm2879_vm1, %v5155_v6  ;;  %v4892_v42 = vpop.f32.mrf.mxu3  ;;  %v4630_v33 = vpop.f32.mrf.mxu0  ;;  %v11880_v18 = vmax.f32 %v11878_v21, %v11879_v54 }
 0x856   : > { %v4719_v49 = vpop.f32.mrf.mxu1  ;;  %v5034_v36 = vmax.f32 %v11871_v58, %v4630_v33 }
 0x857   : > { %v5128_v25 = vmax.f32 %v5096_v48, %v4892_v42 }
 0x858   : > { %5393 = vmatmul.bf16.gmra.mxu0 %v10367_v60  ;;  %v5066_v14 = vmax.f32 %v5034_v36, %v4719_v49  ;;  %v11881_v49 = vld [vmem:[#allocation39_spill] sm:$0xff] }
 0x859   : > { %5184 = vmax.xlane.f32.xlu1 %v5128_v25  ;;  %5482 = vmatmul.bf16.gmra.mxu1 %v10367_v60 }
 0x85c   : > { %v4805_v51 = vpop.f32.mrf.mxu2  ;;  %v5157_v5 = vpop.xlane.xlu2 %5156 }
 0x85d   : > { %v5097_v52 = vmax.f32 %v5065_v37, %v4805_v51  ;;  %5210 = vst.msk [vmem:[%s9139_s29 + $0x250] sm:$0xff] %vm2879_vm1, %v5157_v5  ;;  %v4894_v63 = vpop.f32.mrf.mxu3  ;;  %v4632_v57 = vpop.f32.mrf.mxu0  ;;  %v11882_v37 = vld [vmem:[#allocation23_spill] sm:$0xff] }
 0x85e   : > { %v4721_v47 = vpop.f32.mrf.mxu1  ;;  %v5035_v4 = vmax.f32 %v11874_v61, %v4632_v57  ;;  %v11883_v51 = vmax.f32 %v11881_v49, %v11882_v37 }
 0x85f   : > { %v5129_v10 = vmax.f32 %v5097_v52, %v4894_v63 }
 0x860   : > { %v5067_v2 = vmax.f32 %v5035_v4, %v4721_v47  ;;  %v10415_v47 = vld [vmem:[#allocation2 + $0x1c0] sm:$0xff] }
 0x861   : > { %5571 = vmatmul.bf16.gmra.mxu2 %v10367_v60  ;;  %5186 = vmax.xlane.f32.xlu2 %v5129_v10 }
 0x862   : > { %5660 = vmatmul.bf16.gmra.mxu3 %v10367_v60 }
 0x864   : > { %v4808_v59 = vpop.f32.mrf.mxu2  ;;  %v5159_v32 = vpop.xlane.xlu0 %5158 }
 0x865   : > { %v5098_v44 = vmax.f32 %v5066_v14, %v4808_v59  ;;  %5211 = vst.msk [vmem:[%s9139_s29 + $0x258] sm:$0xff] %vm2879_vm1, %v5159_v32  ;;  %v4897_v40 = vpop.f32.mrf.mxu3  ;;  %v4635_v56 = vpop.f32.mrf.mxu0  ;;  %v11884_v14 = vmax.f32 %v10205_v16, %v10208_v0 }
 0x866   : > { %v4724_v20 = vpop.f32.mrf.mxu1  ;;  %v5036_v29 = vmax.f32 %v11877_v43, %v4635_v56 }
 0x867   : > { %v5130_v28 = vmax.f32 %v5098_v44, %v4897_v40 }
 0x868   : > { %5398 = vmatmul.bf16.gmra.mxu0 %v10383_v45  ;;  %v5068_v12 = vmax.f32 %v5036_v29, %v4724_v20 }
 0x869   : > { %5188 = vmax.xlane.f32.xlu0 %v5130_v28  ;;  %5487 = vmatmul.bf16.gmra.mxu1 %v10383_v45 }
 0x86c   : > { %v4810_v3 = vpop.f32.mrf.mxu2  ;;  %v5161_v39 = vpop.xlane.xlu1 %5160 }
 0x86d   : > { %v5099_v7 = vmax.f32 %v5067_v2, %v4810_v3  ;;  %5212 = vst.msk [vmem:[%s9139_s29 + $0x260] sm:$0xff] %vm2879_vm1, %v5161_v39  ;;  %v4899_v53 = vpop.f32.mrf.mxu3  ;;  %v4637_v1 = vpop.f32.mrf.mxu0 }
 0x86e   : > { %v4726_v19 = vpop.f32.mrf.mxu1  ;;  %v5037_v46 = vmax.f32 %v11880_v18, %v4637_v1 }
 0x86f   : > { %v5131_v9 = vmax.f32 %v5099_v7, %v4899_v53 }
 0x870   : > { %v5069_v55 = vmax.f32 %v5037_v46, %v4726_v19 }
 0x871   : > { %5576 = vmatmul.bf16.gmra.mxu2 %v10383_v45  ;;  %5190 = vmax.xlane.f32.xlu1 %v5131_v9 }
 0x872   : > { %5665 = vmatmul.bf16.gmra.mxu3 %v10383_v45 }
 0x874   : > { %v4813_v13 = vpop.f32.mrf.mxu2  ;;  %v5163_v26 = vpop.xlane.xlu2 %5162 }
 0x875   : > { %v5100_v30 = vmax.f32 %v5068_v12, %v4813_v13  ;;  %5213 = vst.msk [vmem:[%s9139_s29 + $0x268] sm:$0xff] %vm2879_vm1, %v5163_v26  ;;  %v4902_v34 = vpop.f32.mrf.mxu3  ;;  %v4640_v48 = vpop.f32.mrf.mxu0 }
 0x876   : > { %v4729_v42 = vpop.f32.mrf.mxu1  ;;  %v5038_v5 = vmax.f32 %v11883_v51, %v4640_v48  ;;  %v10454_v48 = vld [vmem:[#allocation2 + $0x1d0] sm:$0xff] }
 0x877   : > { %v5132_v6 = vmax.f32 %v5100_v30, %v4902_v34 }
 0x878   : > { %5403 = vmatmul.bf16.gmra.mxu0 %v10399_v50  ;;  %v5070_v8 = vmax.f32 %v5038_v5, %v4729_v42 }
 0x879   : > { %5192 = vmax.xlane.f32.xlu2 %v5132_v6  ;;  %5492 = vmatmul.bf16.gmra.mxu1 %v10399_v50 }
 0x87c   : > { %v4815_v15 = vpop.f32.mrf.mxu2  ;;  %v5165_v35 = vpop.xlane.xlu0 %5164 }
 0x87d   : > { %v5101_v25 = vmax.f32 %v5069_v55, %v4815_v15  ;;  %5214 = vst.msk [vmem:[%s9139_s29 + $0x270] sm:$0xff] %vm2879_vm1, %v5165_v35  ;;  %v4904_v33 = vpop.f32.mrf.mxu3  ;;  %v4642_v52 = vpop.f32.mrf.mxu0 }
 0x87e   : > { %v4731_v11 = vpop.f32.mrf.mxu1  ;;  %v5039_v59 = vmax.f32 %v11884_v14, %v4642_v52 }
 0x87f   : > { %v5133_v63 = vmax.f32 %v5101_v25, %v4904_v33 }
 0x880   : > { %v5071_v38 = vmax.f32 %v5039_v59, %v4731_v11 }
 0x881   : > { %5581 = vmatmul.bf16.gmra.mxu2 %v10399_v50  ;;  %5194 = vmax.xlane.f32.xlu0 %v5133_v63 }
 0x882   : > { %5670 = vmatmul.bf16.gmra.mxu3 %v10399_v50 }
 0x884   : > { %v4818_v58 = vpop.f32.mrf.mxu2  ;;  %v5167_v36 = vpop.xlane.xlu1 %5166 }
 0x885   : > { %v5102_v57 = vmax.f32 %v5070_v8, %v4818_v58  ;;  %5215 = vst.msk [vmem:[%s9139_s29 + $0x278] sm:$0xff] %vm2879_vm1, %v5167_v36  ;;  %v4907_v10 = vpop.f32.mrf.mxu3  ;;  %v5369_v44 = vpop.f32.mrf.mxu0 }
 0x886   : > { %v5458_v40 = vpop.f32.mrf.mxu1 }
 0x887   : > { %v5134_v32 = vmax.f32 %v5102_v57, %v4907_v10  ;;  %v6072_v41 = vmax.f32 %v5369_v44, %v5458_v40  ;;  %v10476_v57 = vld [vmem:[#allocation2 + $0x1d8] sm:$0xff] }
 0x888   : > { %5408 = vmatmul.bf16.gmra.mxu0 %v10415_v47 }
 0x889   : > { %5196 = vmax.xlane.f32.xlu1 %v5134_v32  ;;  %5497 = vmatmul.bf16.gmra.mxu1 %v10415_v47 }
 0x88c   : > { %v4820_v61 = vpop.f32.mrf.mxu2  ;;  %v5169_v4 = vpop.xlane.xlu2 %5168 }
 0x88d   : > { %v5103_v28 = vmax.f32 %v5071_v38, %v4820_v61  ;;  %5216 = vst.msk [vmem:[%s9139_s29 + $0x280] sm:$0xff] %vm2879_vm1, %v5169_v4  ;;  %v4909_v56 = vpop.f32.mrf.mxu3  ;;  %v5371_v16 = vpop.f32.mrf.mxu0 }
 0x88e   : > { %v5460_v0 = vpop.f32.mrf.mxu1 }
 0x88f   : > { %v5135_v20 = vmax.f32 %v5103_v28, %v4909_v56  ;;  %v6073_v2 = vmax.f32 %v5371_v16, %v5460_v0 }
 0x891   : > { %5586 = vmatmul.bf16.gmra.mxu2 %v10415_v47  ;;  %5198 = vmax.xlane.f32.xlu2 %v5135_v20 }
 0x892   : > { %5675 = vmatmul.bf16.gmra.mxu3 %v10415_v47 }
 0x894   : > { %v5547_v3 = vpop.f32.mrf.mxu2  ;;  %v5171_v39 = vpop.xlane.xlu0 %5170 }
 0x895   : > { %v10426_v7 = vmax.f32 %v6072_v41, %v5547_v3  ;;  %5217 = vst.msk [vmem:[%s9139_s29 + $0x288] sm:$0xff] %vm2879_vm1, %v5171_v39  ;;  %v10430_v53 = vpop.f32.mrf.mxu3  ;;  %v5374_v43 = vpop.f32.mrf.mxu0  ;;  %v10498_v3 = vld [vmem:[#allocation2 + $0x1e0] sm:$0xff] }
 0x896   : > { %v5463_v29 = vpop.f32.mrf.mxu1 }
 0x897   : > { %v6074_v1 = vmax.f32 %v5374_v43, %v5463_v29 }
 0x898   : > { %5413 = vmatmul.bf16.gmra.mxu0 %v10432_v62 }
 0x899   : > { %5502 = vmatmul.bf16.gmra.mxu1 %v10432_v62 }
 0x89c   : > { %v5549_v9 = vpop.f32.mrf.mxu2  ;;  %v5173_v19 = vpop.xlane.xlu1 %5172 }
 0x89d   : > { %v10437_v12 = vmax.f32 %v6073_v2, %v5549_v9  ;;  %5218 = vst.msk [vmem:[%s9139_s29 + $0x290] sm:$0xff] %vm2879_vm1, %v5173_v19  ;;  %v10442_v13 = vpop.f32.mrf.mxu3  ;;  %v5376_v30 = vpop.f32.mrf.mxu0 }
 0x89e   : > { %v5465_v34 = vpop.f32.mrf.mxu1 }
 0x89f   : > { %v6075_v21 = vmax.f32 %v5376_v30, %v5465_v34 }
 0x8a1   : > { %5591 = vmatmul.bf16.gmra.mxu2 %v10432_v62 }
 0x8a2   : > { %5680 = vmatmul.bf16.gmra.mxu3 %v10432_v62 }
 0x8a4   : > { %v5552_v54 = vpop.f32.mrf.mxu2  ;;  %v5175_v18 = vpop.xlane.xlu2 %5174 }
 0x8a5   : > { %v10448_v46 = vmax.f32 %v6074_v1, %v5552_v54  ;;  %5219 = vst.msk [vmem:[%s9139_s29 + $0x298] sm:$0xff] %vm2879_vm1, %v5175_v18  ;;  %v10452_v6 = vpop.f32.mrf.mxu3  ;;  %v5379_v55 = vpop.f32.mrf.mxu0 }
 0x8a6   : > { %v5468_v15 = vpop.f32.mrf.mxu1 }
 0x8a7   : > { %v6076_v35 = vmax.f32 %v5379_v55, %v5468_v15 }
 0x8a8   : > { %5418 = vmatmul.bf16.gmra.mxu0 %v10454_v48 }
 0x8a9   : > { %5507 = vmatmul.bf16.gmra.mxu1 %v10454_v48 }
 0x8ac   : > { %v5554_v25 = vpop.f32.mrf.mxu2  ;;  %v5177_v33 = vpop.xlane.xlu0 %5176 }
 0x8ad   : > { %v10459_v49 = vmax.f32 %v6075_v21, %v5554_v25  ;;  %5220 = vst.msk [vmem:[%s9139_s29 + $0x2a0] sm:$0xff] %vm2879_vm1, %v5177_v33  ;;  %v10464_v37 = vpop.f32.mrf.mxu3  ;;  %v5381_v5 = vpop.f32.mrf.mxu0 }
 0x8ae   : > { %v5470_v52 = vpop.f32.mrf.mxu1 }
 0x8af   : > { %v6077_v63 = vmax.f32 %v5381_v5, %v5470_v52  ;;  %v10520_v5 = vld [vmem:[#allocation2 + $0x1e8] sm:$0xff] }
 0x8b1   : > { %5596 = vmatmul.bf16.gmra.mxu2 %v10454_v48 }
 0x8b2   : > { %5685 = vmatmul.bf16.gmra.mxu3 %v10454_v48 }
 0x8b4   : > { %v5557_v11 = vpop.f32.mrf.mxu2  ;;  %v5179_v8 = vpop.xlane.xlu1 %5178 }
 0x8b5   : > { %v10470_v58 = vmax.f32 %v6076_v35, %v5557_v11  ;;  %5221 = vst.msk [vmem:[%s9139_s29 + $0x2a8] sm:$0xff] %vm2879_vm1, %v5179_v8  ;;  %v10474_v36 = vpop.f32.mrf.mxu3  ;;  %v5384_v14 = vpop.f32.mrf.mxu0 }
 0x8b6   : > { %v5473_v59 = vpop.f32.mrf.mxu1 }
 0x8b7   : > { %v6078_v32 = vmax.f32 %v5384_v14, %v5473_v59 }
 0x8b8   : > { %5423 = vmatmul.bf16.gmra.mxu0 %v10476_v57 }
 0x8b9   : > { %5512 = vmatmul.bf16.gmra.mxu1 %v10476_v57 }
 0x8bc   : > { %v5559_v44 = vpop.f32.mrf.mxu2  ;;  %v5181_v40 = vpop.xlane.xlu2 %5180 }
 0x8bd   : > { %v10481_v38 = vmax.f32 %v6077_v63, %v5559_v44  ;;  %5222 = vst.msk [vmem:[%s9139_s29 + $0x2b0] sm:$0xff] %vm2879_vm1, %v5181_v40  ;;  %v10486_v41 = vpop.f32.mrf.mxu3  ;;  %v5386_v4 = vpop.f32.mrf.mxu0 }
 0x8be   : > { %v5475_v28 = vpop.f32.mrf.mxu1 }
 0x8bf   : > { %v6079_v56 = vmax.f32 %v5386_v4, %v5475_v28 }
 0x8c1   : > { %5601 = vmatmul.bf16.gmra.mxu2 %v10476_v57 }
 0x8c2   : > { %5690 = vmatmul.bf16.gmra.mxu3 %v10476_v57 }
 0x8c4   : > { %v5562_v20 = vpop.f32.mrf.mxu2  ;;  %v5183_v16 = vpop.xlane.xlu0 %5182 }
 0x8c5   : > { %v10492_v0 = vmax.f32 %v6078_v32, %v5562_v20  ;;  %5223 = vst.msk [vmem:[%s9139_s29 + $0x2b8] sm:$0xff] %vm2879_vm1, %v5183_v16  ;;  %v10496_v2 = vpop.f32.mrf.mxu3  ;;  %v5389_v43 = vpop.f32.mrf.mxu0 }
 0x8c6   : > { %v5478_v29 = vpop.f32.mrf.mxu1 }
 0x8c7   : > { %v6080_v1 = vmax.f32 %v5389_v43, %v5478_v29 }
 0x8c8   : > { %5428 = vmatmul.bf16.gmra.mxu0 %v10498_v3 }
 0x8c9   : > { %5517 = vmatmul.bf16.gmra.mxu1 %v10498_v3 }
 0x8cc   : > { %v5564_v9 = vpop.f32.mrf.mxu2  ;;  %v5185_v19 = vpop.xlane.xlu1 %5184 }
 0x8cd   : > { %v10503_v30 = vmax.f32 %v6079_v56, %v5564_v9  ;;  %5224 = vst.msk [vmem:[%s9139_s29 + $0x2c0] sm:$0xff] %vm2879_vm1, %v5185_v19  ;;  %v10508_v34 = vpop.f32.mrf.mxu3  ;;  %v5391_v54 = vpop.f32.mrf.mxu0 }
 0x8ce   : > { %v5480_v18 = vpop.f32.mrf.mxu1 }
 0x8cf   : > { %v6081_v55 = vmax.f32 %v5391_v54, %v5480_v18 }
 0x8d1   : > { %5606 = vmatmul.bf16.gmra.mxu2 %v10498_v3 }
 0x8d2   : > { %5695 = vmatmul.bf16.gmra.mxu3 %v10498_v3 }
 0x8d4   : > { %v5567_v15 = vpop.f32.mrf.mxu2  ;;  %v5187_v35 = vpop.xlane.xlu2 %5186 }
 0x8d5   : > { %v10514_v25 = vmax.f32 %v6080_v1, %v5567_v15  ;;  %5225 = vst.msk [vmem:[%s9139_s29 + $0x2c8] sm:$0xff] %vm2879_vm1, %v5187_v35  ;;  %v10518_v33 = vpop.f32.mrf.mxu3  ;;  %v5394_v63 = vpop.f32.mrf.mxu0  ;;  %v10542_v1 = vld [vmem:[#allocation2 + $0x1f0] sm:$0xff] }
 0x8d6   : > { %v5483_v11 = vpop.f32.mrf.mxu1 }
 0x8d7   : > { %v6082_v8 = vmax.f32 %v5394_v63, %v5483_v11 }
 0x8d8   : > { %5433 = vmatmul.bf16.gmra.mxu0 %v10520_v5 }
 0x8d9   : > { %5522 = vmatmul.bf16.gmra.mxu1 %v10520_v5 }
 0x8dc   : > { %v5569_v14 = vpop.f32.mrf.mxu2  ;;  %v5189_v59 = vpop.xlane.xlu0 %5188 }
 0x8dd   : > { %v10525_v32 = vmax.f32 %v6081_v55, %v5569_v14  ;;  %5226 = vst.msk [vmem:[%s9139_s29 + $0x2d0] sm:$0xff] %vm2879_vm1, %v5189_v59  ;;  %v10530_v44 = vpop.f32.mrf.mxu3  ;;  %v5396_v4 = vpop.f32.mrf.mxu0 }
 0x8de   : > { %v5485_v28 = vpop.f32.mrf.mxu1 }
 0x8df   : > { %v6083_v56 = vmax.f32 %v5396_v4, %v5485_v28 }
 0x8e1   : > { %5611 = vmatmul.bf16.gmra.mxu2 %v10520_v5 }
 0x8e2   : > { %5700 = vmatmul.bf16.gmra.mxu3 %v10520_v5 }
 0x8e4   : > { %v5572_v20 = vpop.f32.mrf.mxu2  ;;  %v5191_v16 = vpop.xlane.xlu1 %5190 }
 0x8e5   : > { %v10536_v43 = vmax.f32 %v6082_v8, %v5572_v20  ;;  %5227 = vst.msk [vmem:[%s9139_s29 + $0x2d8] sm:$0xff] %vm2879_vm1, %v5191_v16  ;;  %v10540_v29 = vpop.f32.mrf.mxu3  ;;  %v5399_v19 = vpop.f32.mrf.mxu0  ;;  %v10564_v16 = vld [vmem:[#allocation2 + $0x1f8] sm:$0xff] }
 0x8e6   : > { %v5488_v54 = vpop.f32.mrf.mxu1 }
 0x8e7   : > { %v6084_v18 = vmax.f32 %v5399_v19, %v5488_v54 }
 0x8e8   : > { %5438 = vmatmul.bf16.gmra.mxu0 %v10542_v1 }
 0x8e9   : > { %5527 = vmatmul.bf16.gmra.mxu1 %v10542_v1 }
 0x8ec   : > { %v5574_v55 = vpop.f32.mrf.mxu2  ;;  %v5193_v15 = vpop.xlane.xlu2 %5192 }
 0x8ed   : > { %v10547_v35 = vmax.f32 %v6083_v56, %v5574_v55  ;;  %5228 = vst.msk [vmem:[%s9139_s29 + $0x2e0] sm:$0xff] %vm2879_vm1, %v5193_v15  ;;  %v10552_v63 = vpop.f32.mrf.mxu3  ;;  %v5401_v8 = vpop.f32.mrf.mxu0 }
 0x8ee   : > { %v5490_v14 = vpop.f32.mrf.mxu1 }
 0x8ef   : > { %v6085_v59 = vmax.f32 %v5401_v8, %v5490_v14 }
 0x8f1   : > { %5616 = vmatmul.bf16.gmra.mxu2 %v10542_v1 }
 0x8f2   : > { %5705 = vmatmul.bf16.gmra.mxu3 %v10542_v1 }
 0x8f4   : > { %v5577_v4 = vpop.f32.mrf.mxu2  ;;  %v5195_v28 = vpop.xlane.xlu0 %5194 }
 0x8f5   : > { %v10558_v56 = vmax.f32 %v6084_v18, %v5577_v4  ;;  %5229 = vst.msk [vmem:[%s9139_s29 + $0x2e8] sm:$0xff] %vm2879_vm1, %v5195_v28  ;;  %v10562_v20 = vpop.f32.mrf.mxu3  ;;  %v5404_v54 = vpop.f32.mrf.mxu0 }
 0x8f6   : > { %v5493_v55 = vpop.f32.mrf.mxu1 }
 0x8f7   : > { %v6086_v15 = vmax.f32 %v5404_v54, %v5493_v55 }
 0x8f8   : > { %5443 = vmatmul.bf16.gmra.mxu0 %v10564_v16 }
 0x8f9   : > { %5532 = vmatmul.bf16.gmra.mxu1 %v10564_v16 }
 0x8fc   : > { %v5579_v8 = vpop.f32.mrf.mxu2  ;;  %v5197_v14 = vpop.xlane.xlu1 %5196 }
 0x8fd   : > { %v10569_v11 = vmax.f32 %v6085_v59, %v5579_v8  ;;  %5230 = vst.msk [vmem:[%s9139_s29 + $0x2f0] sm:$0xff] %vm2879_vm1, %v5197_v14  ;;  %v10574_v18 = vpop.f32.mrf.mxu3  ;;  %v5406_v28 = vpop.f32.mrf.mxu0 }
 0x8fe   : > { %v5495_v19 = vpop.f32.mrf.mxu1 }
 0x8ff   : > { %v6087_v54 = vmax.f32 %v5406_v28, %v5495_v19 }
 0x901   : > { %5621 = vmatmul.bf16.gmra.mxu2 %v10564_v16 }
 0x902   : > { %5710 = vmatmul.bf16.gmra.mxu3 %v10564_v16 }
 0x904   : > { %v5582_v55 = vpop.f32.mrf.mxu2  ;;  %v5199_v9 = vpop.xlane.xlu2 %5198 }
 0x905   : > { %v10580_v59 = vmax.f32 %v6086_v15, %v5582_v55  ;;  %5231 = vst.msk [vmem:[%s9139_s29 + $0x2f8] sm:$0xff] %vm2879_vm1, %v5199_v9  ;;  %v10584_v8 = vpop.f32.mrf.mxu3  ;;  %v5409_v40 = vpop.f32.mrf.mxu0 }
 0x906   : > { %v5498_v4 = vpop.f32.mrf.mxu1 }
 0x907   : > { %v6088_v52 = vmax.f32 %v5409_v40, %v5498_v4 }
 0x908   : > { %5724 = vmatmul.bf16.vlgmr.msrb.gmra.mxu0 %v10287_v23 }
 0x909   : > { %5813 = vmatmul.bf16.vlgmr.msrb.gmra.mxu1 %v10287_v23 }
 0x90c   : > { %v5584_v21 = vpop.f32.mrf.mxu2 }
 0x90d   : > { %v10589_v39 = vmax.f32 %v6087_v54, %v5584_v21  ;;  %v10592_v19 = vpop.f32.mrf.mxu3  ;;  %v5411_v15 = vpop.f32.mrf.mxu0 }
 0x90e   : > { %v5500_v28 = vpop.f32.mrf.mxu1 }
 0x90f   : > { %v6089_v55 = vmax.f32 %v5411_v15, %v5500_v28 }
 0x911   : > { %5902 = vmatmul.bf16.vlgmr.msrb.gmra.mxu2 %v10287_v23 }
 0x912   : > { %5991 = vmatmul.bf16.vlgmr.msrb.gmra.mxu3 %v10287_v23 }
 0x914   : > { %v5587_v14 = vpop.f32.mrf.mxu2 }
 0x915   : > { %v10598_v61 = vmax.f32 %v6088_v52, %v5587_v14  ;;  %v10600_v40 = vpop.f32.mrf.mxu3  ;;  %v5414_v4 = vpop.f32.mrf.mxu0 }
 0x916   : > { %v5503_v54 = vpop.f32.mrf.mxu1 }
 0x917   : > { %v6090_v9 = vmax.f32 %v5414_v4, %v5503_v54 }
 0x918   : > { %5729 = vmatmul.bf16.gmra.mxu0 %v10303_v22 }
 0x919   : > { %5818 = vmatmul.bf16.gmra.mxu1 %v10303_v22 }
 0x91c   : > { %v5589_v10 = vpop.f32.mrf.mxu2 }
 0x91d   : > { %v10605_v51 = vmax.f32 %v6089_v55, %v5589_v10  ;;  %v10608_v23 = vpop.f32.mrf.mxu3  ;;  %v5416_v14 = vpop.f32.mrf.mxu0 }
 0x91e   : > { %v5505_v15 = vpop.f32.mrf.mxu1 }
 0x91f   : > { %v6091_v28 = vmax.f32 %v5416_v14, %v5505_v15 }
 0x921   : > { %5907 = vmatmul.bf16.gmra.mxu2 %v10303_v22 }
 0x922   : > { %5996 = vmatmul.bf16.gmra.mxu3 %v10303_v22 }
 0x924   : > { %v5592_v21 = vpop.f32.mrf.mxu2 }
 0x925   : > { %v10614_v42 = vmax.f32 %v6090_v9, %v5592_v21  ;;  %v10616_v4 = vpop.f32.mrf.mxu3  ;;  %v5419_v55 = vpop.f32.mrf.mxu0 }
 0x926   : > { %11885 = vst [vmem:[#allocation46_spill] sm:$0xff] %v10616_v4  ;;  %v5508_v54 = vpop.f32.mrf.mxu1 }
 0x927   : > { %v6092_v52 = vmax.f32 %v5419_v55, %v5508_v54 }
 0x928   : > { %5734 = vmatmul.bf16.gmra.mxu0 %v10319_v17 }
 0x929   : > { %5823 = vmatmul.bf16.gmra.mxu1 %v10319_v17 }
 0x92c   : > { %v5594_v26 = vpop.f32.mrf.mxu2 }
 0x92d   : > { %v10621_v27 = vmax.f32 %v6091_v28, %v5594_v26  ;;  %v10624_v22 = vpop.f32.mrf.mxu3  ;;  %v5421_v21 = vpop.f32.mrf.mxu0 }
 0x92e   : > { %11887 = vst [vmem:[#allocation18_spill] sm:$0xff] %v10624_v22  ;;  %v5510_v14 = vpop.f32.mrf.mxu1 }
 0x92f   : > { %11886 = vst [vmem:[#allocation48_spill] sm:$0xff] %v10621_v27  ;;  %v6093_v15 = vmax.f32 %v5421_v21, %v5510_v14 }
 0x931   : > { %5912 = vmatmul.bf16.gmra.mxu2 %v10319_v17 }
 0x932   : > { %6001 = vmatmul.bf16.gmra.mxu3 %v10319_v17 }
 0x934   : > { %v5597_v10 = vpop.f32.mrf.mxu2 }
 0x935   : > { %v10630_v4 = vmax.f32 %v6092_v52, %v5597_v10  ;;  %v10632_v55 = vpop.f32.mrf.mxu3  ;;  %v5424_v28 = vpop.f32.mrf.mxu0 }
 0x936   : > { %11888 = vst [vmem:[#allocation34_spill] sm:$0xff] %v10632_v55  ;;  %v5513_v54 = vpop.f32.mrf.mxu1 }
 0x937   : > { %v6094_v9 = vmax.f32 %v5424_v28, %v5513_v54 }
 0x938   : > { %5739 = vmatmul.bf16.gmra.mxu0 %v10335_v31 }
 0x939   : > { %5828 = vmatmul.bf16.gmra.mxu1 %v10335_v31 }
 0x93c   : > { %v5599_v22 = vpop.f32.mrf.mxu2 }
 0x93d   : > { %v10637_v27 = vmax.f32 %v6093_v15, %v5599_v22  ;;  %v10640_v17 = vpop.f32.mrf.mxu3  ;;  %v5426_v10 = vpop.f32.mrf.mxu0 }
 0x93e   : > { %11890 = vst [vmem:[#allocation37_spill] sm:$0xff] %v10640_v17  ;;  %v5515_v21 = vpop.f32.mrf.mxu1 }
 0x93f   : > { %11889 = vst [vmem:[#allocation24_spill] sm:$0xff] %v10637_v27  ;;  %v6095_v14 = vmax.f32 %v5426_v10, %v5515_v21 }
 0x941   : > { %5917 = vmatmul.bf16.gmra.mxu2 %v10335_v31 }
 0x942   : > { %6006 = vmatmul.bf16.gmra.mxu3 %v10335_v31 }
 0x944   : > { %v5602_v26 = vpop.f32.mrf.mxu2 }
 0x945   : > { %v10646_v55 = vmax.f32 %v6094_v9, %v5602_v26  ;;  %v10648_v28 = vpop.f32.mrf.mxu3  ;;  %v5429_v15 = vpop.f32.mrf.mxu0 }
 0x946   : > { %11891 = vst [vmem:[#allocation40_spill] sm:$0xff] %v10648_v28  ;;  %v5518_v54 = vpop.f32.mrf.mxu1 }
 0x947   : > { %v6096_v52 = vmax.f32 %v5429_v15, %v5518_v54 }
 0x948   : > { %5744 = vmatmul.bf16.gmra.mxu0 %v10351_v24 }
 0x949   : > { %5833 = vmatmul.bf16.gmra.mxu1 %v10351_v24 }
 0x94c   : > { %v5604_v17 = vpop.f32.mrf.mxu2 }
 0x94d   : > { %v10653_v27 = vmax.f32 %v6095_v14, %v5604_v17  ;;  %v10656_v31 = vpop.f32.mrf.mxu3  ;;  %v5431_v26 = vpop.f32.mrf.mxu0 }
 0x94e   : > { %11893 = vst [vmem:[#allocation21_spill] sm:$0xff] %v10656_v31  ;;  %v5520_v10 = vpop.f32.mrf.mxu1 }
 0x94f   : > { %11892 = vst [vmem:[#allocation20_spill] sm:$0xff] %v10653_v27  ;;  %v6097_v21 = vmax.f32 %v5431_v26, %v5520_v10 }
 0x951   : > { %5922 = vmatmul.bf16.gmra.mxu2 %v10351_v24 }
 0x952   : > { %6011 = vmatmul.bf16.gmra.mxu3 %v10351_v24 }
 0x954   : > { %v5607_v22 = vpop.f32.mrf.mxu2 }
 0x955   : > { %v10662_v28 = vmax.f32 %v6096_v52, %v5607_v22  ;;  %v10664_v15 = vpop.f32.mrf.mxu3  ;;  %v5434_v14 = vpop.f32.mrf.mxu0 }
 0x956   : > { %11894 = vst [vmem:[#allocation35_spill] sm:$0xff] %v10664_v15  ;;  %v5523_v54 = vpop.f32.mrf.mxu1 }
 0x957   : > { %v6098_v9 = vmax.f32 %v5434_v14, %v5523_v54 }
 0x958   : > { %5749 = vmatmul.bf16.gmra.mxu0 %v10367_v60 }
 0x959   : > { %5838 = vmatmul.bf16.gmra.mxu1 %v10367_v60 }
 0x95c   : > { %v5609_v31 = vpop.f32.mrf.mxu2 }
 0x95d   : > { %v10669_v27 = vmax.f32 %v6097_v21, %v5609_v31  ;;  %v10672_v24 = vpop.f32.mrf.mxu3  ;;  %v5436_v22 = vpop.f32.mrf.mxu0 }
 0x95e   : > { %11896 = vst [vmem:[#allocation22_spill] sm:$0xff] %v10672_v24  ;;  %v5525_v26 = vpop.f32.mrf.mxu1 }
 0x95f   : > { %11895 = vst [vmem:[#allocation38_spill] sm:$0xff] %v10669_v27  ;;  %v6099_v10 = vmax.f32 %v5436_v22, %v5525_v26 }
 0x961   : > { %5927 = vmatmul.bf16.gmra.mxu2 %v10367_v60 }
 0x962   : > { %6016 = vmatmul.bf16.gmra.mxu3 %v10367_v60 }
 0x964   : > { %v5612_v17 = vpop.f32.mrf.mxu2 }
 0x965   : > { %v10678_v15 = vmax.f32 %v6098_v9, %v5612_v17  ;;  %v10680_v14 = vpop.f32.mrf.mxu3  ;;  %v5439_v21 = vpop.f32.mrf.mxu0 }
 0x966   : > { %11898 = vst [vmem:[#allocation62_spill] sm:$0xff] %v10680_v14  ;;  %v5528_v54 = vpop.f32.mrf.mxu1 }
 0x967   : > { %11897 = vst [vmem:[#allocation45_spill] sm:$0xff] %v10678_v15  ;;  %v6100_v52 = vmax.f32 %v5439_v21, %v5528_v54 }
 0x968   : > { %5754 = vmatmul.bf16.gmra.mxu0 %v10383_v45 }
 0x969   : > { %5843 = vmatmul.bf16.gmra.mxu1 %v10383_v45 }
 0x96c   : > { %v5614_v24 = vpop.f32.mrf.mxu2 }
 0x96d   : > { %v10685_v27 = vmax.f32 %v6099_v10, %v5614_v24  ;;  %v10688_v60 = vpop.f32.mrf.mxu3  ;;  %v5441_v17 = vpop.f32.mrf.mxu0 }
 0x96e   : > { %11900 = vst [vmem:[#allocation16_spill] sm:$0xff] %v10688_v60  ;;  %v5530_v22 = vpop.f32.mrf.mxu1 }
 0x96f   : > { %11899 = vst [vmem:[#allocation10_spill] sm:$0xff] %v10685_v27  ;;  %v6101_v26 = vmax.f32 %v5441_v17, %v5530_v22 }
 0x971   : > { %5932 = vmatmul.bf16.gmra.mxu2 %v10383_v45 }
 0x972   : > { %6021 = vmatmul.bf16.gmra.mxu3 %v10383_v45 }
 0x974   : > { %v5617_v31 = vpop.f32.mrf.mxu2 }
 0x975   : > { %v10694_v14 = vmax.f32 %v6100_v52, %v5617_v31  ;;  %v10696_v21 = vpop.f32.mrf.mxu3  ;;  %v5444_v10 = vpop.f32.mrf.mxu0 }
 0x976   : > { %11902 = vst [vmem:[#allocation52_spill] sm:$0xff] %v10696_v21  ;;  %v5533_v54 = vpop.f32.mrf.mxu1 }
 0x977   : > { %11901 = vst [vmem:[#allocation36_spill] sm:$0xff] %v10694_v14  ;;  %v6102_v9 = vmax.f32 %v5444_v10, %v5533_v54 }
 0x978   : > { %5759 = vmatmul.bf16.gmra.mxu0 %v10399_v50 }
 0x979   : > { %5848 = vmatmul.bf16.gmra.mxu1 %v10399_v50 }
 0x97c   : > { %v5619_v60 = vpop.f32.mrf.mxu2 }
 0x97d   : > { %v10701_v27 = vmax.f32 %v6101_v26, %v5619_v60  ;;  %v10704_v45 = vpop.f32.mrf.mxu3  ;;  %v5446_v31 = vpop.f32.mrf.mxu0 }
 0x97e   : > { %11904 = vst [vmem:[#allocation51_spill] sm:$0xff] %v10704_v45  ;;  %v5535_v17 = vpop.f32.mrf.mxu1 }
 0x97f   : > { %11903 = vst [vmem:[#allocation83_spill] sm:$0xff] %v10701_v27  ;;  %v6103_v22 = vmax.f32 %v5446_v31, %v5535_v17 }
 0x981   : > { %5937 = vmatmul.bf16.gmra.mxu2 %v10399_v50 }
 0x982   : > { %6026 = vmatmul.bf16.gmra.mxu3 %v10399_v50  ;;  %v11907_v50 = vmax.f32 %v10426_v7, %v10430_v53 }
 0x984   : > { %v5622_v24 = vpop.f32.mrf.mxu2 }
 0x985   : > { %v10710_v21 = vmax.f32 %v6102_v9, %v5622_v24  ;;  %v10712_v10 = vpop.f32.mrf.mxu3  ;;  %v5725_v26 = vpop.f32.mrf.mxu0 }
 0x986   : > { %11906 = vst [vmem:[#allocation85_spill] sm:$0xff] %v10712_v10  ;;  %v5814_v54 = vpop.f32.mrf.mxu1  ;;  %v6168_v9 = vmax.f32 %v11907_v50, %v5725_v26 }
 0x987   : > { %11905 = vst [vmem:[#allocation84_spill] sm:$0xff] %v10710_v21  ;;  %v11908_v21 = vmax.f32 %v10437_v12, %v10442_v13 }
 0x988   : > { %5764 = vmatmul.bf16.gmra.mxu0 %v10415_v47  ;;  %v6200_v60 = vmax.f32 %v6168_v9, %v5814_v54 }
 0x989   : > { %5853 = vmatmul.bf16.gmra.mxu1 %v10415_v47 }
 0x98c   : > { %v5624_v52 = vpop.f32.mrf.mxu2 }
 0x98d   : > { %v10717_v45 = vmax.f32 %v6103_v22, %v5624_v52  ;;  %v10720_v27 = vpop.f32.mrf.mxu3  ;;  %v5727_v31 = vpop.f32.mrf.mxu0 }
 0x98e   : > { %v5816_v17 = vpop.f32.mrf.mxu1  ;;  %v6169_v14 = vmax.f32 %v11908_v21, %v5727_v31 }
 0x990   : > { %v6201_v26 = vmax.f32 %v6169_v14, %v5816_v17 }
 0x991   : > { %5942 = vmatmul.bf16.gmra.mxu2 %v10415_v47 }
 0x992   : > { %6031 = vmatmul.bf16.gmra.mxu3 %v10415_v47 }
 0x994   : > { %v5903_v52 = vpop.f32.mrf.mxu2 }
 0x995   : > { %v6232_v22 = vmax.f32 %v6200_v60, %v5903_v52  ;;  %v5992_v10 = vpop.f32.mrf.mxu3  ;;  %v5730_v7 = vpop.f32.mrf.mxu0  ;;  %v11909_v60 = vmax.f32 %v10448_v46, %v10452_v6 }
 0x996   : > { %v5819_v53 = vpop.f32.mrf.mxu1 }
 0x997   : > { %v6264_v15 = vmax.f32 %v6232_v22, %v5992_v10  ;;  %v6170_v54 = vmax.f32 %v11909_v60, %v5730_v7  ;;  %v11910_v10 = vmax.f32 %v10459_v49, %v10464_v37 }
 0x998   : > { %5769 = vmatmul.bf16.gmra.mxu0 %v10432_v62 }
 0x999   : > { %6296 = vmax.xlane.f32.xlu0 %v6264_v15  ;;  %5858 = vmatmul.bf16.gmra.mxu1 %v10432_v62  ;;  %v6202_v13 = vmax.f32 %v6170_v54, %v5819_v53  ;;  %v11911_v53 = vmax.f32 %v10470_v58, %v10474_v36 }
 0x99c   : > { %v5905_v50 = vpop.f32.mrf.mxu2 }
 0x99d   : > { %v6233_v24 = vmax.f32 %v6201_v26, %v5905_v50  ;;  %v5994_v47 = vpop.f32.mrf.mxu3  ;;  %v5732_v52 = vpop.f32.mrf.mxu0 }
 0x99e   : > { %v5821_v12 = vpop.f32.mrf.mxu1  ;;  %v6171_v31 = vmax.f32 %v11910_v10, %v5732_v52  ;;  %v11912_v52 = vmax.f32 %v10481_v38, %v10486_v41  ;;  %v11913_v10 = vmax.f32 %v10492_v0, %v10496_v2 }
 0x99f   : > { %v6265_v9 = vmax.f32 %v6233_v24, %v5994_v47 }
 0x9a0   : > { %v6203_v6 = vmax.f32 %v6171_v31, %v5821_v12 }
 0x9a1   : > { %5947 = vmatmul.bf16.gmra.mxu2 %v10432_v62  ;;  %6298 = vmax.xlane.f32.xlu1 %v6265_v9 }
 0x9a2   : > { %6036 = vmatmul.bf16.gmra.mxu3 %v10432_v62 }
 0x9a4   : > { %v5908_v15 = vpop.f32.mrf.mxu2 }
 0x9a5   : > { %v6234_v14 = vmax.f32 %v6202_v13, %v5908_v15  ;;  %v5997_v21 = vpop.f32.mrf.mxu3  ;;  %v5735_v22 = vpop.f32.mrf.mxu0 }
 0x9a6   : > { %v5824_v46 = vpop.f32.mrf.mxu1  ;;  %v6172_v26 = vmax.f32 %v11911_v53, %v5735_v22 }
 0x9a7   : > { %v6266_v17 = vmax.f32 %v6234_v14, %v5997_v21 }
 0x9a8   : > { %5774 = vmatmul.bf16.gmra.mxu0 %v10454_v48  ;;  %v6204_v37 = vmax.f32 %v6172_v26, %v5824_v46 }
 0x9a9   : > { %6300 = vmax.xlane.f32.xlu2 %v6266_v17  ;;  %5863 = vmatmul.bf16.gmra.mxu1 %v10454_v48 }
 0x9ac   : > { %v5910_v24 = vpop.f32.mrf.mxu2 }
 0x9ad   : > { %v6235_v7 = vmax.f32 %v6203_v6, %v5910_v24  ;;  %v5999_v62 = vpop.f32.mrf.mxu3  ;;  %v5737_v50 = vpop.f32.mrf.mxu0 }
 0x9ae   : > { %v5826_v49 = vpop.f32.mrf.mxu1  ;;  %v6173_v12 = vmax.f32 %v11912_v52, %v5737_v50 }
 0x9af   : > { %v6267_v47 = vmax.f32 %v6235_v7, %v5999_v62  ;;  %v11914_v7 = vmax.f32 %v10503_v30, %v10508_v34 }
 0x9b0   : > { %v6205_v36 = vmax.f32 %v6173_v12, %v5826_v49  ;;  %v11915_v49 = vmax.f32 %v10514_v25, %v10518_v33 }
 0x9b1   : > { %5952 = vmatmul.bf16.gmra.mxu2 %v10454_v48  ;;  %6302 = vmax.xlane.f32.xlu0 %v6267_v47 }
 0x9b2   : > { %6041 = vmatmul.bf16.gmra.mxu3 %v10454_v48 }
 0x9b4   : > { %v5913_v60 = vpop.f32.mrf.mxu2 }
 0x9b5   : > { %v6236_v54 = vmax.f32 %v6204_v37, %v5913_v60  ;;  %v6002_v9 = vpop.f32.mrf.mxu3  ;;  %v5740_v15 = vpop.f32.mrf.mxu0 }
 0x9b6   : > { %v5829_v58 = vpop.f32.mrf.mxu1  ;;  %v6174_v31 = vmax.f32 %v11913_v10, %v5740_v15 }
 0x9b7   : > { %v6268_v13 = vmax.f32 %v6236_v54, %v6002_v9 }
 0x9b8   : > { %5779 = vmatmul.bf16.gmra.mxu0 %v10476_v57  ;;  %v6206_v41 = vmax.f32 %v6174_v31, %v5829_v58 }
 0x9b9   : > { %6304 = vmax.xlane.f32.xlu1 %v6268_v13  ;;  %5868 = vmatmul.bf16.gmra.mxu1 %v10476_v57  ;;  %v11916_v13 = vmax.f32 %v10525_v32, %v10530_v44 }
 0x9bc   : > { %v5915_v14 = vpop.f32.mrf.mxu2 }
 0x9bd   : > { %v6237_v21 = vmax.f32 %v6205_v36, %v5915_v14  ;;  %v6004_v48 = vpop.f32.mrf.mxu3  ;;  %v5742_v22 = vpop.f32.mrf.mxu0 }
 0x9be   : > { %v5831_v38 = vpop.f32.mrf.mxu1  ;;  %v6175_v62 = vmax.f32 %v11914_v7, %v5742_v22 }
 0x9bf   : > { %v6269_v17 = vmax.f32 %v6237_v21, %v6004_v48  ;;  %v11917_v48 = vmax.f32 %v10536_v43, %v10540_v29 }
 0x9c0   : > { %v6207_v2 = vmax.f32 %v6175_v62, %v5831_v38 }
 0x9c1   : > { %5957 = vmatmul.bf16.gmra.mxu2 %v10476_v57  ;;  %6306 = vmax.xlane.f32.xlu2 %v6269_v17 }
 0x9c2   : > { %6046 = vmatmul.bf16.gmra.mxu3 %v10476_v57 }
 0x9c4   : > { %v5918_v46 = vpop.f32.mrf.mxu2 }
 0x9c5   : > { %v6238_v6 = vmax.f32 %v6206_v41, %v5918_v46  ;;  %v6007_v24 = vpop.f32.mrf.mxu3  ;;  %v5745_v26 = vpop.f32.mrf.mxu0  ;;  %v11918_v46 = vmax.f32 %v10547_v35, %v10552_v63 }
 0x9c6   : > { %v5834_v0 = vpop.f32.mrf.mxu1  ;;  %v6176_v37 = vmax.f32 %v11915_v49, %v5745_v26  ;;  %v11919_v26 = vmax.f32 %v10558_v56, %v10562_v20 }
 0x9c7   : > { %v6270_v53 = vmax.f32 %v6238_v6, %v6007_v24 }
 0x9c8   : > { %5784 = vmatmul.bf16.gmra.mxu0 %v10498_v3  ;;  %v6208_v34 = vmax.f32 %v6176_v37, %v5834_v0  ;;  %v11920_v37 = vmax.f32 %v10569_v11, %v10574_v18 }
 0x9c9   : > { %6308 = vmax.xlane.f32.xlu0 %v6270_v53  ;;  %5873 = vmatmul.bf16.gmra.mxu1 %v10498_v3 }
 0x9cc   : > { %v5920_v50 = vpop.f32.mrf.mxu2 }
 0x9cd   : > { %v6239_v47 = vmax.f32 %v6207_v2, %v5920_v50  ;;  %v6009_v57 = vpop.f32.mrf.mxu3  ;;  %v5747_v54 = vpop.f32.mrf.mxu0 }
 0x9ce   : > { %v5836_v30 = vpop.f32.mrf.mxu1  ;;  %v6177_v15 = vmax.f32 %v11916_v13, %v5747_v54 }
 0x9cf   : > { %v6271_v60 = vmax.f32 %v6239_v47, %v6009_v57 }
 0x9d0   : > { %v6209_v33 = vmax.f32 %v6177_v15, %v5836_v30 }
 0x9d1   : > { %5962 = vmatmul.bf16.gmra.mxu2 %v10498_v3  ;;  %6310 = vmax.xlane.f32.xlu1 %v6271_v60 }
 0x9d2   : > { %6051 = vmatmul.bf16.gmra.mxu3 %v10498_v3 }
 0x9d4   : > { %v5923_v9 = vpop.f32.mrf.mxu2 }
 0x9d5   : > { %v6240_v52 = vmax.f32 %v6208_v34, %v5923_v9  ;;  %v6012_v12 = vpop.f32.mrf.mxu3  ;;  %v5750_v36 = vpop.f32.mrf.mxu0 }
 0x9d6   : > { %v5839_v25 = vpop.f32.mrf.mxu1  ;;  %v6178_v10 = vmax.f32 %v11917_v48, %v5750_v36 }
 0x9d7   : > { %v6272_v58 = vmax.f32 %v6240_v52, %v6012_v12  ;;  %v11921_v52 = vmax.f32 %v10580_v59, %v10584_v8 }
 0x9d8   : > { %5789 = vmatmul.bf16.gmra.mxu0 %v10520_v5  ;;  %v6210_v44 = vmax.f32 %v6178_v10, %v5839_v25 }
 0x9d9   : > { %6312 = vmax.xlane.f32.xlu2 %v6272_v58  ;;  %5878 = vmatmul.bf16.gmra.mxu1 %v10520_v5 }
 0x9dc   : > { %v5925_v14 = vpop.f32.mrf.mxu2 }
 0x9dd   : > { %v6241_v21 = vmax.f32 %v6209_v33, %v5925_v14  ;;  %v6014_v3 = vpop.f32.mrf.mxu3  ;;  %v5752_v17 = vpop.f32.mrf.mxu0  ;;  %v11922_v33 = vmax.f32 %v10589_v39, %v10592_v19 }
 0x9de   : > { %v5841_v32 = vpop.f32.mrf.mxu1  ;;  %v6179_v6 = vmax.f32 %v11918_v46, %v5752_v17  ;;  %v11923_v17 = vmax.f32 %v10598_v61, %v10600_v40 }
 0x9df   : > { %v6273_v31 = vmax.f32 %v6241_v21, %v6014_v3 }
 0x9e0   : > { %v6211_v29 = vmax.f32 %v6179_v6, %v5841_v32 }
 0x9e1   : > { %5967 = vmatmul.bf16.gmra.mxu2 %v10520_v5  ;;  %6314 = vmax.xlane.f32.xlu0 %v6273_v31 }
 0x9e2   : > { %6056 = vmatmul.bf16.gmra.mxu3 %v10520_v5 }
 0x9e4   : > { %v5928_v22 = vpop.f32.mrf.mxu2 }
 0x9e5   : > { %v6242_v38 = vmax.f32 %v6210_v44, %v5928_v22  ;;  %v6017_v41 = vpop.f32.mrf.mxu3  ;;  %v5755_v7 = vpop.f32.mrf.mxu0 }
 0x9e6   : > { %v5844_v43 = vpop.f32.mrf.mxu1  ;;  %v6180_v0 = vmax.f32 %v11919_v26, %v5755_v7 }
 0x9e7   : > { %v6274_v24 = vmax.f32 %v6242_v38, %v6017_v41 }
 0x9e8   : > { %5794 = vmatmul.bf16.gmra.mxu0 %v10542_v1  ;;  %v6212_v63 = vmax.f32 %v6180_v0, %v5844_v43  ;;  %v11925_v0 = vld [vmem:[#allocation46_spill] sm:$0xff] }
 0x9e9   : > { %6316 = vmax.xlane.f32.xlu1 %v6274_v24  ;;  %5883 = vmatmul.bf16.gmra.mxu1 %v10542_v1  ;;  %v11924_v24 = vmax.f32 %v10605_v51, %v10608_v23 }
 0x9ec   : > { %v5930_v62 = vpop.f32.mrf.mxu2 }
 0x9ed   : > { %v6243_v53 = vmax.f32 %v6211_v29, %v5930_v62  ;;  %v6019_v5 = vpop.f32.mrf.mxu3  ;;  %v5757_v50 = vpop.f32.mrf.mxu0 }
 0x9ee   : > { %v5846_v35 = vpop.f32.mrf.mxu1  ;;  %v6181_v60 = vmax.f32 %v11920_v37, %v5757_v50 }
 0x9ef   : > { %v6275_v2 = vmax.f32 %v6243_v53, %v6019_v5 }
 0x9f0   : > { %v6213_v20 = vmax.f32 %v6181_v60, %v5846_v35  ;;  %v11927_v60 = vld [vmem:[#allocation48_spill] sm:$0xff] }
 0x9f1   : > { %5972 = vmatmul.bf16.gmra.mxu2 %v10542_v1  ;;  %6318 = vmax.xlane.f32.xlu2 %v6275_v2  ;;  %v11926_v2 = vmax.f32 %v10614_v42, %v11925_v0 }
 0x9f2   : > { %6061 = vmatmul.bf16.gmra.mxu3 %v10542_v1 }
 0x9f4   : > { %v5933_v47 = vpop.f32.mrf.mxu2 }
 0x9f5   : > { %v6244_v57 = vmax.f32 %v6212_v63, %v5933_v47  ;;  %v6022_v49 = vpop.f32.mrf.mxu3  ;;  %v5760_v30 = vpop.f32.mrf.mxu0 }
 0x9f6   : > { %v5849_v56 = vpop.f32.mrf.mxu1  ;;  %v6182_v12 = vmax.f32 %v11921_v52, %v5760_v30 }
 0x9f7   : > { %v6276_v54 = vmax.f32 %v6244_v57, %v6022_v49 }
 0x9f8   : > { %5799 = vmatmul.bf16.gmra.mxu0 %v10564_v16  ;;  %v6214_v18 = vmax.f32 %v6182_v12, %v5849_v56 }
 0x9f9   : > { %6320 = vmax.xlane.f32.xlu0 %v6276_v54  ;;  %5888 = vmatmul.bf16.gmra.mxu1 %v10564_v16  ;;  %v11928_v54 = vld [vmem:[#allocation18_spill] sm:$0xff] }
 0x9fa   : > { %v11929_v30 = vmax.f32 %v11927_v60, %v11928_v54 }
 0x9fc   : > { %v5935_v34 = vpop.f32.mrf.mxu2 }
 0x9fd   : > { %v6245_v9 = vmax.f32 %v6213_v20, %v5935_v34  ;;  %v6024_v1 = vpop.f32.mrf.mxu3  ;;  %v5762_v15 = vpop.f32.mrf.mxu0 }
 0x9fe   : > { %v5851_v11 = vpop.f32.mrf.mxu1  ;;  %v6183_v14 = vmax.f32 %v11922_v33, %v5762_v15  ;;  %v11930_v15 = vld [vmem:[#allocation34_spill] sm:$0xff] }
 0x9ff   : > { %v6277_v13 = vmax.f32 %v6245_v9, %v6024_v1 }
 0xa00   : > { %v6215_v3 = vmax.f32 %v6183_v14, %v5851_v11  ;;  %v11931_v11 = vmax.f32 %v10630_v4, %v11930_v15 }
 0xa01   : > { %5977 = vmatmul.bf16.gmra.mxu2 %v10564_v16  ;;  %6322 = vmax.xlane.f32.xlu1 %v6277_v13 }
 0xa02   : > { %6066 = vmatmul.bf16.gmra.mxu3 %v10564_v16 }
 0xa04   : > { %v5938_v58 = vpop.f32.mrf.mxu2 }
 0xa05   : > { %v6246_v36 = vmax.f32 %v6214_v18, %v5938_v58  ;;  %v6027_v25 = vpop.f32.mrf.mxu3  ;;  %v5765_v59 = vpop.f32.mrf.mxu0 }
 0xa06   : > { %v5854_v8 = vpop.f32.mrf.mxu1  ;;  %v6184_v32 = vmax.f32 %v11923_v17, %v5765_v59 }
 0xa07   : > { %v6278_v21 = vmax.f32 %v6246_v36, %v6027_v25 }
 0xa08   : > { %v6216_v19 = vmax.f32 %v6184_v32, %v5854_v8 }
 0xa09   : > { %6324 = vmax.xlane.f32.xlu2 %v6278_v21 }
 0xa0c   : > { %v5940_v48 = vpop.f32.mrf.mxu2  ;;  %v6297_v10 = vpop.xlane.xlu0 %6296 }
 0xa0d   : > { %v6247_v31 = vmax.f32 %v6215_v3, %v5940_v48  ;;  %6360 = vst.msk [vmem:[%s9139_s29 + $0x300] sm:$0xff] %vm2879_vm1, %v6297_v10  ;;  %v6029_v16 = vpop.f32.mrf.mxu3  ;;  %v5767_v22 = vpop.f32.mrf.mxu0  ;;  %v11932_v3 = vld [vmem:[#allocation24_spill] sm:$0xff]  ;;  %v11933_v48 = vld [vmem:[#allocation37_spill] sm:$0xff] }
 0xa0e   : > { %v5856_v39 = vpop.f32.mrf.mxu1  ;;  %v6185_v7 = vmax.f32 %v11924_v24, %v5767_v22  ;;  %v11934_v10 = vmax.f32 %v11932_v3, %v11933_v48 }
 0xa0f   : > { %v6279_v44 = vmax.f32 %v6247_v31, %v6029_v16 }
 0xa10   : > { %v6217_v40 = vmax.f32 %v6185_v7, %v5856_v39 }
 0xa11   : > { %6326 = vmax.xlane.f32.xlu0 %v6279_v44 }
 0xa14   : > { %v5943_v38 = vpop.f32.mrf.mxu2  ;;  %v6299_v41 = vpop.xlane.xlu1 %6298 }
 0xa15   : > { %v6248_v46 = vmax.f32 %v6216_v19, %v5943_v38  ;;  %6361 = vst.msk [vmem:[%s9139_s29 + $0x308] sm:$0xff] %vm2879_vm1, %v6299_v41  ;;  %v6032_v6 = vpop.f32.mrf.mxu3  ;;  %v5770_v29 = vpop.f32.mrf.mxu0  ;;  %v11935_v38 = vld [vmem:[#allocation40_spill] sm:$0xff] }
 0xa16   : > { %v5859_v61 = vpop.f32.mrf.mxu1  ;;  %v6186_v50 = vmax.f32 %v11926_v2, %v5770_v29  ;;  %v11936_v41 = vmax.f32 %v10646_v55, %v11935_v38 }
 0xa17   : > { %v6280_v43 = vmax.f32 %v6248_v46, %v6032_v6 }
 0xa18   : > { %v6218_v23 = vmax.f32 %v6186_v50, %v5859_v61 }
 0xa19   : > { %6328 = vmax.xlane.f32.xlu1 %v6280_v43 }
 0xa1c   : > { %v5945_v62 = vpop.f32.mrf.mxu2  ;;  %v6301_v53 = vpop.xlane.xlu2 %6300 }
 0xa1d   : > { %v6249_v5 = vmax.f32 %v6217_v40, %v5945_v62  ;;  %6362 = vst.msk [vmem:[%s9139_s29 + $0x310] sm:$0xff] %vm2879_vm1, %v6301_v53  ;;  %v6034_v26 = vpop.f32.mrf.mxu3  ;;  %v5772_v63 = vpop.f32.mrf.mxu0  ;;  %v11937_v53 = vld [vmem:[#allocation20_spill] sm:$0xff] }
 0xa1e   : > { %v5861_v51 = vpop.f32.mrf.mxu1  ;;  %v6187_v56 = vmax.f32 %v11929_v30, %v5772_v63 }
 0xa1f   : > { %v6281_v35 = vmax.f32 %v6249_v5, %v6034_v26  ;;  %v11938_v5 = vld [vmem:[#allocation21_spill] sm:$0xff] }
 0xa20   : > { %v6219_v9 = vmax.f32 %v6187_v56, %v5861_v51  ;;  %v11939_v26 = vmax.f32 %v11937_v53, %v11938_v5 }
 0xa21   : > { %6330 = vmax.xlane.f32.xlu2 %v6281_v35 }
 0xa24   : > { %v5948_v47 = vpop.f32.mrf.mxu2  ;;  %v6303_v57 = vpop.xlane.xlu0 %6302 }
 0xa25   : > { %v6250_v49 = vmax.f32 %v6218_v23, %v5948_v47  ;;  %6363 = vst.msk [vmem:[%s9139_s29 + $0x318] sm:$0xff] %vm2879_vm1, %v6303_v57  ;;  %v6037_v37 = vpop.f32.mrf.mxu3  ;;  %v5775_v34 = vpop.f32.mrf.mxu0  ;;  %v11940_v57 = vld [vmem:[#allocation35_spill] sm:$0xff] }
 0xa26   : > { %v5864_v42 = vpop.f32.mrf.mxu1  ;;  %v6188_v18 = vmax.f32 %v11931_v11, %v5775_v34 }
 0xa27   : > { %v6282_v20 = vmax.f32 %v6250_v49, %v6037_v37  ;;  %v11941_v49 = vmax.f32 %v10662_v28, %v11940_v57 }
 0xa28   : > { %v6220_v33 = vmax.f32 %v6188_v18, %v5864_v42 }
 0xa29   : > { %6332 = vmax.xlane.f32.xlu0 %v6282_v20 }
 0xa2c   : > { %v5950_v1 = vpop.f32.mrf.mxu2  ;;  %v6305_v52 = vpop.xlane.xlu1 %6304 }
 0xa2d   : > { %v6251_v12 = vmax.f32 %v6219_v9, %v5950_v1  ;;  %6364 = vst.msk [vmem:[%s9139_s29 + $0x320] sm:$0xff] %vm2879_vm1, %v6305_v52  ;;  %v6039_v13 = vpop.f32.mrf.mxu3  ;;  %v5777_v36 = vpop.f32.mrf.mxu0  ;;  %v11942_v1 = vld [vmem:[#allocation38_spill] sm:$0xff] }
 0xa2e   : > { %v5866_v25 = vpop.f32.mrf.mxu1  ;;  %v6189_v31 = vmax.f32 %v11934_v10, %v5777_v36  ;;  %v11943_v52 = vld [vmem:[#allocation22_spill] sm:$0xff] }
 0xa2f   : > { %v6283_v58 = vmax.f32 %v6251_v12, %v6039_v13  ;;  %v11944_v12 = vmax.f32 %v11942_v1, %v11943_v52 }
 0xa30   : > { %v6221_v32 = vmax.f32 %v6189_v31, %v5866_v25 }
 0xa31   : > { %6334 = vmax.xlane.f32.xlu1 %v6283_v58 }
 0xa34   : > { %v5953_v14 = vpop.f32.mrf.mxu2  ;;  %v6307_v21 = vpop.xlane.xlu2 %6306 }
 0xa35   : > { %v6252_v59 = vmax.f32 %v6220_v33, %v5953_v14  ;;  %6365 = vst.msk [vmem:[%s9139_s29 + $0x328] sm:$0xff] %vm2879_vm1, %v6307_v21  ;;  %v6042_v8 = vpop.f32.mrf.mxu3  ;;  %v5780_v17 = vpop.f32.mrf.mxu0  ;;  %v11945_v14 = vld [vmem:[#allocation45_spill] sm:$0xff]  ;;  %v11946_v21 = vld [vmem:[#allocation62_spill] sm:$0xff] }
 0xa36   : > { %v5869_v4 = vpop.f32.mrf.mxu1  ;;  %v6190_v46 = vmax.f32 %v11936_v41, %v5780_v17 }
 0xa37   : > { %v6284_v16 = vmax.f32 %v6252_v59, %v6042_v8  ;;  %v11947_v59 = vmax.f32 %v11945_v14, %v11946_v21 }
 0xa38   : > { %v6222_v43 = vmax.f32 %v6190_v46, %v5869_v4 }
 0xa39   : > { %6336 = vmax.xlane.f32.xlu2 %v6284_v16 }
 0xa3c   : > { %v5955_v44 = vpop.f32.mrf.mxu2  ;;  %v6309_v22 = vpop.xlane.xlu0 %6308 }
 0xa3d   : > { %v6253_v39 = vmax.f32 %v6221_v32, %v5955_v44  ;;  %6366 = vst.msk [vmem:[%s9139_s29 + $0x330] sm:$0xff] %vm2879_vm1, %v6309_v22  ;;  %v6044_v19 = vpop.f32.mrf.mxu3  ;;  %v5782_v24 = vpop.f32.mrf.mxu0  ;;  %v11948_v44 = vld [vmem:[#allocation10_spill] sm:$0xff]  ;;  %v11949_v22 = vld [vmem:[#allocation16_spill] sm:$0xff] }
 0xa3e   : > { %v5871_v7 = vpop.f32.mrf.mxu1  ;;  %v6191_v0 = vmax.f32 %v11939_v26, %v5782_v24 }
 0xa3f   : > { %v6285_v6 = vmax.f32 %v6253_v39, %v6044_v19  ;;  %v11950_v39 = vmax.f32 %v11948_v44, %v11949_v22 }
 0xa40   : > { %v6223_v35 = vmax.f32 %v6191_v0, %v5871_v7 }
 0xa41   : > { %6338 = vmax.xlane.f32.xlu0 %v6285_v6 }
 0xa44   : > { %v5958_v29 = vpop.f32.mrf.mxu2  ;;  %v6311_v61 = vpop.xlane.xlu1 %6310 }
 0xa45   : > { %v6254_v40 = vmax.f32 %v6222_v43, %v5958_v29  ;;  %6367 = vst.msk [vmem:[%s9139_s29 + $0x338] sm:$0xff] %vm2879_vm1, %v6311_v61  ;;  %v6047_v62 = vpop.f32.mrf.mxu3  ;;  %v5785_v50 = vpop.f32.mrf.mxu0  ;;  %v11951_v61 = vld [vmem:[#allocation36_spill] sm:$0xff] }
 0xa46   : > { %v5874_v55 = vpop.f32.mrf.mxu1  ;;  %v6192_v37 = vmax.f32 %v11941_v49, %v5785_v50 }
 0xa47   : > { %v6286_v2 = vmax.f32 %v6254_v40, %v6047_v62  ;;  %v11952_v40 = vld [vmem:[#allocation52_spill] sm:$0xff] }
 0xa48   : > { %v6224_v56 = vmax.f32 %v6192_v37, %v5874_v55  ;;  %v11953_v62 = vmax.f32 %v11951_v61, %v11952_v40 }
 0xa49   : > { %6340 = vmax.xlane.f32.xlu1 %v6286_v2 }
 0xa4c   : > { %v5960_v63 = vpop.f32.mrf.mxu2  ;;  %v6313_v51 = vpop.xlane.xlu2 %6312 }
 0xa4d   : > { %v6255_v23 = vmax.f32 %v6223_v35, %v5960_v63  ;;  %6368 = vst.msk [vmem:[%s9139_s29 + $0x340] sm:$0xff] %vm2879_vm1, %v6313_v51  ;;  %v6049_v47 = vpop.f32.mrf.mxu3  ;;  %v5787_v54 = vpop.f32.mrf.mxu0  ;;  %v11954_v51 = vld [vmem:[#allocation83_spill] sm:$0xff] }
 0xa4e   : > { %v5876_v30 = vpop.f32.mrf.mxu1  ;;  %v6193_v13 = vmax.f32 %v11944_v12, %v5787_v54 }
 0xa4f   : > { %v6287_v60 = vmax.f32 %v6255_v23, %v6049_v47  ;;  %v11955_v23 = vld [vmem:[#allocation51_spill] sm:$0xff] }
 0xa50   : > { %v6225_v18 = vmax.f32 %v6193_v13, %v5876_v30  ;;  %v11956_v47 = vmax.f32 %v11954_v51, %v11955_v23 }
 0xa51   : > { %6342 = vmax.xlane.f32.xlu2 %v6287_v60 }
 0xa54   : > { %v5963_v20 = vpop.f32.mrf.mxu2  ;;  %v6315_v34 = vpop.xlane.xlu0 %6314 }
 0xa55   : > { %v6256_v42 = vmax.f32 %v6224_v56, %v5963_v20  ;;  %6369 = vst.msk [vmem:[%s9139_s29 + $0x348] sm:$0xff] %vm2879_vm1, %v6315_v34  ;;  %v6052_v9 = vpop.f32.mrf.mxu3  ;;  %v5790_v11 = vpop.f32.mrf.mxu0 }
 0xa56   : > { %v5879_v28 = vpop.f32.mrf.mxu1  ;;  %v6194_v8 = vmax.f32 %v11947_v59, %v5790_v11 }
 0xa57   : > { %v6288_v15 = vmax.f32 %v6256_v42, %v6052_v9  ;;  %v11957_v42 = vld [vmem:[#allocation84_spill] sm:$0xff]  ;;  %v11958_v9 = vld [vmem:[#allocation85_spill] sm:$0xff] }
 0xa58   : > { %v6226_v31 = vmax.f32 %v6194_v8, %v5879_v28  ;;  %v11959_v1 = vmax.f32 %v11957_v42, %v11958_v9 }
 0xa59   : > { %6344 = vmax.xlane.f32.xlu0 %v6288_v15 }
 0xa5c   : > { %v5965_v58 = vpop.f32.mrf.mxu2  ;;  %v6317_v36 = vpop.xlane.xlu1 %6316 }
 0xa5d   : > { %v6257_v25 = vmax.f32 %v6225_v18, %v5965_v58  ;;  %6370 = vst.msk [vmem:[%s9139_s29 + $0x350] sm:$0xff] %vm2879_vm1, %v6317_v36  ;;  %v6054_v33 = vpop.f32.mrf.mxu3  ;;  %v5792_v48 = vpop.f32.mrf.mxu0  ;;  %v11960_v36 = vmax.f32 %v10717_v45, %v10720_v27 }
 0xa5e   : > { %v5881_v10 = vpop.f32.mrf.mxu1  ;;  %v6195_v19 = vmax.f32 %v11950_v39, %v5792_v48 }
 0xa5f   : > { %v6289_v3 = vmax.f32 %v6257_v25, %v6054_v33 }
 0xa60   : > { %v6227_v6 = vmax.f32 %v6195_v19, %v5881_v10 }
 0xa61   : > { %6346 = vmax.xlane.f32.xlu1 %v6289_v3 }
 0xa64   : > { %v5968_v16 = vpop.f32.mrf.mxu2  ;;  %v6319_v17 = vpop.xlane.xlu2 %6318 }
 0xa65   : > { %v6258_v4 = vmax.f32 %v6226_v31, %v5968_v16  ;;  %6371 = vst.msk [vmem:[%s9139_s29 + $0x358] sm:$0xff] %vm2879_vm1, %v6319_v17  ;;  %v6057_v32 = vpop.f32.mrf.mxu3  ;;  %v5795_v41 = vpop.f32.mrf.mxu0 }
 0xa66   : > { %v5884_v46 = vpop.f32.mrf.mxu1  ;;  %v6196_v53 = vmax.f32 %v11953_v62, %v5795_v41 }
 0xa67   : > { %v6290_v38 = vmax.f32 %v6258_v4, %v6057_v32 }
 0xa68   : > { %v6228_v0 = vmax.f32 %v6196_v53, %v5884_v46 }
 0xa69   : > { %6348 = vmax.xlane.f32.xlu2 %v6290_v38 }
 0xa6c   : > { %v5970_v24 = vpop.f32.mrf.mxu2  ;;  %v6321_v7 = vpop.xlane.xlu0 %6320 }
 0xa6d   : > { %v6259_v43 = vmax.f32 %v6227_v6, %v5970_v24  ;;  %6372 = vst.msk [vmem:[%s9139_s29 + $0x360] sm:$0xff] %vm2879_vm1, %v6321_v7  ;;  %v6059_v29 = vpop.f32.mrf.mxu3  ;;  %v5797_v26 = vpop.f32.mrf.mxu0 }
 0xa6e   : > { %v5886_v2 = vpop.f32.mrf.mxu1  ;;  %v6197_v57 = vmax.f32 %v11956_v47, %v5797_v26 }
 0xa6f   : > { %v6291_v5 = vmax.f32 %v6259_v43, %v6059_v29 }
 0xa70   : > { %v6229_v60 = vmax.f32 %v6197_v57, %v5886_v2 }
 0xa71   : > { %6350 = vmax.xlane.f32.xlu0 %v6291_v5 }
 0xa74   : > { %v5973_v50 = vpop.f32.mrf.mxu2  ;;  %v6323_v55 = vpop.xlane.xlu1 %6322 }
 0xa75   : > { %v6260_v35 = vmax.f32 %v6228_v0, %v5973_v50  ;;  %6373 = vst.msk [vmem:[%s9139_s29 + $0x368] sm:$0xff] %vm2879_vm1, %v6323_v55  ;;  %v6062_v63 = vpop.f32.mrf.mxu3  ;;  %v5800_v37 = vpop.f32.mrf.mxu0 }
 0xa76   : > { %v5889_v34 = vpop.f32.mrf.mxu1  ;;  %v6198_v52 = vmax.f32 %v11959_v1, %v5800_v37 }
 0xa77   : > { %v6292_v49 = vmax.f32 %v6260_v35, %v6062_v63 }
 0xa78   : > { %v6230_v13 = vmax.f32 %v6198_v52, %v5889_v34 }
 0xa79   : > { %6352 = vmax.xlane.f32.xlu1 %v6292_v49 }
 0xa7c   : > { %v5975_v54 = vpop.f32.mrf.mxu2  ;;  %v6325_v30 = vpop.xlane.xlu2 %6324 }
 0xa7d   : > { %v6261_v56 = vmax.f32 %v6229_v60, %v5975_v54  ;;  %6374 = vst.msk [vmem:[%s9139_s29 + $0x370] sm:$0xff] %vm2879_vm1, %v6325_v30  ;;  %v6064_v20 = vpop.f32.mrf.mxu3  ;;  %v5802_v15 = vpop.f32.mrf.mxu0 }
 0xa7e   : > { %v6199_v25 = vmax.f32 %v11960_v36, %v5802_v15  ;;  %v5891_v14 = vpop.f32.mrf.mxu1 }
 0xa7f   : > { %v6293_v12 = vmax.f32 %v6261_v56, %v6064_v20 }
 0xa80   : > { %v6231_v21 = vmax.f32 %v6199_v25, %v5891_v14 }
 0xa81   : > { %6354 = vmax.xlane.f32.xlu2 %v6293_v12 }
 0xa84   : > { %v5978_v11 = vpop.f32.mrf.mxu2  ;;  %v6327_v28 = vpop.xlane.xlu0 %6326 }
 0xa85   : > { %v6262_v18 = vmax.f32 %v6230_v13, %v5978_v11  ;;  %6375 = vst.msk [vmem:[%s9139_s29 + $0x378] sm:$0xff] %vm2879_vm1, %v6327_v28  ;;  %v6067_v58 = vpop.f32.mrf.mxu3 }
 0xa87   : > { %v6294_v33 = vmax.f32 %v6262_v18, %v6067_v58 }
 0xa89   : > { %6356 = vmax.xlane.f32.xlu0 %v6294_v33 }
 0xa8c   : > { %v5980_v59 = vpop.f32.mrf.mxu2  ;;  %v6329_v8 = vpop.xlane.xlu1 %6328 }
 0xa8d   : > { %v6263_v3 = vmax.f32 %v6231_v21, %v5980_v59  ;;  %6376 = vst.msk [vmem:[%s9139_s29 + $0x380] sm:$0xff] %vm2879_vm1, %v6329_v8  ;;  %v6069_v48 = vpop.f32.mrf.mxu3 }
 0xa8f   : > { %v6295_v10 = vmax.f32 %v6263_v3, %v6069_v48 }
 0xa91   : > { %6358 = vmax.xlane.f32.xlu1 %v6295_v10 }
 0xa94   : > { %v6331_v27 = vpop.xlane.xlu2 %6330 }
 0xa95   : > { %6377 = vst.msk [vmem:[%s9139_s29 + $0x388] sm:$0xff] %vm2879_vm1, %v6331_v27 }
 0xa9c   : > { %v6333_v45 = vpop.xlane.xlu0 %6332 }
 0xa9d   : > { %6378 = vst.msk [vmem:[%s9139_s29 + $0x390] sm:$0xff] %vm2879_vm1, %v6333_v45 }
 0xaa4   : > { %v6335_v31 = vpop.xlane.xlu1 %6334 }
 0xaa5   : > { %6379 = vst.msk [vmem:[%s9139_s29 + $0x398] sm:$0xff] %vm2879_vm1, %v6335_v31 }
 0xaac   : > { %v6337_v16 = vpop.xlane.xlu2 %6336 }
 0xaad   : > { %6380 = vst.msk [vmem:[%s9139_s29 + $0x3a0] sm:$0xff] %vm2879_vm1, %v6337_v16 }
 0xab4   : > { %v6339_v17 = vpop.xlane.xlu0 %6338 }
 0xab5   : > { %6381 = vst.msk [vmem:[%s9139_s29 + $0x3a8] sm:$0xff] %vm2879_vm1, %v6339_v17 }
 0xabc   : > { %v6341_v4 = vpop.xlane.xlu1 %6340 }
 0xabd   : > { %6382 = vst.msk [vmem:[%s9139_s29 + $0x3b0] sm:$0xff] %vm2879_vm1, %v6341_v4 }
 0xac4   : > { %v6343_v32 = vpop.xlane.xlu2 %6342 }
 0xac5   : > { %6383 = vst.msk [vmem:[%s9139_s29 + $0x3b8] sm:$0xff] %vm2879_vm1, %v6343_v32 }
 0xacc   : > { %v6345_v44 = vpop.xlane.xlu0 %6344 }
 0xacd   : > { %6384 = vst.msk [vmem:[%s9139_s29 + $0x3c0] sm:$0xff] %vm2879_vm1, %v6345_v44 }
 0xad4   : > { %v6347_v22 = vpop.xlane.xlu1 %6346 }
 0xad5   : > { %6385 = vst.msk [vmem:[%s9139_s29 + $0x3c8] sm:$0xff] %vm2879_vm1, %v6347_v22 }
 0xadc   : > { %v6349_v39 = vpop.xlane.xlu2 %6348 }
 0xadd   : > { %6386 = vst.msk [vmem:[%s9139_s29 + $0x3d0] sm:$0xff] %vm2879_vm1, %v6349_v39 }
 0xae4   : > { %v6351_v19 = vpop.xlane.xlu0 %6350 }
 0xae5   : > { %6387 = vst.msk [vmem:[%s9139_s29 + $0x3d8] sm:$0xff] %vm2879_vm1, %v6351_v19 }
 0xaec   : > { %v6353_v38 = vpop.xlane.xlu1 %6352 }
 0xaed   : > { %6388 = vst.msk [vmem:[%s9139_s29 + $0x3e0] sm:$0xff] %vm2879_vm1, %v6353_v38 }
 0xaf4   : > { %v6355_v41 = vpop.xlane.xlu2 %6354 }
 0xaf5   : > { %6389 = vst.msk [vmem:[%s9139_s29 + $0x3e8] sm:$0xff] %vm2879_vm1, %v6355_v41 }
 0xafc   : > { %v6357_v46 = vpop.xlane.xlu0 %6356 }
 0xafd   : > { %6390 = vst.msk [vmem:[%s9139_s29 + $0x3f0] sm:$0xff] %vm2879_vm1, %v6357_v46 }
 0xb04   : > { %v6359_v6 = vpop.xlane.xlu1 %6358 }
 0xb05   : > { %6391 = vst.msk [vmem:[%s9139_s29 + $0x3f8] sm:$0xff] %vm2879_vm1, %v6359_v6 }
 0xb06 PF: > { %s17_s21 = sadd.s32 1, %s6990_s21  }
 0xb07   : > { %p14_p7 = scmp.ge.s32.totalorder %s17_s21, 4  }
 0xb09   :  { %16 = sbr.rel (!%p14_p7) target bundleno = 1 (0x1), region = 79 }
 0xb0e   :  { %6413 = vsyncpa [#allocation3], 1 }
 0xb0f   :  { %6415 = vsyncpa [#allocation3 + $0x1], 1 }

</bundles_post_ra>
